<compile_context>
chip_gen: v5e
topology: v5e:2x2
jax: 0.10.0
libtpu: 0.0.40
codegen_flags: <defaults>
</compile_context>

<pallas_src>
import functools

import jax
import jax.numpy as jnp
from jax.experimental import pallas as pl
from jax.experimental.pallas import tpu as pltpu

# ---------------- configuration (small, consistent with the module) -----------
H = 16               # image / feature height
W = 16               # image / feature width
CIN_PAD = 8          # RGB (3) channels zero-padded to 8 for lane friendliness
C = 16               # backbone.out_channels
A = 3                # RPN anchors per location
NH = 5 * A           # fused RPN head width: objectness (A) + bbox deltas (4A)
NH_PAD = 16          # NH padded to 16 columns (last column is zero padding)
K_PROP = 8           # proposals kept per frame (POST_NMS_TOP_N, synthetic)
REP_DIM = 32         # ROI box head representation size
NUM_CLASSES = 5
NUM_REF = 2          # number of reference frames

PAD_L = 8            # sublane-aligned left offset of the interior in the scratch
PAD_W = PAD_L + W + 8  # padded width of the stem-feature scratch buffer


# ---------------- fused backbone-stem + RPN kernel (the only pallas_call) ------
def _fused_rpn_kernel(im2col_ref, ws_ref, bs_ref, wr_ref, br_ref, wh_ref, bh_ref,
                      feat_ref, head_ref, pad_ref, *, n, h, w, c, nh, pad_l):
    """All frames batched into M: stem conv3x3+ReLU -> RPN conv3x3+ReLU -> heads."""
    # ---- backbone stem 3x3 conv (+ReLU): one batched matmul over all frames ----
    feat = jnp.dot(im2col_ref[...], ws_ref[...], preferred_element_type=jnp.float32)
    feat = jnp.maximum(feat + bs_ref[...], 0.0)                     # (n*h*w, c)
    feat_ref[...] = feat.reshape(n, h * w, c)                       # backbone feats out

    # ---- stage stem output into the spatially padded VMEM scratch -------------
    # Zero only the 1-pixel halo ring actually read by the 3x3 taps; the interior
    # is fully overwritten every call and the rest of the buffer is never read.
    zrow = jnp.zeros((n, 1, w + 2, c), jnp.float32)
    zcol = jnp.zeros((n, h + 2, 1, c), jnp.float32)
    pad_ref[:, 0:1, pad_l - 1:pad_l + w + 1, :] = zrow              # top halo row
    pad_ref[:, h + 1:h + 2, pad_l - 1:pad_l + w + 1, :] = zrow      # bottom halo row
    pad_ref[:, :, pad_l - 1:pad_l, :] = zcol                        # left halo col
    pad_ref[:, :, pad_l + w:pad_l + w + 1, :] = zcol                # right halo col
    pad_ref[:, 1:h + 1, pad_l:pad_l + w, :] = feat.reshape(n, h, w, c)

    # ---- RPN 3x3 conv (+ReLU): 9 shifted matmuls accumulated in f32 -----------
    acc = None
    for kh in range(3):
        for kw in range(3):
            k = kh * 3 + kw
            tap = pad_ref[:, kh:kh + h, pad_l - 1 + kw:pad_l - 1 + kw + w, :]
            contrib = jnp.dot(tap.reshape(n * h * w, c),
                              wr_ref[k * c:(k + 1) * c, :],
                              preferred_element_type=jnp.float32)
            acc = contrib if acc is None else acc + contrib
    t = jnp.maximum(acc + br_ref[...], 0.0)                         # (n*h*w, c)

    # ---- fused 1x1 heads: [objectness (A) | bbox deltas (4A) | zero pad] ------
    head = jnp.dot(t, wh_ref[...], preferred_element_type=jnp.float32) + bh_ref[...]
    head_ref[...] = head.reshape(n, h * w, nh)


def fused_backbone_rpn(imgs_nhwc, params):
    """imgs_nhwc: (N, H, W, 3) -> feats (N, H*W, C), heads (N, H*W, NH_PAD)."""
    n = imgs_nhwc.shape[0]
    # channel pad 3 -> 8 and spatial zero-pad for the 3x3 'same' conv
    xp = jnp.pad(imgs_nhwc,
                 ((0, 0), (1, 1), (1, 1), (0, CIN_PAD - imgs_nhwc.shape[-1])))
    # Stem im2col built wrapper-side (plain jnp): lane-dense (N*H*W, 9*CIN_PAD)
    # kernel input; column order is (kh, kw, c_in), matching w_stem's row order.
    cols = [xp[:, kh:kh + H, kw:kw + W, :] for kh in range(3) for kw in range(3)]
    im2col = jnp.concatenate(cols, axis=-1).reshape(n * H * W, 9 * CIN_PAD)

    def vmem():
        return pl.BlockSpec(memory_space=pltpu.MemorySpace.VMEM)

    kern = functools.partial(_fused_rpn_kernel, n=n, h=H, w=W, c=C,
                             nh=NH_PAD, pad_l=PAD_L)
    feats, heads = pl.pallas_call(
        kern,
        out_shape=(jax.ShapeDtypeStruct((n, H * W, C), jnp.float32),
                   jax.ShapeDtypeStruct((n, H * W, NH_PAD), jnp.float32)),
        in_specs=[vmem() for _ in range(7)],
        out_specs=(vmem(), vmem()),
        scratch_shapes=[pltpu.VMEM((n, H + 2, PAD_W, C), jnp.float32)],
    )(im2col, params['w_stem'], params['b_stem'],
      params['w_rpn'], params['b_rpn'],
      params['w_rpn_head'], params['b_rpn_head'])
    return feats, heads


# ---------------- ROI box head: plain jnp (tiny matmuls; XLA fuses) ------------
def roi_head(roi_feats, params):
    """roi_feats: (n_rois, C) -> (n_rois, NUM_CLASSES + 4*NUM_CLASSES)."""
    rep = jnp.maximum(jnp.dot(roi_feats, params['w_fc1']) + params['b_fc1'], 0.0)
    return jnp.dot(rep, params['w_pred']) + params['b_pred']


# ---------------- plain-jnp loss reductions (tiny; XLA fuses them) -------------
def _smooth_l1_mean(pred, tgt):
    d = pred - tgt
    ad = jnp.abs(d)
    return jnp.mean(jnp.where(ad < 1.0, 0.5 * d * d, ad - 0.5))


def _bce_with_logits_mean(logits, targets):
    return jnp.mean(jnp.maximum(logits, 0.0) - logits * targets +
                    jnp.log1p(jnp.exp(-jnp.abs(logits))))


def _softmax_xent_mean(logits, labels, num_classes):
    logp = jax.nn.log_softmax(logits, axis=-1)
    onehot = jax.nn.one_hot(labels, num_classes, dtype=jnp.float32)
    return -jnp.mean(jnp.sum(onehot * logp, axis=-1))


# ---------------- GeneralizedRCNNRDN forward (training semantics) --------------
# TODO(synk): _forward_test's deque-based feature cache, file loading and NMS'd
# proposal bookkeeping are stateful host-side logic; only the training forward
# (the hot numeric path) is implemented here.
def rdn_forward_train(params, img_cur, imgs_ref, targets):
    # torch.cat([img_cur, *imgs_ref], dim=0); NCHW -> NHWC
    concat = jnp.concatenate([img_cur] + list(imgs_ref), axis=0)    # (N, 3, H, W)
    x = jnp.transpose(concat, (0, 2, 3, 1))                         # (N, H, W, 3)

    # backbone + RPN for all frames in ONE fused pallas_call / grid step
    feats, heads = fused_backbone_rpn(x, params)        # (N, HW, C), (N, HW, 16)
    obj_all = heads[:, :, :A]                           # objectness logits
    bbox_all = heads[:, :, A:NH]                        # bbox deltas (drop pad col)

    # RPN 'key' pass losses on the current frame
    loss_objectness = _bce_with_logits_mean(obj_all[0], targets['rpn_obj'])
    loss_rpn_box_reg = _smooth_l1_mean(bbox_all[0], targets['rpn_box'])

    # TODO(synk): NMS / anchor box decoding / ROIAlign have no clean Pallas
    # equivalent; proposals = top-k anchor scores, proposal feats = point-sample
    # gather (plain jnp).  Note: idx // A means several anchors at the same cell
    # yield duplicate ROI features — synthetic proposal semantics, not real NMS.
    def topk_feats(feat, obj):
        _, idx = jax.lax.top_k(obj.reshape(-1), K_PROP)
        return jnp.take(feat, idx // A, axis=0)                     # (K_PROP, C)

    gathered = jax.vmap(topk_feats)(feats, obj_all)                 # (N, K, C)

    # proposals_list = [key pass on cur, 'ref' pass on cur, 'ref' pass per ref
    # frame].  The key and ref RPN passes on frame 0 share features/scores, so
    # frame 0 is reused instead of recomputed (identical result, one fewer pass).
    roi_in = jnp.concatenate([gathered[0], gathered.reshape(-1, C)], axis=0)

    # ROI box head (fc1 + ReLU + fused cls|reg predictor) in plain jnp
    preds = roi_head(roi_in, params)                                # (G*K, 5*NC)
    cls_logits = preds[:, :NUM_CLASSES]
    box_reg = preds[:, NUM_CLASSES:]

    loss_classifier = _softmax_xent_mean(cls_logits, targets['labels'], NUM_CLASSES)
    loss_box_reg = _smooth_l1_mean(box_reg, targets['box_targets'])

    # losses.update(detector_losses); losses.update(proposal_losses)
    return {
        'loss_classifier': loss_classifier,
        'loss_box_reg': loss_box_reg,
        'loss_objectness': loss_objectness,
        'loss_rpn_box_reg': loss_rpn_box_reg,
    }


# ---------------- deterministic parameter init ----------------------------------
# NOTE (porting real checkpoints): conv weights here are stored pre-flattened with
# rows ordered (kh, kw, c_in).  A real PyTorch conv weight (C_out, C_in, kh, kw)
# must be permuted to (kh, kw, C_in, C_out) and reshaped to (9*C_in, C_out).
def init_params(key):
    def normal(k, shape, scale=0.1):
        return scale * jax.random.normal(k, shape, jnp.float32)

    ks = jax.random.split(key, 5)
    w_head = normal(ks[2], (C, NH))
    w_head = jnp.pad(w_head, ((0, 0), (0, NH_PAD - NH)))   # zero padding column
    return {
        # stem / RPN conv weights stored pre-flattened for the matmul formulation
        'w_stem': normal(ks[0], (9 * CIN_PAD, C)),
        'b_stem': jnp.zeros((1, C), jnp.float32),
        'w_rpn': normal(ks[1], (9 * C, C)),
        'b_rpn': jnp.zeros((1, C), jnp.float32),
        # fused RPN heads: columns = [objectness (A) | bbox deltas (4A) | pad]
        'w_rpn_head': w_head,
        'b_rpn_head': jnp.zeros((1, NH_PAD), jnp.float32),
        # ROI box head (plain jnp)
        'w_fc1': normal(ks[3], (C, REP_DIM)),
        'b_fc1': jnp.zeros((REP_DIM,), jnp.float32),
        # fused predictor: columns = [cls logits (NC) | box reg (4*NC)]
        'w_pred': normal(ks[4], (REP_DIM, 5 * NUM_CLASSES)),
        'b_pred': jnp.zeros((5 * NUM_CLASSES,), jnp.float32),
    }


if __name__ == "__main__":
    root = jax.random.PRNGKey(0)
    k_param, k_cur, k_r0, k_r1, k_obj, k_box, k_lab, k_bt = jax.random.split(root, 8)

    params = init_params(k_param)

    img_cur = jax.random.normal(k_cur, (1, 3, H, W), jnp.float32)
    imgs_ref = [jax.random.normal(k_r0, (1, 3, H, W), jnp.float32),
                jax.random.normal(k_r1, (1, 3, H, W), jnp.float32)]

    n_groups = 1 + (1 + NUM_REF)          # key proposals + 'ref' pass on cur + refs
    n_rois = n_groups * K_PROP
    targets = {
        'rpn_obj': (jax.random.uniform(k_obj, (H * W, A)) > 0.5).astype(jnp.float32),
        'rpn_box': 0.1 * jax.random.normal(k_box, (H * W, 4 * A), jnp.float32),
        'labels': jax.random.randint(k_lab, (n_rois,), 0, NUM_CLASSES),
        'box_targets': 0.1 * jax.random.normal(k_bt, (n_rois, NUM_CLASSES * 4),
                                               jnp.float32),
    }

    fwd = jax.jit(rdn_forward_train)
    losses = fwd(params, img_cur, imgs_ref, targets)
    losses = jax.tree_util.tree_map(jax.block_until_ready, losses)

    for name, val in losses.items():
        assert val.shape == (), name
        assert bool(jnp.isfinite(val)), name

    print("KERNEL_OK")
</pallas_src>

<mosaic_0001>
module attributes {stable_mosaic.version = 11 : i64} {
  func.func @_fused_rpn_kernel(%arg0: memref<768x72xf32, #tpu.memory_space<vmem>>, %arg1: memref<72x16xf32, #tpu.memory_space<vmem>>, %arg2: memref<1x16xf32, #tpu.memory_space<vmem>>, %arg3: memref<144x16xf32, #tpu.memory_space<vmem>>, %arg4: memref<1x16xf32, #tpu.memory_space<vmem>>, %arg5: memref<16x16xf32, #tpu.memory_space<vmem>>, %arg6: memref<1x16xf32, #tpu.memory_space<vmem>>, %arg7: memref<3x256x16xf32, #tpu.memory_space<vmem>>, %arg8: memref<3x256x16xf32, #tpu.memory_space<vmem>>, %arg9: memref<3x18x32x16xf32, #tpu.memory_space<vmem>>) attributes {dimension_semantics = [], scalar_prefetch = 0 : i64, scratch_operands = 1 : i64, tpu.core_type = #tpu.core_type<tc>} {
    %c0 = arith.constant 0 : index
    %c0_0 = arith.constant 0 : index
    %0 = vector.load %arg0[%c0, %c0_0] : memref<768x72xf32, #tpu.memory_space<vmem>>, vector<768x72xf32>
    %c0_1 = arith.constant 0 : index
    %c0_2 = arith.constant 0 : index
    %1 = vector.load %arg1[%c0_1, %c0_2] : memref<72x16xf32, #tpu.memory_space<vmem>>, vector<72x16xf32>
    %cst = arith.constant dense<0.000000e+00> : vector<768x16xf32>
    %2 = tpu.matmul %0, %1, %cst {dimension_numbers = #tpu.dot_dimension_numbers<[1], [0], [0], [1], [0, 0, 1, 1], [], []>} : vector<768x72xf32>, vector<72x16xf32>, vector<768x16xf32> -> vector<768x16xf32>
    %c0_3 = arith.constant 0 : index
    %c0_4 = arith.constant 0 : index
    %3 = vector.load %arg2[%c0_3, %c0_4] : memref<1x16xf32, #tpu.memory_space<vmem>>, vector<1x16xf32>
    %4 = vector.broadcast %3 : vector<1x16xf32> to vector<768x16xf32>
    %5 = arith.addf %2, %4 : vector<768x16xf32>
    %cst_5 = arith.constant 0.000000e+00 : f32
    %6 = vector.broadcast %cst_5 : f32 to vector<768x16xf32>
    %7 = arith.maximumf %5, %6 : vector<768x16xf32>
    %8 = vector.shape_cast %7 : vector<768x16xf32> to vector<3x256x16xf32>
    %c0_6 = arith.constant 0 : index
    %c0_7 = arith.constant 0 : index
    %c0_8 = arith.constant 0 : index
    %9 = vector.load %arg7[%c0_6, %c0_7, %c0_8] : memref<3x256x16xf32, #tpu.memory_space<vmem>>, vector<3x256x16xf32>
    tpu.vector_store %arg7[%c0_6, %c0_7, %c0_8], %8 {strides = array<i32>} : memref<3x256x16xf32, #tpu.memory_space<vmem>>, vector<3x256x16xf32>,
    %cst_9 = arith.constant 0.000000e+00 : f32
    %10 = vector.broadcast %cst_9 : f32 to vector<3x1x18x16xf32>
    %cst_10 = arith.constant 0.000000e+00 : f32
    %11 = vector.broadcast %cst_10 : f32 to vector<3x18x1x16xf32>
    %c0_11 = arith.constant 0 : index
    %c0_12 = arith.constant 0 : index
    %c7 = arith.constant 7 : index
    %c0_13 = arith.constant 0 : index
    %12 = vector.load %arg9[%c0_11, %c0_12, %c7, %c0_13] : memref<3x18x32x16xf32, #tpu.memory_space<vmem>>, vector<3x1x18x16xf32>
    tpu.vector_store %arg9[%c0_11, %c0_12, %c7, %c0_13], %10 {strides = array<i32>} : memref<3x18x32x16xf32, #tpu.memory_space<vmem>>, vector<3x1x18x16xf32>,
    %c0_14 = arith.constant 0 : index
    %c17 = arith.constant 17 : index
    %c7_15 = arith.constant 7 : index
    %c0_16 = arith.constant 0 : index
    %13 = vector.load %arg9[%c0_14, %c17, %c7_15, %c0_16] : memref<3x18x32x16xf32, #tpu.memory_space<vmem>>, vector<3x1x18x16xf32>
    tpu.vector_store %arg9[%c0_14, %c17, %c7_15, %c0_16], %10 {strides = array<i32>} : memref<3x18x32x16xf32, #tpu.memory_space<vmem>>, vector<3x1x18x16xf32>,
    %c0_17 = arith.constant 0 : index
    %c0_18 = arith.constant 0 : index
    %c7_19 = arith.constant 7 : index
    %c0_20 = arith.constant 0 : index
    %14 = vector.load %arg9[%c0_17, %c0_18, %c7_19, %c0_20] : memref<3x18x32x16xf32, #tpu.memory_space<vmem>>, vector<3x18x1x16xf32>
    tpu.vector_store %arg9[%c0_17, %c0_18, %c7_19, %c0_20], %11 {strides = array<i32>} : memref<3x18x32x16xf32, #tpu.memory_space<vmem>>, vector<3x18x1x16xf32>,
    %c0_21 = arith.constant 0 : index
    %c0_22 = arith.constant 0 : index
    %c24 = arith.constant 24 : index
    %c0_23 = arith.constant 0 : index
    %15 = vector.load %arg9[%c0_21, %c0_22, %c24, %c0_23] : memref<3x18x32x16xf32, #tpu.memory_space<vmem>>, vector<3x18x1x16xf32>
    tpu.vector_store %arg9[%c0_21, %c0_22, %c24, %c0_23], %11 {strides = array<i32>} : memref<3x18x32x16xf32, #tpu.memory_space<vmem>>, vector<3x18x1x16xf32>,
    %16 = vector.shape_cast %7 : vector<768x16xf32> to vector<3x16x16x16xf32>
    %c0_24 = arith.constant 0 : index
    %c1 = arith.constant 1 : index
    %c8 = arith.constant 8 : index
    %c0_25 = arith.constant 0 : index
    %17 = vector.load %arg9[%c0_24, %c1, %c8, %c0_25] : memref<3x18x32x16xf32, #tpu.memory_space<vmem>>, vector<3x16x16x16xf32>
    tpu.vector_store %arg9[%c0_24, %c1, %c8, %c0_25], %16 {strides = array<i32>} : memref<3x18x32x16xf32, #tpu.memory_space<vmem>>, vector<3x16x16x16xf32>,
    %c0_26 = arith.constant 0 : index
    %c0_27 = arith.constant 0 : index
    %c7_28 = arith.constant 7 : index
    %c0_29 = arith.constant 0 : index
    %18 = vector.load %arg9[%c0_26, %c0_27, %c7_28, %c0_29] : memref<3x18x32x16xf32, #tpu.memory_space<vmem>>, vector<3x16x16x16xf32>
    %19 = vector.shape_cast %18 : vector<3x16x16x16xf32> to vector<768x16xf32>
    %c0_30 = arith.constant 0 : index
    %c0_31 = arith.constant 0 : index
    %20 = vector.load %arg3[%c0_30, %c0_31] : memref<144x16xf32, #tpu.memory_space<vmem>>, vector<16x16xf32>
    %cst_32 = arith.constant dense<0.000000e+00> : vector<768x16xf32>
    %21 = tpu.matmul %19, %20, %cst_32 {dimension_numbers = #tpu.dot_dimension_numbers<[1], [0], [0], [1], [0, 0, 1, 1], [], []>} : vector<768x16xf32>, vector<16x16xf32>, vector<768x16xf32> -> vector<768x16xf32>
    %c0_33 = arith.constant 0 : index
    %c0_34 = arith.constant 0 : index
    %c8_35 = arith.constant 8 : index
    %c0_36 = arith.constant 0 : index
    %22 = vector.load %arg9[%c0_33, %c0_34, %c8_35, %c0_36] : memref<3x18x32x16xf32, #tpu.memory_space<vmem>>, vector<3x16x16x16xf32>
    %23 = vector.shape_cast %22 : vector<3x16x16x16xf32> to vector<768x16xf32>
    %c16 = arith.constant 16 : index
    %c0_37 = arith.constant 0 : index
    %24 = vector.load %arg3[%c16, %c0_37] : memref<144x16xf32, #tpu.memory_space<vmem>>, vector<16x16xf32>
    %cst_38 = arith.constant dense<0.000000e+00> : vector<768x16xf32>
    %25 = tpu.matmul %23, %24, %cst_38 {dimension_numbers = #tpu.dot_dimension_numbers<[1], [0], [0], [1], [0, 0, 1, 1], [], []>} : vector<768x16xf32>, vector<16x16xf32>, vector<768x16xf32> -> vector<768x16xf32>
    %26 = arith.addf %21, %25 : vector<768x16xf32>
    %c0_39 = arith.constant 0 : index
    %c0_40 = arith.constant 0 : index
    %c9 = arith.constant 9 : index
    %c0_41 = arith.constant 0 : index
    %27 = vector.load %arg9[%c0_39, %c0_40, %c9, %c0_41] : memref<3x18x32x16xf32, #tpu.memory_space<vmem>>, vector<3x16x16x16xf32>
    %28 = vector.shape_cast %27 : vector<3x16x16x16xf32> to vector<768x16xf32>
    %c32 = arith.constant 32 : index
    %c0_42 = arith.constant 0 : index
    %29 = vector.load %arg3[%c32, %c0_42] : memref<144x16xf32, #tpu.memory_space<vmem>>, vector<16x16xf32>
    %cst_43 = arith.constant dense<0.000000e+00> : vector<768x16xf32>
    %30 = tpu.matmul %28, %29, %cst_43 {dimension_numbers = #tpu.dot_dimension_numbers<[1], [0], [0], [1], [0, 0, 1, 1], [], []>} : vector<768x16xf32>, vector<16x16xf32>, vector<768x16xf32> -> vector<768x16xf32>
    %31 = arith.addf %26, %30 : vector<768x16xf32>
    %c0_44 = arith.constant 0 : index
    %c1_45 = arith.constant 1 : index
    %c7_46 = arith.constant 7 : index
    %c0_47 = arith.constant 0 : index
    %32 = vector.load %arg9[%c0_44, %c1_45, %c7_46, %c0_47] : memref<3x18x32x16xf32, #tpu.memory_space<vmem>>, vector<3x16x16x16xf32>
    %33 = vector.shape_cast %32 : vector<3x16x16x16xf32> to vector<768x16xf32>
    %c48 = arith.constant 48 : index
    %c0_48 = arith.constant 0 : index
    %34 = vector.load %arg3[%c48, %c0_48] : memref<144x16xf32, #tpu.memory_space<vmem>>, vector<16x16xf32>
    %cst_49 = arith.constant dense<0.000000e+00> : vector<768x16xf32>
    %35 = tpu.matmul %33, %34, %cst_49 {dimension_numbers = #tpu.dot_dimension_numbers<[1], [0], [0], [1], [0, 0, 1, 1], [], []>} : vector<768x16xf32>, vector<16x16xf32>, vector<768x16xf32> -> vector<768x16xf32>
    %36 = arith.addf %31, %35 : vector<768x16xf32>
    %c0_50 = arith.constant 0 : index
    %c1_51 = arith.constant 1 : index
    %c8_52 = arith.constant 8 : index
    %c0_53 = arith.constant 0 : index
    %37 = vector.load %arg9[%c0_50, %c1_51, %c8_52, %c0_53] : memref<3x18x32x16xf32, #tpu.memory_space<vmem>>, vector<3x16x16x16xf32>
    %38 = vector.shape_cast %37 : vector<3x16x16x16xf32> to vector<768x16xf32>
    %c64 = arith.constant 64 : index
    %c0_54 = arith.constant 0 : index
    %39 = vector.load %arg3[%c64, %c0_54] : memref<144x16xf32, #tpu.memory_space<vmem>>, vector<16x16xf32>
    %cst_55 = arith.constant dense<0.000000e+00> : vector<768x16xf32>
    %40 = tpu.matmul %38, %39, %cst_55 {dimension_numbers = #tpu.dot_dimension_numbers<[1], [0], [0], [1], [0, 0, 1, 1], [], []>} : vector<768x16xf32>, vector<16x16xf32>, vector<768x16xf32> -> vector<768x16xf32>
    %41 = arith.addf %36, %40 : vector<768x16xf32>
    %c0_56 = arith.constant 0 : index
    %c1_57 = arith.constant 1 : index
    %c9_58 = arith.constant 9 : index
    %c0_59 = arith.constant 0 : index
    %42 = vector.load %arg9[%c0_56, %c1_57, %c9_58, %c0_59] : memref<3x18x32x16xf32, #tpu.memory_space<vmem>>, vector<3x16x16x16xf32>
    %43 = vector.shape_cast %42 : vector<3x16x16x16xf32> to vector<768x16xf32>
    %c80 = arith.constant 80 : index
    %c0_60 = arith.constant 0 : index
    %44 = vector.load %arg3[%c80, %c0_60] : memref<144x16xf32, #tpu.memory_space<vmem>>, vector<16x16xf32>
    %cst_61 = arith.constant dense<0.000000e+00> : vector<768x16xf32>
    %45 = tpu.matmul %43, %44, %cst_61 {dimension_numbers = #tpu.dot_dimension_numbers<[1], [0], [0], [1], [0, 0, 1, 1], [], []>} : vector<768x16xf32>, vector<16x16xf32>, vector<768x16xf32> -> vector<768x16xf32>
    %46 = arith.addf %41, %45 : vector<768x16xf32>
    %c0_62 = arith.constant 0 : index
    %c2 = arith.constant 2 : index
    %c7_63 = arith.constant 7 : index
    %c0_64 = arith.constant 0 : index
    %47 = vector.load %arg9[%c0_62, %c2, %c7_63, %c0_64] : memref<3x18x32x16xf32, #tpu.memory_space<vmem>>, vector<3x16x16x16xf32>
    %48 = vector.shape_cast %47 : vector<3x16x16x16xf32> to vector<768x16xf32>
    %c96 = arith.constant 96 : index
    %c0_65 = arith.constant 0 : index
    %49 = vector.load %arg3[%c96, %c0_65] : memref<144x16xf32, #tpu.memory_space<vmem>>, vector<16x16xf32>
    %cst_66 = arith.constant dense<0.000000e+00> : vector<768x16xf32>
    %50 = tpu.matmul %48, %49, %cst_66 {dimension_numbers = #tpu.dot_dimension_numbers<[1], [0], [0], [1], [0, 0, 1, 1], [], []>} : vector<768x16xf32>, vector<16x16xf32>, vector<768x16xf32> -> vector<768x16xf32>
    %51 = arith.addf %46, %50 : vector<768x16xf32>
    %c0_67 = arith.constant 0 : index
    %c2_68 = arith.constant 2 : index
    %c8_69 = arith.constant 8 : index
    %c0_70 = arith.constant 0 : index
    %52 = vector.load %arg9[%c0_67, %c2_68, %c8_69, %c0_70] : memref<3x18x32x16xf32, #tpu.memory_space<vmem>>, vector<3x16x16x16xf32>
    %53 = vector.shape_cast %52 : vector<3x16x16x16xf32> to vector<768x16xf32>
    %c112 = arith.constant 112 : index
    %c0_71 = arith.constant 0 : index
    %54 = vector.load %arg3[%c112, %c0_71] : memref<144x16xf32, #tpu.memory_space<vmem>>, vector<16x16xf32>
    %cst_72 = arith.constant dense<0.000000e+00> : vector<768x16xf32>
    %55 = tpu.matmul %53, %54, %cst_72 {dimension_numbers = #tpu.dot_dimension_numbers<[1], [0], [0], [1], [0, 0, 1, 1], [], []>} : vector<768x16xf32>, vector<16x16xf32>, vector<768x16xf32> -> vector<768x16xf32>
    %56 = arith.addf %51, %55 : vector<768x16xf32>
    %c0_73 = arith.constant 0 : index
    %c2_74 = arith.constant 2 : index
    %c9_75 = arith.constant 9 : index
    %c0_76 = arith.constant 0 : index
    %57 = vector.load %arg9[%c0_73, %c2_74, %c9_75, %c0_76] : memref<3x18x32x16xf32, #tpu.memory_space<vmem>>, vector<3x16x16x16xf32>
    %58 = vector.shape_cast %57 : vector<3x16x16x16xf32> to vector<768x16xf32>
    %c128 = arith.constant 128 : index
    %c0_77 = arith.constant 0 : index
    %59 = vector.load %arg3[%c128, %c0_77] : memref<144x16xf32, #tpu.memory_space<vmem>>, vector<16x16xf32>
    %cst_78 = arith.constant dense<0.000000e+00> : vector<768x16xf32>
    %60 = tpu.matmul %58, %59, %cst_78 {dimension_numbers = #tpu.dot_dimension_numbers<[1], [0], [0], [1], [0, 0, 1, 1], [], []>} : vector<768x16xf32>, vector<16x16xf32>, vector<768x16xf32> -> vector<768x16xf32>
    %61 = arith.addf %56, %60 : vector<768x16xf32>
    %c0_79 = arith.constant 0 : index
    %c0_80 = arith.constant 0 : index
    %62 = vector.load %arg4[%c0_79, %c0_80] : memref<1x16xf32, #tpu.memory_space<vmem>>, vector<1x16xf32>
    %63 = vector.broadcast %62 : vector<1x16xf32> to vector<768x16xf32>
    %64 = arith.addf %61, %63 : vector<768x16xf32>
    %cst_81 = arith.constant 0.000000e+00 : f32
    %65 = vector.broadcast %cst_81 : f32 to vector<768x16xf32>
    %66 = arith.maximumf %64, %65 : vector<768x16xf32>
    %c0_82 = arith.constant 0 : index
    %c0_83 = arith.constant 0 : index
    %67 = vector.load %arg5[%c0_82, %c0_83] : memref<16x16xf32, #tpu.memory_space<vmem>>, vector<16x16xf32>
    %cst_84 = arith.constant dense<0.000000e+00> : vector<768x16xf32>
    %68 = tpu.matmul %66, %67, %cst_84 {dimension_numbers = #tpu.dot_dimension_numbers<[1], [0], [0], [1], [0, 0, 1, 1], [], []>} : vector<768x16xf32>, vector<16x16xf32>, vector<768x16xf32> -> vector<768x16xf32>
    %c0_85 = arith.constant 0 : index
    %c0_86 = arith.constant 0 : index
    %69 = vector.load %arg6[%c0_85, %c0_86] : memref<1x16xf32, #tpu.memory_space<vmem>>, vector<1x16xf32>
    %70 = vector.broadcast %69 : vector<1x16xf32> to vector<768x16xf32>
    %71 = arith.addf %68, %70 : vector<768x16xf32>
    %72 = vector.shape_cast %71 : vector<768x16xf32> to vector<3x256x16xf32>
    %c0_87 = arith.constant 0 : index
    %c0_88 = arith.constant 0 : index
    %c0_89 = arith.constant 0 : index
    %73 = vector.load %arg8[%c0_87, %c0_88, %c0_89] : memref<3x256x16xf32, #tpu.memory_space<vmem>>, vector<3x256x16xf32>
    tpu.vector_store %arg8[%c0_87, %c0_88, %c0_89], %72 {strides = array<i32>} : memref<3x256x16xf32, #tpu.memory_space<vmem>>, vector<3x256x16xf32>,
    return
  }
}

</mosaic_0001>

<bundles_post_ra>
// kernel: custom-call
= control target key start
LH: loop header
LB: loop body
LE: loop exit
PB: predicated region body
PF: predicated region fallthrough
CT: control target
= control target key end

     0   :  { %5 = vsyncpa [#allocation9], 0  ;;  %v1045_v0 = vmov 2147483648   ;;  %v1046_v1 = vmov 2147483647   ;;  %s1172_s0 = inlined_call_operand.vmem [shape: f32[3,768], index: 0, kind: input, shape index: {}]   ;;  %s1173_s1 = inlined_call_operand.hbm [shape: f32[3,8], index: 1, kind: output, shape index: {0}]   ;;  %s1174_s2 = inlined_call_operand.vmem [shape: s32[3,8], index: 2, kind: output, shape index: {1}]  }
   0x1   :  { %7 = vst [vmem:[#allocation12] sm:$0xff] %v1045_v0 }
   0x2   :  { %8 = vst [vmem:[#allocation14] sm:$0xff] %v1046_v1 }
   0x3   :  { %v36_v2 = vlaneseq  ;;  %v25_v3 = vld [vmem:[%s1172_s0] sm:$0xff]  ;;  %v27_v4 = vld [vmem:[%s1172_s0 + $0x8] sm:$0xff]  ;;  %v1047_v6 = vmov 2147483648   ;;  %v29_v7 = vld [vmem:[%s1172_s0 + $0x10] sm:$0xff]  ;;  %v1048_v8 = vmov 2147483647  }
   0x4   :  { %89 = vst [vmem:[#allocation13] sm:$0xff] %v1047_v6  ;;  %v47_v11 = vsub.s32 2147483647, %v25_v3  ;;  %vm46_vm0 = vcmp.lt.s32.totalorder %v25_v3, 0  ;;  %v56_v12 = vsub.s32 2147483647, %v27_v4 }
   0x5   :  { %v1077_v5 = vshrl.u32 %v36_v2, 7  ;;  %90 = vst [vmem:[#allocation15] sm:$0xff] %v1048_v8  ;;  %v37_v9 = vand.u32 127, %v36_v2  ;;  %vm55_vm1 = vcmp.lt.s32.totalorder %v27_v4, 0  ;;  %v65_v14 = vsub.s32 2147483647, %v29_v7 }
   0x6   :  { %vm64_vm2 = vcmp.lt.s32.totalorder %v29_v7, 0  ;;  %v48_v16 = vsel %vm46_vm0, %v47_v11, %v25_v3  ;;  %v57_v17 = vsel %vm55_vm1, %v56_v12, %v27_v4  ;;  %s1084_s0 = smov 0  }
   0x7   :  { %v40_v10 = vshrl.u32 %v1077_v5, 2  ;;  %v66_v19 = vsel %vm64_vm2, %v65_v14, %v29_v7 }
   0x9   :  { %v42_v13 = vmul.u32 128, %v40_v10 }
   0xb   :  { %v43_v15 = vadd.s32 %v42_v13, %v37_v9 }
   0xd   :  { %vm50_vm3 = vcmp.lt.s32.totalorder %v43_v15, 768  ;;  %v58_v18 = vadd.s32 256, %v43_v15  ;;  %v67_v20 = vadd.s32 512, %v43_v15  ;;  %81 = vst [vmem:[#allocation17] sm:$0xff] %v43_v15 }
   0xe   :  { %v51_v21 = vsel %vm50_vm3, %v48_v16, 2147483648 }
   0xf   :  { %52 = vst [vmem:[#allocation16] sm:$0xff] %v51_v21  ;;  %vm59_vm4 = vcmp.lt.s32.totalorder %v58_v18, 768  ;;  %vm68_vm5 = vcmp.lt.s32.totalorder %v67_v20, 768 }
  0x10   :  { %v60_v22 = vsel %vm59_vm4, %v57_v17, 2147483648  ;;  %v69_v23 = vsel %vm68_vm5, %v66_v19, 2147483648  ;;  %84 = vst [vmem:[#allocation17 + $0x8] sm:$0xff] %v58_v18 }
  0x11   :  { %61 = vst [vmem:[#allocation16 + $0x8] sm:$0xff] %v60_v22 }
  0x12   :  { %70 = vst [vmem:[#allocation16 + $0x10] sm:$0xff] %v69_v23 }
  0x13   :  { %87 = vst [vmem:[#allocation17 + $0x10] sm:$0xff] %v67_v20 }
  0x14 LB: > { %v99_v25 = vld [vmem:[#allocation17] sm:$0xff]  ;;  %s415_s15 = scalar_lea.vmem [#allocation13], %s1043_s0  ;;  %s417_s16 = scalar_lea.vmem [#allocation15], %s1043_s0  ;;  %s1043_s0 = sphi %s1084_s0, %s97_s0  }
  0x15   : > { %s97_s0 = sadd.s32 1, %s1043_s0  }
  0x16   : > { %v98_v24 = vld [vmem:[#allocation16] sm:$0xff]  ;;  %p94_p3 = scmp.ge.s32.totalorder %s97_s0, 8  }
  0x17   : > { %v104_v27 = vld [vmem:[#allocation17 + $0x8] sm:$0xff]  ;;  %s1054_s0 = smov (%p94_p3), [#allocation8]  }
  0x18   : > { %v102_v26 = vld [vmem:[#allocation16 + $0x8] sm:$0xff]  ;;  %vm108_vm8 = vcmp.lt.s32.totalorder %v104_v27, %v99_v25 }
  0x19   : > { %vm106_vm6 = vcmp.gt.s32.totalorder %v102_v26, %v98_v24  ;;  %vm107_vm7 = vcmp.eq.s32.totalorder %v102_v26, %v98_v24  ;;  %v115_v28 = vld [vmem:[#allocation16 + $0x10] sm:$0xff] }
  0x1a   : > { %vm109_vm9 = vmand %vm107_vm7, %vm108_vm8  ;;  %v117_v29 = vld [vmem:[#allocation17 + $0x10] sm:$0xff] }
  0x1b   : > { %vm110_vm10 = vmor %vm106_vm6, %vm109_vm9 }
  0x1c   : > { %v111_v30 = vsel %vm110_vm10, %v102_v26, %v98_v24  ;;  %v112_v31 = vsel %vm110_vm10, %v104_v27, %v99_v25 }
  0x1d   : > { %vm119_vm11 = vcmp.gt.s32.totalorder %v115_v28, %v111_v30  ;;  %vm120_vm12 = vcmp.eq.s32.totalorder %v115_v28, %v111_v30  ;;  %vm121_vm13 = vcmp.lt.s32.totalorder %v117_v29, %v112_v31 }
  0x1e   : > { %vm122_vm14 = vmand %vm120_vm12, %vm121_vm13 }
  0x1f   : > { %vm123_vm15 = vmor %vm119_vm11, %vm122_vm14 }
  0x20   : > { %v124_v32 = vsel %vm123_vm15, %v115_v28, %v111_v30  ;;  %v125_v33 = vsel %vm123_vm15, %v117_v29, %v112_v31 }
  0x21   : > { %v127_v34 = vrot.slane %v124_v32, 4  ;;  %v128_v35 = vrot.slane %v125_v33, 4 }
  0x23   : > { %vm130_vm0 = vcmp.gt.s32.totalorder %v127_v34, %v124_v32  ;;  %vm131_vm1 = vcmp.eq.s32.totalorder %v127_v34, %v124_v32  ;;  %vm132_vm2 = vcmp.lt.s32.totalorder %v128_v35, %v125_v33 }
  0x24   : > { %vm133_vm3 = vmand %vm131_vm1, %vm132_vm2 }
  0x25   : > { %vm134_vm4 = vmor %vm130_vm0, %vm133_vm3 }
  0x26   : > { %v136_v36 = vsel %vm134_vm4, %v128_v35, %v125_v33  ;;  %v135_v37 = vsel %vm134_vm4, %v127_v34, %v124_v32 }
  0x27   : > { %170 = vxpose.xlu1.b32.start [1/16] %v136_v36, 128  ;;  %138 = vxpose.xlu0.b32.start [1/16] %v135_v37, 128 }
  0x2f   : > { %171 = vxpose.xlu1.b32.cont [2/16] %v136_v36, 128  ;;  %139 = vxpose.xlu0.b32.cont [2/16] %v135_v37, 128 }
  0x37   : > { %172 = vxpose.xlu1.b32.cont [3/16] %v136_v36, 128  ;;  %140 = vxpose.xlu0.b32.cont [3/16] %v135_v37, 128 }
  0x3f   : > { %173 = vxpose.xlu1.b32.cont [4/16] %v136_v36, 128  ;;  %141 = vxpose.xlu0.b32.cont [4/16] %v135_v37, 128 }
  0x47   : > { %174 = vxpose.xlu1.b32.cont [5/16] %v136_v36, 128  ;;  %142 = vxpose.xlu0.b32.cont [5/16] %v135_v37, 128 }
  0x4f   : > { %175 = vxpose.xlu1.b32.cont [6/16] %v136_v36, 128  ;;  %143 = vxpose.xlu0.b32.cont [6/16] %v135_v37, 128 }
  0x57   : > { %176 = vxpose.xlu1.b32.cont [7/16] %v136_v36, 128  ;;  %144 = vxpose.xlu0.b32.cont [7/16] %v135_v37, 128 }
  0x5f   : > { %177 = vxpose.xlu1.b32.cont [8/16] %v136_v36, 128  ;;  %145 = vxpose.xlu0.b32.cont [8/16] %v135_v37, 128 }
  0x67   : > { %178 = vxpose.xlu1.b32.cont [9/16] %v136_v36, 128  ;;  %146 = vxpose.xlu0.b32.cont [9/16] %v135_v37, 128 }
  0x6f   : > { %179 = vxpose.xlu1.b32.cont [10/16] %v136_v36, 128  ;;  %147 = vxpose.xlu0.b32.cont [10/16] %v135_v37, 128 }
  0x77   : > { %180 = vxpose.xlu1.b32.cont [11/16] %v136_v36, 128  ;;  %148 = vxpose.xlu0.b32.cont [11/16] %v135_v37, 128 }
  0x7f   : > { %181 = vxpose.xlu1.b32.cont [12/16] %v136_v36, 128  ;;  %149 = vxpose.xlu0.b32.cont [12/16] %v135_v37, 128 }
  0x87   : > { %182 = vxpose.xlu1.b32.cont [13/16] %v136_v36, 128  ;;  %150 = vxpose.xlu0.b32.cont [13/16] %v135_v37, 128 }
  0x8f   : > { %183 = vxpose.xlu1.b32.cont [14/16] %v136_v36, 128  ;;  %151 = vxpose.xlu0.b32.cont [14/16] %v135_v37, 128 }
  0x97   : > { %184 = vxpose.xlu1.b32.cont [15/16] %v136_v36, 128  ;;  %152 = vxpose.xlu0.b32.cont [15/16] %v135_v37, 128 }
  0x9f   : > { %185 = vxpose.xlu1.b32.end [16/16] %v136_v36, 128  ;;  %153 = vxpose.xlu0.b32.end [16/16] %v135_v37, 128 }
  0xcb   : > { %v186_v38 = vpop.trf.xlu1  ;;  %v154_v39 = vpop.trf.xlu0 }
  0xd3   : > { %v187_v40 = vpop.trf.xlu1  ;;  %v155_v41 = vpop.trf.xlu0 }
  0xd4   : > { %vm206_vm5 = vcmp.lt.s32.totalorder %v187_v40, %v186_v38  ;;  %vm204_vm6 = vcmp.gt.s32.totalorder %v155_v41, %v154_v39  ;;  %vm205_vm7 = vcmp.eq.s32.totalorder %v155_v41, %v154_v39 }
  0xd5   : > { %vm207_vm8 = vmand %vm205_vm7, %vm206_vm5 }
  0xd6   : > { %vm208_vm9 = vmor %vm204_vm6, %vm207_vm8 }
  0xd7   : > { %v209_v42 = vsel %vm208_vm9, %v155_v41, %v154_v39  ;;  %v210_v43 = vsel %vm208_vm9, %v187_v40, %v186_v38 }
  0xdb   : > { %v188_v44 = vpop.trf.xlu1  ;;  %v156_v45 = vpop.trf.xlu0 }
  0xdc   : > { %vm215_vm10 = vcmp.lt.s32.totalorder %v188_v44, %v210_v43  ;;  %vm213_vm11 = vcmp.gt.s32.totalorder %v156_v45, %v209_v42  ;;  %vm214_vm12 = vcmp.eq.s32.totalorder %v156_v45, %v209_v42 }
  0xdd   : > { %vm216_vm13 = vmand %vm214_vm12, %vm215_vm10 }
  0xde   : > { %vm217_vm14 = vmor %vm213_vm11, %vm216_vm13 }
  0xdf   : > { %v218_v46 = vsel %vm217_vm14, %v156_v45, %v209_v42  ;;  %v219_v47 = vsel %vm217_vm14, %v188_v44, %v210_v43 }
  0xe3   : > { %v189_v48 = vpop.trf.xlu1  ;;  %v157_v49 = vpop.trf.xlu0 }
  0xe4   : > { %vm224_vm15 = vcmp.lt.s32.totalorder %v189_v48, %v219_v47  ;;  %vm222_vm0 = vcmp.gt.s32.totalorder %v157_v49, %v218_v46  ;;  %vm223_vm1 = vcmp.eq.s32.totalorder %v157_v49, %v218_v46 }
  0xe5   : > { %vm225_vm2 = vmand %vm223_vm1, %vm224_vm15 }
  0xe6   : > { %vm226_vm3 = vmor %vm222_vm0, %vm225_vm2 }
  0xe7   : > { %v227_v50 = vsel %vm226_vm3, %v157_v49, %v218_v46  ;;  %v228_v51 = vsel %vm226_vm3, %v189_v48, %v219_v47 }
  0xeb   : > { %v190_v52 = vpop.trf.xlu1  ;;  %v158_v53 = vpop.trf.xlu0 }
  0xec   : > { %vm233_vm4 = vcmp.lt.s32.totalorder %v190_v52, %v228_v51  ;;  %vm231_vm5 = vcmp.gt.s32.totalorder %v158_v53, %v227_v50  ;;  %vm232_vm6 = vcmp.eq.s32.totalorder %v158_v53, %v227_v50 }
  0xed   : > { %vm234_vm7 = vmand %vm232_vm6, %vm233_vm4 }
  0xee   : > { %vm235_vm8 = vmor %vm231_vm5, %vm234_vm7 }
  0xef   : > { %v236_v54 = vsel %vm235_vm8, %v158_v53, %v227_v50  ;;  %v237_v55 = vsel %vm235_vm8, %v190_v52, %v228_v51 }
  0xf3   : > { %v191_v56 = vpop.trf.xlu1  ;;  %v159_v57 = vpop.trf.xlu0 }
  0xf4   : > { %vm242_vm9 = vcmp.lt.s32.totalorder %v191_v56, %v237_v55  ;;  %vm240_vm10 = vcmp.gt.s32.totalorder %v159_v57, %v236_v54  ;;  %vm241_vm11 = vcmp.eq.s32.totalorder %v159_v57, %v236_v54 }
  0xf5   : > { %vm243_vm12 = vmand %vm241_vm11, %vm242_vm9 }
  0xf6   : > { %vm244_vm13 = vmor %vm240_vm10, %vm243_vm12 }
  0xf7   : > { %v245_v58 = vsel %vm244_vm13, %v159_v57, %v236_v54  ;;  %v246_v59 = vsel %vm244_vm13, %v191_v56, %v237_v55 }
  0xfb   : > { %v192_v60 = vpop.trf.xlu1  ;;  %v160_v61 = vpop.trf.xlu0 }
  0xfc   : > { %vm251_vm14 = vcmp.lt.s32.totalorder %v192_v60, %v246_v59  ;;  %vm249_vm15 = vcmp.gt.s32.totalorder %v160_v61, %v245_v58  ;;  %vm250_vm0 = vcmp.eq.s32.totalorder %v160_v61, %v245_v58 }
  0xfd   : > { %vm252_vm1 = vmand %vm250_vm0, %vm251_vm14 }
  0xfe   : > { %vm253_vm2 = vmor %vm249_vm15, %vm252_vm1 }
  0xff   : > { %v254_v62 = vsel %vm253_vm2, %v160_v61, %v245_v58  ;;  %v255_v63 = vsel %vm253_vm2, %v192_v60, %v246_v59 }
 0x103   : > { %v193_v0 = vpop.trf.xlu1  ;;  %v161_v1 = vpop.trf.xlu0 }
 0x104   : > { %vm260_vm3 = vcmp.lt.s32.totalorder %v193_v0, %v255_v63  ;;  %vm258_vm4 = vcmp.gt.s32.totalorder %v161_v1, %v254_v62  ;;  %vm259_vm5 = vcmp.eq.s32.totalorder %v161_v1, %v254_v62 }
 0x105   : > { %vm261_vm6 = vmand %vm259_vm5, %vm260_vm3 }
 0x106   : > { %vm262_vm7 = vmor %vm258_vm4, %vm261_vm6 }
 0x107   : > { %v263_v3 = vsel %vm262_vm7, %v161_v1, %v254_v62  ;;  %v264_v4 = vsel %vm262_vm7, %v193_v0, %v255_v63 }
 0x10b   : > { %v194_v6 = vpop.trf.xlu1  ;;  %v162_v7 = vpop.trf.xlu0 }
 0x10c   : > { %vm269_vm8 = vcmp.lt.s32.totalorder %v194_v6, %v264_v4  ;;  %vm267_vm9 = vcmp.gt.s32.totalorder %v162_v7, %v263_v3  ;;  %vm268_vm10 = vcmp.eq.s32.totalorder %v162_v7, %v263_v3 }
 0x10d   : > { %vm270_vm11 = vmand %vm268_vm10, %vm269_vm8 }
 0x10e   : > { %vm271_vm12 = vmor %vm267_vm9, %vm270_vm11 }
 0x10f   : > { %v272_v8 = vsel %vm271_vm12, %v162_v7, %v263_v3  ;;  %v273_v9 = vsel %vm271_vm12, %v194_v6, %v264_v4 }
 0x113   : > { %v195_v10 = vpop.trf.xlu1  ;;  %v163_v11 = vpop.trf.xlu0 }
 0x114   : > { %vm278_vm13 = vcmp.lt.s32.totalorder %v195_v10, %v273_v9  ;;  %vm276_vm14 = vcmp.gt.s32.totalorder %v163_v11, %v272_v8  ;;  %vm277_vm15 = vcmp.eq.s32.totalorder %v163_v11, %v272_v8 }
 0x115   : > { %vm279_vm0 = vmand %vm277_vm15, %vm278_vm13 }
 0x116   : > { %vm280_vm1 = vmor %vm276_vm14, %vm279_vm0 }
 0x117   : > { %v281_v12 = vsel %vm280_vm1, %v163_v11, %v272_v8  ;;  %v282_v13 = vsel %vm280_vm1, %v195_v10, %v273_v9  ;;  %v1049_v8 = vmov 2147483648   ;;  %v1050_v9 = vmov 2147483647  }
 0x11b   : > { %v196_v14 = vpop.trf.xlu1  ;;  %v164_v15 = vpop.trf.xlu0 }
 0x11c   : > { %vm287_vm2 = vcmp.lt.s32.totalorder %v196_v14, %v282_v13  ;;  %vm285_vm3 = vcmp.gt.s32.totalorder %v164_v15, %v281_v12  ;;  %vm286_vm4 = vcmp.eq.s32.totalorder %v164_v15, %v281_v12 }
 0x11d   : > { %vm288_vm5 = vmand %vm286_vm4, %vm287_vm2 }
 0x11e   : > { %vm289_vm6 = vmor %vm285_vm3, %vm288_vm5 }
 0x11f   : > { %v290_v16 = vsel %vm289_vm6, %v164_v15, %v281_v12  ;;  %v291_v17 = vsel %vm289_vm6, %v196_v14, %v282_v13 }
 0x123   : > { %v197_v18 = vpop.trf.xlu1  ;;  %v165_v19 = vpop.trf.xlu0 }
 0x124   : > { %vm296_vm7 = vcmp.lt.s32.totalorder %v197_v18, %v291_v17  ;;  %vm294_vm8 = vcmp.gt.s32.totalorder %v165_v19, %v290_v16  ;;  %vm295_vm9 = vcmp.eq.s32.totalorder %v165_v19, %v290_v16 }
 0x125   : > { %vm297_vm10 = vmand %vm295_vm9, %vm296_vm7 }
 0x126   : > { %vm298_vm11 = vmor %vm294_vm8, %vm297_vm10 }
 0x127   : > { %v299_v20 = vsel %vm298_vm11, %v165_v19, %v290_v16  ;;  %v300_v21 = vsel %vm298_vm11, %v197_v18, %v291_v17  ;;  %v537_v16 = vld [vmem:[#allocation12] sm:$0xff] (%p94_p3)  ;;  %v538_v17 = vld [vmem:[#allocation14] sm:$0xff] (%p94_p3)  ;;  %v1051_v18 = vmov (%p94_p3), 839939668  }
 0x128   :  { %v562_v19 = vunpack.c.l.s4 (%p94_p3), %v1051_v18 }
 0x12b   : > { %v198_v22 = vpop.trf.xlu1  ;;  %v166_v23 = vpop.trf.xlu0 }
 0x12c   : > { %vm305_vm12 = vcmp.lt.s32.totalorder %v198_v22, %v300_v21  ;;  %vm303_vm13 = vcmp.gt.s32.totalorder %v166_v23, %v299_v20  ;;  %vm304_vm14 = vcmp.eq.s32.totalorder %v166_v23, %v299_v20 }
 0x12d   : > { %vm306_vm15 = vmand %vm304_vm14, %vm305_vm12 }
 0x12e   : > { %vm307_vm0 = vmor %vm303_vm13, %vm306_vm15 }
 0x12f   : > { %v308_v24 = vsel %vm307_vm0, %v166_v23, %v299_v20  ;;  %v309_v25 = vsel %vm307_vm0, %v198_v22, %v300_v21  ;;  %v1097_v20 = vunpack.c.0.s8 (%p94_p3), %v562_v19  ;;  %v577_v21 = vand.u32 (%p94_p3), 4, %v1077_v5 }
 0x130   :  { %v1052_v22 = vmov (%p94_p3), 1417023538  }
 0x131   :  { %v584_v23 = vunpack.c.l.s4 (%p94_p3), %v1052_v22 }
 0x133   : > { %v199_v26 = vpop.trf.xlu1  ;;  %v167_v27 = vpop.trf.xlu0 }
 0x134   : > { %vm314_vm1 = vcmp.lt.s32.totalorder %v199_v26, %v309_v25  ;;  %vm312_vm2 = vcmp.gt.s32.totalorder %v167_v27, %v308_v24  ;;  %vm313_vm3 = vcmp.eq.s32.totalorder %v167_v27, %v308_v24 }
 0x135   : > { %vm315_vm4 = vmand %vm313_vm3, %vm314_vm1 }
 0x136   : > { %vm316_vm5 = vmor %vm312_vm2, %vm315_vm4 }
 0x137   : > { %v317_v28 = vsel %vm316_vm5, %v167_v27, %v308_v24  ;;  %v318_v29 = vsel %vm316_vm5, %v199_v26, %v309_v25 }
 0x13b   : > { %v200_v30 = vpop.trf.xlu1  ;;  %v168_v31 = vpop.trf.xlu0 }
 0x13c   : > { %vm323_vm6 = vcmp.lt.s32.totalorder %v200_v30, %v318_v29  ;;  %vm321_vm7 = vcmp.gt.s32.totalorder %v168_v31, %v317_v28  ;;  %vm322_vm8 = vcmp.eq.s32.totalorder %v168_v31, %v317_v28 }
 0x13d   : > { %vm324_vm9 = vmand %vm322_vm8, %vm323_vm6 }
 0x13e   : > { %vm325_vm10 = vmor %vm321_vm7, %vm324_vm9 }
 0x13f   : > { %v326_v32 = vsel %vm325_vm10, %v168_v31, %v317_v28  ;;  %v327_v33 = vsel %vm325_vm10, %v200_v30, %v318_v29 }
 0x143   : > { %v201_v34 = vpop.trf.xlu1  ;;  %v169_v35 = vpop.trf.xlu0 }
 0x144   : > { %vm332_vm11 = vcmp.lt.s32.totalorder %v201_v34, %v327_v33  ;;  %vm330_vm12 = vcmp.gt.s32.totalorder %v169_v35, %v326_v32  ;;  %vm331_vm13 = vcmp.eq.s32.totalorder %v169_v35, %v326_v32 }
 0x145   : > { %vm333_vm14 = vmand %vm331_vm13, %vm332_vm11 }
 0x146   : > { %vm334_vm15 = vmor %vm330_vm12, %vm333_vm14 }
 0x147   : > { %v335_v36 = vsel %vm334_vm15, %v169_v35, %v326_v32  ;;  %v336_v37 = vsel %vm334_vm15, %v201_v34, %v327_v33  ;;  %v1108_v32 = vunpack.c.0.s8 (%p94_p3), %v584_v23  ;;  %v599_v33 = vand.u32 (%p94_p3), 2, %v1077_v5 }
 0x148   : > { %v338_v38 = vrot.slane %v335_v36, 1  ;;  %v339_v39 = vrot.slane %v336_v37, 1 }
 0x14a   : > { %vm341_vm0 = vcmp.gt.s32.totalorder %v338_v38, %v335_v36  ;;  %vm342_vm1 = vcmp.eq.s32.totalorder %v338_v38, %v335_v36  ;;  %vm343_vm2 = vcmp.lt.s32.totalorder %v339_v39, %v336_v37 }
 0x14b   : > { %vm344_vm3 = vmand %vm342_vm1, %vm343_vm2 }
 0x14c   : > { %vm345_vm4 = vmor %vm341_vm0, %vm344_vm3 }
 0x14d   : > { %v346_v40 = vsel %vm345_vm4, %v338_v38, %v335_v36  ;;  %v347_v41 = vsel %vm345_vm4, %v339_v39, %v336_v37  ;;  %v1053_v36 = vmov (%p94_p3), 1732584193  }
 0x14e   : > { %v349_v42 = vrot.slane %v346_v40, 1  ;;  %v350_v43 = vrot.slane %v347_v41, 1  ;;  %v606_v37 = vunpack.c.l.s4 (%p94_p3), %v1053_v36 }
 0x150   : > { %vm352_vm5 = vcmp.gt.s32.totalorder %v349_v42, %v346_v40  ;;  %vm353_vm6 = vcmp.eq.s32.totalorder %v349_v42, %v346_v40  ;;  %vm354_vm7 = vcmp.lt.s32.totalorder %v350_v43, %v347_v41 }
 0x151   : > { %vm355_vm8 = vmand %vm353_vm6, %vm354_vm7 }
 0x152   : > { %vm356_vm9 = vmor %vm352_vm5, %vm355_vm8 }
 0x153   : > { %v357_v44 = vsel %vm356_vm9, %v349_v42, %v346_v40  ;;  %v358_v45 = vsel %vm356_vm9, %v350_v43, %v347_v41  ;;  %v1121_v42 = vunpack.c.0.s8 (%p94_p3), %v606_v37 }
 0x154   : > { %v360_v46 = vrot.slane %v357_v44, 1  ;;  %v361_v47 = vrot.slane %v358_v45, 1 }
 0x156   : > { %vm365_vm10 = vcmp.lt.s32.totalorder %v361_v47, %v358_v45  ;;  %vm363_vm11 = vcmp.gt.s32.totalorder %v360_v46, %v357_v44  ;;  %vm364_vm12 = vcmp.eq.s32.totalorder %v360_v46, %v357_v44 }
 0x157   : > { %vm366_vm13 = vmand %vm364_vm12, %vm365_vm10 }
 0x158   : > { %vm367_vm14 = vmor %vm363_vm11, %vm366_vm13 }
 0x159   : > { %v368_v48 = vsel %vm367_vm14, %v360_v46, %v357_v44  ;;  %v369_v49 = vsel %vm367_vm14, %v361_v47, %v358_v45  ;;  %v621_v46 = vand.u32 (%p94_p3), 1, %v1077_v5 }
 0x15a   : > { %v371_v50 = vrot.slane %v368_v48, 1  ;;  %v372_v51 = vrot.slane %v369_v49, 1 }
 0x15c   : > { %vm374_vm15 = vcmp.gt.s32.totalorder %v371_v50, %v368_v48  ;;  %vm375_vm0 = vcmp.eq.s32.totalorder %v371_v50, %v368_v48  ;;  %vm376_vm1 = vcmp.lt.s32.totalorder %v372_v51, %v369_v49 }
 0x15d   : > { %vm377_vm2 = vmand %vm375_vm0, %vm376_vm1 }
 0x15e   : > { %vm378_vm3 = vmor %vm374_vm15, %vm377_vm2 }
 0x15f   : > { %v379_v52 = vsel %vm378_vm3, %v371_v50, %v368_v48  ;;  %v380_v53 = vsel %vm378_vm3, %v372_v51, %v369_v49 }
 0x160   : > { %v382_v54 = vrot.slane %v379_v52, 1  ;;  %v383_v55 = vrot.slane %v380_v53, 1 }
 0x162   : > { %vm385_vm4 = vcmp.gt.s32.totalorder %v382_v54, %v379_v52  ;;  %vm386_vm5 = vcmp.eq.s32.totalorder %v382_v54, %v379_v52  ;;  %vm387_vm6 = vcmp.lt.s32.totalorder %v383_v55, %v380_v53 }
 0x163   : > { %vm388_vm7 = vmand %vm386_vm5, %vm387_vm6 }
 0x164   : > { %vm389_vm8 = vmor %vm385_vm4, %vm388_vm7 }
 0x165   : > { %v390_v56 = vsel %vm389_vm8, %v382_v54, %v379_v52  ;;  %v391_v57 = vsel %vm389_vm8, %v383_v55, %v380_v53 }
 0x166   : > { %v393_v58 = vrot.slane %v390_v56, 1  ;;  %v394_v59 = vrot.slane %v391_v57, 1 }
 0x168   : > { %vm396_vm9 = vcmp.gt.s32.totalorder %v393_v58, %v390_v56  ;;  %vm397_vm10 = vcmp.eq.s32.totalorder %v393_v58, %v390_v56  ;;  %vm398_vm11 = vcmp.lt.s32.totalorder %v394_v59, %v391_v57 }
 0x169   : > { %vm399_vm12 = vmand %vm397_vm10, %vm398_vm11 }
 0x16a   : > { %vm400_vm13 = vmor %vm396_vm9, %vm399_vm12 }
 0x16b   : > { %v401_v60 = vsel %vm400_vm13, %v393_v58, %v390_v56  ;;  %v402_v61 = vsel %vm400_vm13, %v394_v59, %v391_v57 }
 0x16c   : > { %v404_v62 = vrot.slane %v401_v60, 1  ;;  %v405_v63 = vrot.slane %v402_v61, 1 }
 0x16e   : > { %vm407_vm14 = vcmp.gt.s32.totalorder %v404_v62, %v401_v60  ;;  %vm408_vm15 = vcmp.eq.s32.totalorder %v404_v62, %v401_v60  ;;  %vm409_vm0 = vcmp.lt.s32.totalorder %v405_v63, %v402_v61 }
 0x16f   : > { %vm410_vm1 = vmand %vm408_vm15, %vm409_vm0 }
 0x170   : > { %vm411_vm2 = vmor %vm407_vm14, %vm410_vm1  ;;  %vm1104_vm14 = vcmp.ne.s32.totalorder (%p94_p3), %v577_v21, 0 }
 0x171   : > { %v413_v0 = vsel %vm411_vm2, %v405_v63, %v402_v61  ;;  %v412_v1 = vsel %vm411_vm2, %v404_v62, %v401_v60 }
 0x172   : > { %420 = vxpose.xlu2.b32.start.end [1/1] (short) (narrow) %v413_v0, 8  ;;  %416 = vst [vmem:[%s415_s15] sm:$0x1] %v412_v1 }
 0x173   : > { %418 = vst [vmem:[%s417_s16] sm:$0x1] %v413_v0 }
 0x179   :  { %v525_v14 = vld [vmem:[#allocation13 + $0x7] ss:$-1 sm:$0xff] (%p94_p3) }
 0x17a   :  { %v531_v15 = vld [vmem:[#allocation15 + $0x7] ss:$-1 sm:$0xff] (%p94_p3)  ;;  %vm543_vm6 = vcmp.gt.s32.totalorder (%p94_p3), %v537_v16, %v525_v14  ;;  %vm544_vm7 = vcmp.eq.s32.totalorder (%p94_p3), %v537_v16, %v525_v14 }
 0x17b   :  { %vm545_vm8 = vcmp.lt.s32.totalorder (%p94_p3), %v538_v17, %v531_v15 }
 0x17c   :  { %vm546_vm9 = vmand (%p94_p3), %vm544_vm7, %vm545_vm8  ;;  %vm1115_vm7 = vcmp.ne.s32.totalorder (%p94_p3), %v599_v33, 0 }
 0x17d   :  { %vm547_vm10 = vmor (%p94_p3), %vm543_vm6, %vm546_vm9 }
 0x17e   :  { %v548_v24 = vsel (%p94_p3), %vm547_vm10, %v537_v16, %v525_v14  ;;  %v550_v25 = vsel (%p94_p3), %vm547_vm10, %v525_v14, %v537_v16  ;;  %v552_v26 = vsel (%p94_p3), %vm547_vm10, %v538_v17, %v531_v15 }
 0x17f   :  { %v564_v27 = vperm.slane (%p94_p3), %v548_v24, %v1097_v20  ;;  %v568_v28 = vperm.slane (%p94_p3), %v552_v26, %v1097_v20  ;;  %v709_v29 = vperm.slane (%p94_p3), %v550_v25, %v1097_v20 }
 0x181   :  { %vm570_vm11 = vcmp.gt.s32.totalorder (%p94_p3), %v548_v24, %v564_v27  ;;  %vm571_vm12 = vcmp.eq.s32.totalorder (%p94_p3), %v548_v24, %v564_v27  ;;  %vm572_vm13 = vcmp.lt.s32.totalorder (%p94_p3), %v552_v26, %v568_v28  ;;  %vm716_vm0 = vcmp.eq.s32.totalorder (%p94_p3), %v550_v25, %v709_v29 }
 0x182   :  { %vm573_vm15 = vmand (%p94_p3), %vm571_vm12, %vm572_vm13 }
 0x183   :  { %vm574_vm2 = vmor (%p94_p3), %vm570_vm11, %vm573_vm15 }
 0x20b   : > { %v436_v3 = vpop.trf.xlu2 }
 0x20c   : > { %v475_v4 = vrot.slane %v436_v3, 1  ;;  %986 = vpush %v436_v3 }
 0x20e   : > { %988 = vpush %v475_v4  ;;  %v499_v6 = vrot.slane %v475_v4, 1 }
 0x210   : > { %990 = vpush %v499_v6 }
 0x23d   : > { %s987_s17 = spop %986 }
 0x23e   : > { %s453_s18 = sshrl.u32 %s987_s17, 8  ;;  %s455_s19 = ssub.s32 0, %s987_s17 }
 0x23f   : > { %p454_p0 = scmp.lt.s32.totalorder %s987_s17, 0  ;;  %s974_s20 = smin.u32 %s987_s17, %s455_s19 }
 0x240   : > { %s457_s21 = sand.u32 255, %s974_s20   ;;  %s976_s22 = sshll.u32 %s453_s18, 3 }
 0x241   : > { %s458_s23 = ssub.s32 0, %s457_s21  ;;  %s989_s24 = spop %988 }
 0x242   : > { %s1182_s23 = smov (!%p454_p0, %s458_s23), %s457_s21  ;;  %s479_s28 = ssub.s32 0, %s989_s24 }
 0x243   : > { %s460_s25 = sshrl.u32 %s1182_s23, 7  ;;  %s462_s26 = sand.u32 127, %s1182_s23  }
 0x244   : > { %s975_s27 = sshll.u32 %s460_s25, 9  ;;  %s978_s30 = smin.u32 %s989_s24, %s479_s28 }
 0x245   : > { %s463_s29 = sadd.s32 %s975_s27, %s462_s26  ;;  %p478_p1 = scmp.lt.s32.totalorder %s989_s24, 0 }
 0x246   : > { %v465_v7 = vstv %s463_s29  ;;  %s481_s3 = sand.u32 255, %s978_s30   ;;  %s477_s4 = sshrl.u32 %s989_s24, 8 }
 0x247   : > { %vm467_vm3 = vcmp.eq.s32.totalorder %v36_v2, %v465_v7  ;;  %s482_s5 = ssub.s32 0, %s481_s3  ;;  %s469_s6 = scalar_lea.vmem [#allocation16], %s976_s22 }
 0x248   : > { %470 = vst.msk [vmem:[%s469_s6] sm:$0xff] %vm467_vm3, %v1049_v8  ;;  %s1184_s5 = smov (!%p478_p1, %s482_s5), %s481_s3  ;;  %s472_s7 = scalar_lea.vmem [#allocation17], %s976_s22 }
 0x249   : > { %473 = vst.msk [vmem:[%s472_s7] sm:$0xff] %vm467_vm3, %v1050_v9  ;;  %s991_s8 = spop %990  ;;  %s484_s9 = sshrl.u32 %s1184_s5, 7  ;;  %vm715_vm3 = vcmp.gt.s32.totalorder (%p94_p3), %v550_v25, %v709_v29 }
 0x24a   : > { %s486_s10 = sand.u32 127, %s1184_s5   ;;  %s979_s11 = sshll.u32 %s484_s9, 9 }
 0x24b   : > { %s980_s12 = sshll.u32 %s477_s4, 3  ;;  %s487_s13 = sadd.s32 %s979_s11, %s486_s10 }
 0x24c   : > { %v489_v10 = vstv %s487_s13  ;;  %s503_s14 = ssub.s32 0, %s991_s8  ;;  %p502_p2 = scmp.lt.s32.totalorder %s991_s8, 0 }
 0x24d   : > { %v490_v11 = vadd.s32 128, %v489_v10  ;;  %s982_s15 = smin.u32 %s991_s8, %s503_s14  ;;  %s493_s18 = scalar_lea.vmem [#allocation16], %s980_s12 }
 0x24e   : > { %s505_s16 = sand.u32 255, %s982_s15   ;;  %s496_s19 = scalar_lea.vmem [#allocation17], %s980_s12 }
 0x24f   : > { %vm491_vm4 = vcmp.eq.s32.totalorder %v36_v2, %v490_v11  ;;  %s506_s17 = ssub.s32 0, %s505_s16  ;;  %s501_s20 = sshrl.u32 %s991_s8, 8 }
 0x250   : > { %494 = vst.msk [vmem:[%s493_s18] sm:$0xff] %vm491_vm4, %v1049_v8  ;;  %s1186_s17 = smov (!%p502_p2, %s506_s17), %s505_s16  ;;  %s984_s25 = sshll.u32 %s501_s20, 3 }
 0x251   : > { %497 = vst.msk [vmem:[%s496_s19] sm:$0xff] %vm491_vm4, %v1050_v9  ;;  %s508_s21 = sshrl.u32 %s1186_s17, 7  ;;  %s510_s22 = sand.u32 127, %s1186_s17   ;;  %vm579_vm4 = vmxor (%p94_p3), %vm574_vm2, %vm1104_vm14 }
 0x252   : > { %s983_s23 = sshll.u32 %s508_s21, 9  ;;  %s517_s26 = scalar_lea.vmem [#allocation16], %s984_s25  ;;  %v580_v34 = vsel (%p94_p3), %vm579_vm4, %v548_v24, %v564_v27  ;;  %v581_v35 = vsel (%p94_p3), %vm579_vm4, %v552_v26, %v568_v28 }
 0x253   : > { %s511_s24 = sadd.s32 %s983_s23, %s510_s22  ;;  %s520_s27 = scalar_lea.vmem [#allocation17], %s984_s25  ;;  %v586_v38 = vperm.slane (%p94_p3), %v580_v34, %v1108_v32  ;;  %v590_v39 = vperm.slane (%p94_p3), %v581_v35, %v1108_v32 }
 0x254   : > { %v513_v12 = vstv %s511_s24  ;;  %s905_s28 = sshll.u32 (%p94_p3), %s1054_s0, 4  ;;  %s907_s3 = sshll.u32 (%p94_p3), %s1173_s1, 4  ;;  %s906_s28 = int_to_ptr.vmem [resolvable:$true] %s905_s28  ;;  %s908_s3 = int_to_ptr.hbm [resolvable:$true] %s907_s3 }
 0x255   : > { %v514_v13 = vadd.s32 256, %v513_v12  ;;  %vm592_vm9 = vcmp.gt.s32.totalorder (%p94_p3), %v580_v34, %v586_v38  ;;  %vm594_vm11 = vcmp.lt.s32.totalorder (%p94_p3), %v581_v35, %v590_v39 }
 0x256   :  { %96 = sbr.rel (!%p94_p3) target bundleno = 20 (0x14), region = 104 }
 0x257   : > { %vm515_vm5 = vcmp.eq.s32.totalorder %v36_v2, %v514_v13  ;;  %v554_v2 = vsel (%p94_p3), %vm547_vm10, %v531_v15, %v538_v17  ;;  %vm593_vm10 = vcmp.eq.s32.totalorder (%p94_p3), %v580_v34, %v586_v38 }
 0x258   : > { %518 = vst.msk [vmem:[%s517_s26] sm:$0xff] %vm515_vm5, %v1049_v8  ;;  %v713_v30 = vperm.slane (%p94_p3), %v554_v2, %v1097_v20  ;;  %vm595_vm12 = vmand (%p94_p3), %vm593_vm10, %vm594_vm11 }
 0x259   : > { %521 = vst.msk [vmem:[%s520_s27] sm:$0xff] %vm515_vm5, %v1050_v9  ;;  %vm596_vm13 = vmor (%p94_p3), %vm592_vm9, %vm595_vm12  ;;  %vm1130_vm9 = vcmp.ne.s32.totalorder (%p94_p3), %v621_v46, 0 }
 0x25a   :  { %vm717_vm1 = vcmp.lt.s32.totalorder (%p94_p3), %v554_v2, %v713_v30  ;;  %vm601_vm15 = vmxor (%p94_p3), %vm596_vm13, %vm1115_vm7 }
 0x25b   :  { %vm718_vm5 = vmand %vm716_vm0, %vm717_vm1  ;;  %v602_v47 = vsel %vm601_vm15, %v580_v34, %v586_v38  ;;  %v603_v48 = vsel %vm601_vm15, %v581_v35, %v590_v39 }
 0x25c   :  { %vm719_vm6 = vmor %vm715_vm3, %vm718_vm5  ;;  %v608_v49 = vperm.slane %v602_v47, %v1121_v42  ;;  %v612_v50 = vperm.slane %v603_v48, %v1121_v42 }
 0x25d   :  { %vm724_vm8 = vmxor %vm719_vm6, %vm1104_vm14 }
 0x25e   :  { %v725_v41 = vsel %vm724_vm8, %v550_v25, %v709_v29  ;;  %v726_v43 = vsel %vm724_vm8, %v554_v2, %v713_v30  ;;  %vm614_vm5 = vcmp.gt.s32.totalorder %v602_v47, %v608_v49  ;;  %vm615_vm6 = vcmp.eq.s32.totalorder %v602_v47, %v608_v49 }
 0x25f   :  { %v731_v44 = vperm.slane %v725_v41, %v1108_v32  ;;  %v735_v45 = vperm.slane %v726_v43, %v1108_v32  ;;  %vm616_vm8 = vcmp.lt.s32.totalorder %v603_v48, %v612_v50 }
 0x260   :  { %vm617_vm11 = vmand %vm615_vm6, %vm616_vm8 }
 0x261   :  { %vm737_vm0 = vcmp.gt.s32.totalorder %v725_v41, %v731_v44  ;;  %vm738_vm1 = vcmp.eq.s32.totalorder %v725_v41, %v731_v44  ;;  %vm739_vm2 = vcmp.lt.s32.totalorder %v726_v43, %v735_v45  ;;  %vm618_vm12 = vmor %vm614_vm5, %vm617_vm11 }
 0x262   :  { %vm740_vm3 = vmand %vm738_vm1, %vm739_vm2 }
 0x263   :  { %vm741_vm4 = vmor %vm737_vm0, %vm740_vm3 }
 0x264   :  { %vm746_vm10 = vmxor %vm741_vm4, %vm1115_vm7 }
 0x265   :  { %v747_v5 = vsel %vm746_vm10, %v725_v41, %v731_v44  ;;  %v748_v52 = vsel %vm746_vm10, %v726_v43, %v735_v45  ;;  %vm623_vm13 = vmxor %vm618_vm12, %vm1130_vm9 }
 0x266   :  { %v753_v53 = vperm.slane %v747_v5, %v1121_v42  ;;  %v757_v54 = vperm.slane %v748_v52, %v1121_v42  ;;  %v624_v55 = vsel %vm623_vm13, %v602_v47, %v608_v49  ;;  %v625_v56 = vsel %vm623_vm13, %v603_v48, %v612_v50 }
 0x267   :  { %v636_v57 = vperm.slane %v624_v55, %v1097_v20  ;;  %v640_v58 = vperm.slane %v625_v56, %v1097_v20 }
 0x268   :  { %vm759_vm15 = vcmp.gt.s32.totalorder %v747_v5, %v753_v53  ;;  %vm760_vm0 = vcmp.eq.s32.totalorder %v747_v5, %v753_v53  ;;  %vm761_vm1 = vcmp.lt.s32.totalorder %v748_v52, %v757_v54 }
 0x269   :  { %vm762_vm2 = vmand %vm760_vm0, %vm761_vm1  ;;  %vm642_vm3 = vcmp.gt.s32.totalorder %v624_v55, %v636_v57  ;;  %vm643_vm4 = vcmp.eq.s32.totalorder %v624_v55, %v636_v57  ;;  %vm644_vm5 = vcmp.lt.s32.totalorder %v625_v56, %v640_v58 }
 0x26a   :  { %vm763_vm6 = vmor %vm759_vm15, %vm762_vm2 }
 0x26b   :  { %vm645_vm8 = vmand %vm643_vm4, %vm644_vm5 }
 0x26c   :  { %vm646_vm10 = vmor %vm642_vm3, %vm645_vm8 }
 0x26d   :  { %vm651_vm11 = vmxor %vm646_vm10, %vm1104_vm14 }
 0x26e   :  { %v652_v59 = vsel %vm651_vm11, %v624_v55, %v636_v57  ;;  %v653_v60 = vsel %vm651_vm11, %v625_v56, %v640_v58  ;;  %vm768_vm12 = vmxor %vm763_vm6, %vm1130_vm9 }
 0x26f   :  { %v658_v61 = vperm.slane %v652_v59, %v1108_v32  ;;  %v662_v62 = vperm.slane %v653_v60, %v1108_v32  ;;  %v769_v63 = vsel %vm768_vm12, %v747_v5, %v753_v53  ;;  %v770_v0 = vsel %vm768_vm12, %v748_v52, %v757_v54 }
 0x270   :  { %v781_v1 = vperm.slane %v769_v63, %v1097_v20  ;;  %v785_v3 = vperm.slane %v770_v0, %v1097_v20 }
 0x271   :  { %vm664_vm13 = vcmp.gt.s32.totalorder %v652_v59, %v658_v61  ;;  %vm665_vm15 = vcmp.eq.s32.totalorder %v652_v59, %v658_v61  ;;  %vm666_vm0 = vcmp.lt.s32.totalorder %v653_v60, %v662_v62 }
 0x272   :  { %vm667_vm1 = vmand %vm665_vm15, %vm666_vm0  ;;  %vm788_vm2 = vcmp.eq.s32.totalorder %v769_v63, %v781_v1  ;;  %vm789_vm3 = vcmp.lt.s32.totalorder %v770_v0, %v785_v3  ;;  %vm787_vm5 = vcmp.gt.s32.totalorder %v769_v63, %v781_v1 }
 0x273   :  { %vm668_vm4 = vmor %vm664_vm13, %vm667_vm1 }
 0x274   :  { %vm673_vm6 = vmxor %vm668_vm4, %vm1115_vm7 }
 0x275   :  { %v674_v4 = vsel %vm673_vm6, %v652_v59, %v658_v61  ;;  %v675_v6 = vsel %vm673_vm6, %v653_v60, %v662_v62  ;;  %vm790_vm8 = vmand %vm788_vm2, %vm789_vm3 }
 0x276   :  { %v680_v7 = vperm.slane %v674_v4, %v1121_v42  ;;  %v684_v8 = vperm.slane %v675_v6, %v1121_v42  ;;  %vm791_vm10 = vmor %vm787_vm5, %vm790_vm8 }
 0x277   :  { %vm796_vm11 = vmxor %vm791_vm10, %vm1104_vm14 }
 0x278   :  { %vm686_vm12 = vcmp.gt.s32.totalorder %v674_v4, %v680_v7  ;;  %vm687_vm15 = vcmp.eq.s32.totalorder %v674_v4, %v680_v7  ;;  %vm688_vm0 = vcmp.lt.s32.totalorder %v675_v6, %v684_v8  ;;  %v797_v9 = vsel %vm796_vm11, %v769_v63, %v781_v1 }
 0x279   :  { %vm689_vm13 = vmand %vm687_vm15, %vm688_vm0  ;;  %v798_v10 = vsel %vm796_vm11, %v770_v0, %v785_v3  ;;  %v803_v11 = vperm.slane %v797_v9, %v1108_v32 }
 0x27a   :  { %vm690_vm1 = vmor %vm686_vm12, %vm689_vm13  ;;  %v807_v12 = vperm.slane %v798_v10, %v1108_v32 }
 0x27b   :  { %vm695_vm2 = vmxor %vm690_vm1, %vm1130_vm9  ;;  %vm809_vm3 = vcmp.gt.s32.totalorder %v797_v9, %v803_v11  ;;  %vm810_vm4 = vcmp.eq.s32.totalorder %v797_v9, %v803_v11 }
 0x27c   :  { %v696_v13 = vsel %vm695_vm2, %v674_v4, %v680_v7  ;;  %v697_v14 = vsel %vm695_vm2, %v675_v6, %v684_v8  ;;  %vm811_vm5 = vcmp.lt.s32.totalorder %v798_v10, %v807_v12 }
 0x27d   :  { %699 = vst [vmem:[#allocation12] sm:$0xff] %v696_v13  ;;  %vm812_vm14 = vmand %vm810_vm4, %vm811_vm5 }
 0x27e   :  { %700 = vst [vmem:[#allocation14] sm:$0xff] %v697_v14  ;;  %vm813_vm6 = vmor %vm809_vm3, %vm812_vm14 }
 0x27f   :  { %vm818_vm8 = vmxor %vm813_vm6, %vm1115_vm7 }
 0x280   :  { %v819_v15 = vsel %vm818_vm8, %v797_v9, %v803_v11  ;;  %v820_v16 = vsel %vm818_vm8, %v798_v10, %v807_v12 }
 0x281   :  { %v825_v17 = vperm.slane %v819_v15, %v1121_v42  ;;  %v829_v18 = vperm.slane %v820_v16, %v1121_v42 }
 0x283   :  { %vm831_vm10 = vcmp.gt.s32.totalorder %v819_v15, %v825_v17  ;;  %vm832_vm11 = vcmp.eq.s32.totalorder %v819_v15, %v825_v17  ;;  %vm833_vm12 = vcmp.lt.s32.totalorder %v820_v16, %v829_v18 }
 0x284   :  { %vm834_vm15 = vmand %vm832_vm11, %vm833_vm12  ;;  %v847_v22 = vld [vmem:[#allocation12] sm:$0xff] }
 0x285   :  { %vm835_vm0 = vmor %vm831_vm10, %vm834_vm15  ;;  %v871_v21 = vld [vmem:[#allocation14] sm:$0xff]  ;;  %vm848_vm7 = vcmp.lt.s32.totalorder %v847_v22, 0  ;;  %v849_v23 = vsub.s32 2147483647, %v847_v22 }
 0x286   :  { %vm840_vm13 = vmxor %vm835_vm0, %vm1130_vm9  ;;  %872 = vxpose.xlu0.b32.start.end [1/1] (short) (narrow) %v871_v21, 8 }
 0x287   :  { %v841_v19 = vsel %vm840_vm13, %v819_v15, %v825_v17  ;;  %v842_v20 = vsel %vm840_vm13, %v820_v16, %v829_v18  ;;  %v850_v24 = vsel %vm848_vm7, %v849_v23, %v847_v22 }
 0x288   :  { %844 = vst [vmem:[#allocation13] sm:$0xff] %v841_v19 }
 0x289   :  { %845 = vst [vmem:[#allocation15] sm:$0xff] %v842_v20 }
 0x28a   :  { %851 = vst [vmem:[#allocation12] sm:$0xff] %v850_v24 }
 0x28e   :  { %853 = vxpose.xlu0.b32.start.end [1/1] (short) (narrow) %v850_v24, 8 }
 0x32a   :  { %v873_v25 = vpop.trf.xlu0 }
 0x32b   :  { %889 = vst [vmem:[#allocation10] sm:$0xff] %v873_v25 }
 0x332   :  { %v898_v26 = vld [vmem:[#allocation10] sm:$0xf]  ;;  %v854_v2 = vpop.trf.xlu0 }
 0x333   :  { %901 = vst [vmem:[#allocation11] sm:$0xf] %v898_v26 }
 0x334   :  { %870 = vst [vmem:[#allocation7] sm:$0xff] %v854_v2 }
 0x33a   :  { %v927_v27 = vld [vmem:[#allocation11] sm:$0xf] }
 0x33b   :  { %928 = vst [vmem:[%s1174_s2] sm:$0xf] %v927_v27  ;;  %v892_v28 = vld [vmem:[#allocation7] sm:$0xf] }
 0x33c   :  { %895 = vst [vmem:[#allocation8] sm:$0xf] %v892_v28 }
 0x33d   :  { %910 = dma.vmem_to_hbm [thread:$0]  %s906_s28, 64, %s908_s3, [#allocation9]  }
 0x33e   :  { %1039 = dma.done.wait [#allocation9], 64  }
 0x33f   :  { %1040 = vsyncadd [#allocation9], 4294967232 }
 0x340   :  { %946 = vsyncpa [#allocation9], 1 }

// kernel: rdn_forward_train.1
= control target key start
LH: loop header
LB: loop body
LE: loop exit
PB: predicated region body
PF: predicated region fallthrough
CT: control target
= control target key end

     0   :  { %vm137_vm0 = vcmask 588800   ;;  %vm944_vm1 = vcmask 122880   ;;  %vm827_vm2 = vcmask 130048   ;;  %v10016_v22 = vmov 0.0   ;;  %s14364_s1 = inlined_call_operand.vmem [shape: f32[72,16], index: 1, kind: input, shape index: {}]   ;;  %s14365_s2 = inlined_call_operand.vmem [shape: f32[1,16], index: 2, kind: input, shape index: {}]   ;;  %s14366_s0 = inlined_call_operand.vmem [shape: f32[768,72], index: 0, kind: input, shape index: {}]   ;;  %s14367_s7 = inlined_call_operand.vmem [shape: f32[3,256,16], index: 7, kind: output, shape index: {0}]   ;;  %s14368_s3 = inlined_call_operand.vmem [shape: f32[144,16], index: 3, kind: input, shape index: {}]   ;;  %s14369_s5 = inlined_call_operand.vmem [shape: f32[16,16], index: 5, kind: input, shape index: {}]   ;;  %s14370_s4 = inlined_call_operand.vmem [shape: f32[1,16], index: 4, kind: input, shape index: {}]   ;;  %s14371_s6 = inlined_call_operand.vmem [shape: f32[1,16], index: 6, kind: input, shape index: {}]   ;;  %s14372_s8 = inlined_call_operand.vmem [shape: f32[3,256,16], index: 8, kind: output, shape index: {1}]  }
   0x1   :  { %v132_v0 = vld [vmem:[%s14364_s1 + $0x40] sm:$0xff]  ;;  %v131_v1 = vld [vmem:[%s14364_s1 + $0x38] sm:$0xff]  ;;  %v130_v2 = vld [vmem:[%s14364_s1 + $0x30] sm:$0xff]  ;;  %1010 = vst.msk [vmem:[#allocation2 + $0x178] sm:$0x1] %vm944_vm1, %v10016_v22  ;;  %vm926_vm3 = vcmask 123904  }
   0x2   :  { %433 = vmatpush.msra.mxu0 %v132_v0  ;;  %v129_v3 = vld [vmem:[%s14364_s1 + $0x28] sm:$0xff]  ;;  %v128_v4 = vld [vmem:[%s14364_s1 + $0x20] sm:$0xff]  ;;  %v127_v5 = vld [vmem:[%s14364_s1 + $0x18] sm:$0xff]  ;;  %924 = vst.msk [vmem:[#allocation2 + $0x7] sm:$0xff] %vm827_vm2, %v10016_v22 }
   0x3   :  { %v126_v6 = vld [vmem:[%s14364_s1 + $0x10] sm:$0xff]  ;;  %v125_v7 = vld [vmem:[%s14364_s1 + $0x8] sm:$0xff]  ;;  %v124_v8 = vld [vmem:[%s14364_s1] sm:$0xff]  ;;  %925 = vst.msk [vmem:[#allocation2 + $0xf] sm:$0xff] %vm827_vm2, %v10016_v22 }
   0x4   :  { %434 = vmatpush.msra.mxu0 %v131_v1  ;;  %v28_v9 = vld [vmem:[%s14366_s0] sm:$0xff]  ;;  %v29_v10 = vld [vmem:[%s14366_s0 + $0x8] sm:$0xff]  ;;  %v30_v11 = vld [vmem:[%s14366_s0 + $0x10] sm:$0xff]  ;;  %928 = vst.msk [vmem:[#allocation2 + $0x247] sm:$0xff] %vm827_vm2, %v10016_v22 }
   0x5   :  { %v31_v12 = vld [vmem:[%s14366_s0 + $0x18] sm:$0xff]  ;;  %v32_v13 = vld [vmem:[%s14366_s0 + $0x20] sm:$0xff]  ;;  %v33_v14 = vld [vmem:[%s14366_s0 + $0x28] sm:$0xff]  ;;  %929 = vst.msk [vmem:[#allocation2 + $0x24f] sm:$0xff] %vm827_vm2, %v10016_v22 }
   0x6   :  { %435 = vmatpush.msra.mxu0 %v130_v2  ;;  %v34_v15 = vld [vmem:[%s14366_s0 + $0x30] sm:$0xff]  ;;  %v35_v16 = vld [vmem:[%s14366_s0 + $0x38] sm:$0xff]  ;;  %v36_v17 = vld [vmem:[%s14366_s0 + $0x40] sm:$0xff]  ;;  %931 = vst.msk [vmem:[#allocation2 + $0x487] sm:$0xff] %vm827_vm2, %v10016_v22 }
   0x7   :  { %v37_v18 = vld [vmem:[%s14366_s0 + $0x48] sm:$0xff]  ;;  %v38_v19 = vld [vmem:[%s14366_s0 + $0x50] sm:$0xff]  ;;  %v39_v20 = vld [vmem:[%s14366_s0 + $0x58] sm:$0xff]  ;;  %932 = vst.msk [vmem:[#allocation2 + $0x48f] sm:$0xff] %vm827_vm2, %v10016_v22 }
   0x8   :  { %436 = vmatpush.msra.mxu0 %v129_v3  ;;  %v40_v21 = vld [vmem:[%s14366_s0 + $0x60] sm:$0xff]  ;;  %v41_v23 = vld [vmem:[%s14366_s0 + $0x68] sm:$0xff]  ;;  %935 = vst.msk [vmem:[#allocation2 + $0x227] sm:$0xff] %vm827_vm2, %v10016_v22  ;;  %v42_v24 = vld [vmem:[%s14366_s0 + $0x70] sm:$0xff] }
   0x9   :  { %936 = vst.msk [vmem:[#allocation2 + $0x22f] sm:$0xff] %vm827_vm2, %v10016_v22  ;;  %v43_v25 = vld [vmem:[%s14366_s0 + $0x78] sm:$0xff]  ;;  %v10202_v26 = vld [vmem:[%s14365_s2] ss:$0 sm:$0xff]  ;;  %v45_v32 = vld [vmem:[%s14366_s0 + $0x88] sm:$0xff] }
   0xa   :  { %437 = vmatpush.msra.mxu0 %v128_v4  ;;  %938 = vst.msk [vmem:[#allocation2 + $0x467] sm:$0xff] %vm827_vm2, %v10016_v22  ;;  %v44_v28 = vld [vmem:[%s14366_s0 + $0x80] sm:$0xff]  ;;  %v46_v36 = vld [vmem:[%s14366_s0 + $0x90] sm:$0xff]  ;;  %v47_v40 = vld [vmem:[%s14366_s0 + $0x98] sm:$0xff] }
   0xb   :  { %939 = vst.msk [vmem:[#allocation2 + $0x46f] sm:$0xff] %vm827_vm2, %v10016_v22  ;;  %v48_v44 = vld [vmem:[%s14366_s0 + $0xa0] sm:$0xff]  ;;  %v49_v48 = vld [vmem:[%s14366_s0 + $0xa8] sm:$0xff]  ;;  %v50_v52 = vld [vmem:[%s14366_s0 + $0xb0] sm:$0xff] }
   0xc   :  { %438 = vmatpush.msra.mxu0 %v127_v5  ;;  %941 = vst.msk [vmem:[#allocation2 + $0x6a7] sm:$0xff] %vm827_vm2, %v10016_v22  ;;  %v51_v56 = vld [vmem:[%s14366_s0 + $0xb8] sm:$0xff]  ;;  %v52_v60 = vld [vmem:[%s14366_s0 + $0xc0] sm:$0xff]  ;;  %v53_v0 = vld [vmem:[%s14366_s0 + $0xc8] sm:$0xff] }
   0xd   :  { %942 = vst.msk [vmem:[#allocation2 + $0x6af] sm:$0xff] %vm827_vm2, %v10016_v22  ;;  %v54_v4 = vld [vmem:[%s14366_s0 + $0xd0] sm:$0xff] }
   0xe   :  { %439 = vmatpush.msra.mxu0 %v126_v6  ;;  %946 = vst.msk [vmem:[#allocation2 + $0x27] sm:$0x1] %vm944_vm1, %v10016_v22 }
   0xf   :  { %947 = vst.msk [vmem:[#allocation2 + $0x47] sm:$0x1] %vm944_vm1, %v10016_v22 }
  0x10   :  { %440 = vmatpush.msra.mxu0 %v125_v7  ;;  %948 = vst.msk [vmem:[#allocation2 + $0x67] sm:$0x1] %vm944_vm1, %v10016_v22 }
  0x11   :  { %949 = vst.msk [vmem:[#allocation2 + $0x87] sm:$0x1] %vm944_vm1, %v10016_v22 }
  0x12   :  { %441 = vmatpush.msra.mxu0 %v124_v8  ;;  %950 = vst.msk [vmem:[#allocation2 + $0xa7] sm:$0x1] %vm944_vm1, %v10016_v22  ;;  %v55_v8 = vld [vmem:[%s14366_s0 + $0xd8] sm:$0xff] }
  0x13   :  { %8941 = vmatmul.msk.f32.vlgmr.msra.gmra.mxu0 %vm137_vm0, %v28_v9  ;;  %951 = vst.msk [vmem:[#allocation2 + $0xc7] sm:$0x1] %vm944_vm1, %v10016_v22 }
  0x14   :  { %952 = vst.msk [vmem:[#allocation2 + $0xe7] sm:$0x1] %vm944_vm1, %v10016_v22 }
  0x15   :  { %953 = vst.msk [vmem:[#allocation2 + $0x107] sm:$0x1] %vm944_vm1, %v10016_v22 }
  0x16   :  { %954 = vst.msk [vmem:[#allocation2 + $0x127] sm:$0x1] %vm944_vm1, %v10016_v22 }
  0x17   :  { %955 = vst.msk [vmem:[#allocation2 + $0x147] sm:$0x1] %vm944_vm1, %v10016_v22 }
  0x18   :  { %956 = vst.msk [vmem:[#allocation2 + $0x167] sm:$0x1] %vm944_vm1, %v10016_v22 }
  0x19   :  { %957 = vst.msk [vmem:[#allocation2 + $0x187] sm:$0x1] %vm944_vm1, %v10016_v22 }
  0x1a   :  { %958 = vst.msk [vmem:[#allocation2 + $0x1a7] sm:$0x1] %vm944_vm1, %v10016_v22 }
  0x1b   :  { %8942 = vmatmul.msk.f32.gmra.mxu0 %vm137_vm0, %v29_v10  ;;  %959 = vst.msk [vmem:[#allocation2 + $0x1c7] sm:$0x1] %vm944_vm1, %v10016_v22 }
  0x1c   :  { %960 = vst.msk [vmem:[#allocation2 + $0x1e7] sm:$0x1] %vm944_vm1, %v10016_v22 }
  0x1d   :  { %961 = vst.msk [vmem:[#allocation2 + $0x207] sm:$0x1] %vm944_vm1, %v10016_v22 }
  0x1e   :  { %964 = vst.msk [vmem:[#allocation2 + $0x267] sm:$0x1] %vm944_vm1, %v10016_v22 }
  0x1f   :  { %965 = vst.msk [vmem:[#allocation2 + $0x287] sm:$0x1] %vm944_vm1, %v10016_v22 }
  0x20   :  { %966 = vst.msk [vmem:[#allocation2 + $0x2a7] sm:$0x1] %vm944_vm1, %v10016_v22 }
  0x21   :  { %967 = vst.msk [vmem:[#allocation2 + $0x2c7] sm:$0x1] %vm944_vm1, %v10016_v22 }
  0x22   :  { %968 = vst.msk [vmem:[#allocation2 + $0x2e7] sm:$0x1] %vm944_vm1, %v10016_v22 }
  0x23   :  { %8943 = vmatmul.msk.f32.gmra.mxu0 %vm137_vm0, %v30_v11  ;;  %969 = vst.msk [vmem:[#allocation2 + $0x307] sm:$0x1] %vm944_vm1, %v10016_v22 }
  0x24   :  { %970 = vst.msk [vmem:[#allocation2 + $0x327] sm:$0x1] %vm944_vm1, %v10016_v22 }
  0x25   :  { %971 = vst.msk [vmem:[#allocation2 + $0x347] sm:$0x1] %vm944_vm1, %v10016_v22 }
  0x26   :  { %972 = vst.msk [vmem:[#allocation2 + $0x367] sm:$0x1] %vm944_vm1, %v10016_v22 }
  0x27   :  { %973 = vst.msk [vmem:[#allocation2 + $0x387] sm:$0x1] %vm944_vm1, %v10016_v22 }
  0x28   :  { %974 = vst.msk [vmem:[#allocation2 + $0x3a7] sm:$0x1] %vm944_vm1, %v10016_v22 }
  0x29   :  { %975 = vst.msk [vmem:[#allocation2 + $0x3c7] sm:$0x1] %vm944_vm1, %v10016_v22 }
  0x2a   :  { %976 = vst.msk [vmem:[#allocation2 + $0x3e7] sm:$0x1] %vm944_vm1, %v10016_v22 }
  0x2b   :  { %8944 = vmatmul.msk.f32.gmra.mxu0 %vm137_vm0, %v31_v12  ;;  %977 = vst.msk [vmem:[#allocation2 + $0x407] sm:$0x1] %vm944_vm1, %v10016_v22  ;;  %v56_v12 = vld [vmem:[%s14366_s0 + $0xe0] sm:$0xff] }
  0x2c   :  { %978 = vst.msk [vmem:[#allocation2 + $0x427] sm:$0x1] %vm944_vm1, %v10016_v22 }
  0x2d   :  { %979 = vst.msk [vmem:[#allocation2 + $0x447] sm:$0x1] %vm944_vm1, %v10016_v22 }
  0x2e   :  { %982 = vst.msk [vmem:[#allocation2 + $0x4a7] sm:$0x1] %vm944_vm1, %v10016_v22 }
  0x2f   :  { %983 = vst.msk [vmem:[#allocation2 + $0x4c7] sm:$0x1] %vm944_vm1, %v10016_v22 }
  0x30   :  { %984 = vst.msk [vmem:[#allocation2 + $0x4e7] sm:$0x1] %vm944_vm1, %v10016_v22 }
  0x31   :  { %985 = vst.msk [vmem:[#allocation2 + $0x507] sm:$0x1] %vm944_vm1, %v10016_v22 }
  0x32   :  { %986 = vst.msk [vmem:[#allocation2 + $0x527] sm:$0x1] %vm944_vm1, %v10016_v22 }
  0x33   :  { %8945 = vmatmul.msk.f32.gmra.mxu0 %vm137_vm0, %v32_v13  ;;  %987 = vst.msk [vmem:[#allocation2 + $0x547] sm:$0x1] %vm944_vm1, %v10016_v22 }
  0x34   :  { %988 = vst.msk [vmem:[#allocation2 + $0x567] sm:$0x1] %vm944_vm1, %v10016_v22 }
  0x35   :  { %989 = vst.msk [vmem:[#allocation2 + $0x587] sm:$0x1] %vm944_vm1, %v10016_v22 }
  0x36   :  { %990 = vst.msk [vmem:[#allocation2 + $0x5a7] sm:$0x1] %vm944_vm1, %v10016_v22 }
  0x37   :  { %991 = vst.msk [vmem:[#allocation2 + $0x5c7] sm:$0x1] %vm944_vm1, %v10016_v22 }
  0x38   :  { %992 = vst.msk [vmem:[#allocation2 + $0x5e7] sm:$0x1] %vm944_vm1, %v10016_v22 }
  0x39   :  { %993 = vst.msk [vmem:[#allocation2 + $0x607] sm:$0x1] %vm944_vm1, %v10016_v22 }
  0x3a   :  { %994 = vst.msk [vmem:[#allocation2 + $0x627] sm:$0x1] %vm944_vm1, %v10016_v22 }
  0x3b   :  { %8946 = vmatmul.msk.f32.gmra.mxu0 %vm137_vm0, %v33_v14  ;;  %995 = vst.msk [vmem:[#allocation2 + $0x647] sm:$0x1] %vm944_vm1, %v10016_v22 }
  0x3c   :  { %996 = vst.msk [vmem:[#allocation2 + $0x667] sm:$0x1] %vm944_vm1, %v10016_v22 }
  0x3d   :  { %997 = vst.msk [vmem:[#allocation2 + $0x687] sm:$0x1] %vm944_vm1, %v10016_v22 }
  0x3e   :  { %1000 = vst.msk [vmem:[#allocation2 + $0x38] sm:$0x1] %vm944_vm1, %v10016_v22 }
  0x3f   :  { %1001 = vst.msk [vmem:[#allocation2 + $0x58] sm:$0x1] %vm944_vm1, %v10016_v22 }
  0x40   :  { %1002 = vst.msk [vmem:[#allocation2 + $0x78] sm:$0x1] %vm944_vm1, %v10016_v22 }
  0x41   :  { %1003 = vst.msk [vmem:[#allocation2 + $0x98] sm:$0x1] %vm944_vm1, %v10016_v22 }
  0x42   :  { %1004 = vst.msk [vmem:[#allocation2 + $0xb8] sm:$0x1] %vm944_vm1, %v10016_v22 }
  0x43   :  { %8947 = vmatmul.msk.f32.gmra.mxu0 %vm137_vm0, %v34_v15  ;;  %1005 = vst.msk [vmem:[#allocation2 + $0xd8] sm:$0x1] %vm944_vm1, %v10016_v22 }
  0x44   :  { %1006 = vst.msk [vmem:[#allocation2 + $0xf8] sm:$0x1] %vm944_vm1, %v10016_v22 }
  0x45   :  { %1007 = vst.msk [vmem:[#allocation2 + $0x118] sm:$0x1] %vm944_vm1, %v10016_v22 }
  0x46   :  { %1008 = vst.msk [vmem:[#allocation2 + $0x138] sm:$0x1] %vm944_vm1, %v10016_v22 }
  0x47   :  { %1009 = vst.msk [vmem:[#allocation2 + $0x158] sm:$0x1] %vm944_vm1, %v10016_v22 }
  0x48   :  { %1011 = vst.msk [vmem:[#allocation2 + $0x198] sm:$0x1] %vm944_vm1, %v10016_v22 }
  0x49   :  { %1012 = vst.msk [vmem:[#allocation2 + $0x1b8] sm:$0x1] %vm944_vm1, %v10016_v22 }
  0x4a   :  { %1013 = vst.msk [vmem:[#allocation2 + $0x1d8] sm:$0x1] %vm944_vm1, %v10016_v22 }
  0x4b   :  { %8948 = vmatmul.msk.f32.gmra.mxu0 %vm137_vm0, %v35_v16  ;;  %1014 = vst.msk [vmem:[#allocation2 + $0x1f8] sm:$0x1] %vm944_vm1, %v10016_v22  ;;  %v57_v16 = vld [vmem:[%s14366_s0 + $0xe8] sm:$0xff] }
  0x4c   :  { %1015 = vst.msk [vmem:[#allocation2 + $0x218] sm:$0x1] %vm944_vm1, %v10016_v22 }
  0x4d   :  { %1018 = vst.msk [vmem:[#allocation2 + $0x278] sm:$0x1] %vm944_vm1, %v10016_v22 }
  0x4e   :  { %1019 = vst.msk [vmem:[#allocation2 + $0x298] sm:$0x1] %vm944_vm1, %v10016_v22 }
  0x4f   :  { %1020 = vst.msk [vmem:[#allocation2 + $0x2b8] sm:$0x1] %vm944_vm1, %v10016_v22 }
  0x50   :  { %1021 = vst.msk [vmem:[#allocation2 + $0x2d8] sm:$0x1] %vm944_vm1, %v10016_v22 }
  0x51   :  { %1022 = vst.msk [vmem:[#allocation2 + $0x2f8] sm:$0x1] %vm944_vm1, %v10016_v22 }
  0x52   :  { %1023 = vst.msk [vmem:[#allocation2 + $0x318] sm:$0x1] %vm944_vm1, %v10016_v22 }
  0x53   :  { %8949 = vmatmul.msk.f32.gmra.mxu0 %vm137_vm0, %v36_v17  ;;  %1024 = vst.msk [vmem:[#allocation2 + $0x338] sm:$0x1] %vm944_vm1, %v10016_v22 }
  0x54   :  { %1025 = vst.msk [vmem:[#allocation2 + $0x358] sm:$0x1] %vm944_vm1, %v10016_v22 }
  0x55   :  { %1026 = vst.msk [vmem:[#allocation2 + $0x378] sm:$0x1] %vm944_vm1, %v10016_v22 }
  0x56   :  { %1027 = vst.msk [vmem:[#allocation2 + $0x398] sm:$0x1] %vm944_vm1, %v10016_v22 }
  0x57   :  { %1028 = vst.msk [vmem:[#allocation2 + $0x3b8] sm:$0x1] %vm944_vm1, %v10016_v22 }
  0x58   :  { %1029 = vst.msk [vmem:[#allocation2 + $0x3d8] sm:$0x1] %vm944_vm1, %v10016_v22 }
  0x59   :  { %1030 = vst.msk [vmem:[#allocation2 + $0x3f8] sm:$0x1] %vm944_vm1, %v10016_v22 }
  0x5a   :  { %1031 = vst.msk [vmem:[#allocation2 + $0x418] sm:$0x1] %vm944_vm1, %v10016_v22 }
  0x5b   :  { %8950 = vmatmul.msk.f32.gmra.mxu0 %vm137_vm0, %v37_v18  ;;  %1032 = vst.msk [vmem:[#allocation2 + $0x438] sm:$0x1] %vm944_vm1, %v10016_v22 }
  0x5c   :  { %1033 = vst.msk [vmem:[#allocation2 + $0x458] sm:$0x1] %vm944_vm1, %v10016_v22 }
  0x5d   :  { %1036 = vst.msk [vmem:[#allocation2 + $0x4b8] sm:$0x1] %vm944_vm1, %v10016_v22 }
  0x5e   :  { %1037 = vst.msk [vmem:[#allocation2 + $0x4d8] sm:$0x1] %vm944_vm1, %v10016_v22 }
  0x5f   :  { %1038 = vst.msk [vmem:[#allocation2 + $0x4f8] sm:$0x1] %vm944_vm1, %v10016_v22 }
  0x60   :  { %1039 = vst.msk [vmem:[#allocation2 + $0x518] sm:$0x1] %vm944_vm1, %v10016_v22 }
  0x61   :  { %1040 = vst.msk [vmem:[#allocation2 + $0x538] sm:$0x1] %vm944_vm1, %v10016_v22 }
  0x62   :  { %1041 = vst.msk [vmem:[#allocation2 + $0x558] sm:$0x1] %vm944_vm1, %v10016_v22 }
  0x63   :  { %8951 = vmatmul.msk.f32.gmra.mxu0 %vm137_vm0, %v38_v19  ;;  %1042 = vst.msk [vmem:[#allocation2 + $0x578] sm:$0x1] %vm944_vm1, %v10016_v22 }
  0x64   :  { %1043 = vst.msk [vmem:[#allocation2 + $0x598] sm:$0x1] %vm944_vm1, %v10016_v22 }
  0x65   :  { %1044 = vst.msk [vmem:[#allocation2 + $0x5b8] sm:$0x1] %vm944_vm1, %v10016_v22 }
  0x66   :  { %1045 = vst.msk [vmem:[#allocation2 + $0x5d8] sm:$0x1] %vm944_vm1, %v10016_v22 }
  0x67   :  { %1046 = vst.msk [vmem:[#allocation2 + $0x5f8] sm:$0x1] %vm944_vm1, %v10016_v22 }
  0x68   :  { %1047 = vst.msk [vmem:[#allocation2 + $0x618] sm:$0x1] %vm944_vm1, %v10016_v22 }
  0x69   :  { %1048 = vst.msk [vmem:[#allocation2 + $0x638] sm:$0x1] %vm944_vm1, %v10016_v22 }
  0x6a   :  { %1049 = vst.msk [vmem:[#allocation2 + $0x658] sm:$0x1] %vm944_vm1, %v10016_v22 }
  0x6b   :  { %8952 = vmatmul.msk.f32.gmra.mxu0 %vm137_vm0, %v39_v20  ;;  %1050 = vst.msk [vmem:[#allocation2 + $0x678] sm:$0x1] %vm944_vm1, %v10016_v22  ;;  %v58_v20 = vld [vmem:[%s14366_s0 + $0xf0] sm:$0xff] }
  0x6c   :  { %1051 = vst.msk [vmem:[#allocation2 + $0x698] sm:$0x1] %vm944_vm1, %v10016_v22 }
  0x6d   :  { %945 = vst.msk [vmem:[#allocation2 + $0x7] sm:$0x1] %vm944_vm1, %v10016_v22 }
  0x6e   :  { %962 = vst.msk [vmem:[#allocation2 + $0x227] sm:$0x1] %vm944_vm1, %v10016_v22 }
  0x6f   :  { %963 = vst.msk [vmem:[#allocation2 + $0x247] sm:$0x1] %vm944_vm1, %v10016_v22 }
  0x70   :  { %980 = vst.msk [vmem:[#allocation2 + $0x467] sm:$0x1] %vm944_vm1, %v10016_v22 }
  0x71   :  { %981 = vst.msk [vmem:[#allocation2 + $0x487] sm:$0x1] %vm944_vm1, %v10016_v22 }
  0x72   :  { %998 = vst.msk [vmem:[#allocation2 + $0x6a7] sm:$0x1] %vm944_vm1, %v10016_v22 }
  0x73   :  { %8953 = vmatmul.msk.f32.gmra.mxu0 %vm137_vm0, %v40_v21  ;;  %930 = vst.msk [vmem:[#allocation2 + $0x257] sm:$0x3] %vm926_vm3, %v10016_v22 }
  0x74   :  { %927 = vst.msk [vmem:[#allocation2 + $0x17] sm:$0x3] %vm926_vm3, %v10016_v22 }
  0x75   :  { %933 = vst.msk [vmem:[#allocation2 + $0x497] sm:$0x3] %vm926_vm3, %v10016_v22 }
  0x76   :  { %937 = vst.msk [vmem:[#allocation2 + $0x237] sm:$0x3] %vm926_vm3, %v10016_v22 }
  0x77   :  { %940 = vst.msk [vmem:[#allocation2 + $0x477] sm:$0x3] %vm926_vm3, %v10016_v22 }
  0x78   :  { %943 = vst.msk [vmem:[#allocation2 + $0x6b7] sm:$0x3] %vm926_vm3, %v10016_v22 }
  0x79   :  { %1017 = vst.msk [vmem:[#allocation2 + $0x258] sm:$0x1] %vm944_vm1, %v10016_v22 }
  0x7a   :  { %999 = vst.msk [vmem:[#allocation2 + $0x18] sm:$0x1] %vm944_vm1, %v10016_v22 }
  0x7b   :  { %8954 = vmatmul.msk.f32.gmra.mxu0 %vm137_vm0, %v41_v23  ;;  %1016 = vst.msk [vmem:[#allocation2 + $0x238] sm:$0x1] %vm944_vm1, %v10016_v22 }
  0x7c   :  { %1034 = vst.msk [vmem:[#allocation2 + $0x478] sm:$0x1] %vm944_vm1, %v10016_v22 }
  0x7d   :  { %1035 = vst.msk [vmem:[#allocation2 + $0x498] sm:$0x1] %vm944_vm1, %v10016_v22 }
  0x7e   :  { %1052 = vst.msk [vmem:[#allocation2 + $0x6b8] sm:$0x1] %vm944_vm1, %v10016_v22  ;;  %v75_v22 = vld [vmem:[%s14366_s0 + $0x178] sm:$0xff] }
  0x83   :  { %8955 = vmatmul.msk.f32.gmra.mxu0 %vm137_vm0, %v42_v24 }
  0x8b   :  { %8956 = vmatmul.msk.f32.gmra.mxu0 %vm137_vm0, %v43_v25  ;;  %v59_v25 = vld [vmem:[%s14366_s0 + $0xf8] sm:$0xff] }
  0x90   :  { %v443_v27 = vpop.f32.mrf.mxu0 }
  0x91   :  { %v444_v29 = vadd.f32 %v10202_v26, %v443_v27 }
  0x93   :  { %v731_v30 = vmax.f32 %v444_v29, 0.0  ;;  %8957 = vmatmul.msk.f32.gmra.mxu0 %vm137_vm0, %v44_v28 }
  0x95   :  { %828 = vst.msk [vmem:[%s14367_s7] sm:$0xff] %vm827_vm2, %v731_v30 }
  0x96   :  { %1054 = vst.msk [vmem:[#allocation2 + $0x28] sm:$0xff] %vm827_vm2, %v731_v30  ;;  %v60_v30 = vld [vmem:[%s14366_s0 + $0x100] sm:$0xff] }
  0x98   :  { %v446_v31 = vpop.f32.mrf.mxu0 }
  0x99   :  { %v447_v33 = vadd.f32 %v10202_v26, %v446_v31 }
  0x9b   :  { %v732_v34 = vmax.f32 %v447_v33, 0.0  ;;  %8958 = vmatmul.msk.f32.gmra.mxu0 %vm137_vm0, %v45_v32 }
  0x9d   :  { %829 = vst.msk [vmem:[%s14367_s7 + $0x8] sm:$0xff] %vm827_vm2, %v732_v34 }
  0x9e   :  { %1055 = vst.msk [vmem:[#allocation2 + $0x30] sm:$0xff] %vm827_vm2, %v732_v34  ;;  %v61_v34 = vld [vmem:[%s14366_s0 + $0x108] sm:$0xff] }
  0xa0   :  { %v449_v35 = vpop.f32.mrf.mxu0 }
  0xa1   :  { %v450_v37 = vadd.f32 %v10202_v26, %v449_v35 }
  0xa3   :  { %v733_v38 = vmax.f32 %v450_v37, 0.0  ;;  %8959 = vmatmul.msk.f32.gmra.mxu0 %vm137_vm0, %v46_v36 }
  0xa5   :  { %830 = vst.msk [vmem:[%s14367_s7 + $0x10] sm:$0xff] %vm827_vm2, %v733_v38 }
  0xa6   :  { %1056 = vst.msk [vmem:[#allocation2 + $0x48] sm:$0xff] %vm827_vm2, %v733_v38  ;;  %v62_v38 = vld [vmem:[%s14366_s0 + $0x110] sm:$0xff] }
  0xa8   :  { %v452_v39 = vpop.f32.mrf.mxu0 }
  0xa9   :  { %v453_v41 = vadd.f32 %v10202_v26, %v452_v39 }
  0xab   :  { %v734_v42 = vmax.f32 %v453_v41, 0.0  ;;  %8960 = vmatmul.msk.f32.gmra.mxu0 %vm137_vm0, %v47_v40  ;;  %v1345_v40 = vld [vmem:[%s14368_s3 + $0x18] sm:$0xff]  ;;  %v1247_v41 = vld [vmem:[%s14368_s3 + $0x8] sm:$0xff] }
  0xac   :  { %9997 = vmatpush.msra.mxu1 %v1345_v40  ;;  %9999 = vmatpush.msra.mxu2 %v1247_v41 }
  0xad   :  { %831 = vst.msk [vmem:[%s14367_s7 + $0x18] sm:$0xff] %vm827_vm2, %v734_v42  ;;  %1648 = vmatpush.msrb.mxu0 %v1345_v40 }
  0xae   :  { %1057 = vst.msk [vmem:[#allocation2 + $0x50] sm:$0xff] %vm827_vm2, %v734_v42  ;;  %v2629_v42 = vld [vmem:[%s14368_s3 + $0x28] sm:$0xff] }
  0xaf   :  { %10001 = vmatpush.msra.mxu3 %v2629_v42 }
  0xb0   :  { %v455_v43 = vpop.f32.mrf.mxu0 }
  0xb1   :  { %v456_v45 = vadd.f32 %v10202_v26, %v455_v43 }
  0xb3   :  { %v735_v46 = vmax.f32 %v456_v45, 0.0  ;;  %8961 = vmatmul.msk.f32.gmra.mxu0 %vm137_vm0, %v48_v44  ;;  %v1344_v44 = vld [vmem:[%s14368_s3 + $0x10] sm:$0xff]  ;;  %v1246_v45 = vld [vmem:[%s14368_s3] sm:$0xff] }
  0xb4   :  { %9998 = vmatpush.msra.mxu1 %v1344_v44  ;;  %10000 = vmatpush.msra.mxu2 %v1246_v45 }
  0xb5   :  { %832 = vst.msk [vmem:[%s14367_s7 + $0x20] sm:$0xff] %vm827_vm2, %v735_v46  ;;  %1649 = vmatpush.msrb.mxu0 %v1344_v44 }
  0xb6   :  { %1058 = vst.msk [vmem:[#allocation2 + $0x68] sm:$0xff] %vm827_vm2, %v735_v46  ;;  %v2628_v46 = vld [vmem:[%s14368_s3 + $0x20] sm:$0xff] }
  0xb7   :  { %10002 = vmatpush.msra.mxu3 %v2628_v46  ;;  %2241 = vmatpush.msra.mxu0 %v1247_v41  ;;  %v72_v41 = vld [vmem:[%s14366_s0 + $0x160] sm:$0xff] }
  0xb8   :  { %v458_v47 = vpop.f32.mrf.mxu0 }
  0xb9   :  { %v459_v49 = vadd.f32 %v10202_v26, %v458_v47  ;;  %v4203_v47 = vld [vmem:[%s14368_s3 + $0x48] sm:$0xff]  ;;  %2242 = vmatpush.msra.mxu0 %v1246_v45 }
  0xba   :  { %4506 = vmatpush.msrb.mxu2 %v4203_v47 }
  0xbb   :  { %v736_v50 = vmax.f32 %v459_v49, 0.0  ;;  %8962 = vmatmul.msk.f32.gmra.mxu0 %vm137_vm0, %v49_v48  ;;  %v63_v49 = vld [vmem:[%s14366_s0 + $0x118] sm:$0xff] }
  0xbd   :  { %833 = vst.msk [vmem:[%s14367_s7 + $0x28] sm:$0xff] %vm827_vm2, %v736_v50 }
  0xbe   :  { %1059 = vst.msk [vmem:[#allocation2 + $0x70] sm:$0xff] %vm827_vm2, %v736_v50 }
  0xc0   :  { %v461_v51 = vpop.f32.mrf.mxu0 }
  0xc1   :  { %v462_v53 = vadd.f32 %v10202_v26, %v461_v51 }
  0xc3   :  { %v737_v54 = vmax.f32 %v462_v53, 0.0  ;;  %8963 = vmatmul.msk.f32.gmra.mxu0 %vm137_vm0, %v50_v52  ;;  %v3416_v52 = vld [vmem:[%s14368_s3 + $0x38] sm:$0xff] }
  0xc4   :  { %3719 = vmatpush.msrb.mxu1 %v3416_v52 }
  0xc5   :  { %834 = vst.msk [vmem:[%s14367_s7 + $0x30] sm:$0xff] %vm827_vm2, %v737_v54 }
  0xc6   :  { %1060 = vst.msk [vmem:[#allocation2 + $0x88] sm:$0xff] %vm827_vm2, %v737_v54  ;;  %v64_v54 = vld [vmem:[%s14366_s0 + $0x120] sm:$0xff] }
  0xc8   :  { %v464_v55 = vpop.f32.mrf.mxu0 }
  0xc9   :  { %v465_v57 = vadd.f32 %v10202_v26, %v464_v55 }
  0xcb   :  { %v738_v58 = vmax.f32 %v465_v57, 0.0  ;;  %8964 = vmatmul.msk.f32.gmra.mxu0 %vm137_vm0, %v51_v56 }
  0xcd   :  { %835 = vst.msk [vmem:[%s14367_s7 + $0x38] sm:$0xff] %vm827_vm2, %v738_v58 }
  0xce   :  { %1061 = vst.msk [vmem:[#allocation2 + $0x90] sm:$0xff] %vm827_vm2, %v738_v58  ;;  %v65_v58 = vld [vmem:[%s14366_s0 + $0x128] sm:$0xff] }
  0xd0   :  { %v467_v59 = vpop.f32.mrf.mxu0 }
  0xd1   :  { %v468_v61 = vadd.f32 %v10202_v26, %v467_v59 }
  0xd3   :  { %v739_v62 = vmax.f32 %v468_v61, 0.0  ;;  %8965 = vmatmul.msk.f32.gmra.mxu0 %vm137_vm0, %v52_v60 }
  0xd5   :  { %836 = vst.msk [vmem:[%s14367_s7 + $0x40] sm:$0xff] %vm827_vm2, %v739_v62 }
  0xd6   :  { %1062 = vst.msk [vmem:[#allocation2 + $0xa8] sm:$0xff] %vm827_vm2, %v739_v62  ;;  %v66_v62 = vld [vmem:[%s14366_s0 + $0x130] sm:$0xff] }
  0xd8   :  { %v470_v63 = vpop.f32.mrf.mxu0 }
  0xd9   :  { %v471_v1 = vadd.f32 %v10202_v26, %v470_v63 }
  0xdb   :  { %v740_v2 = vmax.f32 %v471_v1, 0.0  ;;  %8966 = vmatmul.msk.f32.gmra.mxu0 %vm137_vm0, %v53_v0 }
  0xdd   :  { %837 = vst.msk [vmem:[%s14367_s7 + $0x48] sm:$0xff] %vm827_vm2, %v740_v2 }
  0xde   :  { %1063 = vst.msk [vmem:[#allocation2 + $0xb0] sm:$0xff] %vm827_vm2, %v740_v2 }
  0xe0   :  { %v473_v3 = vpop.f32.mrf.mxu0 }
  0xe1   :  { %v474_v5 = vadd.f32 %v10202_v26, %v473_v3 }
  0xe3   :  { %v741_v6 = vmax.f32 %v474_v5, 0.0  ;;  %8967 = vmatmul.msk.f32.gmra.mxu0 %vm137_vm0, %v54_v4  ;;  %v67_v5 = vld [vmem:[%s14366_s0 + $0x138] sm:$0xff] }
  0xe5   :  { %838 = vst.msk [vmem:[%s14367_s7 + $0x50] sm:$0xff] %vm827_vm2, %v741_v6 }
  0xe6   :  { %1064 = vst.msk [vmem:[#allocation2 + $0xc8] sm:$0xff] %vm827_vm2, %v741_v6 }
  0xe8   :  { %v476_v7 = vpop.f32.mrf.mxu0 }
  0xe9   :  { %v477_v9 = vadd.f32 %v10202_v26, %v476_v7 }
  0xeb   :  { %v742_v10 = vmax.f32 %v477_v9, 0.0  ;;  %8968 = vmatmul.msk.f32.gmra.mxu0 %vm137_vm0, %v55_v8 }
  0xed   :  { %839 = vst.msk [vmem:[%s14367_s7 + $0x58] sm:$0xff] %vm827_vm2, %v742_v10 }
  0xee   :  { %1065 = vst.msk [vmem:[#allocation2 + $0xd0] sm:$0xff] %vm827_vm2, %v742_v10 }
  0xf0   :  { %v479_v11 = vpop.f32.mrf.mxu0 }
  0xf1   :  { %v480_v13 = vadd.f32 %v10202_v26, %v479_v11  ;;  %v68_v11 = vld [vmem:[%s14366_s0 + $0x140] sm:$0xff] }
  0xf3   :  { %v743_v14 = vmax.f32 %v480_v13, 0.0  ;;  %8969 = vmatmul.msk.f32.gmra.mxu0 %vm137_vm0, %v56_v12 }
  0xf5   :  { %840 = vst.msk [vmem:[%s14367_s7 + $0x60] sm:$0xff] %vm827_vm2, %v743_v14 }
  0xf6   :  { %1066 = vst.msk [vmem:[#allocation2 + $0xe8] sm:$0xff] %vm827_vm2, %v743_v14 }
  0xf8   :  { %v482_v15 = vpop.f32.mrf.mxu0 }
  0xf9   :  { %v483_v17 = vadd.f32 %v10202_v26, %v482_v15 }
  0xfb   :  { %v744_v18 = vmax.f32 %v483_v17, 0.0  ;;  %8970 = vmatmul.msk.f32.gmra.mxu0 %vm137_vm0, %v57_v16 }
  0xfd   :  { %841 = vst.msk [vmem:[%s14367_s7 + $0x68] sm:$0xff] %vm827_vm2, %v744_v18 }
  0xfe   :  { %1067 = vst.msk [vmem:[#allocation2 + $0xf0] sm:$0xff] %vm827_vm2, %v744_v18  ;;  %v69_v18 = vld [vmem:[%s14366_s0 + $0x148] sm:$0xff] }
 0x100   :  { %v485_v19 = vpop.f32.mrf.mxu0 }
 0x101   :  { %v486_v21 = vadd.f32 %v10202_v26, %v485_v19 }
 0x103   :  { %v745_v23 = vmax.f32 %v486_v21, 0.0  ;;  %8971 = vmatmul.msk.f32.gmra.mxu0 %vm137_vm0, %v58_v20 }
 0x105   :  { %842 = vst.msk [vmem:[%s14367_s7 + $0x70] sm:$0xff] %vm827_vm2, %v745_v23 }
 0x106   :  { %1068 = vst.msk [vmem:[#allocation2 + $0x108] sm:$0xff] %vm827_vm2, %v745_v23 }
 0x108   :  { %v488_v24 = vpop.f32.mrf.mxu0 }
 0x109   :  { %v489_v27 = vadd.f32 %v10202_v26, %v488_v24 }
 0x10b   :  { %v746_v28 = vmax.f32 %v489_v27, 0.0  ;;  %8972 = vmatmul.msk.f32.gmra.mxu0 %vm137_vm0, %v59_v25  ;;  %v70_v27 = vld [vmem:[%s14366_s0 + $0x150] sm:$0xff] }
 0x10d   :  { %843 = vst.msk [vmem:[%s14367_s7 + $0x78] sm:$0xff] %vm827_vm2, %v746_v28 }
 0x10e   :  { %1069 = vst.msk [vmem:[#allocation2 + $0x110] sm:$0xff] %vm827_vm2, %v746_v28 }
 0x110   :  { %v491_v29 = vpop.f32.mrf.mxu0 }
 0x111   :  { %v492_v31 = vadd.f32 %v10202_v26, %v491_v29 }
 0x113   :  { %v747_v32 = vmax.f32 %v492_v31, 0.0  ;;  %8973 = vmatmul.msk.f32.gmra.mxu0 %vm137_vm0, %v60_v30 }
 0x115   :  { %844 = vst.msk [vmem:[%s14367_s7 + $0x80] sm:$0xff] %vm827_vm2, %v747_v32 }
 0x116   :  { %1070 = vst.msk [vmem:[#allocation2 + $0x128] sm:$0xff] %vm827_vm2, %v747_v32 }
 0x118   :  { %v494_v33 = vpop.f32.mrf.mxu0 }
 0x119   :  { %v495_v35 = vadd.f32 %v10202_v26, %v494_v33 }
 0x11b   :  { %v748_v36 = vmax.f32 %v495_v35, 0.0  ;;  %8974 = vmatmul.msk.f32.gmra.mxu0 %vm137_vm0, %v61_v34  ;;  %v71_v34 = vld [vmem:[%s14366_s0 + $0x158] sm:$0xff] }
 0x11d   :  { %845 = vst.msk [vmem:[%s14367_s7 + $0x88] sm:$0xff] %vm827_vm2, %v748_v36 }
 0x11e   :  { %1071 = vst.msk [vmem:[#allocation2 + $0x130] sm:$0xff] %vm827_vm2, %v748_v36 }
 0x120   :  { %v497_v37 = vpop.f32.mrf.mxu0 }
 0x121   :  { %v498_v39 = vadd.f32 %v10202_v26, %v497_v37 }
 0x123   :  { %v749_v43 = vmax.f32 %v498_v39, 0.0  ;;  %8975 = vmatmul.msk.f32.gmra.mxu0 %vm137_vm0, %v62_v38 }
 0x125   :  { %846 = vst.msk [vmem:[%s14367_s7 + $0x90] sm:$0xff] %vm827_vm2, %v749_v43 }
 0x126   :  { %1072 = vst.msk [vmem:[#allocation2 + $0x148] sm:$0xff] %vm827_vm2, %v749_v43 }
 0x128   :  { %v500_v48 = vpop.f32.mrf.mxu0 }
 0x129   :  { %v501_v50 = vadd.f32 %v10202_v26, %v500_v48  ;;  %v73_v48 = vld [vmem:[%s14366_s0 + $0x168] sm:$0xff] }
 0x12b   :  { %v750_v51 = vmax.f32 %v501_v50, 0.0  ;;  %8976 = vmatmul.msk.f32.gmra.mxu0 %vm137_vm0, %v63_v49 }
 0x12d   :  { %847 = vst.msk [vmem:[%s14367_s7 + $0x98] sm:$0xff] %vm827_vm2, %v750_v51 }
 0x12e   :  { %1073 = vst.msk [vmem:[#allocation2 + $0x150] sm:$0xff] %vm827_vm2, %v750_v51 }
 0x130   :  { %v503_v53 = vpop.f32.mrf.mxu0 }
 0x131   :  { %v504_v55 = vadd.f32 %v10202_v26, %v503_v53 }
 0x133   :  { %v751_v56 = vmax.f32 %v504_v55, 0.0  ;;  %8977 = vmatmul.msk.f32.gmra.mxu0 %vm137_vm0, %v64_v54  ;;  %v74_v55 = vld [vmem:[%s14366_s0 + $0x170] sm:$0xff] }
 0x135   :  { %848 = vst.msk [vmem:[%s14367_s7 + $0xa0] sm:$0xff] %vm827_vm2, %v751_v56 }
 0x136   :  { %1074 = vst.msk [vmem:[#allocation2 + $0x168] sm:$0xff] %vm827_vm2, %v751_v56 }
 0x138   :  { %v506_v57 = vpop.f32.mrf.mxu0 }
 0x139   :  { %v507_v59 = vadd.f32 %v10202_v26, %v506_v57 }
 0x13b   :  { %v752_v60 = vmax.f32 %v507_v59, 0.0  ;;  %8978 = vmatmul.msk.f32.gmra.mxu0 %vm137_vm0, %v65_v58 }
 0x13d   :  { %849 = vst.msk [vmem:[%s14367_s7 + $0xa8] sm:$0xff] %vm827_vm2, %v752_v60 }
 0x13e   :  { %1075 = vst.msk [vmem:[#allocation2 + $0x170] sm:$0xff] %vm827_vm2, %v752_v60 }
 0x140   :  { %v509_v61 = vpop.f32.mrf.mxu0 }
 0x141   :  { %v510_v63 = vadd.f32 %v10202_v26, %v509_v61 }
 0x143   :  { %v753_v0 = vmax.f32 %v510_v63, 0.0  ;;  %8979 = vmatmul.msk.f32.gmra.mxu0 %vm137_vm0, %v66_v62 }
 0x145   :  { %850 = vst.msk [vmem:[%s14367_s7 + $0xb0] sm:$0xff] %vm827_vm2, %v753_v0  ;;  %v1271_v1 = vld [vmem:[#allocation2 + $0x170] sm:$0xff] }
 0x146   :  { %v1173_v2 = vld [vmem:[#allocation2 + $0x16f] sm:$0xff]  ;;  %1076 = vst.msk [vmem:[#allocation2 + $0x188] sm:$0xff] %vm827_vm2, %v753_v0  ;;  %9060 = vmatmul.msk.f32.vlgmr.msra.gmra.mxu1 %vm827_vm2, %v1271_v1  ;;  %v1182_v1 = vld [vmem:[#allocation2 + $0x247] sm:$0xff] }
 0x147   :  { %v2555_v3 = vld [vmem:[#allocation2 + $0x171] sm:$0xff]  ;;  %9156 = vmatmul.msk.f32.vlgmr.msra.gmra.mxu2 %vm827_vm2, %v1173_v2  ;;  %v1280_v0 = vld [vmem:[#allocation2 + $0x248] sm:$0xff] }
 0x148   :  { %9252 = vmatmul.msk.f32.vlgmr.msra.gmra.mxu3 %vm827_vm2, %v2555_v3  ;;  %v512_v4 = vpop.f32.mrf.mxu0 }
 0x149   :  { %v513_v6 = vadd.f32 %v10202_v26, %v512_v4  ;;  %v76_v4 = vld [vmem:[%s14366_s0 + $0x180] sm:$0xff] }
 0x14b   :  { %v754_v7 = vmax.f32 %v513_v6, 0.0  ;;  %8980 = vmatmul.msk.f32.gmra.mxu0 %vm137_vm0, %v67_v5 }
 0x14d   :  { %851 = vst.msk [vmem:[%s14367_s7 + $0xb8] sm:$0xff] %vm827_vm2, %v754_v7  ;;  %v1272_v8 = vld [vmem:[#allocation2 + $0x188] sm:$0xff] }
 0x14e   :  { %v1174_v9 = vld [vmem:[#allocation2 + $0x187] sm:$0xff]  ;;  %1077 = vst.msk [vmem:[#allocation2 + $0x190] sm:$0xff] %vm827_vm2, %v754_v7  ;;  %9061 = vmatmul.msk.f32.gmra.mxu1 %vm827_vm2, %v1272_v8  ;;  %v1281_v7 = vld [vmem:[#allocation2 + $0x250] sm:$0xff] }
 0x14f   :  { %9157 = vmatmul.msk.f32.gmra.mxu2 %vm827_vm2, %v1174_v9  ;;  %v1183_v8 = vld [vmem:[#allocation2 + $0x24f] sm:$0xff] }
 0x150   :  { %v515_v10 = vpop.f32.mrf.mxu0  ;;  %v2564_v9 = vld [vmem:[#allocation2 + $0x249] sm:$0xff] }
 0x151   :  { %v516_v12 = vadd.f32 %v10202_v26, %v515_v10 }
 0x153   :  { %v755_v13 = vmax.f32 %v516_v12, 0.0  ;;  %8981 = vmatmul.msk.f32.gmra.mxu0 %vm137_vm0, %v68_v11  ;;  %v77_v11 = vld [vmem:[%s14366_s0 + $0x188] sm:$0xff] }
 0x155   :  { %852 = vst.msk [vmem:[%s14367_s7 + $0xc0] sm:$0xff] %vm827_vm2, %v755_v13  ;;  %v1273_v14 = vld [vmem:[#allocation2 + $0x190] sm:$0xff] }
 0x156   :  { %v1175_v15 = vld [vmem:[#allocation2 + $0x18f] sm:$0xff]  ;;  %1078 = vst.msk [vmem:[#allocation2 + $0x1a8] sm:$0xff] %vm827_vm2, %v755_v13  ;;  %9062 = vmatmul.msk.f32.gmra.mxu1 %vm827_vm2, %v1273_v14 }
 0x157   :  { %v2556_v16 = vld [vmem:[#allocation2 + $0x189] sm:$0xff]  ;;  %9158 = vmatmul.msk.f32.gmra.mxu2 %vm827_vm2, %v1175_v15  ;;  %v2557_v24 = vld [vmem:[#allocation2 + $0x191] sm:$0xff] }
 0x158   :  { %9253 = vmatmul.msk.f32.gmra.mxu3 %vm827_vm2, %v2556_v16  ;;  %v518_v17 = vpop.f32.mrf.mxu0  ;;  %v2565_v14 = vld [vmem:[#allocation2 + $0x251] sm:$0xff] }
 0x159   :  { %v519_v19 = vadd.f32 %v10202_v26, %v518_v17 }
 0x15b   :  { %v756_v20 = vmax.f32 %v519_v19, 0.0  ;;  %8982 = vmatmul.msk.f32.gmra.mxu0 %vm137_vm0, %v69_v18  ;;  %v78_v18 = vld [vmem:[%s14366_s0 + $0x190] sm:$0xff] }
 0x15d   :  { %853 = vst.msk [vmem:[%s14367_s7 + $0xc8] sm:$0xff] %vm827_vm2, %v756_v20  ;;  %v1274_v21 = vld [vmem:[#allocation2 + $0x1a8] sm:$0xff] }
 0x15e   :  { %v1176_v23 = vld [vmem:[#allocation2 + $0x1a7] sm:$0xff]  ;;  %1079 = vst.msk [vmem:[#allocation2 + $0x1b0] sm:$0xff] %vm827_vm2, %v756_v20  ;;  %9063 = vmatmul.msk.f32.gmra.mxu1 %vm827_vm2, %v1274_v21 }
 0x15f   :  { %9159 = vmatmul.msk.f32.gmra.mxu2 %vm827_vm2, %v1176_v23 }
 0x160   :  { %9254 = vmatmul.msk.f32.gmra.mxu3 %vm827_vm2, %v2557_v24  ;;  %v521_v25 = vpop.f32.mrf.mxu0 }
 0x161   :  { %v522_v28 = vadd.f32 %v10202_v26, %v521_v25 }
 0x163   :  { %v757_v29 = vmax.f32 %v522_v28, 0.0  ;;  %8983 = vmatmul.msk.f32.gmra.mxu0 %vm137_vm0, %v70_v27  ;;  %v79_v27 = vld [vmem:[%s14366_s0 + $0x198] sm:$0xff] }
 0x165   :  { %854 = vst.msk [vmem:[%s14367_s7 + $0xd0] sm:$0xff] %vm827_vm2, %v757_v29  ;;  %v1275_v30 = vld [vmem:[#allocation2 + $0x1b0] sm:$0xff] }
 0x166   :  { %v1177_v31 = vld [vmem:[#allocation2 + $0x1af] sm:$0xff]  ;;  %1080 = vst.msk [vmem:[#allocation2 + $0x1c8] sm:$0xff] %vm827_vm2, %v757_v29  ;;  %9064 = vmatmul.msk.f32.gmra.mxu1 %vm827_vm2, %v1275_v30 }
 0x167   :  { %v2558_v32 = vld [vmem:[#allocation2 + $0x1a9] sm:$0xff]  ;;  %9160 = vmatmul.msk.f32.gmra.mxu2 %vm827_vm2, %v1177_v31  ;;  %v2559_v39 = vld [vmem:[#allocation2 + $0x1b1] sm:$0xff] }
 0x168   :  { %9255 = vmatmul.msk.f32.gmra.mxu3 %vm827_vm2, %v2558_v32  ;;  %v524_v33 = vpop.f32.mrf.mxu0 }
 0x169   :  { %v525_v35 = vadd.f32 %v10202_v26, %v524_v33  ;;  %v4990_v33 = vld [vmem:[%s14368_s3 + $0x58] sm:$0xff] }
 0x16a   :  { %5293 = vmatpush.msrb.mxu3 %v4990_v33 }
 0x16b   :  { %v758_v36 = vmax.f32 %v525_v35, 0.0  ;;  %8984 = vmatmul.msk.f32.gmra.mxu0 %vm137_vm0, %v71_v34  ;;  %v80_v35 = vld [vmem:[%s14366_s0 + $0x1a0] sm:$0xff] }
 0x16d   :  { %855 = vst.msk [vmem:[%s14367_s7 + $0xd8] sm:$0xff] %vm827_vm2, %v758_v36  ;;  %v1276_v37 = vld [vmem:[#allocation2 + $0x1c8] sm:$0xff] }
 0x16e   :  { %v1178_v38 = vld [vmem:[#allocation2 + $0x1c7] sm:$0xff]  ;;  %1081 = vst.msk [vmem:[#allocation2 + $0x1d0] sm:$0xff] %vm827_vm2, %v758_v36  ;;  %9065 = vmatmul.msk.f32.gmra.mxu1 %vm827_vm2, %v1276_v37 }
 0x16f   :  { %9161 = vmatmul.msk.f32.gmra.mxu2 %vm827_vm2, %v1178_v38 }
 0x170   :  { %9256 = vmatmul.msk.f32.gmra.mxu3 %vm827_vm2, %v2559_v39  ;;  %v527_v40 = vpop.f32.mrf.mxu0 }
 0x171   :  { %v528_v42 = vadd.f32 %v10202_v26, %v527_v40 }
 0x173   :  { %v759_v43 = vmax.f32 %v528_v42, 0.0  ;;  %8985 = vmatmul.msk.f32.gmra.mxu0 %vm137_vm0, %v72_v41  ;;  %v81_v42 = vld [vmem:[%s14366_s0 + $0x1a8] sm:$0xff] }
 0x175   :  { %856 = vst.msk [vmem:[%s14367_s7 + $0xe0] sm:$0xff] %vm827_vm2, %v759_v43  ;;  %v1277_v44 = vld [vmem:[#allocation2 + $0x1d0] sm:$0xff] }
 0x176   :  { %v1179_v45 = vld [vmem:[#allocation2 + $0x1cf] sm:$0xff]  ;;  %1082 = vst.msk [vmem:[#allocation2 + $0x1e8] sm:$0xff] %vm827_vm2, %v759_v43  ;;  %9066 = vmatmul.msk.f32.gmra.mxu1 %vm827_vm2, %v1277_v44 }
 0x177   :  { %v2560_v46 = vld [vmem:[#allocation2 + $0x1c9] sm:$0xff]  ;;  %9162 = vmatmul.msk.f32.gmra.mxu2 %vm827_vm2, %v1179_v45  ;;  %v2561_v53 = vld [vmem:[#allocation2 + $0x1d1] sm:$0xff] }
 0x178   :  { %9257 = vmatmul.msk.f32.gmra.mxu3 %vm827_vm2, %v2560_v46  ;;  %v530_v47 = vpop.f32.mrf.mxu0 }
 0x179   :  { %v531_v49 = vadd.f32 %v10202_v26, %v530_v47 }
 0x17b   :  { %v760_v50 = vmax.f32 %v531_v49, 0.0  ;;  %8986 = vmatmul.msk.f32.gmra.mxu0 %vm137_vm0, %v73_v48  ;;  %v82_v49 = vld [vmem:[%s14366_s0 + $0x1b0] sm:$0xff] }
 0x17d   :  { %857 = vst.msk [vmem:[%s14367_s7 + $0xe8] sm:$0xff] %vm827_vm2, %v760_v50  ;;  %v1278_v51 = vld [vmem:[#allocation2 + $0x1e8] sm:$0xff] }
 0x17e   :  { %v1180_v52 = vld [vmem:[#allocation2 + $0x1e7] sm:$0xff]  ;;  %1083 = vst.msk [vmem:[#allocation2 + $0x1f0] sm:$0xff] %vm827_vm2, %v760_v50  ;;  %9067 = vmatmul.msk.f32.gmra.mxu1 %vm827_vm2, %v1278_v51 }
 0x17f   :  { %9163 = vmatmul.msk.f32.gmra.mxu2 %vm827_vm2, %v1180_v52 }
 0x180   :  { %9258 = vmatmul.msk.f32.gmra.mxu3 %vm827_vm2, %v2561_v53  ;;  %v533_v54 = vpop.f32.mrf.mxu0 }
 0x181   :  { %v534_v56 = vadd.f32 %v10202_v26, %v533_v54 }
 0x183   :  { %v761_v57 = vmax.f32 %v534_v56, 0.0  ;;  %8987 = vmatmul.msk.f32.gmra.mxu0 %vm137_vm0, %v74_v55 }
 0x185   :  { %858 = vst.msk [vmem:[%s14367_s7 + $0xf0] sm:$0xff] %vm827_vm2, %v761_v57  ;;  %v1279_v58 = vld [vmem:[#allocation2 + $0x1f0] sm:$0xff] }
 0x186   :  { %v1181_v59 = vld [vmem:[#allocation2 + $0x1ef] sm:$0xff]  ;;  %1084 = vst.msk [vmem:[#allocation2 + $0x208] sm:$0xff] %vm827_vm2, %v761_v57  ;;  %9068 = vmatmul.msk.f32.gmra.mxu1 %vm827_vm2, %v1279_v58  ;;  %v83_v57 = vld [vmem:[%s14366_s0 + $0x1b8] sm:$0xff] }
 0x187   :  { %v2562_v60 = vld [vmem:[#allocation2 + $0x1e9] sm:$0xff]  ;;  %9164 = vmatmul.msk.f32.gmra.mxu2 %vm827_vm2, %v1181_v59  ;;  %v2563_v2 = vld [vmem:[#allocation2 + $0x1f1] sm:$0xff] }
 0x188   :  { %9259 = vmatmul.msk.f32.gmra.mxu3 %vm827_vm2, %v2562_v60  ;;  %v536_v61 = vpop.f32.mrf.mxu0 }
 0x189   :  { %v537_v62 = vadd.f32 %v10202_v26, %v536_v61 }
 0x18b   :  { %v762_v63 = vmax.f32 %v537_v62, 0.0  ;;  %8988 = vmatmul.msk.f32.gmra.mxu0 %vm137_vm0, %v75_v22 }
 0x18d   :  { %859 = vst.msk [vmem:[%s14367_s7 + $0xf8] sm:$0xff] %vm827_vm2, %v762_v63 }
 0x18e   :  { %1085 = vst.msk [vmem:[#allocation2 + $0x210] sm:$0xff] %vm827_vm2, %v762_v63  ;;  %9069 = vmatmul.msk.f32.gmra.mxu1 %vm827_vm2, %v1280_v0 }
 0x18f   :  { %9165 = vmatmul.msk.f32.gmra.mxu2 %vm827_vm2, %v1182_v1  ;;  %v84_v1 = vld [vmem:[%s14366_s0 + $0x1c0] sm:$0xff] }
 0x190   :  { %9260 = vmatmul.msk.f32.gmra.mxu3 %vm827_vm2, %v2563_v2  ;;  %v539_v3 = vpop.f32.mrf.mxu0  ;;  %v10892_v2 = vld [vmem:[%s14365_s2] ss:$0 sm:$0xff] }
 0x191   :  { %v540_v5 = vadd.f32 %v10202_v26, %v539_v3 }
 0x193   :  { %v763_v6 = vmax.f32 %v540_v5, 0.0  ;;  %8989 = vmatmul.msk.f32.gmra.mxu0 %vm137_vm0, %v76_v4 }
 0x195   :  { %860 = vst.msk [vmem:[%s14367_s7 + $0x100] sm:$0xff] %vm827_vm2, %v763_v6 }
 0x196   :  { %1086 = vst.msk [vmem:[#allocation2 + $0x268] sm:$0xff] %vm827_vm2, %v763_v6  ;;  %9070 = vmatmul.msk.f32.gmra.mxu1 %vm827_vm2, %v1281_v7 }
 0x197   :  { %9166 = vmatmul.msk.f32.gmra.mxu2 %vm827_vm2, %v1183_v8 }
 0x198   :  { %9261 = vmatmul.msk.f32.gmra.mxu3 %vm827_vm2, %v2564_v9  ;;  %v542_v10 = vpop.f32.mrf.mxu0 }
 0x199   :  { %v543_v12 = vadd.f32 %v10202_v26, %v542_v10 }
 0x19b   :  { %v764_v13 = vmax.f32 %v543_v12, 0.0  ;;  %8990 = vmatmul.msk.f32.gmra.mxu0 %vm137_vm0, %v77_v11 }
 0x19d   :  { %861 = vst.msk [vmem:[%s14367_s7 + $0x108] sm:$0xff] %vm827_vm2, %v764_v13  ;;  %v1282_v15 = vld [vmem:[#allocation2 + $0x268] sm:$0xff] }
 0x19e   :  { %v1184_v16 = vld [vmem:[#allocation2 + $0x267] sm:$0xff]  ;;  %1087 = vst.msk [vmem:[#allocation2 + $0x270] sm:$0xff] %vm827_vm2, %v764_v13  ;;  %9071 = vmatmul.msk.f32.gmra.mxu1 %vm827_vm2, %v1282_v15 }
 0x19f   :  { %9167 = vmatmul.msk.f32.gmra.mxu2 %vm827_vm2, %v1184_v16  ;;  %v85_v13 = vld [vmem:[%s14366_s0 + $0x1c8] sm:$0xff] }
 0x1a0   :  { %9262 = vmatmul.msk.f32.gmra.mxu3 %vm827_vm2, %v2565_v14  ;;  %v545_v17 = vpop.f32.mrf.mxu0 }
 0x1a1   :  { %v546_v19 = vadd.f32 %v10202_v26, %v545_v17 }
 0x1a3   :  { %v765_v20 = vmax.f32 %v546_v19, 0.0  ;;  %8991 = vmatmul.msk.f32.gmra.mxu0 %vm137_vm0, %v78_v18 }
 0x1a5   :  { %862 = vst.msk [vmem:[%s14367_s7 + $0x110] sm:$0xff] %vm827_vm2, %v765_v20  ;;  %v1283_v21 = vld [vmem:[#allocation2 + $0x270] sm:$0xff] }
 0x1a6   :  { %v1185_v23 = vld [vmem:[#allocation2 + $0x26f] sm:$0xff]  ;;  %1088 = vst.msk [vmem:[#allocation2 + $0x288] sm:$0xff] %vm827_vm2, %v765_v20  ;;  %9072 = vmatmul.msk.f32.gmra.mxu1 %vm827_vm2, %v1283_v21 }
 0x1a7   :  { %v2566_v24 = vld [vmem:[#allocation2 + $0x269] sm:$0xff]  ;;  %9168 = vmatmul.msk.f32.gmra.mxu2 %vm827_vm2, %v1185_v23  ;;  %v2567_v32 = vld [vmem:[#allocation2 + $0x271] sm:$0xff] }
 0x1a8   :  { %9263 = vmatmul.msk.f32.gmra.mxu3 %vm827_vm2, %v2566_v24  ;;  %v548_v25 = vpop.f32.mrf.mxu0 }
 0x1a9   :  { %v549_v28 = vadd.f32 %v10202_v26, %v548_v25 }
 0x1ab   :  { %v766_v29 = vmax.f32 %v549_v28, 0.0  ;;  %8992 = vmatmul.msk.f32.gmra.mxu0 %vm137_vm0, %v79_v27  ;;  %v86_v27 = vld [vmem:[%s14366_s0 + $0x1d0] sm:$0xff] }
 0x1ad   :  { %863 = vst.msk [vmem:[%s14367_s7 + $0x118] sm:$0xff] %vm827_vm2, %v766_v29  ;;  %v1284_v30 = vld [vmem:[#allocation2 + $0x288] sm:$0xff] }
 0x1ae   :  { %v1186_v31 = vld [vmem:[#allocation2 + $0x287] sm:$0xff]  ;;  %1089 = vst.msk [vmem:[#allocation2 + $0x290] sm:$0xff] %vm827_vm2, %v766_v29  ;;  %9073 = vmatmul.msk.f32.gmra.mxu1 %vm827_vm2, %v1284_v30 }
 0x1af   :  { %9169 = vmatmul.msk.f32.gmra.mxu2 %vm827_vm2, %v1186_v31 }
 0x1b0   :  { %9264 = vmatmul.msk.f32.gmra.mxu3 %vm827_vm2, %v2567_v32  ;;  %v551_v34 = vpop.f32.mrf.mxu0 }
 0x1b1   :  { %v552_v36 = vadd.f32 %v10202_v26, %v551_v34 }
 0x1b3   :  { %v767_v37 = vmax.f32 %v552_v36, 0.0  ;;  %8993 = vmatmul.msk.f32.gmra.mxu0 %vm137_vm0, %v80_v35 }
 0x1b5   :  { %864 = vst.msk [vmem:[%s14367_s7 + $0x120] sm:$0xff] %vm827_vm2, %v767_v37  ;;  %v1285_v38 = vld [vmem:[#allocation2 + $0x290] sm:$0xff] }
 0x1b6   :  { %v1187_v39 = vld [vmem:[#allocation2 + $0x28f] sm:$0xff]  ;;  %1090 = vst.msk [vmem:[#allocation2 + $0x2a8] sm:$0xff] %vm827_vm2, %v767_v37  ;;  %9074 = vmatmul.msk.f32.gmra.mxu1 %vm827_vm2, %v1285_v38 }
 0x1b7   :  { %v2568_v40 = vld [vmem:[#allocation2 + $0x289] sm:$0xff]  ;;  %9170 = vmatmul.msk.f32.gmra.mxu2 %vm827_vm2, %v1187_v39  ;;  %v2569_v47 = vld [vmem:[#allocation2 + $0x291] sm:$0xff] }
 0x1b8   :  { %9265 = vmatmul.msk.f32.gmra.mxu3 %vm827_vm2, %v2568_v40  ;;  %v554_v41 = vpop.f32.mrf.mxu0  ;;  %v87_v39 = vld [vmem:[%s14366_s0 + $0x1d8] sm:$0xff] }
 0x1b9   :  { %v555_v43 = vadd.f32 %v10202_v26, %v554_v41 }
 0x1bb   :  { %v768_v44 = vmax.f32 %v555_v43, 0.0  ;;  %8994 = vmatmul.msk.f32.gmra.mxu0 %vm137_vm0, %v81_v42 }
 0x1bd   :  { %865 = vst.msk [vmem:[%s14367_s7 + $0x128] sm:$0xff] %vm827_vm2, %v768_v44  ;;  %v1286_v45 = vld [vmem:[#allocation2 + $0x2a8] sm:$0xff] }
 0x1be   :  { %v1188_v46 = vld [vmem:[#allocation2 + $0x2a7] sm:$0xff]  ;;  %1091 = vst.msk [vmem:[#allocation2 + $0x2b0] sm:$0xff] %vm827_vm2, %v768_v44  ;;  %9075 = vmatmul.msk.f32.gmra.mxu1 %vm827_vm2, %v1286_v45 }
 0x1bf   :  { %9171 = vmatmul.msk.f32.gmra.mxu2 %vm827_vm2, %v1188_v46 }
 0x1c0   :  { %9266 = vmatmul.msk.f32.gmra.mxu3 %vm827_vm2, %v2569_v47  ;;  %v557_v48 = vpop.f32.mrf.mxu0 }
 0x1c1   :  { %v558_v50 = vadd.f32 %v10202_v26, %v557_v48 }
 0x1c3   :  { %v769_v51 = vmax.f32 %v558_v50, 0.0  ;;  %v1720_v52 = vpop.f32.mrf.mxu1  ;;  %8995 = vmatmul.msk.f32.gmra.mxu0 %vm137_vm0, %v82_v49 }
 0x1c5   :  { %866 = vst.msk [vmem:[%s14367_s7 + $0x130] sm:$0xff] %vm827_vm2, %v769_v51  ;;  %v1287_v53 = vld [vmem:[#allocation2 + $0x2b0] sm:$0xff] }
 0x1c6   :  { %v1189_v54 = vld [vmem:[#allocation2 + $0x2af] sm:$0xff]  ;;  %1092 = vst.msk [vmem:[#allocation2 + $0x2c8] sm:$0xff] %vm827_vm2, %v769_v51  ;;  %9076 = vmatmul.msk.f32.gmra.mxu1 %vm827_vm2, %v1287_v53  ;;  %v88_v51 = vld [vmem:[%s14366_s0 + $0x1e0] sm:$0xff] }
 0x1c7   :  { %v2570_v55 = vld [vmem:[#allocation2 + $0x2a9] sm:$0xff]  ;;  %9172 = vmatmul.msk.f32.gmra.mxu2 %vm827_vm2, %v1189_v54 }
 0x1c8   :  { %9267 = vmatmul.msk.f32.gmra.mxu3 %vm827_vm2, %v2570_v55  ;;  %v560_v56 = vpop.f32.mrf.mxu0 }
 0x1c9   :  { %v561_v58 = vadd.f32 %v10202_v26, %v560_v56  ;;  %v2571_v26 = vld [vmem:[#allocation2 + $0x2b1] sm:$0xff] }
 0x1ca   :  { %v2313_v59 = vpop.f32.mrf.mxu2 }
 0x1cb   :  { %v10875_v60 = vadd.f32 %v2313_v59, %v1720_v52  ;;  %v770_v61 = vmax.f32 %v561_v58, 0.0  ;;  %v1723_v22 = vpop.f32.mrf.mxu1  ;;  %8996 = vmatmul.msk.f32.gmra.mxu0 %vm137_vm0, %v83_v57  ;;  %v10895_v5 = vpop.f32.mrf.mxu3 }
 0x1cd   :  { %867 = vst.msk [vmem:[%s14367_s7 + $0x138] sm:$0xff] %vm827_vm2, %v770_v61  ;;  %v1288_v62 = vld [vmem:[#allocation2 + $0x2c8] sm:$0xff] }
 0x1ce   :  { %v1190_v63 = vld [vmem:[#allocation2 + $0x2c7] sm:$0xff]  ;;  %1093 = vst.msk [vmem:[#allocation2 + $0x2d0] sm:$0xff] %vm827_vm2, %v770_v61  ;;  %9077 = vmatmul.msk.f32.gmra.mxu1 %vm827_vm2, %v1288_v62 }
 0x1cf   :  { %9173 = vmatmul.msk.f32.gmra.mxu2 %vm827_vm2, %v1190_v63  ;;  %v89_v63 = vld [vmem:[%s14366_s0 + $0x1e8] sm:$0xff] }
 0x1d0   :  { %9268 = vmatmul.msk.f32.gmra.mxu3 %vm827_vm2, %v2571_v26  ;;  %v563_v0 = vpop.f32.mrf.mxu0 }
 0x1d1   :  { %v564_v3 = vadd.f32 %v10892_v2, %v563_v0 }
 0x1d2   :  { %v2316_v4 = vpop.f32.mrf.mxu2 }
 0x1d3   :  { %v2317_v6 = vadd.f32 %v2316_v4, %v1723_v22  ;;  %v771_v7 = vmax.f32 %v564_v3, 0.0  ;;  %v1726_v8 = vpop.f32.mrf.mxu1  ;;  %8997 = vmatmul.msk.f32.gmra.mxu0 %vm137_vm0, %v84_v1 }
 0x1d5   :  { %868 = vst.msk [vmem:[%s14367_s7 + $0x140] sm:$0xff] %vm827_vm2, %v771_v7  ;;  %v1289_v9 = vld [vmem:[#allocation2 + $0x2d0] sm:$0xff] }
 0x1d6   :  { %v1191_v10 = vld [vmem:[#allocation2 + $0x2cf] sm:$0xff]  ;;  %1094 = vst.msk [vmem:[#allocation2 + $0x2e8] sm:$0xff] %vm827_vm2, %v771_v7  ;;  %9078 = vmatmul.msk.f32.gmra.mxu1 %vm827_vm2, %v1289_v9 }
 0x1d7   :  { %v2572_v11 = vld [vmem:[#allocation2 + $0x2c9] sm:$0xff]  ;;  %9174 = vmatmul.msk.f32.gmra.mxu2 %vm827_vm2, %v1191_v10  ;;  %v2573_v24 = vld [vmem:[#allocation2 + $0x2d1] sm:$0xff] }
 0x1d8   :  { %9269 = vmatmul.msk.f32.gmra.mxu3 %vm827_vm2, %v2572_v11  ;;  %v566_v12 = vpop.f32.mrf.mxu0 }
 0x1d9   :  { %v567_v14 = vadd.f32 %v10892_v2, %v566_v12  ;;  %v90_v12 = vld [vmem:[%s14366_s0 + $0x1f0] sm:$0xff] }
 0x1da   :  { %v2319_v15 = vpop.f32.mrf.mxu2 }
 0x1db   :  { %v2320_v16 = vadd.f32 %v2319_v15, %v1726_v8  ;;  %v3007_v17 = vpop.f32.mrf.mxu3  ;;  %v772_v18 = vmax.f32 %v567_v14, 0.0  ;;  %v1729_v20 = vpop.f32.mrf.mxu1  ;;  %8998 = vmatmul.msk.f32.gmra.mxu0 %vm137_vm0, %v85_v13 }
 0x1dc   :  { %v10910_v19 = vadd.f32 %v3007_v17, %v2317_v6 }
 0x1dd   :  { %869 = vst.msk [vmem:[%s14367_s7 + $0x148] sm:$0xff] %vm827_vm2, %v772_v18  ;;  %v1290_v21 = vld [vmem:[#allocation2 + $0x2e8] sm:$0xff] }
 0x1de   :  { %v1192_v23 = vld [vmem:[#allocation2 + $0x2e7] sm:$0xff]  ;;  %1095 = vst.msk [vmem:[#allocation2 + $0x2f0] sm:$0xff] %vm827_vm2, %v772_v18  ;;  %9079 = vmatmul.msk.f32.gmra.mxu1 %vm827_vm2, %v1290_v21 }
 0x1df   :  { %9175 = vmatmul.msk.f32.gmra.mxu2 %vm827_vm2, %v1192_v23 }
 0x1e0   :  { %9270 = vmatmul.msk.f32.gmra.mxu3 %vm827_vm2, %v2573_v24  ;;  %v569_v25 = vpop.f32.mrf.mxu0 }
 0x1e1   :  { %v570_v28 = vadd.f32 %v10892_v2, %v569_v25 }
 0x1e2   :  { %v2322_v29 = vpop.f32.mrf.mxu2 }
 0x1e3   :  { %v2323_v30 = vadd.f32 %v2322_v29, %v1729_v20  ;;  %v3010_v31 = vpop.f32.mrf.mxu3  ;;  %v773_v32 = vmax.f32 %v570_v28, 0.0  ;;  %v1732_v34 = vpop.f32.mrf.mxu1  ;;  %8999 = vmatmul.msk.f32.gmra.mxu0 %vm137_vm0, %v86_v27  ;;  %v91_v27 = vld [vmem:[%s14366_s0 + $0x1f8] sm:$0xff] }
 0x1e4   :  { %v10925_v33 = vadd.f32 %v3010_v31, %v2320_v16 }
 0x1e5   :  { %870 = vst.msk [vmem:[%s14367_s7 + $0x150] sm:$0xff] %vm827_vm2, %v773_v32  ;;  %v1291_v35 = vld [vmem:[#allocation2 + $0x2f0] sm:$0xff] }
 0x1e6   :  { %v1193_v36 = vld [vmem:[#allocation2 + $0x2ef] sm:$0xff]  ;;  %1096 = vst.msk [vmem:[#allocation2 + $0x308] sm:$0xff] %vm827_vm2, %v773_v32  ;;  %9080 = vmatmul.msk.f32.gmra.mxu1 %vm827_vm2, %v1291_v35 }
 0x1e7   :  { %v2574_v37 = vld [vmem:[#allocation2 + $0x2e9] sm:$0xff]  ;;  %9176 = vmatmul.msk.f32.gmra.mxu2 %vm827_vm2, %v1193_v36  ;;  %v2575_v49 = vld [vmem:[#allocation2 + $0x2f1] sm:$0xff] }
 0x1e8   :  { %9271 = vmatmul.msk.f32.gmra.mxu3 %vm827_vm2, %v2574_v37  ;;  %v572_v38 = vpop.f32.mrf.mxu0 }
 0x1e9   :  { %v573_v40 = vadd.f32 %v10892_v2, %v572_v38 }
 0x1ea   :  { %v2325_v41 = vpop.f32.mrf.mxu2 }
 0x1eb   :  { %v2326_v42 = vadd.f32 %v2325_v41, %v1732_v34  ;;  %v3013_v43 = vpop.f32.mrf.mxu3  ;;  %v774_v44 = vmax.f32 %v573_v40, 0.0  ;;  %v1735_v46 = vpop.f32.mrf.mxu1  ;;  %9000 = vmatmul.msk.f32.gmra.mxu0 %vm137_vm0, %v87_v39  ;;  %v92_v40 = vld [vmem:[%s14366_s0 + $0x200] sm:$0xff] }
 0x1ec   :  { %v10940_v45 = vadd.f32 %v3013_v43, %v2323_v30 }
 0x1ed   :  { %871 = vst.msk [vmem:[%s14367_s7 + $0x158] sm:$0xff] %vm827_vm2, %v774_v44  ;;  %v1292_v47 = vld [vmem:[#allocation2 + $0x308] sm:$0xff] }
 0x1ee   :  { %v1194_v48 = vld [vmem:[#allocation2 + $0x307] sm:$0xff]  ;;  %1097 = vst.msk [vmem:[#allocation2 + $0x310] sm:$0xff] %vm827_vm2, %v774_v44  ;;  %9081 = vmatmul.msk.f32.gmra.mxu1 %vm827_vm2, %v1292_v47 }
 0x1ef   :  { %9177 = vmatmul.msk.f32.gmra.mxu2 %vm827_vm2, %v1194_v48 }
 0x1f0   :  { %9272 = vmatmul.msk.f32.gmra.mxu3 %vm827_vm2, %v2575_v49  ;;  %v575_v50 = vpop.f32.mrf.mxu0 }
 0x1f1   :  { %v576_v52 = vadd.f32 %v10892_v2, %v575_v50 }
 0x1f2   :  { %v2328_v53 = vpop.f32.mrf.mxu2 }
 0x1f3   :  { %v2329_v54 = vadd.f32 %v2328_v53, %v1735_v46  ;;  %v3016_v55 = vpop.f32.mrf.mxu3  ;;  %v775_v56 = vmax.f32 %v576_v52, 0.0  ;;  %v1738_v58 = vpop.f32.mrf.mxu1  ;;  %9001 = vmatmul.msk.f32.gmra.mxu0 %vm137_vm0, %v88_v51  ;;  %v93_v53 = vld [vmem:[%s14366_s0 + $0x208] sm:$0xff] }
 0x1f4   :  { %v10955_v57 = vadd.f32 %v3016_v55, %v2326_v42 }
 0x1f5   :  { %872 = vst.msk [vmem:[%s14367_s7 + $0x160] sm:$0xff] %vm827_vm2, %v775_v56  ;;  %v1293_v59 = vld [vmem:[#allocation2 + $0x310] sm:$0xff] }
 0x1f6   :  { %v1195_v61 = vld [vmem:[#allocation2 + $0x30f] sm:$0xff]  ;;  %1098 = vst.msk [vmem:[#allocation2 + $0x328] sm:$0xff] %vm827_vm2, %v775_v56  ;;  %9082 = vmatmul.msk.f32.gmra.mxu1 %vm827_vm2, %v1293_v59 }
 0x1f7   :  { %v2576_v22 = vld [vmem:[#allocation2 + $0x309] sm:$0xff]  ;;  %9178 = vmatmul.msk.f32.gmra.mxu2 %vm827_vm2, %v1195_v61  ;;  %v2577_v10 = vld [vmem:[#allocation2 + $0x311] sm:$0xff] }
 0x1f8   :  { %9273 = vmatmul.msk.f32.gmra.mxu3 %vm827_vm2, %v2576_v22  ;;  %v578_v62 = vpop.f32.mrf.mxu0 }
 0x1f9   :  { %v579_v26 = vadd.f32 %v10892_v2, %v578_v62 }
 0x1fa   :  { %v2331_v0 = vpop.f32.mrf.mxu2 }
 0x1fb   :  { %v2332_v1 = vadd.f32 %v2331_v0, %v1738_v58  ;;  %v3019_v3 = vpop.f32.mrf.mxu3  ;;  %v776_v4 = vmax.f32 %v579_v26, 0.0  ;;  %v1741_v7 = vpop.f32.mrf.mxu1  ;;  %9002 = vmatmul.msk.f32.gmra.mxu0 %vm137_vm0, %v89_v63 }
 0x1fc   :  { %v10970_v6 = vadd.f32 %v3019_v3, %v2329_v54 }
 0x1fd   :  { %873 = vst.msk [vmem:[%s14367_s7 + $0x168] sm:$0xff] %vm827_vm2, %v776_v4  ;;  %v1294_v8 = vld [vmem:[#allocation2 + $0x328] sm:$0xff] }
 0x1fe   :  { %v1196_v9 = vld [vmem:[#allocation2 + $0x327] sm:$0xff]  ;;  %1099 = vst.msk [vmem:[#allocation2 + $0x330] sm:$0xff] %vm827_vm2, %v776_v4  ;;  %9083 = vmatmul.msk.f32.gmra.mxu1 %vm827_vm2, %v1294_v8 }
 0x1ff   :  { %9179 = vmatmul.msk.f32.gmra.mxu2 %vm827_vm2, %v1196_v9 }
 0x200   :  { %9274 = vmatmul.msk.f32.gmra.mxu3 %vm827_vm2, %v2577_v10  ;;  %v581_v11 = vpop.f32.mrf.mxu0 }
 0x201   :  { %v582_v13 = vadd.f32 %v10892_v2, %v581_v11 }
 0x202   :  { %v2334_v14 = vpop.f32.mrf.mxu2 }
 0x203   :  { %v2335_v15 = vadd.f32 %v2334_v14, %v1741_v7  ;;  %v3022_v16 = vpop.f32.mrf.mxu3  ;;  %v777_v17 = vmax.f32 %v582_v13, 0.0  ;;  %v1744_v20 = vpop.f32.mrf.mxu1  ;;  %9003 = vmatmul.msk.f32.gmra.mxu0 %vm137_vm0, %v90_v12 }
 0x204   :  { %v10985_v18 = vadd.f32 %v3022_v16, %v2332_v1  ;;  %v94_v1 = vld [vmem:[%s14366_s0 + $0x210] sm:$0xff]  ;;  %v95_v16 = vld [vmem:[%s14366_s0 + $0x218] sm:$0xff] }
 0x205   :  { %874 = vst.msk [vmem:[%s14367_s7 + $0x170] sm:$0xff] %vm827_vm2, %v777_v17  ;;  %v1295_v21 = vld [vmem:[#allocation2 + $0x330] sm:$0xff] }
 0x206   :  { %v1197_v23 = vld [vmem:[#allocation2 + $0x32f] sm:$0xff]  ;;  %1100 = vst.msk [vmem:[#allocation2 + $0x348] sm:$0xff] %vm827_vm2, %v777_v17  ;;  %9084 = vmatmul.msk.f32.gmra.mxu1 %vm827_vm2, %v1295_v21 }
 0x207   :  { %v2578_v24 = vld [vmem:[#allocation2 + $0x329] sm:$0xff]  ;;  %9180 = vmatmul.msk.f32.gmra.mxu2 %vm827_vm2, %v1197_v23  ;;  %v2579_v38 = vld [vmem:[#allocation2 + $0x331] sm:$0xff] }
 0x208   :  { %9275 = vmatmul.msk.f32.gmra.mxu3 %vm827_vm2, %v2578_v24  ;;  %v584_v25 = vpop.f32.mrf.mxu0 }
 0x209   :  { %v585_v28 = vadd.f32 %v10892_v2, %v584_v25 }
 0x20a   :  { %v2337_v29 = vpop.f32.mrf.mxu2 }
 0x20b   :  { %v2338_v30 = vadd.f32 %v2337_v29, %v1744_v20  ;;  %v3025_v31 = vpop.f32.mrf.mxu3  ;;  %v778_v32 = vmax.f32 %v585_v28, 0.0  ;;  %v1747_v35 = vpop.f32.mrf.mxu1  ;;  %9004 = vmatmul.msk.f32.gmra.mxu0 %vm137_vm0, %v91_v27 }
 0x20c   :  { %v11000_v34 = vadd.f32 %v3025_v31, %v2335_v15 }
 0x20d   :  { %875 = vst.msk [vmem:[%s14367_s7 + $0x178] sm:$0xff] %vm827_vm2, %v778_v32  ;;  %v1296_v36 = vld [vmem:[#allocation2 + $0x348] sm:$0xff] }
 0x20e   :  { %v1198_v37 = vld [vmem:[#allocation2 + $0x347] sm:$0xff]  ;;  %1101 = vst.msk [vmem:[#allocation2 + $0x350] sm:$0xff] %vm827_vm2, %v778_v32  ;;  %9085 = vmatmul.msk.f32.gmra.mxu1 %vm827_vm2, %v1296_v36 }
 0x20f   :  { %9181 = vmatmul.msk.f32.gmra.mxu2 %vm827_vm2, %v1198_v37  ;;  %v96_v32 = vld [vmem:[%s14366_s0 + $0x220] sm:$0xff] }
 0x210   :  { %9276 = vmatmul.msk.f32.gmra.mxu3 %vm827_vm2, %v2579_v38  ;;  %v587_v39 = vpop.f32.mrf.mxu0 }
 0x211   :  { %v588_v41 = vadd.f32 %v10892_v2, %v587_v39 }
 0x212   :  { %v2340_v42 = vpop.f32.mrf.mxu2 }
 0x213   :  { %v2341_v43 = vadd.f32 %v2340_v42, %v1747_v35  ;;  %v3028_v44 = vpop.f32.mrf.mxu3  ;;  %v779_v46 = vmax.f32 %v588_v41, 0.0  ;;  %v1750_v48 = vpop.f32.mrf.mxu1  ;;  %9005 = vmatmul.msk.f32.gmra.mxu0 %vm137_vm0, %v92_v40 }
 0x214   :  { %v11015_v47 = vadd.f32 %v3028_v44, %v2338_v30 }
 0x215   :  { %876 = vst.msk [vmem:[%s14367_s7 + $0x180] sm:$0xff] %vm827_vm2, %v779_v46  ;;  %v1297_v49 = vld [vmem:[#allocation2 + $0x350] sm:$0xff] }
 0x216   :  { %v1199_v50 = vld [vmem:[#allocation2 + $0x34f] sm:$0xff]  ;;  %1102 = vst.msk [vmem:[#allocation2 + $0x368] sm:$0xff] %vm827_vm2, %v779_v46  ;;  %9086 = vmatmul.msk.f32.gmra.mxu1 %vm827_vm2, %v1297_v49 }
 0x217   :  { %v2580_v51 = vld [vmem:[#allocation2 + $0x349] sm:$0xff]  ;;  %9182 = vmatmul.msk.f32.gmra.mxu2 %vm827_vm2, %v1199_v50  ;;  %v2581_v26 = vld [vmem:[#allocation2 + $0x351] sm:$0xff] }
 0x218   :  { %9277 = vmatmul.msk.f32.gmra.mxu3 %vm827_vm2, %v2580_v51  ;;  %v590_v52 = vpop.f32.mrf.mxu0 }
 0x219   :  { %v591_v54 = vadd.f32 %v10892_v2, %v590_v52 }
 0x21a   :  { %v2343_v55 = vpop.f32.mrf.mxu2 }
 0x21b   :  { %v2344_v56 = vadd.f32 %v2343_v55, %v1750_v48  ;;  %v3031_v58 = vpop.f32.mrf.mxu3  ;;  %v780_v59 = vmax.f32 %v591_v54, 0.0  ;;  %v1753_v22 = vpop.f32.mrf.mxu1  ;;  %9006 = vmatmul.msk.f32.gmra.mxu0 %vm137_vm0, %v93_v53  ;;  %v97_v48 = vld [vmem:[%s14366_s0 + $0x228] sm:$0xff] }
 0x21c   :  { %v11030_v61 = vadd.f32 %v3031_v58, %v2341_v43 }
 0x21d   :  { %877 = vst.msk [vmem:[%s14367_s7 + $0x188] sm:$0xff] %vm827_vm2, %v780_v59  ;;  %v1298_v62 = vld [vmem:[#allocation2 + $0x368] sm:$0xff] }
 0x21e   :  { %v1200_v63 = vld [vmem:[#allocation2 + $0x367] sm:$0xff]  ;;  %1103 = vst.msk [vmem:[#allocation2 + $0x370] sm:$0xff] %vm827_vm2, %v780_v59  ;;  %9087 = vmatmul.msk.f32.gmra.mxu1 %vm827_vm2, %v1298_v62  ;;  %v98_v62 = vld [vmem:[%s14366_s0 + $0x230] sm:$0xff] }
 0x21f   :  { %9183 = vmatmul.msk.f32.gmra.mxu2 %vm827_vm2, %v1200_v63 }
 0x220   :  { %9278 = vmatmul.msk.f32.gmra.mxu3 %vm827_vm2, %v2581_v26  ;;  %v593_v0 = vpop.f32.mrf.mxu0 }
 0x221   :  { %v594_v3 = vadd.f32 %v10892_v2, %v593_v0 }
 0x222   :  { %v2346_v4 = vpop.f32.mrf.mxu2 }
 0x223   :  { %v2347_v7 = vadd.f32 %v2346_v4, %v1753_v22  ;;  %v3034_v8 = vpop.f32.mrf.mxu3  ;;  %v781_v9 = vmax.f32 %v594_v3, 0.0  ;;  %v1756_v11 = vpop.f32.mrf.mxu1  ;;  %9007 = vmatmul.msk.f32.gmra.mxu0 %vm137_vm0, %v94_v1 }
 0x224   :  { %v11045_v10 = vadd.f32 %v3034_v8, %v2344_v56 }
 0x225   :  { %878 = vst.msk [vmem:[%s14367_s7 + $0x190] sm:$0xff] %vm827_vm2, %v781_v9  ;;  %v1299_v12 = vld [vmem:[#allocation2 + $0x370] sm:$0xff] }
 0x226   :  { %v1201_v13 = vld [vmem:[#allocation2 + $0x36f] sm:$0xff]  ;;  %1104 = vst.msk [vmem:[#allocation2 + $0x388] sm:$0xff] %vm827_vm2, %v781_v9  ;;  %9088 = vmatmul.msk.f32.gmra.mxu1 %vm827_vm2, %v1299_v12 }
 0x227   :  { %v2582_v14 = vld [vmem:[#allocation2 + $0x369] sm:$0xff]  ;;  %9184 = vmatmul.msk.f32.gmra.mxu2 %vm827_vm2, %v1201_v13  ;;  %v2583_v30 = vld [vmem:[#allocation2 + $0x371] sm:$0xff] }
 0x228   :  { %9279 = vmatmul.msk.f32.gmra.mxu3 %vm827_vm2, %v2582_v14  ;;  %v596_v15 = vpop.f32.mrf.mxu0  ;;  %v99_v13 = vld [vmem:[%s14366_s0 + $0x238] sm:$0xff] }
 0x229   :  { %v597_v17 = vadd.f32 %v10892_v2, %v596_v15 }
 0x22a   :  { %v2349_v20 = vpop.f32.mrf.mxu2 }
 0x22b   :  { %v2350_v21 = vadd.f32 %v2349_v20, %v1756_v11  ;;  %v3037_v23 = vpop.f32.mrf.mxu3  ;;  %v782_v24 = vmax.f32 %v597_v17, 0.0  ;;  %v1759_v27 = vpop.f32.mrf.mxu1  ;;  %9008 = vmatmul.msk.f32.gmra.mxu0 %vm137_vm0, %v95_v16 }
 0x22c   :  { %v11060_v25 = vadd.f32 %v3037_v23, %v2347_v7 }
 0x22d   :  { %879 = vst.msk [vmem:[%s14367_s7 + $0x198] sm:$0xff] %vm827_vm2, %v782_v24  ;;  %v1300_v28 = vld [vmem:[#allocation2 + $0x388] sm:$0xff] }
 0x22e   :  { %v1202_v29 = vld [vmem:[#allocation2 + $0x387] sm:$0xff]  ;;  %1105 = vst.msk [vmem:[#allocation2 + $0x390] sm:$0xff] %vm827_vm2, %v782_v24  ;;  %9089 = vmatmul.msk.f32.gmra.mxu1 %vm827_vm2, %v1300_v28 }
 0x22f   :  { %9185 = vmatmul.msk.f32.gmra.mxu2 %vm827_vm2, %v1202_v29  ;;  %v4202_v29 = vld [vmem:[%s14368_s3 + $0x40] sm:$0xff] }
 0x230   :  { %9280 = vmatmul.msk.f32.gmra.mxu3 %vm827_vm2, %v2583_v30  ;;  %v599_v31 = vpop.f32.mrf.mxu0  ;;  %4507 = vmatpush.msrb.mxu2 %v4202_v29  ;;  %v3415_v30 = vld [vmem:[%s14368_s3 + $0x30] sm:$0xff] }
 0x231   :  { %v600_v35 = vadd.f32 %v10892_v2, %v599_v31  ;;  %3720 = vmatpush.msrb.mxu1 %v3415_v30 }
 0x232   :  { %v2352_v36 = vpop.f32.mrf.mxu2 }
 0x233   :  { %v2353_v37 = vadd.f32 %v2352_v36, %v1759_v27  ;;  %v3040_v38 = vpop.f32.mrf.mxu3  ;;  %v783_v39 = vmax.f32 %v600_v35, 0.0  ;;  %v1762_v41 = vpop.f32.mrf.mxu1  ;;  %9009 = vmatmul.msk.f32.gmra.mxu0 %vm137_vm0, %v96_v32  ;;  %v100_v32 = vld [vmem:[%s14366_s0 + $0x240] sm:$0xff] }
 0x234   :  { %v11075_v40 = vadd.f32 %v3040_v38, %v2350_v21 }
 0x235   :  { %880 = vst.msk [vmem:[%s14367_s7 + $0x1a0] sm:$0xff] %vm827_vm2, %v783_v39  ;;  %v1301_v42 = vld [vmem:[#allocation2 + $0x390] sm:$0xff] }
 0x236   :  { %v1203_v43 = vld [vmem:[#allocation2 + $0x38f] sm:$0xff]  ;;  %1106 = vst.msk [vmem:[#allocation2 + $0x3a8] sm:$0xff] %vm827_vm2, %v783_v39  ;;  %9090 = vmatmul.msk.f32.gmra.mxu1 %vm827_vm2, %v1301_v42 }
 0x237   :  { %v2584_v44 = vld [vmem:[#allocation2 + $0x389] sm:$0xff]  ;;  %9186 = vmatmul.msk.f32.gmra.mxu2 %vm827_vm2, %v1203_v43  ;;  %v2585_v59 = vld [vmem:[#allocation2 + $0x391] sm:$0xff] }
 0x238   :  { %9281 = vmatmul.msk.f32.gmra.mxu3 %vm827_vm2, %v2584_v44  ;;  %v602_v46 = vpop.f32.mrf.mxu0 }
 0x239   :  { %v603_v49 = vadd.f32 %v10892_v2, %v602_v46 }
 0x23a   :  { %v2355_v50 = vpop.f32.mrf.mxu2 }
 0x23b   :  { %v2356_v51 = vadd.f32 %v2355_v50, %v1762_v41  ;;  %v3043_v52 = vpop.f32.mrf.mxu3  ;;  %v784_v53 = vmax.f32 %v603_v49, 0.0  ;;  %v1765_v55 = vpop.f32.mrf.mxu1  ;;  %9010 = vmatmul.msk.f32.gmra.mxu0 %vm137_vm0, %v97_v48  ;;  %v101_v49 = vld [vmem:[%s14366_s0 + $0x248] sm:$0xff] }
 0x23c   :  { %v11090_v54 = vadd.f32 %v3043_v52, %v2353_v37 }
 0x23d   :  { %881 = vst.msk [vmem:[%s14367_s7 + $0x1a8] sm:$0xff] %vm827_vm2, %v784_v53  ;;  %v1302_v56 = vld [vmem:[#allocation2 + $0x3a8] sm:$0xff] }
 0x23e   :  { %v1204_v58 = vld [vmem:[#allocation2 + $0x3a7] sm:$0xff]  ;;  %1107 = vst.msk [vmem:[#allocation2 + $0x3b0] sm:$0xff] %vm827_vm2, %v784_v53  ;;  %9091 = vmatmul.msk.f32.gmra.mxu1 %vm827_vm2, %v1302_v56 }
 0x23f   :  { %9187 = vmatmul.msk.f32.gmra.mxu2 %vm827_vm2, %v1204_v58 }
 0x240   :  { %9282 = vmatmul.msk.f32.gmra.mxu3 %vm827_vm2, %v2585_v59  ;;  %v605_v22 = vpop.f32.mrf.mxu0 }
 0x241   :  { %v606_v63 = vadd.f32 %v10892_v2, %v605_v22 }
 0x242   :  { %v2358_v26 = vpop.f32.mrf.mxu2 }
 0x243   :  { %v2359_v0 = vadd.f32 %v2358_v26, %v1765_v55  ;;  %v3046_v1 = vpop.f32.mrf.mxu3  ;;  %v785_v3 = vmax.f32 %v606_v63, 0.0  ;;  %v1768_v7 = vpop.f32.mrf.mxu1  ;;  %9011 = vmatmul.msk.f32.gmra.mxu0 %vm137_vm0, %v98_v62  ;;  %v102_v26 = vld [vmem:[%s14366_s0 + $0x250] sm:$0xff] }
 0x244   :  { %v11105_v4 = vadd.f32 %v3046_v1, %v2356_v51 }
 0x245   :  { %882 = vst.msk [vmem:[%s14367_s7 + $0x1b0] sm:$0xff] %vm827_vm2, %v785_v3  ;;  %v1303_v8 = vld [vmem:[#allocation2 + $0x3b0] sm:$0xff] }
 0x246   :  { %v1205_v9 = vld [vmem:[#allocation2 + $0x3af] sm:$0xff]  ;;  %1108 = vst.msk [vmem:[#allocation2 + $0x3c8] sm:$0xff] %vm827_vm2, %v785_v3  ;;  %9092 = vmatmul.msk.f32.gmra.mxu1 %vm827_vm2, %v1303_v8 }
 0x247   :  { %v2586_v11 = vld [vmem:[#allocation2 + $0x3a9] sm:$0xff]  ;;  %9188 = vmatmul.msk.f32.gmra.mxu2 %vm827_vm2, %v1205_v9  ;;  %v2587_v28 = vld [vmem:[#allocation2 + $0x3b1] sm:$0xff] }
 0x248   :  { %9283 = vmatmul.msk.f32.gmra.mxu3 %vm827_vm2, %v2586_v11  ;;  %v608_v12 = vpop.f32.mrf.mxu0 }
 0x249   :  { %v609_v14 = vadd.f32 %v10892_v2, %v608_v12 }
 0x24a   :  { %v2361_v15 = vpop.f32.mrf.mxu2 }
 0x24b   :  { %v2362_v16 = vadd.f32 %v2361_v15, %v1768_v7  ;;  %v3049_v17 = vpop.f32.mrf.mxu3  ;;  %v786_v20 = vmax.f32 %v609_v14, 0.0  ;;  %v1771_v23 = vpop.f32.mrf.mxu1  ;;  %9012 = vmatmul.msk.f32.gmra.mxu0 %vm137_vm0, %v99_v13 }
 0x24c   :  { %v11120_v21 = vadd.f32 %v3049_v17, %v2359_v0 }
 0x24d   :  { %883 = vst.msk [vmem:[%s14367_s7 + $0x1b8] sm:$0xff] %vm827_vm2, %v786_v20  ;;  %v1304_v24 = vld [vmem:[#allocation2 + $0x3c8] sm:$0xff] }
 0x24e   :  { %v1206_v27 = vld [vmem:[#allocation2 + $0x3c7] sm:$0xff]  ;;  %1109 = vst.msk [vmem:[#allocation2 + $0x3d0] sm:$0xff] %vm827_vm2, %v786_v20  ;;  %9093 = vmatmul.msk.f32.gmra.mxu1 %vm827_vm2, %v1304_v24 }
 0x24f   :  { %9189 = vmatmul.msk.f32.gmra.mxu2 %vm827_vm2, %v1206_v27 }
 0x250   :  { %9284 = vmatmul.msk.f32.gmra.mxu3 %vm827_vm2, %v2587_v28  ;;  %v611_v31 = vpop.f32.mrf.mxu0 }
 0x251   :  { %v612_v35 = vadd.f32 %v10892_v2, %v611_v31 }
 0x252   :  { %v2364_v36 = vpop.f32.mrf.mxu2 }
 0x253   :  { %v2365_v37 = vadd.f32 %v2364_v36, %v1771_v23  ;;  %v3052_v38 = vpop.f32.mrf.mxu3  ;;  %v787_v39 = vmax.f32 %v612_v35, 0.0  ;;  %v1774_v42 = vpop.f32.mrf.mxu1  ;;  %9013 = vmatmul.msk.f32.gmra.mxu0 %vm137_vm0, %v100_v32  ;;  %v104_v36 = vld [vmem:[%s14366_s0 + $0x260] sm:$0xff] }
 0x254   :  { %v11141_v41 = vadd.f32 %v3052_v38, %v2362_v16  ;;  %v103_v16 = vld [vmem:[%s14366_s0 + $0x258] sm:$0xff] }
 0x255   :  { %884 = vst.msk [vmem:[%s14367_s7 + $0x1c0] sm:$0xff] %vm827_vm2, %v787_v39  ;;  %v1305_v43 = vld [vmem:[#allocation2 + $0x3d0] sm:$0xff] }
 0x256   :  { %v1207_v44 = vld [vmem:[#allocation2 + $0x3cf] sm:$0xff]  ;;  %1110 = vst.msk [vmem:[#allocation2 + $0x3e8] sm:$0xff] %vm827_vm2, %v787_v39  ;;  %9094 = vmatmul.msk.f32.gmra.mxu1 %vm827_vm2, %v1305_v43 }
 0x257   :  { %v2588_v46 = vld [vmem:[#allocation2 + $0x3c9] sm:$0xff]  ;;  %9190 = vmatmul.msk.f32.gmra.mxu2 %vm827_vm2, %v1207_v44  ;;  %v2589_v62 = vld [vmem:[#allocation2 + $0x3d1] sm:$0xff] }
 0x258   :  { %9285 = vmatmul.msk.f32.gmra.mxu3 %vm827_vm2, %v2588_v46  ;;  %v614_v48 = vpop.f32.mrf.mxu0 }
 0x259   :  { %v615_v50 = vadd.f32 %v10892_v2, %v614_v48 }
 0x25a   :  { %v2367_v51 = vpop.f32.mrf.mxu2 }
 0x25b   :  { %v2368_v52 = vadd.f32 %v2367_v51, %v1774_v42  ;;  %v3055_v53 = vpop.f32.mrf.mxu3  ;;  %v788_v55 = vmax.f32 %v615_v50, 0.0  ;;  %v1777_v58 = vpop.f32.mrf.mxu1  ;;  %9014 = vmatmul.msk.f32.gmra.mxu0 %vm137_vm0, %v101_v49 }
 0x25c   :  { %v11156_v56 = vadd.f32 %v3055_v53, %v2365_v37 }
 0x25d   :  { %885 = vst.msk [vmem:[%s14367_s7 + $0x1c8] sm:$0xff] %vm827_vm2, %v788_v55  ;;  %v1306_v59 = vld [vmem:[#allocation2 + $0x3e8] sm:$0xff] }
 0x25e   :  { %v1208_v22 = vld [vmem:[#allocation2 + $0x3e7] sm:$0xff]  ;;  %1111 = vst.msk [vmem:[#allocation2 + $0x3f0] sm:$0xff] %vm827_vm2, %v788_v55  ;;  %9095 = vmatmul.msk.f32.gmra.mxu1 %vm827_vm2, %v1306_v59 }
 0x25f   :  { %9191 = vmatmul.msk.f32.gmra.mxu2 %vm827_vm2, %v1208_v22 }
 0x260   :  { %9286 = vmatmul.msk.f32.gmra.mxu3 %vm827_vm2, %v2589_v62  ;;  %v617_v63 = vpop.f32.mrf.mxu0 }
 0x261   :  { %v618_v0 = vadd.f32 %v10892_v2, %v617_v63 }
 0x262   :  { %v2370_v1 = vpop.f32.mrf.mxu2 }
 0x263   :  { %v2371_v3 = vadd.f32 %v2370_v1, %v1777_v58  ;;  %v3058_v7 = vpop.f32.mrf.mxu3  ;;  %v789_v8 = vmax.f32 %v618_v0, 0.0  ;;  %v1780_v11 = vpop.f32.mrf.mxu1  ;;  %9015 = vmatmul.msk.f32.gmra.mxu0 %vm137_vm0, %v102_v26 }
 0x264   :  { %v11171_v9 = vadd.f32 %v3058_v7, %v2368_v52  ;;  %v105_v52 = vld [vmem:[%s14366_s0 + $0x268] sm:$0xff]  ;;  %v106_v7 = vld [vmem:[%s14366_s0 + $0x270] sm:$0xff] }
 0x265   :  { %886 = vst.msk [vmem:[%s14367_s7 + $0x1d0] sm:$0xff] %vm827_vm2, %v789_v8  ;;  %v1307_v12 = vld [vmem:[#allocation2 + $0x3f0] sm:$0xff] }
 0x266   :  { %v1209_v13 = vld [vmem:[#allocation2 + $0x3ef] sm:$0xff]  ;;  %1112 = vst.msk [vmem:[#allocation2 + $0x408] sm:$0xff] %vm827_vm2, %v789_v8  ;;  %9096 = vmatmul.msk.f32.gmra.mxu1 %vm827_vm2, %v1307_v12 }
 0x267   :  { %v2590_v14 = vld [vmem:[#allocation2 + $0x3e9] sm:$0xff]  ;;  %9192 = vmatmul.msk.f32.gmra.mxu2 %vm827_vm2, %v1209_v13  ;;  %v2591_v32 = vld [vmem:[#allocation2 + $0x3f1] sm:$0xff] }
 0x268   :  { %9287 = vmatmul.msk.f32.gmra.mxu3 %vm827_vm2, %v2590_v14  ;;  %v620_v15 = vpop.f32.mrf.mxu0 }
 0x269   :  { %v621_v17 = vadd.f32 %v10892_v2, %v620_v15 }
 0x26a   :  { %v2373_v20 = vpop.f32.mrf.mxu2 }
 0x26b   :  { %v2374_v23 = vadd.f32 %v2373_v20, %v1780_v11  ;;  %v3061_v24 = vpop.f32.mrf.mxu3  ;;  %v790_v27 = vmax.f32 %v621_v17, 0.0  ;;  %v1783_v29 = vpop.f32.mrf.mxu1  ;;  %9016 = vmatmul.msk.f32.gmra.mxu0 %vm137_vm0, %v103_v16 }
 0x26c   :  { %v11186_v28 = vadd.f32 %v3061_v24, %v2371_v3 }
 0x26d   :  { %887 = vst.msk [vmem:[%s14367_s7 + $0x1d8] sm:$0xff] %vm827_vm2, %v790_v27  ;;  %v1308_v30 = vld [vmem:[#allocation2 + $0x408] sm:$0xff] }
 0x26e   :  { %v1210_v31 = vld [vmem:[#allocation2 + $0x407] sm:$0xff]  ;;  %1113 = vst.msk [vmem:[#allocation2 + $0x410] sm:$0xff] %vm827_vm2, %v790_v27  ;;  %9097 = vmatmul.msk.f32.gmra.mxu1 %vm827_vm2, %v1308_v30  ;;  %v107_v27 = vld [vmem:[%s14366_s0 + $0x278] sm:$0xff] }
 0x26f   :  { %9193 = vmatmul.msk.f32.gmra.mxu2 %vm827_vm2, %v1210_v31 }
 0x270   :  { %9288 = vmatmul.msk.f32.gmra.mxu3 %vm827_vm2, %v2591_v32  ;;  %v623_v35 = vpop.f32.mrf.mxu0 }
 0x271   :  { %v624_v37 = vadd.f32 %v10892_v2, %v623_v35 }
 0x272   :  { %v2376_v38 = vpop.f32.mrf.mxu2 }
 0x273   :  { %v2377_v39 = vadd.f32 %v2376_v38, %v1783_v29  ;;  %v3064_v42 = vpop.f32.mrf.mxu3  ;;  %v791_v43 = vmax.f32 %v624_v37, 0.0  ;;  %v1786_v46 = vpop.f32.mrf.mxu1  ;;  %9017 = vmatmul.msk.f32.gmra.mxu0 %vm137_vm0, %v104_v36  ;;  %v1312_v38 = vld [vmem:[#allocation2 + $0x488] sm:$0xff] }
 0x274   :  { %v11201_v44 = vadd.f32 %v3064_v42, %v2374_v23 }
 0x275   :  { %888 = vst.msk [vmem:[%s14367_s7 + $0x1e0] sm:$0xff] %vm827_vm2, %v791_v43  ;;  %v1309_v48 = vld [vmem:[#allocation2 + $0x410] sm:$0xff] }
 0x276   :  { %v1211_v49 = vld [vmem:[#allocation2 + $0x40f] sm:$0xff]  ;;  %1114 = vst.msk [vmem:[#allocation2 + $0x428] sm:$0xff] %vm827_vm2, %v791_v43  ;;  %9098 = vmatmul.msk.f32.gmra.mxu1 %vm827_vm2, %v1309_v48 }
 0x277   :  { %v2592_v50 = vld [vmem:[#allocation2 + $0x409] sm:$0xff]  ;;  %9194 = vmatmul.msk.f32.gmra.mxu2 %vm827_vm2, %v1211_v49  ;;  %v2593_v1 = vld [vmem:[#allocation2 + $0x411] sm:$0xff] }
 0x278   :  { %9289 = vmatmul.msk.f32.gmra.mxu3 %vm827_vm2, %v2592_v50  ;;  %v626_v51 = vpop.f32.mrf.mxu0 }
 0x279   :  { %v627_v53 = vadd.f32 %v10892_v2, %v626_v51 }
 0x27a   :  { %v2379_v55 = vpop.f32.mrf.mxu2 }
 0x27b   :  { %v2380_v58 = vadd.f32 %v2379_v55, %v1786_v46  ;;  %v3067_v59 = vpop.f32.mrf.mxu3  ;;  %v792_v22 = vmax.f32 %v627_v53, 0.0  ;;  %v1789_v63 = vpop.f32.mrf.mxu1  ;;  %9018 = vmatmul.msk.f32.gmra.mxu0 %vm137_vm0, %v105_v52  ;;  %v108_v46 = vld [vmem:[%s14366_s0 + $0x280] sm:$0xff] }
 0x27c   :  { %v11216_v62 = vadd.f32 %v3067_v59, %v2377_v39  ;;  %v1214_v39 = vld [vmem:[#allocation2 + $0x487] sm:$0xff]  ;;  %v1215_v59 = vld [vmem:[#allocation2 + $0x48f] sm:$0xff] }
 0x27d   :  { %889 = vst.msk [vmem:[%s14367_s7 + $0x1e8] sm:$0xff] %vm827_vm2, %v792_v22  ;;  %v1310_v26 = vld [vmem:[#allocation2 + $0x428] sm:$0xff] }
 0x27e   :  { %v1212_v0 = vld [vmem:[#allocation2 + $0x427] sm:$0xff]  ;;  %1115 = vst.msk [vmem:[#allocation2 + $0x430] sm:$0xff] %vm827_vm2, %v792_v22  ;;  %9099 = vmatmul.msk.f32.gmra.mxu1 %vm827_vm2, %v1310_v26 }
 0x27f   :  { %9195 = vmatmul.msk.f32.gmra.mxu2 %vm827_vm2, %v1212_v0  ;;  %v2596_v22 = vld [vmem:[#allocation2 + $0x489] sm:$0xff] }
 0x280   :  { %9290 = vmatmul.msk.f32.gmra.mxu3 %vm827_vm2, %v2593_v1  ;;  %v629_v3 = vpop.f32.mrf.mxu0  ;;  %v109_v26 = vld [vmem:[%s14366_s0 + $0x288] sm:$0xff] }
 0x281   :  { %v630_v8 = vadd.f32 %v10892_v2, %v629_v3 }
 0x282   :  { %v2382_v11 = vpop.f32.mrf.mxu2 }
 0x283   :  { %v2383_v12 = vadd.f32 %v2382_v11, %v1789_v63  ;;  %v3070_v13 = vpop.f32.mrf.mxu3  ;;  %v793_v14 = vmax.f32 %v630_v8, 0.0  ;;  %v1792_v16 = vpop.f32.mrf.mxu1  ;;  %9019 = vmatmul.msk.f32.gmra.mxu0 %vm137_vm0, %v106_v7 }
 0x284   :  { %v11231_v15 = vadd.f32 %v3070_v13, %v2380_v58  ;;  %v1313_v58 = vld [vmem:[#allocation2 + $0x490] sm:$0xff] }
 0x285   :  { %890 = vst.msk [vmem:[%s14367_s7 + $0x1f0] sm:$0xff] %vm827_vm2, %v793_v14  ;;  %v1311_v17 = vld [vmem:[#allocation2 + $0x430] sm:$0xff] }
 0x286   :  { %14373 = vst [vmem:[#allocation3_spill] sm:$0xff] %v11231_v15  ;;  %v1213_v20 = vld [vmem:[#allocation2 + $0x42f] sm:$0xff]  ;;  %9100 = vmatmul.msk.f32.gmra.mxu1 %vm827_vm2, %v1311_v17 }
 0x287   :  { %v2594_v23 = vld [vmem:[#allocation2 + $0x429] sm:$0xff]  ;;  %1116 = vst.msk [vmem:[#allocation2 + $0x448] sm:$0xff] %vm827_vm2, %v793_v14  ;;  %9196 = vmatmul.msk.f32.gmra.mxu2 %vm827_vm2, %v1213_v20  ;;  %v2595_v42 = vld [vmem:[#allocation2 + $0x431] sm:$0xff] }
 0x288   :  { %9291 = vmatmul.msk.f32.gmra.mxu3 %vm827_vm2, %v2594_v23  ;;  %v632_v24 = vpop.f32.mrf.mxu0  ;;  %v2597_v13 = vld [vmem:[#allocation2 + $0x491] sm:$0xff] }
 0x289   :  { %v633_v29 = vadd.f32 %v10892_v2, %v632_v24  ;;  %v110_v20 = vld [vmem:[%s14366_s0 + $0x290] sm:$0xff] }
 0x28a   :  { %v2385_v30 = vpop.f32.mrf.mxu2  ;;  %v11990_v15 = vld [vmem:[#allocation2 + $0xf1] sm:$0xff] }
 0x28b   :  { %v2386_v31 = vadd.f32 %v2385_v30, %v1792_v16  ;;  %v3073_v32 = vpop.f32.mrf.mxu3  ;;  %v794_v35 = vmax.f32 %v633_v29, 0.0  ;;  %v1795_v37 = vpop.f32.mrf.mxu1  ;;  %9020 = vmatmul.msk.f32.gmra.mxu0 %vm137_vm0, %v107_v27 }
 0x28c   :  { %v11246_v36 = vadd.f32 %v3073_v32, %v2383_v12 }
 0x28d   :  { %891 = vst.msk [vmem:[%s14367_s7 + $0x1f8] sm:$0xff] %vm827_vm2, %v794_v35 }
 0x28e   :  { %14374 = vst [vmem:[#allocation4_spill] sm:$0xff] %v11246_v36  ;;  %9101 = vmatmul.msk.f32.gmra.mxu1 %vm827_vm2, %v1312_v38  ;;  %v11901_v36 = vld [vmem:[#allocation2 + $0xaf] sm:$0xff] }
 0x28f   :  { %1117 = vst.msk [vmem:[#allocation2 + $0x450] sm:$0xff] %vm827_vm2, %v794_v35  ;;  %9197 = vmatmul.msk.f32.gmra.mxu2 %vm827_vm2, %v1214_v39 }
 0x290   :  { %9292 = vmatmul.msk.f32.gmra.mxu3 %vm827_vm2, %v2595_v42  ;;  %v635_v43 = vpop.f32.mrf.mxu0  ;;  %v111_v42 = vld [vmem:[%s14366_s0 + $0x298] sm:$0xff] }
 0x291   :  { %v636_v48 = vadd.f32 %v10892_v2, %v635_v43 }
 0x292   :  { %v2388_v49 = vpop.f32.mrf.mxu2 }
 0x293   :  { %v2389_v50 = vadd.f32 %v2388_v49, %v1795_v37  ;;  %v3076_v51 = vpop.f32.mrf.mxu3  ;;  %v795_v52 = vmax.f32 %v636_v48, 0.0  ;;  %v1798_v55 = vpop.f32.mrf.mxu1  ;;  %9021 = vmatmul.msk.f32.gmra.mxu0 %vm137_vm0, %v108_v46 }
 0x294   :  { %v11261_v53 = vadd.f32 %v3076_v51, %v2386_v31 }
 0x295   :  { %892 = vst.msk [vmem:[%s14367_s7 + $0x200] sm:$0xff] %vm827_vm2, %v795_v52 }
 0x296   :  { %14375 = vst [vmem:[#allocation5_spill] sm:$0xff] %v11261_v53  ;;  %9102 = vmatmul.msk.f32.gmra.mxu1 %vm827_vm2, %v1313_v58  ;;  %v11886_v53 = vld [vmem:[#allocation2 + $0xa7] sm:$0xff] }
 0x297   :  { %1118 = vst.msk [vmem:[#allocation2 + $0x4a8] sm:$0xff] %vm827_vm2, %v795_v52  ;;  %9198 = vmatmul.msk.f32.gmra.mxu2 %vm827_vm2, %v1215_v59 }
 0x298   :  { %9293 = vmatmul.msk.f32.gmra.mxu3 %vm827_vm2, %v2596_v22  ;;  %v638_v63 = vpop.f32.mrf.mxu0 }
 0x299   :  { %v639_v0 = vadd.f32 %v10892_v2, %v638_v63  ;;  %v112_v63 = vld [vmem:[%s14366_s0 + $0x2a0] sm:$0xff] }
 0x29a   :  { %v2391_v1 = vpop.f32.mrf.mxu2 }
 0x29b   :  { %v2392_v3 = vadd.f32 %v2391_v1, %v1798_v55  ;;  %v3079_v7 = vpop.f32.mrf.mxu3  ;;  %v796_v8 = vmax.f32 %v639_v0, 0.0  ;;  %v1801_v12 = vpop.f32.mrf.mxu1  ;;  %9022 = vmatmul.msk.f32.gmra.mxu0 %vm137_vm0, %v109_v26 }
 0x29c   :  { %v11276_v11 = vadd.f32 %v3079_v7, %v2389_v50 }
 0x29d   :  { %893 = vst.msk [vmem:[%s14367_s7 + $0x208] sm:$0xff] %vm827_vm2, %v796_v8 }
 0x29e   :  { %14376 = vst [vmem:[#allocation6_spill] sm:$0xff] %v11276_v11  ;;  %v1314_v14 = vld [vmem:[#allocation2 + $0x4a8] sm:$0xff] }
 0x29f   :  { %v1216_v16 = vld [vmem:[#allocation2 + $0x4a7] sm:$0xff]  ;;  %1119 = vst.msk [vmem:[#allocation2 + $0x4b0] sm:$0xff] %vm827_vm2, %v796_v8  ;;  %9103 = vmatmul.msk.f32.gmra.mxu1 %vm827_vm2, %v1314_v14 }
 0x2a0   :  { %9199 = vmatmul.msk.f32.gmra.mxu2 %vm827_vm2, %v1216_v16  ;;  %9294 = vmatmul.msk.f32.gmra.mxu3 %vm827_vm2, %v2597_v13  ;;  %v641_v17 = vpop.f32.mrf.mxu0 }
 0x2a1   :  { %v642_v23 = vadd.f32 %v10892_v2, %v641_v17  ;;  %v113_v17 = vld [vmem:[%s14366_s0 + $0x2a8] sm:$0xff] }
 0x2a2   :  { %v2394_v24 = vpop.f32.mrf.mxu2 }
 0x2a3   :  { %v2395_v27 = vadd.f32 %v2394_v24, %v1801_v12  ;;  %v3082_v29 = vpop.f32.mrf.mxu3  ;;  %v797_v30 = vmax.f32 %v642_v23, 0.0  ;;  %v1804_v32 = vpop.f32.mrf.mxu1  ;;  %9023 = vmatmul.msk.f32.gmra.mxu0 %vm137_vm0, %v110_v20  ;;  %v11338_v20 = vld [vmem:[%s14365_s2] ss:$0 sm:$0xff] }
 0x2a4   :  { %v11291_v31 = vadd.f32 %v3082_v29, %v2392_v3 }
 0x2a5   :  { %894 = vst.msk [vmem:[%s14367_s7 + $0x210] sm:$0xff] %vm827_vm2, %v797_v30 }
 0x2a6   :  { %14377 = vst [vmem:[#allocation7_spill] sm:$0xff] %v11291_v31  ;;  %v1315_v35 = vld [vmem:[#allocation2 + $0x4b0] sm:$0xff] }
 0x2a7   :  { %v1217_v37 = vld [vmem:[#allocation2 + $0x4af] sm:$0xff]  ;;  %1120 = vst.msk [vmem:[#allocation2 + $0x4c8] sm:$0xff] %vm827_vm2, %v797_v30  ;;  %9104 = vmatmul.msk.f32.gmra.mxu1 %vm827_vm2, %v1315_v35 }
 0x2a8   :  { %v2598_v38 = vld [vmem:[#allocation2 + $0x4a9] sm:$0xff]  ;;  %9200 = vmatmul.msk.f32.gmra.mxu2 %vm827_vm2, %v1217_v37  ;;  %v644_v39 = vpop.f32.mrf.mxu0  ;;  %v2599_v59 = vld [vmem:[#allocation2 + $0x4b1] sm:$0xff] }
 0x2a9   :  { %9295 = vmatmul.msk.f32.gmra.mxu3 %vm827_vm2, %v2598_v38  ;;  %v645_v43 = vadd.f32 %v10892_v2, %v644_v39  ;;  %v11871_v31 = vld [vmem:[#allocation2 + $0x8f] sm:$0xff] }
 0x2aa   :  { %v2397_v46 = vpop.f32.mrf.mxu2 }
 0x2ab   :  { %v2398_v48 = vadd.f32 %v2397_v46, %v1804_v32  ;;  %v3085_v49 = vpop.f32.mrf.mxu3  ;;  %v798_v50 = vmax.f32 %v645_v43, 0.0  ;;  %v1807_v52 = vpop.f32.mrf.mxu1  ;;  %9024 = vmatmul.msk.f32.gmra.mxu0 %vm137_vm0, %v111_v42  ;;  %v114_v43 = vld [vmem:[%s14366_s0 + $0x2b0] sm:$0xff] }
 0x2ac   :  { %v11306_v51 = vadd.f32 %v3085_v49, %v2395_v27 }
 0x2ad   :  { %895 = vst.msk [vmem:[%s14367_s7 + $0x218] sm:$0xff] %vm827_vm2, %v798_v50 }
 0x2ae   :  { %14378 = vst [vmem:[#allocation8_spill] sm:$0xff] %v11306_v51  ;;  %v1316_v55 = vld [vmem:[#allocation2 + $0x4c8] sm:$0xff] }
 0x2af   :  { %v1218_v58 = vld [vmem:[#allocation2 + $0x4c7] sm:$0xff]  ;;  %1121 = vst.msk [vmem:[#allocation2 + $0x4d0] sm:$0xff] %vm827_vm2, %v798_v50  ;;  %9105 = vmatmul.msk.f32.gmra.mxu1 %vm827_vm2, %v1316_v55 }
 0x2b0   :  { %9201 = vmatmul.msk.f32.gmra.mxu2 %vm827_vm2, %v1218_v58  ;;  %v647_v22 = vpop.f32.mrf.mxu0 }
 0x2b1   :  { %9296 = vmatmul.msk.f32.gmra.mxu3 %vm827_vm2, %v2599_v59  ;;  %v648_v26 = vadd.f32 %v10892_v2, %v647_v22 }
 0x2b2   :  { %v2400_v0 = vpop.f32.mrf.mxu2 }
 0x2b3   :  { %v2401_v1 = vadd.f32 %v2400_v0, %v1807_v52  ;;  %v3088_v3 = vpop.f32.mrf.mxu3  ;;  %v799_v7 = vmax.f32 %v648_v26, 0.0  ;;  %v1810_v12 = vpop.f32.mrf.mxu1  ;;  %9025 = vmatmul.msk.f32.gmra.mxu0 %vm137_vm0, %v112_v63  ;;  %v115_v0 = vld [vmem:[%s14366_s0 + $0x2b8] sm:$0xff] }
 0x2b4   :  { %v11321_v8 = vadd.f32 %v3088_v3, %v2398_v48 }
 0x2b5   :  { %896 = vst.msk [vmem:[%s14367_s7 + $0x220] sm:$0xff] %vm827_vm2, %v799_v7 }
 0x2b6   :  { %14379 = vst [vmem:[#allocation9_spill] sm:$0xff] %v11321_v8  ;;  %v1317_v13 = vld [vmem:[#allocation2 + $0x4d0] sm:$0xff]  ;;  %v11853_v8 = vld [vmem:[#allocation2 + $0x87] sm:$0xff] }
 0x2b7   :  { %v1219_v14 = vld [vmem:[#allocation2 + $0x4cf] sm:$0xff]  ;;  %1122 = vst.msk [vmem:[#allocation2 + $0x4e8] sm:$0xff] %vm827_vm2, %v799_v7  ;;  %9106 = vmatmul.msk.f32.gmra.mxu1 %vm827_vm2, %v1317_v13 }
 0x2b8   :  { %v2600_v16 = vld [vmem:[#allocation2 + $0x4c9] sm:$0xff]  ;;  %9202 = vmatmul.msk.f32.gmra.mxu2 %vm827_vm2, %v1219_v14  ;;  %v650_v2 = vpop.f32.mrf.mxu0  ;;  %v2601_v39 = vld [vmem:[#allocation2 + $0x4d1] sm:$0xff] }
 0x2b9   :  { %9297 = vmatmul.msk.f32.gmra.mxu3 %vm827_vm2, %v2600_v16  ;;  %v651_v23 = vadd.f32 %v11338_v20, %v650_v2 }
 0x2ba   :  { %v2403_v24 = vpop.f32.mrf.mxu2 }
 0x2bb   :  { %v2404_v27 = vadd.f32 %v2403_v24, %v1810_v12  ;;  %v3091_v29 = vpop.f32.mrf.mxu3  ;;  %v800_v30 = vmax.f32 %v651_v23, 0.0  ;;  %v1813_v35 = vpop.f32.mrf.mxu1  ;;  %9026 = vmatmul.msk.f32.gmra.mxu0 %vm137_vm0, %v113_v17 }
 0x2bc   :  { %v11341_v32 = vadd.f32 %v3091_v29, %v2401_v1 }
 0x2bd   :  { %897 = vst.msk [vmem:[%s14367_s7 + $0x228] sm:$0xff] %vm827_vm2, %v800_v30 }
 0x2be   :  { %14380 = vst [vmem:[#allocation10_spill] sm:$0xff] %v11341_v32  ;;  %v1318_v37 = vld [vmem:[#allocation2 + $0x4e8] sm:$0xff] }
 0x2bf   :  { %v1220_v38 = vld [vmem:[#allocation2 + $0x4e7] sm:$0xff]  ;;  %1123 = vst.msk [vmem:[#allocation2 + $0x4f0] sm:$0xff] %vm827_vm2, %v800_v30  ;;  %9107 = vmatmul.msk.f32.gmra.mxu1 %vm827_vm2, %v1318_v37 }
 0x2c0   :  { %9203 = vmatmul.msk.f32.gmra.mxu2 %vm827_vm2, %v1220_v38  ;;  %v653_v42 = vpop.f32.mrf.mxu0 }
 0x2c1   :  { %9298 = vmatmul.msk.f32.gmra.mxu3 %vm827_vm2, %v2601_v39  ;;  %v654_v46 = vadd.f32 %v11338_v20, %v653_v42 }
 0x2c2   :  { %v2406_v48 = vpop.f32.mrf.mxu2 }
 0x2c3   :  { %v2407_v49 = vadd.f32 %v2406_v48, %v1813_v35  ;;  %v3094_v50 = vpop.f32.mrf.mxu3  ;;  %v801_v52 = vmax.f32 %v654_v46, 0.0  ;;  %v1816_v58 = vpop.f32.mrf.mxu1  ;;  %9027 = vmatmul.msk.f32.gmra.mxu0 %vm137_vm0, %v114_v43 }
 0x2c4   :  { %v11356_v55 = vadd.f32 %v3094_v50, %v2404_v27  ;;  %v116_v27 = vld [vmem:[%s14366_s0 + $0x2c0] sm:$0xff] }
 0x2c5   :  { %898 = vst.msk [vmem:[%s14367_s7 + $0x230] sm:$0xff] %vm827_vm2, %v801_v52 }
 0x2c6   :  { %14381 = vst [vmem:[#allocation11_spill] sm:$0xff] %v11356_v55  ;;  %v1319_v59 = vld [vmem:[#allocation2 + $0x4f0] sm:$0xff] }
 0x2c7   :  { %v1221_v22 = vld [vmem:[#allocation2 + $0x4ef] sm:$0xff]  ;;  %1124 = vst.msk [vmem:[#allocation2 + $0x508] sm:$0xff] %vm827_vm2, %v801_v52  ;;  %9108 = vmatmul.msk.f32.gmra.mxu1 %vm827_vm2, %v1319_v59 }
 0x2c8   :  { %v2602_v63 = vld [vmem:[#allocation2 + $0x4e9] sm:$0xff]  ;;  %9204 = vmatmul.msk.f32.gmra.mxu2 %vm827_vm2, %v1221_v22  ;;  %v656_v26 = vpop.f32.mrf.mxu0  ;;  %v2603_v23 = vld [vmem:[#allocation2 + $0x4f1] sm:$0xff] }
 0x2c9   :  { %9299 = vmatmul.msk.f32.gmra.mxu3 %vm827_vm2, %v2602_v63  ;;  %v657_v1 = vadd.f32 %v11338_v20, %v656_v26  ;;  %v117_v52 = vld [vmem:[%s14366_s0 + $0x2c8] sm:$0xff] }
 0x2ca   :  { %v2409_v3 = vpop.f32.mrf.mxu2  ;;  %v11835_v55 = vld [vmem:[#allocation2 + $0x6f] sm:$0xff] }
 0x2cb   :  { %v2410_v7 = vadd.f32 %v2409_v3, %v1816_v58  ;;  %v3097_v12 = vpop.f32.mrf.mxu3  ;;  %v802_v13 = vmax.f32 %v657_v1, 0.0  ;;  %v1819_v16 = vpop.f32.mrf.mxu1  ;;  %9028 = vmatmul.msk.f32.gmra.mxu0 %vm137_vm0, %v115_v0 }
 0x2cc   :  { %v11371_v14 = vadd.f32 %v3097_v12, %v2407_v49  ;;  %v4989_v49 = vld [vmem:[%s14368_s3 + $0x50] sm:$0xff] }
 0x2cd   :  { %899 = vst.msk [vmem:[%s14367_s7 + $0x238] sm:$0xff] %vm827_vm2, %v802_v13  ;;  %5294 = vmatpush.msrb.mxu3 %v4989_v49 }
 0x2ce   :  { %14382 = vst [vmem:[#allocation12_spill] sm:$0xff] %v11371_v14  ;;  %v1320_v2 = vld [vmem:[#allocation2 + $0x508] sm:$0xff] }
 0x2cf   :  { %v1222_v17 = vld [vmem:[#allocation2 + $0x507] sm:$0xff]  ;;  %1125 = vst.msk [vmem:[#allocation2 + $0x510] sm:$0xff] %vm827_vm2, %v802_v13  ;;  %9109 = vmatmul.msk.f32.gmra.mxu1 %vm827_vm2, %v1320_v2 }
 0x2d0   :  { %9205 = vmatmul.msk.f32.gmra.mxu2 %vm827_vm2, %v1222_v17  ;;  %v659_v24 = vpop.f32.mrf.mxu0 }
 0x2d1   :  { %9300 = vmatmul.msk.f32.gmra.mxu3 %vm827_vm2, %v2603_v23  ;;  %v660_v29 = vadd.f32 %v11338_v20, %v659_v24 }
 0x2d2   :  { %v2412_v30 = vpop.f32.mrf.mxu2 }
 0x2d3   :  { %v2413_v35 = vadd.f32 %v2412_v30, %v1819_v16  ;;  %v3100_v37 = vpop.f32.mrf.mxu3  ;;  %v803_v38 = vmax.f32 %v660_v29, 0.0  ;;  %v1822_v42 = vpop.f32.mrf.mxu1  ;;  %9029 = vmatmul.msk.f32.gmra.mxu0 %vm137_vm0, %v116_v27  ;;  %v118_v16 = vld [vmem:[%s14366_s0 + $0x2d0] sm:$0xff] }
 0x2d4   :  { %v11386_v39 = vadd.f32 %v3100_v37, %v2410_v7 }
 0x2d5   :  { %900 = vst.msk [vmem:[%s14367_s7 + $0x240] sm:$0xff] %vm827_vm2, %v803_v38 }
 0x2d6   :  { %14383 = vst [vmem:[#allocation13_spill] sm:$0xff] %v11386_v39  ;;  %v1321_v43 = vld [vmem:[#allocation2 + $0x510] sm:$0xff]  ;;  %v11817_v39 = vld [vmem:[#allocation2 + $0x67] sm:$0xff] }
 0x2d7   :  { %v1223_v46 = vld [vmem:[#allocation2 + $0x50f] sm:$0xff]  ;;  %1126 = vst.msk [vmem:[#allocation2 + $0x528] sm:$0xff] %vm827_vm2, %v803_v38  ;;  %9110 = vmatmul.msk.f32.gmra.mxu1 %vm827_vm2, %v1321_v43  ;;  %v119_v43 = vld [vmem:[%s14366_s0 + $0x2d8] sm:$0xff] }
 0x2d8   :  { %v2604_v48 = vld [vmem:[#allocation2 + $0x509] sm:$0xff]  ;;  %9206 = vmatmul.msk.f32.gmra.mxu2 %vm827_vm2, %v1223_v46  ;;  %v662_v50 = vpop.f32.mrf.mxu0  ;;  %v2605_v12 = vld [vmem:[#allocation2 + $0x511] sm:$0xff] }
 0x2d9   :  { %9301 = vmatmul.msk.f32.gmra.mxu3 %vm827_vm2, %v2604_v48  ;;  %v663_v58 = vadd.f32 %v11338_v20, %v662_v50 }
 0x2da   :  { %v2415_v59 = vpop.f32.mrf.mxu2 }
 0x2db   :  { %v2416_v22 = vadd.f32 %v2415_v59, %v1822_v42  ;;  %v3103_v63 = vpop.f32.mrf.mxu3  ;;  %v804_v26 = vmax.f32 %v663_v58, 0.0  ;;  %v1825_v1 = vpop.f32.mrf.mxu1  ;;  %9030 = vmatmul.msk.f32.gmra.mxu0 %vm137_vm0, %v117_v52 }
 0x2dc   :  { %v11404_v0 = vadd.f32 %v3103_v63, %v2413_v35 }
 0x2dd   :  { %901 = vst.msk [vmem:[%s14367_s7 + $0x248] sm:$0xff] %vm827_vm2, %v804_v26 }
 0x2de   :  { %14384 = vst [vmem:[#allocation14_spill] sm:$0xff] %v11404_v0  ;;  %v1322_v3 = vld [vmem:[#allocation2 + $0x528] sm:$0xff] }
 0x2df   :  { %v1224_v7 = vld [vmem:[#allocation2 + $0x527] sm:$0xff]  ;;  %1127 = vst.msk [vmem:[#allocation2 + $0x530] sm:$0xff] %vm827_vm2, %v804_v26  ;;  %9111 = vmatmul.msk.f32.gmra.mxu1 %vm827_vm2, %v1322_v3 }
 0x2e0   :  { %9207 = vmatmul.msk.f32.gmra.mxu2 %vm827_vm2, %v1224_v7  ;;  %v665_v13 = vpop.f32.mrf.mxu0  ;;  %v120_v3 = vld [vmem:[%s14366_s0 + $0x2e0] sm:$0xff] }
 0x2e1   :  { %9302 = vmatmul.msk.f32.gmra.mxu3 %vm827_vm2, %v2605_v12  ;;  %v666_v2 = vadd.f32 %v11338_v20, %v665_v13 }
 0x2e2   :  { %v2418_v17 = vpop.f32.mrf.mxu2 }
 0x2e3   :  { %v2419_v23 = vadd.f32 %v2418_v17, %v1825_v1  ;;  %v3106_v24 = vpop.f32.mrf.mxu3  ;;  %v805_v27 = vmax.f32 %v666_v2, 0.0  ;;  %v1828_v30 = vpop.f32.mrf.mxu1  ;;  %9031 = vmatmul.msk.f32.gmra.mxu0 %vm137_vm0, %v118_v16 }
 0x2e4   :  { %v11419_v29 = vadd.f32 %v3106_v24, %v2416_v22 }
 0x2e5   :  { %902 = vst.msk [vmem:[%s14367_s7 + $0x250] sm:$0xff] %vm827_vm2, %v805_v27 }
 0x2e6   :  { %14385 = vst [vmem:[#allocation15_spill] sm:$0xff] %v11419_v29  ;;  %v1323_v35 = vld [vmem:[#allocation2 + $0x530] sm:$0xff] }
 0x2e7   :  { %v1225_v37 = vld [vmem:[#allocation2 + $0x52f] sm:$0xff]  ;;  %1128 = vst.msk [vmem:[#allocation2 + $0x548] sm:$0xff] %vm827_vm2, %v805_v27  ;;  %9112 = vmatmul.msk.f32.gmra.mxu1 %vm827_vm2, %v1323_v35 }
 0x2e8   :  { %v2606_v38 = vld [vmem:[#allocation2 + $0x529] sm:$0xff]  ;;  %9208 = vmatmul.msk.f32.gmra.mxu2 %vm827_vm2, %v1225_v37  ;;  %v668_v42 = vpop.f32.mrf.mxu0  ;;  %v2607_v26 = vld [vmem:[#allocation2 + $0x531] sm:$0xff] }
 0x2e9   :  { %9303 = vmatmul.msk.f32.gmra.mxu3 %vm827_vm2, %v2606_v38  ;;  %v669_v46 = vadd.f32 %v11338_v20, %v668_v42  ;;  %v121_v37 = vld [vmem:[%s14366_s0 + $0x2e8] sm:$0xff] }
 0x2ea   :  { %v2421_v48 = vpop.f32.mrf.mxu2 }
 0x2eb   :  { %v2422_v49 = vadd.f32 %v2421_v48, %v1828_v30  ;;  %v3109_v50 = vpop.f32.mrf.mxu3  ;;  %v806_v52 = vmax.f32 %v669_v46, 0.0  ;;  %v1831_v59 = vpop.f32.mrf.mxu1  ;;  %9032 = vmatmul.msk.f32.gmra.mxu0 %vm137_vm0, %v119_v43 }
 0x2ec   :  { %v11434_v58 = vadd.f32 %v3109_v50, %v2419_v23 }
 0x2ed   :  { %903 = vst.msk [vmem:[%s14367_s7 + $0x258] sm:$0xff] %vm827_vm2, %v806_v52 }
 0x2ee   :  { %14386 = vst [vmem:[#allocation16_spill] sm:$0xff] %v11434_v58  ;;  %v1324_v22 = vld [vmem:[#allocation2 + $0x548] sm:$0xff] }
 0x2ef   :  { %v1226_v63 = vld [vmem:[#allocation2 + $0x547] sm:$0xff]  ;;  %1129 = vst.msk [vmem:[#allocation2 + $0x550] sm:$0xff] %vm827_vm2, %v806_v52  ;;  %9113 = vmatmul.msk.f32.gmra.mxu1 %vm827_vm2, %v1324_v22 }
 0x2f0   :  { %9209 = vmatmul.msk.f32.gmra.mxu2 %vm827_vm2, %v1226_v63  ;;  %v671_v1 = vpop.f32.mrf.mxu0 }
 0x2f1   :  { %9304 = vmatmul.msk.f32.gmra.mxu3 %vm827_vm2, %v2607_v26  ;;  %v672_v7 = vadd.f32 %v11338_v20, %v671_v1  ;;  %v122_v26 = vld [vmem:[%s14366_s0 + $0x2f0] sm:$0xff] }
 0x2f2   :  { %v2424_v12 = vpop.f32.mrf.mxu2 }
 0x2f3   :  { %v2425_v13 = vadd.f32 %v2424_v12, %v1831_v59  ;;  %v3112_v16 = vpop.f32.mrf.mxu3  ;;  %v807_v2 = vmax.f32 %v672_v7, 0.0  ;;  %v1834_v23 = vpop.f32.mrf.mxu1  ;;  %9033 = vmatmul.msk.f32.gmra.mxu0 %vm137_vm0, %v120_v3 }
 0x2f4   :  { %v11449_v17 = vadd.f32 %v3112_v16, %v2422_v49 }
 0x2f5   :  { %904 = vst.msk [vmem:[%s14367_s7 + $0x260] sm:$0xff] %vm827_vm2, %v807_v2 }
 0x2f6   :  { %14387 = vst [vmem:[#allocation17_spill] sm:$0xff] %v11449_v17  ;;  %v1325_v24 = vld [vmem:[#allocation2 + $0x550] sm:$0xff] }
 0x2f7   :  { %v1227_v27 = vld [vmem:[#allocation2 + $0x54f] sm:$0xff]  ;;  %1130 = vst.msk [vmem:[#allocation2 + $0x568] sm:$0xff] %vm827_vm2, %v807_v2  ;;  %9114 = vmatmul.msk.f32.gmra.mxu1 %vm827_vm2, %v1325_v24 }
 0x2f8   :  { %v2608_v30 = vld [vmem:[#allocation2 + $0x549] sm:$0xff]  ;;  %9210 = vmatmul.msk.f32.gmra.mxu2 %vm827_vm2, %v1227_v27  ;;  %v674_v35 = vpop.f32.mrf.mxu0  ;;  %v2609_v22 = vld [vmem:[#allocation2 + $0x551] sm:$0xff] }
 0x2f9   :  { %9305 = vmatmul.msk.f32.gmra.mxu3 %vm827_vm2, %v2608_v30  ;;  %v675_v38 = vadd.f32 %v11338_v20, %v674_v35  ;;  %v123_v35 = vld [vmem:[%s14366_s0 + $0x2f8] sm:$0xff] }
 0x2fa   :  { %v2427_v42 = vpop.f32.mrf.mxu2 }
 0x2fb   :  { %v2428_v43 = vadd.f32 %v2427_v42, %v1834_v23  ;;  %v3115_v46 = vpop.f32.mrf.mxu3  ;;  %v808_v48 = vmax.f32 %v675_v38, 0.0  ;;  %v1837_v50 = vpop.f32.mrf.mxu1  ;;  %9034 = vmatmul.msk.f32.gmra.mxu0 %vm137_vm0, %v121_v37 }
 0x2fc   :  { %v11464_v49 = vadd.f32 %v3115_v46, %v2425_v13 }
 0x2fd   :  { %905 = vst.msk [vmem:[%s14367_s7 + $0x268] sm:$0xff] %vm827_vm2, %v808_v48 }
 0x2fe   :  { %14388 = vst [vmem:[#allocation18_spill] sm:$0xff] %v11464_v49  ;;  %v1326_v52 = vld [vmem:[#allocation2 + $0x568] sm:$0xff] }
 0x2ff   :  { %v1228_v59 = vld [vmem:[#allocation2 + $0x567] sm:$0xff]  ;;  %1131 = vst.msk [vmem:[#allocation2 + $0x570] sm:$0xff] %vm827_vm2, %v808_v48  ;;  %9115 = vmatmul.msk.f32.gmra.mxu1 %vm827_vm2, %v1326_v52 }
 0x300   :  { %9211 = vmatmul.msk.f32.gmra.mxu2 %vm827_vm2, %v1228_v59  ;;  %v677_v63 = vpop.f32.mrf.mxu0 }
 0x301   :  { %9306 = vmatmul.msk.f32.gmra.mxu3 %vm827_vm2, %v2609_v22  ;;  %v678_v1 = vadd.f32 %v11338_v20, %v677_v63 }
 0x302   :  { %v2430_v3 = vpop.f32.mrf.mxu2 }
 0x303   :  { %v2431_v7 = vadd.f32 %v2430_v3, %v1837_v50  ;;  %v3118_v12 = vpop.f32.mrf.mxu3  ;;  %v809_v13 = vmax.f32 %v678_v1, 0.0  ;;  %v1840_v2 = vpop.f32.mrf.mxu1  ;;  %9035 = vmatmul.msk.f32.gmra.mxu0 %vm137_vm0, %v122_v26  ;;  %v1248_v26 = vld [vmem:[#allocation2 + $0x8] sm:$0xff] }
 0x304   :  { %v11479_v16 = vadd.f32 %v3118_v12, %v2428_v43 }
 0x305   :  { %906 = vst.msk [vmem:[%s14367_s7 + $0x270] sm:$0xff] %vm827_vm2, %v809_v13 }
 0x306   :  { %14389 = vst [vmem:[#allocation19_spill] sm:$0xff] %v11479_v16  ;;  %v1327_v23 = vld [vmem:[#allocation2 + $0x570] sm:$0xff] }
 0x307   :  { %v1229_v24 = vld [vmem:[#allocation2 + $0x56f] sm:$0xff]  ;;  %1132 = vst.msk [vmem:[#allocation2 + $0x588] sm:$0xff] %vm827_vm2, %v809_v13  ;;  %9116 = vmatmul.msk.f32.gmra.mxu1 %vm827_vm2, %v1327_v23 }
 0x308   :  { %v2610_v27 = vld [vmem:[#allocation2 + $0x569] sm:$0xff]  ;;  %9212 = vmatmul.msk.f32.gmra.mxu2 %vm827_vm2, %v1229_v24  ;;  %v680_v30 = vpop.f32.mrf.mxu0  ;;  %v2611_v22 = vld [vmem:[#allocation2 + $0x571] sm:$0xff] }
 0x309   :  { %9307 = vmatmul.msk.f32.gmra.mxu3 %vm827_vm2, %v2610_v27  ;;  %v681_v37 = vadd.f32 %v11338_v20, %v680_v30  ;;  %v10009_v24 = vld [vmem:[%s14368_s3 + $0x28] sm:$0xff] }
 0x30a   :  { %v2433_v38 = vpop.f32.mrf.mxu2 }
 0x30b   :  { %v2434_v42 = vadd.f32 %v2433_v38, %v1840_v2  ;;  %v3121_v43 = vpop.f32.mrf.mxu3  ;;  %v810_v46 = vmax.f32 %v681_v37, 0.0  ;;  %v1843_v50 = vpop.f32.mrf.mxu1  ;;  %9036 = vmatmul.msk.f32.gmra.mxu0 %vm137_vm0, %v123_v35  ;;  %v10010_v37 = vld [vmem:[%s14368_s3 + $0x20] sm:$0xff] }
 0x30c   :  { %v11494_v48 = vadd.f32 %v3121_v43, %v2431_v7 }
 0x30d   :  { %907 = vst.msk [vmem:[%s14367_s7 + $0x278] sm:$0xff] %vm827_vm2, %v810_v46 }
 0x30e   :  { %14390 = vst [vmem:[#allocation20_spill] sm:$0xff] %v11494_v48  ;;  %v1328_v52 = vld [vmem:[#allocation2 + $0x588] sm:$0xff] }
 0x30f   :  { %v1230_v59 = vld [vmem:[#allocation2 + $0x587] sm:$0xff]  ;;  %1133 = vst.msk [vmem:[#allocation2 + $0x590] sm:$0xff] %vm827_vm2, %v810_v46  ;;  %9117 = vmatmul.msk.f32.gmra.mxu1 %vm827_vm2, %v1328_v52 }
 0x310   :  { %9213 = vmatmul.msk.f32.gmra.mxu2 %vm827_vm2, %v1230_v59  ;;  %v683_v63 = vpop.f32.mrf.mxu0 }
 0x311   :  { %9308 = vmatmul.msk.f32.gmra.mxu3 %vm827_vm2, %v2611_v22  ;;  %v684_v1 = vadd.f32 %v11338_v20, %v683_v63 }
 0x312   :  { %v2436_v3 = vpop.f32.mrf.mxu2 }
 0x313   :  { %v2437_v7 = vadd.f32 %v2436_v3, %v1843_v50  ;;  %v3124_v12 = vpop.f32.mrf.mxu3  ;;  %v811_v13 = vmax.f32 %v684_v1, 0.0  ;;  %v1846_v23 = vpop.f32.mrf.mxu1  ;;  %9037 = vmatmul.msk.f32.vlgmr.msrb.gmra.mxu0 %vm827_vm2, %v1248_v26 }
 0x314   :  { %v11506_v2 = vadd.f32 %v3124_v12, %v2434_v42  ;;  %2932 = vmatpush.msrb.mxu0 %v10009_v24  ;;  %v1249_v42 = vld [vmem:[#allocation2 + $0x10] sm:$0xff] }
 0x315   :  { %908 = vst.msk [vmem:[%s14367_s7 + $0x280] sm:$0xff] %vm827_vm2, %v811_v13 }
 0x316   :  { %14391 = vst [vmem:[#allocation21_spill] sm:$0xff] %v11506_v2  ;;  %v1329_v27 = vld [vmem:[#allocation2 + $0x590] sm:$0xff]  ;;  %2933 = vmatpush.msrb.mxu0 %v10010_v37 }
 0x317   :  { %v1231_v30 = vld [vmem:[#allocation2 + $0x58f] sm:$0xff]  ;;  %1134 = vst.msk [vmem:[#allocation2 + $0x5a8] sm:$0xff] %vm827_vm2, %v811_v13  ;;  %9118 = vmatmul.msk.f32.gmra.mxu1 %vm827_vm2, %v1329_v27 }
 0x318   :  { %v2612_v35 = vld [vmem:[#allocation2 + $0x589] sm:$0xff]  ;;  %9214 = vmatmul.msk.f32.gmra.mxu2 %vm827_vm2, %v1231_v30  ;;  %v686_v38 = vpop.f32.mrf.mxu0  ;;  %v2613_v3 = vld [vmem:[#allocation2 + $0x591] sm:$0xff] }
 0x319   :  { %9309 = vmatmul.msk.f32.gmra.mxu3 %vm827_vm2, %v2612_v35  ;;  %v687_v43 = vadd.f32 %v11338_v20, %v686_v38  ;;  %v11536_v27 = vld [vmem:[#allocation2 + $0x28] sm:$0xff] }
 0x31a   :  { %v2439_v46 = vpop.f32.mrf.mxu2 }
 0x31b   :  { %v2440_v50 = vadd.f32 %v2439_v46, %v1846_v23  ;;  %v3127_v52 = vpop.f32.mrf.mxu3  ;;  %v812_v59 = vmax.f32 %v687_v43, 0.0  ;;  %9038 = vmatmul.msk.f32.gmra.mxu0 %vm827_vm2, %v1249_v42 }
 0x31c   :  { %v11524_v22 = vadd.f32 %v3127_v52, %v2437_v7  ;;  %v1849_v63 = vpop.f32.mrf.mxu1 }
 0x31d   :  { %909 = vst.msk [vmem:[%s14367_s7 + $0x288] sm:$0xff] %vm827_vm2, %v812_v59 }
 0x31e   :  { %14392 = vst [vmem:[#allocation22_spill] sm:$0xff] %v11524_v22  ;;  %v1330_v26 = vld [vmem:[#allocation2 + $0x5a8] sm:$0xff] }
 0x31f   :  { %v1232_v1 = vld [vmem:[#allocation2 + $0x5a7] sm:$0xff]  ;;  %1135 = vst.msk [vmem:[#allocation2 + $0x5b0] sm:$0xff] %vm827_vm2, %v812_v59  ;;  %9119 = vmatmul.msk.f32.gmra.mxu1 %vm827_vm2, %v1330_v26  ;;  %v11551_v26 = vld [vmem:[#allocation2 + $0x30] sm:$0xff] }
 0x320   :  { %9215 = vmatmul.msk.f32.gmra.mxu2 %vm827_vm2, %v1232_v1  ;;  %v689_v7 = vpop.f32.mrf.mxu0 }
 0x321   :  { %9310 = vmatmul.msk.f32.gmra.mxu3 %vm827_vm2, %v2613_v3  ;;  %v690_v12 = vadd.f32 %v11338_v20, %v689_v7 }
 0x323   :  { %v2442_v13 = vpop.f32.mrf.mxu2  ;;  %v3130_v24 = vpop.f32.mrf.mxu3  ;;  %v813_v30 = vmax.f32 %v690_v12, 0.0  ;;  %9039 = vmatmul.msk.f32.gmra.mxu0 %vm827_vm2, %v11536_v27 }
 0x324   :  { %v2443_v23 = vadd.f32 %v2442_v13, %v1849_v63  ;;  %v11538_v35 = vadd.f32 %v3130_v24, %v2440_v50  ;;  %v1852_v37 = vpop.f32.mrf.mxu1 }
 0x325   :  { %910 = vst.msk [vmem:[%s14367_s7 + $0x290] sm:$0xff] %vm827_vm2, %v813_v30 }
 0x326   :  { %14393 = vst [vmem:[#allocation23_spill] sm:$0xff] %v11538_v35  ;;  %v1331_v38 = vld [vmem:[#allocation2 + $0x5b0] sm:$0xff] }
 0x327   :  { %v1233_v42 = vld [vmem:[#allocation2 + $0x5af] sm:$0xff]  ;;  %1136 = vst.msk [vmem:[#allocation2 + $0x5c8] sm:$0xff] %vm827_vm2, %v813_v30  ;;  %9120 = vmatmul.msk.f32.gmra.mxu1 %vm827_vm2, %v1331_v38 }
 0x328   :  { %v2614_v43 = vld [vmem:[#allocation2 + $0x5a9] sm:$0xff]  ;;  %9216 = vmatmul.msk.f32.gmra.mxu2 %vm827_vm2, %v1233_v42  ;;  %v692_v46 = vpop.f32.mrf.mxu0  ;;  %v2615_v24 = vld [vmem:[#allocation2 + $0x5b1] sm:$0xff] }
 0x329   :  { %9311 = vmatmul.msk.f32.gmra.mxu3 %vm827_vm2, %v2614_v43  ;;  %v693_v50 = vadd.f32 %v11338_v20, %v692_v46  ;;  %v11566_v43 = vld [vmem:[#allocation2 + $0x48] sm:$0xff] }
 0x32b   :  { %v2445_v52 = vpop.f32.mrf.mxu2  ;;  %v814_v1 = vmax.f32 %v693_v50, 0.0  ;;  %9040 = vmatmul.msk.f32.gmra.mxu0 %vm827_vm2, %v11551_v26 }
 0x32c   :  { %v2446_v59 = vadd.f32 %v2445_v52, %v1852_v37  ;;  %v3133_v63 = vpop.f32.mrf.mxu3  ;;  %v1855_v7 = vpop.f32.mrf.mxu1 }
 0x32d   :  { %v11553_v3 = vadd.f32 %v3133_v63, %v2443_v23  ;;  %911 = vst.msk [vmem:[%s14367_s7 + $0x298] sm:$0xff] %vm827_vm2, %v814_v1 }
 0x32e   :  { %v1332_v12 = vld [vmem:[#allocation2 + $0x5c8] sm:$0xff]  ;;  %1137 = vst.msk [vmem:[#allocation2 + $0x5d0] sm:$0xff] %vm827_vm2, %v814_v1 }
 0x32f   :  { %14394 = vst [vmem:[#allocation24_spill] sm:$0xff] %v11553_v3  ;;  %v1234_v13 = vld [vmem:[#allocation2 + $0x5c7] sm:$0xff]  ;;  %9121 = vmatmul.msk.f32.gmra.mxu1 %vm827_vm2, %v1332_v12 }
 0x330   :  { %9217 = vmatmul.msk.f32.gmra.mxu2 %vm827_vm2, %v1234_v13  ;;  %v695_v23 = vpop.f32.mrf.mxu0 }
 0x331   :  { %9312 = vmatmul.msk.f32.gmra.mxu3 %vm827_vm2, %v2615_v24  ;;  %v696_v30 = vadd.f32 %v11338_v20, %v695_v23 }
 0x333   :  { %v2448_v37 = vpop.f32.mrf.mxu2  ;;  %v815_v46 = vmax.f32 %v696_v30, 0.0  ;;  %9041 = vmatmul.msk.f32.gmra.mxu0 %vm827_vm2, %v11566_v43  ;;  %v11581_v30 = vld [vmem:[#allocation2 + $0x50] sm:$0xff] }
 0x334   :  { %v2449_v38 = vadd.f32 %v2448_v37, %v1855_v7  ;;  %v3136_v42 = vpop.f32.mrf.mxu3  ;;  %v1858_v52 = vpop.f32.mrf.mxu1 }
 0x335   :  { %v11568_v50 = vadd.f32 %v3136_v42, %v2446_v59  ;;  %912 = vst.msk [vmem:[%s14367_s7 + $0x2a0] sm:$0xff] %vm827_vm2, %v815_v46  ;;  %v1333_v63 = vld [vmem:[#allocation2 + $0x5d0] sm:$0xff] }
 0x336   :  { %v1235_v1 = vld [vmem:[#allocation2 + $0x5cf] sm:$0xff]  ;;  %1138 = vst.msk [vmem:[#allocation2 + $0x5e8] sm:$0xff] %vm827_vm2, %v815_v46 }
 0x337   :  { %14395 = vst [vmem:[#allocation25_spill] sm:$0xff] %v11568_v50  ;;  %v2616_v12 = vld [vmem:[#allocation2 + $0x5c9] sm:$0xff]  ;;  %9122 = vmatmul.msk.f32.gmra.mxu1 %vm827_vm2, %v1333_v63 }
 0x338   :  { %9218 = vmatmul.msk.f32.gmra.mxu2 %vm827_vm2, %v1235_v1  ;;  %v698_v59 = vpop.f32.mrf.mxu0 }
 0x339   :  { %9313 = vmatmul.msk.f32.gmra.mxu3 %vm827_vm2, %v2616_v12  ;;  %v699_v7 = vadd.f32 %v11338_v20, %v698_v59 }
 0x33b   :  { %v2451_v13 = vpop.f32.mrf.mxu2  ;;  %v816_v37 = vmax.f32 %v699_v7, 0.0  ;;  %9042 = vmatmul.msk.f32.gmra.mxu0 %vm827_vm2, %v11581_v30 }
 0x33c   :  { %v2452_v24 = vadd.f32 %v2451_v13, %v1858_v52  ;;  %v3139_v23 = vpop.f32.mrf.mxu3  ;;  %v1861_v50 = vpop.f32.mrf.mxu1  ;;  %v2617_v52 = vld [vmem:[#allocation2 + $0x5d1] sm:$0xff]  ;;  %v11596_v13 = vld [vmem:[#allocation2 + $0x68] sm:$0xff] }
 0x33d   :  { %v11583_v42 = vadd.f32 %v3139_v23, %v2449_v38  ;;  %913 = vst.msk [vmem:[%s14367_s7 + $0x2a8] sm:$0xff] %vm827_vm2, %v816_v37  ;;  %v1334_v46 = vld [vmem:[#allocation2 + $0x5e8] sm:$0xff] }
 0x33e   :  { %v1236_v63 = vld [vmem:[#allocation2 + $0x5e7] sm:$0xff]  ;;  %1139 = vst.msk [vmem:[#allocation2 + $0x5f0] sm:$0xff] %vm827_vm2, %v816_v37 }
 0x33f   :  { %14396 = vst [vmem:[#allocation26_spill] sm:$0xff] %v11583_v42  ;;  %9123 = vmatmul.msk.f32.gmra.mxu1 %vm827_vm2, %v1334_v46 }
 0x340   :  { %9219 = vmatmul.msk.f32.gmra.mxu2 %vm827_vm2, %v1236_v63  ;;  %v701_v38 = vpop.f32.mrf.mxu0 }
 0x341   :  { %9314 = vmatmul.msk.f32.gmra.mxu3 %vm827_vm2, %v2617_v52  ;;  %v702_v1 = vadd.f32 %v11338_v20, %v701_v38 }
 0x343   :  { %v2454_v12 = vpop.f32.mrf.mxu2  ;;  %v817_v23 = vmax.f32 %v702_v1, 0.0  ;;  %9043 = vmatmul.msk.f32.gmra.mxu0 %vm827_vm2, %v11596_v13 }
 0x344   :  { %v2455_v59 = vadd.f32 %v2454_v12, %v1861_v50  ;;  %v3142_v7 = vpop.f32.mrf.mxu3  ;;  %v1864_v3 = vpop.f32.mrf.mxu1  ;;  %v11611_v12 = vld [vmem:[#allocation2 + $0x70] sm:$0xff] }
 0x345   :  { %v11598_v42 = vadd.f32 %v3142_v7, %v2452_v24  ;;  %914 = vst.msk [vmem:[%s14367_s7 + $0x2b0] sm:$0xff] %vm827_vm2, %v817_v23  ;;  %v1335_v37 = vld [vmem:[#allocation2 + $0x5f0] sm:$0xff] }
 0x346   :  { %v1237_v46 = vld [vmem:[#allocation2 + $0x5ef] sm:$0xff]  ;;  %1140 = vst.msk [vmem:[#allocation2 + $0x608] sm:$0xff] %vm827_vm2, %v817_v23 }
 0x347   :  { %14397 = vst [vmem:[#allocation27_spill] sm:$0xff] %v11598_v42  ;;  %v2618_v63 = vld [vmem:[#allocation2 + $0x5e9] sm:$0xff]  ;;  %9124 = vmatmul.msk.f32.gmra.mxu1 %vm827_vm2, %v1335_v37 }
 0x348   :  { %9220 = vmatmul.msk.f32.gmra.mxu2 %vm827_vm2, %v1237_v46  ;;  %v704_v50 = vpop.f32.mrf.mxu0 }
 0x349   :  { %9315 = vmatmul.msk.f32.gmra.mxu3 %vm827_vm2, %v2618_v63  ;;  %v705_v24 = vadd.f32 %v11338_v20, %v704_v50 }
 0x34b   :  { %v2457_v52 = vpop.f32.mrf.mxu2  ;;  %v818_v7 = vmax.f32 %v705_v24, 0.0  ;;  %9044 = vmatmul.msk.f32.gmra.mxu0 %vm827_vm2, %v11611_v12 }
 0x34c   :  { %v2458_v38 = vadd.f32 %v2457_v52, %v1864_v3  ;;  %v3145_v1 = vpop.f32.mrf.mxu3  ;;  %v1867_v35 = vpop.f32.mrf.mxu1  ;;  %v2619_v3 = vld [vmem:[#allocation2 + $0x5f1] sm:$0xff]  ;;  %v11626_v52 = vld [vmem:[#allocation2 + $0x88] sm:$0xff] }
 0x34d   :  { %v11613_v42 = vadd.f32 %v3145_v1, %v2455_v59  ;;  %915 = vst.msk [vmem:[%s14367_s7 + $0x2b8] sm:$0xff] %vm827_vm2, %v818_v7  ;;  %v1336_v23 = vld [vmem:[#allocation2 + $0x608] sm:$0xff] }
 0x34e   :  { %v1238_v37 = vld [vmem:[#allocation2 + $0x607] sm:$0xff]  ;;  %1141 = vst.msk [vmem:[#allocation2 + $0x610] sm:$0xff] %vm827_vm2, %v818_v7 }
 0x34f   :  { %14398 = vst [vmem:[#allocation28_spill] sm:$0xff] %v11613_v42  ;;  %9125 = vmatmul.msk.f32.gmra.mxu1 %vm827_vm2, %v1336_v23 }
 0x350   :  { %9221 = vmatmul.msk.f32.gmra.mxu2 %vm827_vm2, %v1238_v37  ;;  %v707_v59 = vpop.f32.mrf.mxu0 }
 0x351   :  { %9316 = vmatmul.msk.f32.gmra.mxu3 %vm827_vm2, %v2619_v3  ;;  %v708_v46 = vadd.f32 %v11338_v20, %v707_v59 }
 0x353   :  { %v2460_v63 = vpop.f32.mrf.mxu2  ;;  %v819_v1 = vmax.f32 %v708_v46, 0.0  ;;  %9045 = vmatmul.msk.f32.gmra.mxu0 %vm827_vm2, %v11626_v52 }
 0x354   :  { %v2461_v50 = vadd.f32 %v2460_v63, %v1867_v35  ;;  %v3148_v24 = vpop.f32.mrf.mxu3  ;;  %v1870_v22 = vpop.f32.mrf.mxu1  ;;  %v11641_v63 = vld [vmem:[#allocation2 + $0x90] sm:$0xff] }
 0x355   :  { %v11628_v42 = vadd.f32 %v3148_v24, %v2458_v38  ;;  %916 = vst.msk [vmem:[%s14367_s7 + $0x2c0] sm:$0xff] %vm827_vm2, %v819_v1  ;;  %v1337_v7 = vld [vmem:[#allocation2 + $0x610] sm:$0xff] }
 0x356   :  { %v1239_v23 = vld [vmem:[#allocation2 + $0x60f] sm:$0xff]  ;;  %1142 = vst.msk [vmem:[#allocation2 + $0x628] sm:$0xff] %vm827_vm2, %v819_v1 }
 0x357   :  { %14399 = vst [vmem:[#allocation29_spill] sm:$0xff] %v11628_v42  ;;  %v2620_v37 = vld [vmem:[#allocation2 + $0x609] sm:$0xff]  ;;  %9126 = vmatmul.msk.f32.gmra.mxu1 %vm827_vm2, %v1337_v7 }
 0x358   :  { %9222 = vmatmul.msk.f32.gmra.mxu2 %vm827_vm2, %v1239_v23  ;;  %v710_v35 = vpop.f32.mrf.mxu0 }
 0x359   :  { %9317 = vmatmul.msk.f32.gmra.mxu3 %vm827_vm2, %v2620_v37  ;;  %v711_v38 = vadd.f32 %v11338_v20, %v710_v35 }
 0x35b   :  { %v2463_v3 = vpop.f32.mrf.mxu2  ;;  %v820_v24 = vmax.f32 %v711_v38, 0.0  ;;  %9046 = vmatmul.msk.f32.gmra.mxu0 %vm827_vm2, %v11641_v63 }
 0x35c   :  { %v2464_v59 = vadd.f32 %v2463_v3, %v1870_v22  ;;  %v3151_v46 = vpop.f32.mrf.mxu3  ;;  %v1873_v2 = vpop.f32.mrf.mxu1  ;;  %v2621_v22 = vld [vmem:[#allocation2 + $0x611] sm:$0xff]  ;;  %v11656_v3 = vld [vmem:[#allocation2 + $0xa8] sm:$0xff] }
 0x35d   :  { %v11643_v42 = vadd.f32 %v3151_v46, %v2461_v50  ;;  %917 = vst.msk [vmem:[%s14367_s7 + $0x2c8] sm:$0xff] %vm827_vm2, %v820_v24  ;;  %v1338_v1 = vld [vmem:[#allocation2 + $0x628] sm:$0xff] }
 0x35e   :  { %v1240_v7 = vld [vmem:[#allocation2 + $0x627] sm:$0xff]  ;;  %1143 = vst.msk [vmem:[#allocation2 + $0x630] sm:$0xff] %vm827_vm2, %v820_v24 }
 0x35f   :  { %14400 = vst [vmem:[#allocation30_spill] sm:$0xff] %v11643_v42  ;;  %9127 = vmatmul.msk.f32.gmra.mxu1 %vm827_vm2, %v1338_v1 }
 0x360   :  { %9223 = vmatmul.msk.f32.gmra.mxu2 %vm827_vm2, %v1240_v7  ;;  %v713_v50 = vpop.f32.mrf.mxu0 }
 0x361   :  { %9318 = vmatmul.msk.f32.gmra.mxu3 %vm827_vm2, %v2621_v22  ;;  %v714_v23 = vadd.f32 %v11338_v20, %v713_v50 }
 0x363   :  { %v2466_v37 = vpop.f32.mrf.mxu2  ;;  %v821_v46 = vmax.f32 %v714_v23, 0.0  ;;  %9047 = vmatmul.msk.f32.gmra.mxu0 %vm827_vm2, %v11656_v3 }
 0x364   :  { %v2467_v35 = vadd.f32 %v2466_v37, %v1873_v2  ;;  %v3154_v38 = vpop.f32.mrf.mxu3  ;;  %v1876_v48 = vpop.f32.mrf.mxu1  ;;  %v11671_v37 = vld [vmem:[#allocation2 + $0xb0] sm:$0xff] }
 0x365   :  { %v11658_v42 = vadd.f32 %v3154_v38, %v2464_v59  ;;  %918 = vst.msk [vmem:[%s14367_s7 + $0x2d0] sm:$0xff] %vm827_vm2, %v821_v46  ;;  %v1339_v24 = vld [vmem:[#allocation2 + $0x630] sm:$0xff] }
 0x366   :  { %v1241_v1 = vld [vmem:[#allocation2 + $0x62f] sm:$0xff]  ;;  %1144 = vst.msk [vmem:[#allocation2 + $0x648] sm:$0xff] %vm827_vm2, %v821_v46 }
 0x367   :  { %14401 = vst [vmem:[#allocation31_spill] sm:$0xff] %v11658_v42  ;;  %v2622_v7 = vld [vmem:[#allocation2 + $0x629] sm:$0xff]  ;;  %9128 = vmatmul.msk.f32.gmra.mxu1 %vm827_vm2, %v1339_v24 }
 0x368   :  { %9224 = vmatmul.msk.f32.gmra.mxu2 %vm827_vm2, %v1241_v1  ;;  %v716_v2 = vpop.f32.mrf.mxu0 }
 0x369   :  { %9319 = vmatmul.msk.f32.gmra.mxu3 %vm827_vm2, %v2622_v7  ;;  %v717_v59 = vadd.f32 %v11338_v20, %v716_v2 }
 0x36b   :  { %v2469_v22 = vpop.f32.mrf.mxu2  ;;  %v822_v38 = vmax.f32 %v717_v59, 0.0  ;;  %9048 = vmatmul.msk.f32.gmra.mxu0 %vm827_vm2, %v11671_v37 }
 0x36c   :  { %v2470_v50 = vadd.f32 %v2469_v22, %v1876_v48  ;;  %v3157_v23 = vpop.f32.mrf.mxu3  ;;  %v1879_v16 = vpop.f32.mrf.mxu1  ;;  %v2623_v48 = vld [vmem:[#allocation2 + $0x631] sm:$0xff] }
 0x36d   :  { %v11673_v42 = vadd.f32 %v3157_v23, %v2467_v35  ;;  %919 = vst.msk [vmem:[%s14367_s7 + $0x2d8] sm:$0xff] %vm827_vm2, %v822_v38  ;;  %v1340_v46 = vld [vmem:[#allocation2 + $0x648] sm:$0xff] }
 0x36e   :  { %v1242_v24 = vld [vmem:[#allocation2 + $0x647] sm:$0xff]  ;;  %1145 = vst.msk [vmem:[#allocation2 + $0x650] sm:$0xff] %vm827_vm2, %v822_v38 }
 0x36f   :  { %14402 = vst [vmem:[#allocation32_spill] sm:$0xff] %v11673_v42  ;;  %9129 = vmatmul.msk.f32.gmra.mxu1 %vm827_vm2, %v1340_v46  ;;  %v7352_v35 = vld [vmem:[%s14368_s3 + $0x88] sm:$0xff] }
 0x370   :  { %9225 = vmatmul.msk.f32.gmra.mxu2 %vm827_vm2, %v1242_v24  ;;  %v719_v1 = vpop.f32.mrf.mxu0  ;;  %v11689_v23 = vld [vmem:[#allocation2 + $0xc8] sm:$0xff] }
 0x371   :  { %9320 = vmatmul.msk.f32.gmra.mxu3 %vm827_vm2, %v2623_v48  ;;  %7655 = vmatpush.msra.mxu2 %v7352_v35  ;;  %v720_v7 = vadd.f32 %v11338_v20, %v719_v1  ;;  %v6565_v48 = vld [vmem:[%s14368_s3 + $0x78] sm:$0xff] }
 0x372   :  { %6868 = vmatpush.msra.mxu1 %v6565_v48 }
 0x373   :  { %v2472_v2 = vpop.f32.mrf.mxu2  ;;  %v823_v38 = vmax.f32 %v720_v7, 0.0  ;;  %9049 = vmatmul.msk.f32.gmra.mxu0 %vm827_vm2, %v11689_v23 }
 0x374   :  { %v2473_v59 = vadd.f32 %v2472_v2, %v1879_v16  ;;  %v3160_v22 = vpop.f32.mrf.mxu3  ;;  %v1882_v24 = vpop.f32.mrf.mxu1 }
 0x375   :  { %v11691_v46 = vadd.f32 %v3160_v22, %v2470_v50  ;;  %920 = vst.msk [vmem:[%s14367_s7 + $0x2e0] sm:$0xff] %vm827_vm2, %v823_v38  ;;  %v1341_v16 = vld [vmem:[#allocation2 + $0x650] sm:$0xff] }
 0x376   :  { %v1243_v35 = vld [vmem:[#allocation2 + $0x64f] sm:$0xff]  ;;  %1146 = vst.msk [vmem:[#allocation2 + $0x668] sm:$0xff] %vm827_vm2, %v823_v38 }
 0x377   :  { %14403 = vst [vmem:[#allocation33_spill] sm:$0xff] %v11691_v46  ;;  %v2624_v1 = vld [vmem:[#allocation2 + $0x649] sm:$0xff]  ;;  %9130 = vmatmul.msk.f32.gmra.mxu1 %vm827_vm2, %v1341_v16 }
 0x378   :  { %9226 = vmatmul.msk.f32.gmra.mxu2 %vm827_vm2, %v1243_v35  ;;  %v722_v50 = vpop.f32.mrf.mxu0  ;;  %v11707_v46 = vld [vmem:[#allocation2 + $0xd0] sm:$0xff] }
 0x379   :  { %9321 = vmatmul.msk.f32.gmra.mxu3 %vm827_vm2, %v2624_v1  ;;  %v723_v7 = vadd.f32 %v11338_v20, %v722_v50 }
 0x37b   :  { %v2475_v2 = vpop.f32.mrf.mxu2  ;;  %v824_v42 = vmax.f32 %v723_v7, 0.0  ;;  %9050 = vmatmul.msk.f32.gmra.mxu0 %vm827_vm2, %v11707_v46 }
 0x37c   :  { %v2476_v22 = vadd.f32 %v2475_v2, %v1882_v24  ;;  %v3163_v48 = vpop.f32.mrf.mxu3  ;;  %v1885_v17 = vpop.f32.mrf.mxu1  ;;  %v2625_v24 = vld [vmem:[#allocation2 + $0x651] sm:$0xff]  ;;  %v11722_v2 = vld [vmem:[#allocation2 + $0xe8] sm:$0xff] }
 0x37d   :  { %v11709_v49 = vadd.f32 %v3163_v48, %v2473_v59  ;;  %921 = vst.msk [vmem:[%s14367_s7 + $0x2e8] sm:$0xff] %vm827_vm2, %v824_v42  ;;  %v1342_v38 = vld [vmem:[#allocation2 + $0x668] sm:$0xff] }
 0x37e   :  { %v1244_v16 = vld [vmem:[#allocation2 + $0x667] sm:$0xff]  ;;  %1147 = vst.msk [vmem:[#allocation2 + $0x670] sm:$0xff] %vm827_vm2, %v824_v42 }
 0x37f   :  { %14404 = vst [vmem:[#allocation34_spill] sm:$0xff] %v11709_v49  ;;  %9131 = vmatmul.msk.f32.gmra.mxu1 %vm827_vm2, %v1342_v38 }
 0x380   :  { %9227 = vmatmul.msk.f32.gmra.mxu2 %vm827_vm2, %v1244_v16  ;;  %v725_v59 = vpop.f32.mrf.mxu0 }
 0x381   :  { %9322 = vmatmul.msk.f32.gmra.mxu3 %vm827_vm2, %v2625_v24  ;;  %v726_v35 = vadd.f32 %v11338_v20, %v725_v59 }
 0x383   :  { %v2478_v1 = vpop.f32.mrf.mxu2  ;;  %v825_v48 = vmax.f32 %v726_v35, 0.0  ;;  %9051 = vmatmul.msk.f32.gmra.mxu0 %vm827_vm2, %v11722_v2 }
 0x384   :  { %v2479_v50 = vadd.f32 %v2478_v1, %v1885_v17  ;;  %v3166_v7 = vpop.f32.mrf.mxu3  ;;  %v1888_v58 = vpop.f32.mrf.mxu1  ;;  %v11737_v1 = vld [vmem:[#allocation2 + $0xf0] sm:$0xff] }
 0x385   :  { %v11724_v49 = vadd.f32 %v3166_v7, %v2476_v22  ;;  %922 = vst.msk [vmem:[%s14367_s7 + $0x2f0] sm:$0xff] %vm827_vm2, %v825_v48  ;;  %v1343_v42 = vld [vmem:[#allocation2 + $0x670] sm:$0xff] }
 0x386   :  { %v1245_v38 = vld [vmem:[#allocation2 + $0x66f] sm:$0xff]  ;;  %1148 = vst.msk [vmem:[#allocation2 + $0x688] sm:$0xff] %vm827_vm2, %v825_v48  ;;  %v11747_v48 = vld [vmem:[#allocation2 + $0x27] sm:$0xff] }
 0x387   :  { %14405 = vst [vmem:[#allocation35_spill] sm:$0xff] %v11724_v49  ;;  %v2626_v16 = vld [vmem:[#allocation2 + $0x669] sm:$0xff]  ;;  %9132 = vmatmul.msk.f32.gmra.mxu1 %vm827_vm2, %v1343_v42 }
 0x388   :  { %9228 = vmatmul.msk.f32.gmra.mxu2 %vm827_vm2, %v1245_v38  ;;  %v728_v17 = vpop.f32.mrf.mxu0 }
 0x389   :  { %9323 = vmatmul.msk.f32.gmra.mxu3 %vm827_vm2, %v2626_v16  ;;  %v729_v22 = vadd.f32 %v11338_v20, %v728_v17  ;;  %v2627_v20 = vld [vmem:[#allocation2 + $0x671] sm:$0xff]  ;;  %v11757_v16 = vld [vmem:[#allocation2 + $0x108] sm:$0xff] }
 0x38b   :  { %v2481_v24 = vpop.f32.mrf.mxu2  ;;  %v826_v7 = vmax.f32 %v729_v22, 0.0  ;;  %9052 = vmatmul.msk.f32.gmra.mxu0 %vm827_vm2, %v11737_v1 }
 0x38c   :  { %v2482_v59 = vadd.f32 %v2481_v24, %v1888_v58  ;;  %v3169_v35 = vpop.f32.mrf.mxu3  ;;  %v1891_v29 = vpop.f32.mrf.mxu1  ;;  %v11763_v24 = vld [vmem:[#allocation2 + $0x2f] sm:$0xff] }
 0x38d   :  { %v11739_v49 = vadd.f32 %v3169_v35, %v2479_v50  ;;  %923 = vst.msk [vmem:[%s14367_s7 + $0x2f8] sm:$0xff] %vm827_vm2, %v826_v7 }
 0x38e   :  { %1149 = vst.msk [vmem:[#allocation2 + $0x690] sm:$0xff] %vm827_vm2, %v826_v7 }
 0x38f   :  { %14406 = vst [vmem:[#allocation36_spill] sm:$0xff] %v11739_v49  ;;  %9325 = vmatmul.msk.f32.vlgmr.msrb.gmra.mxu1 %vm827_vm2, %v11747_v48  ;;  %v11799_v49 = vld [vmem:[#allocation2 + $0x4f] sm:$0xff] }
 0x390   :  { %9421 = vmatmul.msk.f32.vlgmr.msrb.gmra.mxu2 %vm827_vm2, %v11536_v27  ;;  %v11755_v58 = vpop.f32.mrf.mxu0  ;;  %v11769_v27 = vld [vmem:[#allocation2 + $0x29] sm:$0xff] }
 0x391   :  { %9324 = vmatmul.msk.f32.gmra.mxu3 %vm827_vm2, %v2627_v20  ;;  %14407 = vst [vmem:[#allocation37_spill] sm:$0xff] %v11755_v58  ;;  %v11775_v20 = vld [vmem:[#allocation2 + $0x110] sm:$0xff]  ;;  %v11781_v58 = vld [vmem:[#allocation2 + $0x47] sm:$0xff] }
 0x393   :  { %v2484_v50 = vpop.f32.mrf.mxu2  ;;  %9053 = vmatmul.msk.f32.gmra.mxu0 %vm827_vm2, %v11757_v16 }
 0x394   :  { %v2485_v42 = vadd.f32 %v2484_v50, %v1891_v29  ;;  %v3172_v38 = vpop.f32.mrf.mxu3  ;;  %v1894_v22 = vpop.f32.mrf.mxu1 }
 0x395   :  { %v11759_v17 = vadd.f32 %v3172_v38, %v2482_v59 }
 0x397   :  { %14408 = vst [vmem:[#allocation38_spill] sm:$0xff] %v11759_v17  ;;  %9326 = vmatmul.msk.f32.gmra.mxu1 %vm827_vm2, %v11763_v24 }
 0x398   :  { %9422 = vmatmul.msk.f32.gmra.mxu2 %vm827_vm2, %v11551_v26  ;;  %v11773_v29 = vpop.f32.mrf.mxu0  ;;  %v11787_v26 = vld [vmem:[#allocation2 + $0x31] sm:$0xff] }
 0x399   :  { %9517 = vmatmul.msk.f32.vlgmr.msrb.gmra.mxu3 %vm827_vm2, %v11769_v27  ;;  %14409 = vst [vmem:[#allocation39_spill] sm:$0xff] %v11773_v29  ;;  %v11793_v29 = vld [vmem:[#allocation2 + $0x128] sm:$0xff] }
 0x39b   :  { %v2487_v59 = vpop.f32.mrf.mxu2  ;;  %9054 = vmatmul.msk.f32.gmra.mxu0 %vm827_vm2, %v11775_v20 }
 0x39c   :  { %v2488_v35 = vadd.f32 %v2487_v59, %v1894_v22  ;;  %v3175_v7 = vpop.f32.mrf.mxu3  ;;  %v1897_v38 = vpop.f32.mrf.mxu1 }
 0x39d   :  { %v11777_v50 = vadd.f32 %v3175_v7, %v2485_v42 }
 0x39f   :  { %14410 = vst [vmem:[#allocation40_spill] sm:$0xff] %v11777_v50  ;;  %9327 = vmatmul.msk.f32.gmra.mxu1 %vm827_vm2, %v11781_v58 }
 0x3a0   :  { %9423 = vmatmul.msk.f32.gmra.mxu2 %vm827_vm2, %v11566_v43  ;;  %v11791_v22 = vpop.f32.mrf.mxu0  ;;  %v11805_v43 = vld [vmem:[#allocation2 + $0x49] sm:$0xff] }
 0x3a1   :  { %9518 = vmatmul.msk.f32.gmra.mxu3 %vm827_vm2, %v11787_v26  ;;  %14411 = vst [vmem:[#allocation41_spill] sm:$0xff] %v11791_v22  ;;  %v11811_v22 = vld [vmem:[#allocation2 + $0x130] sm:$0xff] }
 0x3a3   :  { %v2490_v42 = vpop.f32.mrf.mxu2  ;;  %9055 = vmatmul.msk.f32.gmra.mxu0 %vm827_vm2, %v11793_v29 }
 0x3a4   :  { %v2491_v59 = vadd.f32 %v2490_v42, %v1897_v38  ;;  %v3178_v7 = vpop.f32.mrf.mxu3  ;;  %v1900_v17 = vpop.f32.mrf.mxu1 }
 0x3a5   :  { %v11795_v50 = vadd.f32 %v3178_v7, %v2488_v35 }
 0x3a7   :  { %14412 = vst [vmem:[#allocation42_spill] sm:$0xff] %v11795_v50  ;;  %9328 = vmatmul.msk.f32.gmra.mxu1 %vm827_vm2, %v11799_v49 }
 0x3a8   :  { %9424 = vmatmul.msk.f32.gmra.mxu2 %vm827_vm2, %v11581_v30  ;;  %v11809_v38 = vpop.f32.mrf.mxu0  ;;  %v11823_v30 = vld [vmem:[#allocation2 + $0x51] sm:$0xff] }
 0x3a9   :  { %9519 = vmatmul.msk.f32.gmra.mxu3 %vm827_vm2, %v11805_v43  ;;  %14413 = vst [vmem:[#allocation43_spill] sm:$0xff] %v11809_v38  ;;  %v11829_v38 = vld [vmem:[#allocation2 + $0x148] sm:$0xff] }
 0x3ab   :  { %v2493_v35 = vpop.f32.mrf.mxu2  ;;  %9056 = vmatmul.msk.f32.gmra.mxu0 %vm827_vm2, %v11811_v22 }
 0x3ac   :  { %v2494_v42 = vadd.f32 %v2493_v35, %v1900_v17  ;;  %v3181_v7 = vpop.f32.mrf.mxu3  ;;  %v1903_v0 = vpop.f32.mrf.mxu1 }
 0x3ad   :  { %v11813_v50 = vadd.f32 %v3181_v7, %v2491_v59 }
 0x3af   :  { %14414 = vst [vmem:[#allocation44_spill] sm:$0xff] %v11813_v50  ;;  %9329 = vmatmul.msk.f32.gmra.mxu1 %vm827_vm2, %v11817_v39 }
 0x3b0   :  { %9425 = vmatmul.msk.f32.gmra.mxu2 %vm827_vm2, %v11596_v13  ;;  %v11827_v17 = vpop.f32.mrf.mxu0  ;;  %v11841_v13 = vld [vmem:[#allocation2 + $0x69] sm:$0xff] }
 0x3b1   :  { %9520 = vmatmul.msk.f32.gmra.mxu3 %vm827_vm2, %v11823_v30  ;;  %14415 = vst [vmem:[#allocation45_spill] sm:$0xff] %v11827_v17  ;;  %v11847_v17 = vld [vmem:[#allocation2 + $0x150] sm:$0xff] }
 0x3b3   :  { %v2496_v59 = vpop.f32.mrf.mxu2  ;;  %9057 = vmatmul.msk.f32.gmra.mxu0 %vm827_vm2, %v11829_v38 }
 0x3b4   :  { %v2497_v35 = vadd.f32 %v2496_v59, %v1903_v0  ;;  %v3184_v7 = vpop.f32.mrf.mxu3  ;;  %v1906_v14 = vpop.f32.mrf.mxu1 }
 0x3b5   :  { %v11831_v50 = vadd.f32 %v3184_v7, %v2494_v42 }
 0x3b7   :  { %14416 = vst [vmem:[#allocation46_spill] sm:$0xff] %v11831_v50  ;;  %9330 = vmatmul.msk.f32.gmra.mxu1 %vm827_vm2, %v11835_v55 }
 0x3b8   :  { %9426 = vmatmul.msk.f32.gmra.mxu2 %vm827_vm2, %v11611_v12  ;;  %v11845_v0 = vpop.f32.mrf.mxu0  ;;  %v11859_v12 = vld [vmem:[#allocation2 + $0x71] sm:$0xff] }
 0x3b9   :  { %9521 = vmatmul.msk.f32.gmra.mxu3 %vm827_vm2, %v11841_v13  ;;  %14417 = vst [vmem:[#allocation47_spill] sm:$0xff] %v11845_v0  ;;  %v11865_v0 = vld [vmem:[#allocation2 + $0x168] sm:$0xff] }
 0x3bb   :  { %v2499_v42 = vpop.f32.mrf.mxu2  ;;  %9058 = vmatmul.msk.f32.gmra.mxu0 %vm827_vm2, %v11847_v17 }
 0x3bc   :  { %v2500_v59 = vadd.f32 %v2499_v42, %v1906_v14  ;;  %v3187_v7 = vpop.f32.mrf.mxu3  ;;  %v1909_v32 = vpop.f32.mrf.mxu1 }
 0x3bd   :  { %v11849_v50 = vadd.f32 %v3187_v7, %v2497_v35 }
 0x3bf   :  { %14418 = vst [vmem:[#allocation48_spill] sm:$0xff] %v11849_v50  ;;  %9331 = vmatmul.msk.f32.gmra.mxu1 %vm827_vm2, %v11853_v8 }
 0x3c0   :  { %9427 = vmatmul.msk.f32.gmra.mxu2 %vm827_vm2, %v11626_v52  ;;  %v11863_v14 = vpop.f32.mrf.mxu0  ;;  %v11877_v52 = vld [vmem:[#allocation2 + $0x89] sm:$0xff] }
 0x3c1   :  { %9522 = vmatmul.msk.f32.gmra.mxu3 %vm827_vm2, %v11859_v12  ;;  %14419 = vst [vmem:[#allocation49_spill] sm:$0xff] %v11863_v14 }
 0x3c3   :  { %v2502_v35 = vpop.f32.mrf.mxu2  ;;  %9059 = vmatmul.msk.f32.gmra.mxu0 %vm827_vm2, %v11865_v0 }
 0x3c4   :  { %v2503_v42 = vadd.f32 %v2502_v35, %v1909_v32  ;;  %v3190_v7 = vpop.f32.mrf.mxu3  ;;  %v1912_v51 = vpop.f32.mrf.mxu1 }
 0x3c5   :  { %v11867_v50 = vadd.f32 %v3190_v7, %v2500_v59  ;;  %v1150_v59 = vld [vmem:[#allocation2 + $0x7] sm:$0xff] }
 0x3c7   :  { %14420 = vst [vmem:[#allocation50_spill] sm:$0xff] %v11867_v50  ;;  %9332 = vmatmul.msk.f32.gmra.mxu1 %vm827_vm2, %v11871_v31 }
 0x3c8   :  { %9428 = vmatmul.msk.f32.gmra.mxu2 %vm827_vm2, %v11641_v63  ;;  %v11881_v32 = vpop.f32.mrf.mxu0  ;;  %v11892_v63 = vld [vmem:[#allocation2 + $0x91] sm:$0xff] }
 0x3c9   :  { %9523 = vmatmul.msk.f32.gmra.mxu3 %vm827_vm2, %v11877_v52  ;;  %14421 = vst [vmem:[#allocation51_spill] sm:$0xff] %v11881_v32 }
 0x3cb   :  { %v2505_v35 = vpop.f32.mrf.mxu2  ;;  %9133 = vmatmul.msk.f32.vlgmr.msra.gmra.mxu0 %vm827_vm2, %v1150_v59 }
 0x3cc   :  { %v2506_v7 = vadd.f32 %v2505_v35, %v1912_v51  ;;  %v3193_v14 = vpop.f32.mrf.mxu3  ;;  %v1915_v11 = vpop.f32.mrf.mxu1 }
 0x3cd   :  { %v11883_v50 = vadd.f32 %v3193_v14, %v2503_v42  ;;  %v1151_v14 = vld [vmem:[#allocation2 + $0xf] sm:$0xff] }
 0x3cf   :  { %14422 = vst [vmem:[#allocation52_spill] sm:$0xff] %v11883_v50  ;;  %9333 = vmatmul.msk.f32.gmra.mxu1 %vm827_vm2, %v11886_v53 }
 0x3d0   :  { %9429 = vmatmul.msk.f32.gmra.mxu2 %vm827_vm2, %v11656_v3  ;;  %v11896_v51 = vpop.f32.mrf.mxu0  ;;  %v11907_v3 = vld [vmem:[#allocation2 + $0xa9] sm:$0xff] }
 0x3d1   :  { %9524 = vmatmul.msk.f32.gmra.mxu3 %vm827_vm2, %v11892_v63  ;;  %14423 = vst [vmem:[#allocation53_spill] sm:$0xff] %v11896_v51 }
 0x3d3   :  { %v2508_v42 = vpop.f32.mrf.mxu2  ;;  %9134 = vmatmul.msk.f32.gmra.mxu0 %vm827_vm2, %v1151_v14 }
 0x3d4   :  { %v2509_v35 = vadd.f32 %v2508_v42, %v1915_v11  ;;  %v3196_v32 = vpop.f32.mrf.mxu3  ;;  %v1918_v50 = vpop.f32.mrf.mxu1 }
 0x3d5   :  { %v11898_v59 = vadd.f32 %v3196_v32, %v2506_v7 }
 0x3d7   :  { %14424 = vst [vmem:[#allocation54_spill] sm:$0xff] %v11898_v59  ;;  %9334 = vmatmul.msk.f32.gmra.mxu1 %vm827_vm2, %v11901_v36  ;;  %v11917_v59 = vld [vmem:[#allocation2 + $0xc7] sm:$0xff] }
 0x3d8   :  { %9430 = vmatmul.msk.f32.gmra.mxu2 %vm827_vm2, %v11671_v37  ;;  %v11911_v11 = vpop.f32.mrf.mxu0  ;;  %v11923_v37 = vld [vmem:[#allocation2 + $0xb1] sm:$0xff] }
 0x3d9   :  { %9525 = vmatmul.msk.f32.gmra.mxu3 %vm827_vm2, %v11907_v3  ;;  %14425 = vst [vmem:[#allocation55_spill] sm:$0xff] %v11911_v11 }
 0x3db   :  { %v2511_v32 = vpop.f32.mrf.mxu2  ;;  %9135 = vmatmul.msk.f32.gmra.mxu0 %vm827_vm2, %v11747_v48 }
 0x3dc   :  { %v2512_v7 = vadd.f32 %v2511_v32, %v1918_v50  ;;  %v3199_v42 = vpop.f32.mrf.mxu3  ;;  %v1921_v14 = vpop.f32.mrf.mxu1 }
 0x3dd   :  { %v11913_v51 = vadd.f32 %v3199_v42, %v2509_v35 }
 0x3df   :  { %14426 = vst [vmem:[#allocation56_spill] sm:$0xff] %v11913_v51  ;;  %9335 = vmatmul.msk.f32.gmra.mxu1 %vm827_vm2, %v11917_v59  ;;  %v11933_v51 = vld [vmem:[#allocation2 + $0xcf] sm:$0xff] }
 0x3e0   :  { %9431 = vmatmul.msk.f32.gmra.mxu2 %vm827_vm2, %v11689_v23  ;;  %v11927_v50 = vpop.f32.mrf.mxu0  ;;  %v11939_v23 = vld [vmem:[#allocation2 + $0xc9] sm:$0xff] }
 0x3e1   :  { %9526 = vmatmul.msk.f32.gmra.mxu3 %vm827_vm2, %v11923_v37  ;;  %14427 = vst [vmem:[#allocation57_spill] sm:$0xff] %v11927_v50 }
 0x3e3   :  { %v2514_v35 = vpop.f32.mrf.mxu2  ;;  %9136 = vmatmul.msk.f32.gmra.mxu0 %vm827_vm2, %v11763_v24 }
 0x3e4   :  { %v2515_v32 = vadd.f32 %v2514_v35, %v1921_v14  ;;  %v3202_v42 = vpop.f32.mrf.mxu3  ;;  %v1924_v48 = vpop.f32.mrf.mxu1 }
 0x3e5   :  { %v11929_v11 = vadd.f32 %v3202_v42, %v2512_v7 }
 0x3e7   :  { %14428 = vst [vmem:[#allocation58_spill] sm:$0xff] %v11929_v11  ;;  %9336 = vmatmul.msk.f32.gmra.mxu1 %vm827_vm2, %v11933_v51  ;;  %v11949_v11 = vld [vmem:[#allocation2 + $0xe7] sm:$0xff] }
 0x3e8   :  { %9432 = vmatmul.msk.f32.gmra.mxu2 %vm827_vm2, %v11707_v46  ;;  %v11943_v14 = vpop.f32.mrf.mxu0  ;;  %v11955_v46 = vld [vmem:[#allocation2 + $0xd1] sm:$0xff] }
 0x3e9   :  { %9527 = vmatmul.msk.f32.gmra.mxu3 %vm827_vm2, %v11939_v23  ;;  %14429 = vst [vmem:[#allocation59_spill] sm:$0xff] %v11943_v14 }
 0x3eb   :  { %v2517_v7 = vpop.f32.mrf.mxu2  ;;  %9137 = vmatmul.msk.f32.gmra.mxu0 %vm827_vm2, %v11781_v58 }
 0x3ec   :  { %v2518_v35 = vadd.f32 %v2517_v7, %v1924_v48  ;;  %v3205_v42 = vpop.f32.mrf.mxu3  ;;  %v1927_v24 = vpop.f32.mrf.mxu1 }
 0x3ed   :  { %v11945_v50 = vadd.f32 %v3205_v42, %v2515_v32 }
 0x3ef   :  { %14430 = vst [vmem:[#allocation60_spill] sm:$0xff] %v11945_v50  ;;  %9337 = vmatmul.msk.f32.gmra.mxu1 %vm827_vm2, %v11949_v11  ;;  %v11965_v50 = vld [vmem:[#allocation2 + $0xef] sm:$0xff] }
 0x3f0   :  { %9433 = vmatmul.msk.f32.gmra.mxu2 %vm827_vm2, %v11722_v2  ;;  %v11959_v48 = vpop.f32.mrf.mxu0  ;;  %v11971_v2 = vld [vmem:[#allocation2 + $0xe9] sm:$0xff] }
 0x3f1   :  { %9528 = vmatmul.msk.f32.gmra.mxu3 %vm827_vm2, %v11955_v46  ;;  %14431 = vst [vmem:[#allocation61_spill] sm:$0xff] %v11959_v48 }
 0x3f3   :  { %v2520_v32 = vpop.f32.mrf.mxu2  ;;  %9138 = vmatmul.msk.f32.gmra.mxu0 %vm827_vm2, %v11799_v49 }
 0x3f4   :  { %v2521_v7 = vadd.f32 %v2520_v32, %v1927_v24  ;;  %v3208_v42 = vpop.f32.mrf.mxu3  ;;  %v1930_v58 = vpop.f32.mrf.mxu1 }
 0x3f5   :  { %v11961_v14 = vadd.f32 %v3208_v42, %v2518_v35  ;;  %v8239_v35 = vld [vmem:[%s14369_s5 + $0x8] sm:$0xff] }
 0x3f6   :  { %8546 = vmatpush.msra.mxu3 %v8239_v35 }
 0x3f7   :  { %14432 = vst [vmem:[#allocation62_spill] sm:$0xff] %v11961_v14  ;;  %9338 = vmatmul.msk.f32.gmra.mxu1 %vm827_vm2, %v11965_v50 }
 0x3f8   :  { %9434 = vmatmul.msk.f32.gmra.mxu2 %vm827_vm2, %v11737_v1  ;;  %v11978_v24 = vpop.f32.mrf.mxu0  ;;  %v11984_v1 = vld [vmem:[#allocation2 + $0x107] sm:$0xff] }
 0x3f9   :  { %9529 = vmatmul.msk.f32.gmra.mxu3 %vm827_vm2, %v11971_v2  ;;  %14433 = vst [vmem:[#allocation63_spill] sm:$0xff] %v11978_v24  ;;  %v12000_v24 = vld [vmem:[#allocation2 + $0x10f] sm:$0xff] }
 0x3fb   :  { %v2523_v49 = vpop.f32.mrf.mxu2  ;;  %9139 = vmatmul.msk.f32.gmra.mxu0 %vm827_vm2, %v11817_v39 }
 0x3fc   :  { %v2524_v32 = vadd.f32 %v2523_v49, %v1930_v58  ;;  %v3211_v42 = vpop.f32.mrf.mxu3  ;;  %v1933_v14 = vpop.f32.mrf.mxu1 }
 0x3fd   :  { %v11980_v48 = vadd.f32 %v3211_v42, %v2521_v7 }
 0x3ff   :  { %9339 = vmatmul.msk.f32.gmra.mxu1 %vm827_vm2, %v11984_v1 }
 0x400   :  { %9435 = vmatmul.msk.f32.gmra.mxu2 %vm827_vm2, %v11757_v16  ;;  %v11994_v58 = vpop.f32.mrf.mxu0  ;;  %v12006_v16 = vld [vmem:[#allocation2 + $0x109] sm:$0xff] }
 0x401   :  { %9530 = vmatmul.msk.f32.gmra.mxu3 %vm827_vm2, %v11990_v15  ;;  %14434 = vst [vmem:[#allocation64_spill] sm:$0xff] %v11994_v58 }
 0x403   :  { %v2526_v7 = vpop.f32.mrf.mxu2  ;;  %9140 = vmatmul.msk.f32.gmra.mxu0 %vm827_vm2, %v11835_v55 }
 0x404   :  { %v2527_v35 = vadd.f32 %v2526_v7, %v1933_v14  ;;  %v3214_v49 = vpop.f32.mrf.mxu3  ;;  %v1936_v39 = vpop.f32.mrf.mxu1 }
 0x405   :  { %v11996_v42 = vadd.f32 %v3214_v49, %v2524_v32 }
 0x407   :  { %14435 = vst [vmem:[#allocation65_spill] sm:$0xff] %v11996_v42  ;;  %9340 = vmatmul.msk.f32.gmra.mxu1 %vm827_vm2, %v12000_v24  ;;  %v12018_v42 = vld [vmem:[#allocation2 + $0x127] sm:$0xff] }
 0x408   :  { %9436 = vmatmul.msk.f32.gmra.mxu2 %vm827_vm2, %v11775_v20  ;;  %v12010_v14 = vpop.f32.mrf.mxu0  ;;  %v12024_v20 = vld [vmem:[#allocation2 + $0x111] sm:$0xff] }
 0x409   :  { %9531 = vmatmul.msk.f32.gmra.mxu3 %vm827_vm2, %v12006_v16  ;;  %14436 = vst [vmem:[#allocation66_spill] sm:$0xff] %v12010_v14  ;;  %v12038_v14 = vld [vmem:[#allocation2 + $0x12f] sm:$0xff] }
 0x40b   :  { %v2529_v32 = vpop.f32.mrf.mxu2  ;;  %9141 = vmatmul.msk.f32.gmra.mxu0 %vm827_vm2, %v11853_v8 }
 0x40c   :  { %v2530_v7 = vadd.f32 %v2529_v32, %v1936_v39  ;;  %v3217_v49 = vpop.f32.mrf.mxu3  ;;  %v12014_v55 = vpop.f32.mrf.mxu1 }
 0x40d   :  { %v12012_v58 = vadd.f32 %v3217_v49, %v2527_v35 }
 0x40f   :  { %9341 = vmatmul.msk.f32.gmra.mxu1 %vm827_vm2, %v12018_v42 }
 0x410   :  { %9437 = vmatmul.msk.f32.gmra.mxu2 %vm827_vm2, %v11793_v29  ;;  %v12028_v35 = vpop.f32.mrf.mxu0  ;;  %v12044_v29 = vld [vmem:[#allocation2 + $0x129] sm:$0xff] }
 0x411   :  { %9532 = vmatmul.msk.f32.gmra.mxu3 %vm827_vm2, %v12024_v20  ;;  %14437 = vst [vmem:[#allocation67_spill] sm:$0xff] %v12028_v35 }
 0x413   :  { %v12030_v39 = vpop.f32.mrf.mxu2  ;;  %9142 = vmatmul.msk.f32.gmra.mxu0 %vm827_vm2, %v11871_v31 }
 0x414   :  { %14438 = vst [vmem:[#allocation68_spill] sm:$0xff] %v12030_v39  ;;  %v3220_v32 = vpop.f32.mrf.mxu3  ;;  %v12034_v8 = vpop.f32.mrf.mxu1 }
 0x415   :  { %v12032_v49 = vadd.f32 %v3220_v32, %v2530_v7  ;;  %14440 = vst [vmem:[#allocation70_spill] sm:$0xff] %v12034_v8  ;;  %v12058_v8 = vld [vmem:[#allocation2 + $0x147] sm:$0xff] }
 0x417   :  { %14439 = vst [vmem:[#allocation69_spill] sm:$0xff] %v12032_v49  ;;  %9342 = vmatmul.msk.f32.gmra.mxu1 %vm827_vm2, %v12038_v14  ;;  %v4127_v49 = vld [vmem:[#allocation2 + $0x170] sm:$0xff] }
 0x418   :  { %9438 = vmatmul.msk.f32.gmra.mxu2 %vm827_vm2, %v11811_v22  ;;  %v12048_v7 = vpop.f32.mrf.mxu0  ;;  %v12064_v22 = vld [vmem:[#allocation2 + $0x131] sm:$0xff] }
 0x419   :  { %9533 = vmatmul.msk.f32.gmra.mxu3 %vm827_vm2, %v12044_v29  ;;  %14441 = vst [vmem:[#allocation71_spill] sm:$0xff] %v12048_v7 }
 0x41b   :  { %v12050_v32 = vpop.f32.mrf.mxu2  ;;  %9143 = vmatmul.msk.f32.gmra.mxu0 %vm827_vm2, %v11886_v53 }
 0x41c   :  { %14442 = vst [vmem:[#allocation72_spill] sm:$0xff] %v12050_v32  ;;  %v12052_v35 = vpop.f32.mrf.mxu3  ;;  %v12054_v31 = vpop.f32.mrf.mxu1 }
 0x41d   :  { %14443 = vst [vmem:[#allocation73_spill] sm:$0xff] %v12052_v35  ;;  %v12078_v35 = vld [vmem:[#allocation2 + $0x14f] sm:$0xff] }
 0x41e   :  { %14444 = vst [vmem:[#allocation74_spill] sm:$0xff] %v12054_v31 }
 0x41f   :  { %9343 = vmatmul.msk.f32.gmra.mxu1 %vm827_vm2, %v12058_v8 }
 0x420   :  { %9439 = vmatmul.msk.f32.gmra.mxu2 %vm827_vm2, %v11829_v38  ;;  %v12068_v7 = vpop.f32.mrf.mxu0  ;;  %v12084_v38 = vld [vmem:[#allocation2 + $0x149] sm:$0xff] }
 0x421   :  { %9534 = vmatmul.msk.f32.gmra.mxu3 %vm827_vm2, %v12064_v22  ;;  %14445 = vst [vmem:[#allocation75_spill] sm:$0xff] %v12068_v7 }
 0x423   :  { %v12070_v32 = vpop.f32.mrf.mxu2  ;;  %9144 = vmatmul.msk.f32.gmra.mxu0 %vm827_vm2, %v11901_v36 }
 0x424   :  { %14446 = vst [vmem:[#allocation76_spill] sm:$0xff] %v12070_v32  ;;  %v12072_v31 = vpop.f32.mrf.mxu3  ;;  %v12074_v53 = vpop.f32.mrf.mxu1 }
 0x425   :  { %14447 = vst [vmem:[#allocation77_spill] sm:$0xff] %v12072_v31  ;;  %v12098_v31 = vld [vmem:[#allocation2 + $0x167] sm:$0xff] }
 0x426   :  { %14448 = vst [vmem:[#allocation78_spill] sm:$0xff] %v12074_v53 }
 0x427   :  { %9344 = vmatmul.msk.f32.gmra.mxu1 %vm827_vm2, %v12078_v35 }
 0x428   :  { %9440 = vmatmul.msk.f32.gmra.mxu2 %vm827_vm2, %v11847_v17  ;;  %v12088_v7 = vpop.f32.mrf.mxu0  ;;  %v12104_v17 = vld [vmem:[#allocation2 + $0x151] sm:$0xff] }
 0x429   :  { %9535 = vmatmul.msk.f32.gmra.mxu3 %vm827_vm2, %v12084_v38  ;;  %14449 = vst [vmem:[#allocation79_spill] sm:$0xff] %v12088_v7 }
 0x42b   :  { %v12090_v32 = vpop.f32.mrf.mxu2  ;;  %9145 = vmatmul.msk.f32.gmra.mxu0 %vm827_vm2, %v11917_v59 }
 0x42c   :  { %14450 = vst [vmem:[#allocation80_spill] sm:$0xff] %v12090_v32  ;;  %v12092_v53 = vpop.f32.mrf.mxu3  ;;  %v12094_v36 = vpop.f32.mrf.mxu1 }
 0x42d   :  { %14451 = vst [vmem:[#allocation81_spill] sm:$0xff] %v12092_v53  ;;  %v3340_v53 = vld [vmem:[#allocation2 + $0x16f] sm:$0xff] }
 0x42e   :  { %14452 = vst [vmem:[#allocation82_spill] sm:$0xff] %v12094_v36 }
 0x42f   :  { %9345 = vmatmul.msk.f32.gmra.mxu1 %vm827_vm2, %v12098_v31 }
 0x430   :  { %9441 = vmatmul.msk.f32.gmra.mxu2 %vm827_vm2, %v11865_v0  ;;  %v12108_v7 = vpop.f32.mrf.mxu0  ;;  %v12120_v0 = vld [vmem:[#allocation2 + $0x169] sm:$0xff] }
 0x431   :  { %9536 = vmatmul.msk.f32.gmra.mxu3 %vm827_vm2, %v12104_v17  ;;  %14453 = vst [vmem:[#allocation83_spill] sm:$0xff] %v12108_v7 }
 0x433   :  { %v12110_v32 = vpop.f32.mrf.mxu2  ;;  %9146 = vmatmul.msk.f32.gmra.mxu0 %vm827_vm2, %v11933_v51  ;;  %v3341_v51 = vld [vmem:[#allocation2 + $0x187] sm:$0xff] }
 0x434   :  { %14454 = vst [vmem:[#allocation84_spill] sm:$0xff] %v12110_v32  ;;  %v12112_v36 = vpop.f32.mrf.mxu3  ;;  %v12114_v59 = vpop.f32.mrf.mxu1 }
 0x435   :  { %14455 = vst [vmem:[#allocation85_spill] sm:$0xff] %v12112_v36 }
 0x436   :  { %14456 = vst [vmem:[#allocation86_spill] sm:$0xff] %v12114_v59 }
 0x437   :  { %9346 = vmatmul.msk.f32.gmra.mxu1 %vm827_vm2, %v3340_v53  ;;  %v4128_v53 = vld [vmem:[#allocation2 + $0x188] sm:$0xff] }
 0x438   :  { %9442 = vmatmul.msk.f32.gmra.mxu2 %vm827_vm2, %v4127_v49  ;;  %v12124_v7 = vpop.f32.mrf.mxu0  ;;  %v4914_v49 = vld [vmem:[#allocation2 + $0x171] sm:$0xff] }
 0x439   :  { %9537 = vmatmul.msk.f32.gmra.mxu3 %vm827_vm2, %v12120_v0  ;;  %14457 = vst [vmem:[#allocation87_spill] sm:$0xff] %v12124_v7 }
 0x43b   :  { %v12126_v32 = vpop.f32.mrf.mxu2  ;;  %9147 = vmatmul.msk.f32.gmra.mxu0 %vm827_vm2, %v11949_v11  ;;  %v3342_v11 = vld [vmem:[#allocation2 + $0x18f] sm:$0xff] }
 0x43c   :  { %14458 = vst [vmem:[#allocation88_spill] sm:$0xff] %v12126_v32  ;;  %v12128_v36 = vpop.f32.mrf.mxu3  ;;  %v12130_v59 = vpop.f32.mrf.mxu1 }
 0x43d   :  { %14459 = vst [vmem:[#allocation89_spill] sm:$0xff] %v12128_v36 }
 0x43e   :  { %14460 = vst [vmem:[#allocation90_spill] sm:$0xff] %v12130_v59  ;;  %v4129_v59 = vld [vmem:[#allocation2 + $0x190] sm:$0xff] }
 0x43f   :  { %9347 = vmatmul.msk.f32.gmra.mxu1 %vm827_vm2, %v3341_v51  ;;  %v4915_v51 = vld [vmem:[#allocation2 + $0x189] sm:$0xff] }
 0x440   :  { %9443 = vmatmul.msk.f32.gmra.mxu2 %vm827_vm2, %v4128_v53  ;;  %v12137_v39 = vpop.f32.mrf.mxu0 }
 0x441   :  { %9538 = vmatmul.msk.f32.gmra.mxu3 %vm827_vm2, %v4914_v49  ;;  %14461 = vst [vmem:[#allocation91_spill] sm:$0xff] %v12137_v39 }
 0x443   :  { %v12139_v7 = vpop.f32.mrf.mxu2  ;;  %9148 = vmatmul.msk.f32.gmra.mxu0 %vm827_vm2, %v11965_v50  ;;  %v3343_v50 = vld [vmem:[#allocation2 + $0x1a7] sm:$0xff] }
 0x444   :  { %14462 = vst [vmem:[#allocation92_spill] sm:$0xff] %v12139_v7  ;;  %v12141_v32 = vpop.f32.mrf.mxu3  ;;  %v12143_v36 = vpop.f32.mrf.mxu1 }
 0x445   :  { %14463 = vst [vmem:[#allocation93_spill] sm:$0xff] %v12141_v32  ;;  %v4137_v32 = vld [vmem:[#allocation2 + $0x210] sm:$0xff] }
 0x446   :  { %14464 = vst [vmem:[#allocation94_spill] sm:$0xff] %v12143_v36  ;;  %v4130_v36 = vld [vmem:[#allocation2 + $0x1a8] sm:$0xff] }
 0x447   :  { %9348 = vmatmul.msk.f32.gmra.mxu1 %vm827_vm2, %v3342_v11 }
 0x448   :  { %9444 = vmatmul.msk.f32.gmra.mxu2 %vm827_vm2, %v4129_v59  ;;  %v12150_v53 = vpop.f32.mrf.mxu0  ;;  %v4916_v59 = vld [vmem:[#allocation2 + $0x191] sm:$0xff] }
 0x449   :  { %9539 = vmatmul.msk.f32.gmra.mxu3 %vm827_vm2, %v4915_v51 }
 0x44b   :  { %v12152_v49 = vpop.f32.mrf.mxu2  ;;  %9149 = vmatmul.msk.f32.gmra.mxu0 %vm827_vm2, %v11984_v1  ;;  %v3344_v1 = vld [vmem:[#allocation2 + $0x1af] sm:$0xff] }
 0x44c   :  { %14465 = vst [vmem:[#allocation95_spill] sm:$0xff] %v12152_v49  ;;  %v12154_v39 = vpop.f32.mrf.mxu3  ;;  %v12156_v7 = vpop.f32.mrf.mxu1 }
 0x44d   :  { %14466 = vst [vmem:[#allocation96_spill] sm:$0xff] %v12154_v39 }
 0x44e   :  { %14467 = vst [vmem:[#allocation97_spill] sm:$0xff] %v12156_v7  ;;  %v4131_v7 = vld [vmem:[#allocation2 + $0x1b0] sm:$0xff] }
 0x44f   :  { %9349 = vmatmul.msk.f32.gmra.mxu1 %vm827_vm2, %v3343_v50 }
 0x450   :  { %9445 = vmatmul.msk.f32.gmra.mxu2 %vm827_vm2, %v4130_v36  ;;  %v12163_v11 = vpop.f32.mrf.mxu0  ;;  %v4917_v36 = vld [vmem:[#allocation2 + $0x1a9] sm:$0xff] }
 0x451   :  { %9540 = vmatmul.msk.f32.gmra.mxu3 %vm827_vm2, %v4916_v59 }
 0x453   :  { %v12165_v51 = vpop.f32.mrf.mxu2  ;;  %9150 = vmatmul.msk.f32.gmra.mxu0 %vm827_vm2, %v12000_v24  ;;  %v3345_v24 = vld [vmem:[#allocation2 + $0x1c7] sm:$0xff] }
 0x454   :  { %14468 = vst [vmem:[#allocation98_spill] sm:$0xff] %v12165_v51  ;;  %v12167_v49 = vpop.f32.mrf.mxu3  ;;  %v12169_v39 = vpop.f32.mrf.mxu1 }
 0x455   :  { %14469 = vst [vmem:[#allocation99_spill] sm:$0xff] %v12167_v49 }
 0x456   :  { %14470 = vst [vmem:[#allocation100_spill] sm:$0xff] %v12169_v39  ;;  %v4132_v39 = vld [vmem:[#allocation2 + $0x1c8] sm:$0xff] }
 0x457   :  { %9350 = vmatmul.msk.f32.gmra.mxu1 %vm827_vm2, %v3344_v1 }
 0x458   :  { %9446 = vmatmul.msk.f32.gmra.mxu2 %vm827_vm2, %v4131_v7  ;;  %v12176_v50 = vpop.f32.mrf.mxu0  ;;  %v4918_v7 = vld [vmem:[#allocation2 + $0x1b1] sm:$0xff] }
 0x459   :  { %9541 = vmatmul.msk.f32.gmra.mxu3 %vm827_vm2, %v4917_v36 }
 0x45b   :  { %v12178_v59 = vpop.f32.mrf.mxu2  ;;  %9151 = vmatmul.msk.f32.gmra.mxu0 %vm827_vm2, %v12018_v42  ;;  %v3346_v42 = vld [vmem:[#allocation2 + $0x1cf] sm:$0xff] }
 0x45c   :  { %14471 = vst [vmem:[#allocation101_spill] sm:$0xff] %v12178_v59  ;;  %v12180_v51 = vpop.f32.mrf.mxu3  ;;  %v12182_v49 = vpop.f32.mrf.mxu1 }
 0x45d   :  { %14472 = vst [vmem:[#allocation102_spill] sm:$0xff] %v12180_v51 }
 0x45e   :  { %14473 = vst [vmem:[#allocation103_spill] sm:$0xff] %v12182_v49  ;;  %v4133_v49 = vld [vmem:[#allocation2 + $0x1d0] sm:$0xff] }
 0x45f   :  { %9351 = vmatmul.msk.f32.gmra.mxu1 %vm827_vm2, %v3345_v24 }
 0x460   :  { %9447 = vmatmul.msk.f32.gmra.mxu2 %vm827_vm2, %v4132_v39  ;;  %v12189_v1 = vpop.f32.mrf.mxu0  ;;  %v4919_v39 = vld [vmem:[#allocation2 + $0x1c9] sm:$0xff] }
 0x461   :  { %9542 = vmatmul.msk.f32.gmra.mxu3 %vm827_vm2, %v4918_v7 }
 0x463   :  { %v12191_v36 = vpop.f32.mrf.mxu2  ;;  %9152 = vmatmul.msk.f32.gmra.mxu0 %vm827_vm2, %v12038_v14  ;;  %v3347_v14 = vld [vmem:[#allocation2 + $0x1e7] sm:$0xff] }
 0x464   :  { %14474 = vst [vmem:[#allocation104_spill] sm:$0xff] %v12191_v36  ;;  %v12193_v59 = vpop.f32.mrf.mxu3  ;;  %v12195_v51 = vpop.f32.mrf.mxu1 }
 0x465   :  { %14475 = vst [vmem:[#allocation105_spill] sm:$0xff] %v12193_v59 }
 0x466   :  { %14476 = vst [vmem:[#allocation106_spill] sm:$0xff] %v12195_v51  ;;  %v4134_v51 = vld [vmem:[#allocation2 + $0x1e8] sm:$0xff] }
 0x467   :  { %9352 = vmatmul.msk.f32.gmra.mxu1 %vm827_vm2, %v3346_v42 }
 0x468   :  { %9448 = vmatmul.msk.f32.gmra.mxu2 %vm827_vm2, %v4133_v49  ;;  %v12202_v24 = vpop.f32.mrf.mxu0  ;;  %v4920_v49 = vld [vmem:[#allocation2 + $0x1d1] sm:$0xff] }
 0x469   :  { %9543 = vmatmul.msk.f32.gmra.mxu3 %vm827_vm2, %v4919_v39 }
 0x46b   :  { %v12204_v7 = vpop.f32.mrf.mxu2  ;;  %9153 = vmatmul.msk.f32.gmra.mxu0 %vm827_vm2, %v12058_v8  ;;  %v3348_v8 = vld [vmem:[#allocation2 + $0x1ef] sm:$0xff] }
 0x46c   :  { %14477 = vst [vmem:[#allocation107_spill] sm:$0xff] %v12204_v7  ;;  %v12206_v36 = vpop.f32.mrf.mxu3  ;;  %v12208_v59 = vpop.f32.mrf.mxu1 }
 0x46d   :  { %14478 = vst [vmem:[#allocation108_spill] sm:$0xff] %v12206_v36 }
 0x46e   :  { %14479 = vst [vmem:[#allocation109_spill] sm:$0xff] %v12208_v59  ;;  %v4135_v59 = vld [vmem:[#allocation2 + $0x1f0] sm:$0xff] }
 0x46f   :  { %9353 = vmatmul.msk.f32.gmra.mxu1 %vm827_vm2, %v3347_v14 }
 0x470   :  { %9449 = vmatmul.msk.f32.gmra.mxu2 %vm827_vm2, %v4134_v51  ;;  %v12215_v42 = vpop.f32.mrf.mxu0  ;;  %v4921_v51 = vld [vmem:[#allocation2 + $0x1e9] sm:$0xff] }
 0x471   :  { %9544 = vmatmul.msk.f32.gmra.mxu3 %vm827_vm2, %v4920_v49 }
 0x473   :  { %v12217_v39 = vpop.f32.mrf.mxu2  ;;  %9154 = vmatmul.msk.f32.gmra.mxu0 %vm827_vm2, %v12078_v35  ;;  %v3349_v35 = vld [vmem:[#allocation2 + $0x207] sm:$0xff] }
 0x474   :  { %14480 = vst [vmem:[#allocation110_spill] sm:$0xff] %v12217_v39  ;;  %v12219_v7 = vpop.f32.mrf.mxu3  ;;  %v12221_v36 = vpop.f32.mrf.mxu1 }
 0x475   :  { %14481 = vst [vmem:[#allocation111_spill] sm:$0xff] %v12219_v7 }
 0x476   :  { %14482 = vst [vmem:[#allocation112_spill] sm:$0xff] %v12221_v36  ;;  %v4136_v36 = vld [vmem:[#allocation2 + $0x208] sm:$0xff] }
 0x477   :  { %9354 = vmatmul.msk.f32.gmra.mxu1 %vm827_vm2, %v3348_v8 }
 0x478   :  { %9450 = vmatmul.msk.f32.gmra.mxu2 %vm827_vm2, %v4135_v59  ;;  %v12228_v14 = vpop.f32.mrf.mxu0  ;;  %v4922_v59 = vld [vmem:[#allocation2 + $0x1f1] sm:$0xff] }
 0x479   :  { %9545 = vmatmul.msk.f32.gmra.mxu3 %vm827_vm2, %v4921_v51  ;;  %v2532_v51 = vld [vmem:[#allocation2 + $0x9] sm:$0xff] }
 0x47b   :  { %v12230_v49 = vpop.f32.mrf.mxu2  ;;  %9155 = vmatmul.msk.f32.gmra.mxu0 %vm827_vm2, %v12098_v31  ;;  %v3350_v31 = vld [vmem:[#allocation2 + $0x20f] sm:$0xff] }
 0x47c   :  { %14483 = vst [vmem:[#allocation113_spill] sm:$0xff] %v12230_v49  ;;  %v12232_v39 = vpop.f32.mrf.mxu3  ;;  %v12234_v7 = vpop.f32.mrf.mxu1 }
 0x47d   :  { %14484 = vst [vmem:[#allocation114_spill] sm:$0xff] %v12232_v39 }
 0x47e   :  { %14485 = vst [vmem:[#allocation115_spill] sm:$0xff] %v12234_v7 }
 0x47f   :  { %9355 = vmatmul.msk.f32.gmra.mxu1 %vm827_vm2, %v3349_v35 }
 0x480   :  { %9451 = vmatmul.msk.f32.gmra.mxu2 %vm827_vm2, %v4136_v36  ;;  %v12241_v8 = vpop.f32.mrf.mxu0  ;;  %v4923_v36 = vld [vmem:[#allocation2 + $0x209] sm:$0xff] }
 0x481   :  { %9546 = vmatmul.msk.f32.gmra.mxu3 %vm827_vm2, %v4922_v59  ;;  %14486 = vst [vmem:[#allocation116_spill] sm:$0xff] %v12241_v8  ;;  %v2533_v59 = vld [vmem:[#allocation2 + $0x11] sm:$0xff] }
 0x483   :  { %v12243_v49 = vpop.f32.mrf.mxu2  ;;  %9229 = vmatmul.msk.f32.vlgmr.msrb.gmra.mxu0 %vm827_vm2, %v2532_v51  ;;  %v3351_v51 = vld [vmem:[#allocation2 + $0x267] sm:$0xff] }
 0x484   :  { %14487 = vst [vmem:[#allocation117_spill] sm:$0xff] %v12243_v49  ;;  %v12245_v39 = vpop.f32.mrf.mxu3  ;;  %v12247_v7 = vpop.f32.mrf.mxu1 }
 0x485   :  { %14488 = vst [vmem:[#allocation118_spill] sm:$0xff] %v12245_v39 }
 0x486   :  { %14489 = vst [vmem:[#allocation119_spill] sm:$0xff] %v12247_v7  ;;  %v4138_v7 = vld [vmem:[#allocation2 + $0x268] sm:$0xff] }
 0x487   :  { %9356 = vmatmul.msk.f32.gmra.mxu1 %vm827_vm2, %v3350_v31 }
 0x488   :  { %9452 = vmatmul.msk.f32.gmra.mxu2 %vm827_vm2, %v4137_v32  ;;  %v12253_v35 = vpop.f32.mrf.mxu0  ;;  %v4924_v32 = vld [vmem:[#allocation2 + $0x211] sm:$0xff] }
 0x489   :  { %9547 = vmatmul.msk.f32.gmra.mxu3 %vm827_vm2, %v4923_v36 }
 0x48b   :  { %v12255_v8 = vpop.f32.mrf.mxu2  ;;  %9230 = vmatmul.msk.f32.gmra.mxu0 %vm827_vm2, %v2533_v59  ;;  %v3352_v59 = vld [vmem:[#allocation2 + $0x26f] sm:$0xff] }
 0x48c   :  { %14490 = vst [vmem:[#allocation120_spill] sm:$0xff] %v12255_v8  ;;  %v12257_v49 = vpop.f32.mrf.mxu3  ;;  %v12259_v39 = vpop.f32.mrf.mxu1 }
 0x48d   :  { %14491 = vst [vmem:[#allocation121_spill] sm:$0xff] %v12257_v49 }
 0x48e   :  { %14492 = vst [vmem:[#allocation122_spill] sm:$0xff] %v12259_v39  ;;  %v4139_v39 = vld [vmem:[#allocation2 + $0x270] sm:$0xff] }
 0x48f   :  { %9357 = vmatmul.msk.f32.gmra.mxu1 %vm827_vm2, %v3351_v51 }
 0x490   :  { %9453 = vmatmul.msk.f32.gmra.mxu2 %vm827_vm2, %v4138_v7  ;;  %v12265_v31 = vpop.f32.mrf.mxu0  ;;  %v4925_v7 = vld [vmem:[#allocation2 + $0x269] sm:$0xff] }
 0x491   :  { %9548 = vmatmul.msk.f32.gmra.mxu3 %vm827_vm2, %v4924_v32 }
 0x493   :  { %v12267_v36 = vpop.f32.mrf.mxu2  ;;  %9231 = vmatmul.msk.f32.gmra.mxu0 %vm827_vm2, %v11769_v27  ;;  %v3353_v27 = vld [vmem:[#allocation2 + $0x287] sm:$0xff] }
 0x494   :  { %14493 = vst [vmem:[#allocation123_spill] sm:$0xff] %v12267_v36  ;;  %v12269_v8 = vpop.f32.mrf.mxu3  ;;  %v12271_v49 = vpop.f32.mrf.mxu1 }
 0x495   :  { %14494 = vst [vmem:[#allocation124_spill] sm:$0xff] %v12269_v8 }
 0x496   :  { %14495 = vst [vmem:[#allocation125_spill] sm:$0xff] %v12271_v49  ;;  %v4140_v49 = vld [vmem:[#allocation2 + $0x288] sm:$0xff] }
 0x497   :  { %9358 = vmatmul.msk.f32.gmra.mxu1 %vm827_vm2, %v3352_v59 }
 0x498   :  { %9454 = vmatmul.msk.f32.gmra.mxu2 %vm827_vm2, %v4139_v39  ;;  %v12278_v51 = vpop.f32.mrf.mxu0  ;;  %v4926_v39 = vld [vmem:[#allocation2 + $0x271] sm:$0xff] }
 0x499   :  { %9549 = vmatmul.msk.f32.gmra.mxu3 %vm827_vm2, %v4925_v7 }
 0x49b   :  { %v12280_v32 = vpop.f32.mrf.mxu2  ;;  %9232 = vmatmul.msk.f32.gmra.mxu0 %vm827_vm2, %v11787_v26  ;;  %v3354_v26 = vld [vmem:[#allocation2 + $0x28f] sm:$0xff] }
 0x49c   :  { %14496 = vst [vmem:[#allocation126_spill] sm:$0xff] %v12280_v32  ;;  %v12282_v36 = vpop.f32.mrf.mxu3  ;;  %v12284_v8 = vpop.f32.mrf.mxu1 }
 0x49d   :  { %14497 = vst [vmem:[#allocation127_spill] sm:$0xff] %v12282_v36 }
 0x49e   :  { %14498 = vst [vmem:[#allocation128_spill] sm:$0xff] %v12284_v8  ;;  %v4141_v8 = vld [vmem:[#allocation2 + $0x290] sm:$0xff] }
 0x49f   :  { %9359 = vmatmul.msk.f32.gmra.mxu1 %vm827_vm2, %v3353_v27 }
 0x4a0   :  { %9455 = vmatmul.msk.f32.gmra.mxu2 %vm827_vm2, %v4140_v49  ;;  %v12291_v59 = vpop.f32.mrf.mxu0  ;;  %v4927_v49 = vld [vmem:[#allocation2 + $0x289] sm:$0xff] }
 0x4a1   :  { %9550 = vmatmul.msk.f32.gmra.mxu3 %vm827_vm2, %v4926_v39 }
 0x4a3   :  { %v12293_v7 = vpop.f32.mrf.mxu2  ;;  %9233 = vmatmul.msk.f32.gmra.mxu0 %vm827_vm2, %v11805_v43  ;;  %v3355_v43 = vld [vmem:[#allocation2 + $0x2a7] sm:$0xff] }
 0x4a4   :  { %14499 = vst [vmem:[#allocation129_spill] sm:$0xff] %v12293_v7  ;;  %v12295_v32 = vpop.f32.mrf.mxu3  ;;  %v12297_v36 = vpop.f32.mrf.mxu1 }
 0x4a5   :  { %14500 = vst [vmem:[#allocation130_spill] sm:$0xff] %v12295_v32 }
 0x4a6   :  { %14501 = vst [vmem:[#allocation131_spill] sm:$0xff] %v12297_v36  ;;  %v4142_v36 = vld [vmem:[#allocation2 + $0x2a8] sm:$0xff] }
 0x4a7   :  { %9360 = vmatmul.msk.f32.gmra.mxu1 %vm827_vm2, %v3354_v26 }
 0x4a8   :  { %9456 = vmatmul.msk.f32.gmra.mxu2 %vm827_vm2, %v4141_v8  ;;  %v12304_v27 = vpop.f32.mrf.mxu0  ;;  %v4928_v8 = vld [vmem:[#allocation2 + $0x291] sm:$0xff] }
 0x4a9   :  { %9551 = vmatmul.msk.f32.gmra.mxu3 %vm827_vm2, %v4927_v49 }
 0x4ab   :  { %v12306_v39 = vpop.f32.mrf.mxu2  ;;  %9234 = vmatmul.msk.f32.gmra.mxu0 %vm827_vm2, %v11823_v30  ;;  %v3356_v30 = vld [vmem:[#allocation2 + $0x2af] sm:$0xff] }
 0x4ac   :  { %14502 = vst [vmem:[#allocation132_spill] sm:$0xff] %v12306_v39  ;;  %v12308_v7 = vpop.f32.mrf.mxu3  ;;  %v12310_v32 = vpop.f32.mrf.mxu1 }
 0x4ad   :  { %14503 = vst [vmem:[#allocation133_spill] sm:$0xff] %v12308_v7 }
 0x4ae   :  { %14504 = vst [vmem:[#allocation134_spill] sm:$0xff] %v12310_v32  ;;  %v4143_v32 = vld [vmem:[#allocation2 + $0x2b0] sm:$0xff] }
 0x4af   :  { %9361 = vmatmul.msk.f32.gmra.mxu1 %vm827_vm2, %v3355_v43 }
 0x4b0   :  { %9457 = vmatmul.msk.f32.gmra.mxu2 %vm827_vm2, %v4142_v36  ;;  %v12317_v26 = vpop.f32.mrf.mxu0  ;;  %v4929_v36 = vld [vmem:[#allocation2 + $0x2a9] sm:$0xff] }
 0x4b1   :  { %9552 = vmatmul.msk.f32.gmra.mxu3 %vm827_vm2, %v4928_v8  ;;  %14505 = vst [vmem:[#allocation135_spill] sm:$0xff] %v12317_v26  ;;  %v3359_v26 = vld [vmem:[#allocation2 + $0x2e7] sm:$0xff] }
 0x4b3   :  { %v12319_v49 = vpop.f32.mrf.mxu2  ;;  %9235 = vmatmul.msk.f32.gmra.mxu0 %vm827_vm2, %v11841_v13  ;;  %v3357_v13 = vld [vmem:[#allocation2 + $0x2c7] sm:$0xff] }
 0x4b4   :  { %14506 = vst [vmem:[#allocation136_spill] sm:$0xff] %v12319_v49  ;;  %v12321_v39 = vpop.f32.mrf.mxu3  ;;  %v12323_v7 = vpop.f32.mrf.mxu1 }
 0x4b5   :  { %14507 = vst [vmem:[#allocation137_spill] sm:$0xff] %v12321_v39 }
 0x4b6   :  { %14508 = vst [vmem:[#allocation138_spill] sm:$0xff] %v12323_v7  ;;  %v4144_v7 = vld [vmem:[#allocation2 + $0x2c8] sm:$0xff] }
 0x4b7   :  { %9362 = vmatmul.msk.f32.gmra.mxu1 %vm827_vm2, %v3356_v30 }
 0x4b8   :  { %9458 = vmatmul.msk.f32.gmra.mxu2 %vm827_vm2, %v4143_v32  ;;  %v12330_v43 = vpop.f32.mrf.mxu0  ;;  %v4930_v32 = vld [vmem:[#allocation2 + $0x2b1] sm:$0xff] }
 0x4b9   :  { %9553 = vmatmul.msk.f32.gmra.mxu3 %vm827_vm2, %v4929_v36  ;;  %14509 = vst [vmem:[#allocation139_spill] sm:$0xff] %v12330_v43 }
 0x4bb   :  { %v12332_v8 = vpop.f32.mrf.mxu2  ;;  %9236 = vmatmul.msk.f32.gmra.mxu0 %vm827_vm2, %v11859_v12  ;;  %v3358_v12 = vld [vmem:[#allocation2 + $0x2cf] sm:$0xff] }
 0x4bc   :  { %14510 = vst [vmem:[#allocation140_spill] sm:$0xff] %v12332_v8  ;;  %v12334_v49 = vpop.f32.mrf.mxu3  ;;  %v12336_v39 = vpop.f32.mrf.mxu1 }
 0x4bd   :  { %14511 = vst [vmem:[#allocation141_spill] sm:$0xff] %v12334_v49 }
 0x4be   :  { %14512 = vst [vmem:[#allocation142_spill] sm:$0xff] %v12336_v39  ;;  %v4145_v39 = vld [vmem:[#allocation2 + $0x2d0] sm:$0xff] }
 0x4bf   :  { %9363 = vmatmul.msk.f32.gmra.mxu1 %vm827_vm2, %v3357_v13  ;;  %v3246_v13 = vadd.f32 %v10895_v5, %v10875_v60  ;;  %v4146_v60 = vld [vmem:[#allocation2 + $0x2e8] sm:$0xff]  ;;  %v4932_v5 = vld [vmem:[#allocation2 + $0x2d1] sm:$0xff] }
 0x4c0   :  { %9459 = vmatmul.msk.f32.gmra.mxu2 %vm827_vm2, %v4144_v7  ;;  %v12343_v30 = vpop.f32.mrf.mxu0  ;;  %v4931_v7 = vld [vmem:[#allocation2 + $0x2c9] sm:$0xff] }
 0x4c1   :  { %9554 = vmatmul.msk.f32.gmra.mxu3 %vm827_vm2, %v4930_v32  ;;  %14513 = vst [vmem:[#allocation143_spill] sm:$0xff] %v12343_v30 }
 0x4c3   :  { %v12345_v36 = vpop.f32.mrf.mxu2  ;;  %9237 = vmatmul.msk.f32.gmra.mxu0 %vm827_vm2, %v11877_v52 }
 0x4c4   :  { %14514 = vst [vmem:[#allocation144_spill] sm:$0xff] %v12345_v36  ;;  %v12347_v8 = vpop.f32.mrf.mxu3  ;;  %v3791_v49 = vpop.f32.mrf.mxu1 }
 0x4c5   :  { %14515 = vst [vmem:[#allocation145_spill] sm:$0xff] %v12347_v8  ;;  %v4033_v32 = vadd.f32 %v3791_v49, %v3246_v13 }
 0x4c7   :  { %9364 = vmatmul.msk.f32.gmra.mxu1 %vm827_vm2, %v3358_v12 }
 0x4c8   :  { %9460 = vmatmul.msk.f32.gmra.mxu2 %vm827_vm2, %v4145_v39  ;;  %v12356_v36 = vpop.f32.mrf.mxu0 }
 0x4c9   :  { %9555 = vmatmul.msk.f32.gmra.mxu3 %vm827_vm2, %v4931_v7 }
 0x4cb   :  { %v4578_v8 = vpop.f32.mrf.mxu2  ;;  %9238 = vmatmul.msk.f32.gmra.mxu0 %vm827_vm2, %v11892_v63  ;;  %v3360_v63 = vld [vmem:[#allocation2 + $0x2ef] sm:$0xff] }
 0x4cc   :  { %v4820_v30 = vadd.f32 %v4578_v8, %v4033_v32  ;;  %v12358_v43 = vpop.f32.mrf.mxu3  ;;  %v3794_v52 = vpop.f32.mrf.mxu1 }
 0x4cd   :  { %14516 = vst [vmem:[#allocation146_spill] sm:$0xff] %v12358_v43  ;;  %v4034_v39 = vadd.f32 %v3794_v52, %v10910_v19  ;;  %v3393_v43 = vld [vmem:[#allocation2 + $0x547] sm:$0xff] }
 0x4cf   :  { %9365 = vmatmul.msk.f32.gmra.mxu1 %vm827_vm2, %v3359_v26  ;;  %v4147_v26 = vld [vmem:[#allocation2 + $0x2f0] sm:$0xff] }
 0x4d0   :  { %9461 = vmatmul.msk.f32.gmra.mxu2 %vm827_vm2, %v4146_v60  ;;  %v12366_v49 = vpop.f32.mrf.mxu0  ;;  %v4933_v60 = vld [vmem:[#allocation2 + $0x2e9] sm:$0xff] }
 0x4d1   :  { %9556 = vmatmul.msk.f32.gmra.mxu3 %vm827_vm2, %v4932_v5 }
 0x4d3   :  { %v4581_v8 = vpop.f32.mrf.mxu2  ;;  %9239 = vmatmul.msk.f32.gmra.mxu0 %vm827_vm2, %v11907_v3  ;;  %v3361_v3 = vld [vmem:[#allocation2 + $0x307] sm:$0xff] }
 0x4d4   :  { %v4821_v12 = vadd.f32 %v4581_v8, %v4034_v39  ;;  %v5365_v13 = vpop.f32.mrf.mxu3  ;;  %v3797_v32 = vpop.f32.mrf.mxu1 }
 0x4d5   :  { %v12368_v7 = vadd.f32 %v5365_v13, %v4820_v30  ;;  %v4035_v19 = vadd.f32 %v3797_v32, %v10925_v33 }
 0x4d7   :  { %14517 = vst [vmem:[#allocation147_spill] sm:$0xff] %v12368_v7  ;;  %9366 = vmatmul.msk.f32.gmra.mxu1 %vm827_vm2, %v3360_v63  ;;  %v4148_v63 = vld [vmem:[#allocation2 + $0x308] sm:$0xff] }
 0x4d8   :  { %9462 = vmatmul.msk.f32.gmra.mxu2 %vm827_vm2, %v4147_v26  ;;  %v12376_v52 = vpop.f32.mrf.mxu0  ;;  %v4934_v26 = vld [vmem:[#allocation2 + $0x2f1] sm:$0xff] }
 0x4d9   :  { %9557 = vmatmul.msk.f32.gmra.mxu3 %vm827_vm2, %v4933_v60  ;;  %14518 = vst [vmem:[#allocation148_spill] sm:$0xff] %v12376_v52  ;;  %v3392_v7 = vld [vmem:[#allocation2 + $0x52f] sm:$0xff]  ;;  %v3403_v52 = vld [vmem:[#allocation2 + $0x5e7] sm:$0xff] }
 0x4db   :  { %v4584_v5 = vpop.f32.mrf.mxu2  ;;  %9240 = vmatmul.msk.f32.gmra.mxu0 %vm827_vm2, %v11923_v37  ;;  %v3362_v37 = vld [vmem:[#allocation2 + $0x30f] sm:$0xff] }
 0x4dc   :  { %v4822_v30 = vadd.f32 %v4584_v5, %v4035_v19  ;;  %v5368_v39 = vpop.f32.mrf.mxu3  ;;  %v3800_v13 = vpop.f32.mrf.mxu1 }
 0x4dd   :  { %v12378_v8 = vadd.f32 %v5368_v39, %v4821_v12  ;;  %v4036_v33 = vadd.f32 %v3800_v13, %v10940_v45 }
 0x4df   :  { %14519 = vst [vmem:[#allocation149_spill] sm:$0xff] %v12378_v8  ;;  %9367 = vmatmul.msk.f32.gmra.mxu1 %vm827_vm2, %v3361_v3  ;;  %v4149_v3 = vld [vmem:[#allocation2 + $0x310] sm:$0xff]  ;;  %v3391_v8 = vld [vmem:[#allocation2 + $0x527] sm:$0xff] }
 0x4e0   :  { %9463 = vmatmul.msk.f32.gmra.mxu2 %vm827_vm2, %v4148_v63  ;;  %v12386_v32 = vpop.f32.mrf.mxu0  ;;  %v4935_v63 = vld [vmem:[#allocation2 + $0x309] sm:$0xff] }
 0x4e1   :  { %9558 = vmatmul.msk.f32.gmra.mxu3 %vm827_vm2, %v4934_v26  ;;  %14520 = vst [vmem:[#allocation150_spill] sm:$0xff] %v12386_v32  ;;  %v3401_v32 = vld [vmem:[#allocation2 + $0x5c7] sm:$0xff] }
 0x4e3   :  { %v4587_v60 = vpop.f32.mrf.mxu2  ;;  %9241 = vmatmul.msk.f32.gmra.mxu0 %vm827_vm2, %v11939_v23  ;;  %v3363_v23 = vld [vmem:[#allocation2 + $0x327] sm:$0xff] }
 0x4e4   :  { %v4823_v12 = vadd.f32 %v4587_v60, %v4036_v33  ;;  %v5371_v19 = vpop.f32.mrf.mxu3  ;;  %v3803_v39 = vpop.f32.mrf.mxu1 }
 0x4e5   :  { %v12388_v5 = vadd.f32 %v5371_v19, %v4822_v30  ;;  %v4037_v45 = vadd.f32 %v3803_v39, %v10955_v57  ;;  %v7351_v57 = vld [vmem:[%s14368_s3 + $0x80] sm:$0xff] }
 0x4e6   :  { %7656 = vmatpush.msra.mxu2 %v7351_v57 }
 0x4e7   :  { %14521 = vst [vmem:[#allocation151_spill] sm:$0xff] %v12388_v5  ;;  %9368 = vmatmul.msk.f32.gmra.mxu1 %vm827_vm2, %v3362_v37  ;;  %v4150_v37 = vld [vmem:[#allocation2 + $0x328] sm:$0xff] }
 0x4e8   :  { %9464 = vmatmul.msk.f32.gmra.mxu2 %vm827_vm2, %v4149_v3  ;;  %v12396_v13 = vpop.f32.mrf.mxu0  ;;  %v4936_v3 = vld [vmem:[#allocation2 + $0x311] sm:$0xff] }
 0x4e9   :  { %9559 = vmatmul.msk.f32.gmra.mxu3 %vm827_vm2, %v4935_v63  ;;  %14522 = vst [vmem:[#allocation152_spill] sm:$0xff] %v12396_v13  ;;  %v3390_v5 = vld [vmem:[#allocation2 + $0x50f] sm:$0xff]  ;;  %v3399_v13 = vld [vmem:[#allocation2 + $0x5a7] sm:$0xff] }
 0x4eb   :  { %v4590_v26 = vpop.f32.mrf.mxu2  ;;  %9242 = vmatmul.msk.f32.gmra.mxu0 %vm827_vm2, %v11955_v46 }
 0x4ec   :  { %v4824_v30 = vadd.f32 %v4590_v26, %v4037_v45  ;;  %v5374_v33 = vpop.f32.mrf.mxu3  ;;  %v3806_v19 = vpop.f32.mrf.mxu1 }
 0x4ed   :  { %v12398_v60 = vadd.f32 %v5374_v33, %v4823_v12  ;;  %v4038_v12 = vadd.f32 %v3806_v19, %v10970_v6  ;;  %v4937_v6 = vld [vmem:[#allocation2 + $0x329] sm:$0xff] }
 0x4ef   :  { %14523 = vst [vmem:[#allocation153_spill] sm:$0xff] %v12398_v60  ;;  %9369 = vmatmul.msk.f32.gmra.mxu1 %vm827_vm2, %v3363_v23  ;;  %v6564_v23 = vld [vmem:[%s14368_s3 + $0x70] sm:$0xff]  ;;  %v3389_v60 = vld [vmem:[#allocation2 + $0x507] sm:$0xff] }
 0x4f0   :  { %9465 = vmatmul.msk.f32.gmra.mxu2 %vm827_vm2, %v4150_v37  ;;  %v12409_v39 = vpop.f32.mrf.mxu0  ;;  %6869 = vmatpush.msra.mxu1 %v6564_v23  ;;  %v3364_v37 = vld [vmem:[#allocation2 + $0x32f] sm:$0xff]  ;;  %v3365_v23 = vld [vmem:[#allocation2 + $0x347] sm:$0xff] }
 0x4f1   :  { %9560 = vmatmul.msk.f32.gmra.mxu3 %vm827_vm2, %v4936_v3  ;;  %14524 = vst [vmem:[#allocation154_spill] sm:$0xff] %v12409_v39  ;;  %v4151_v3 = vld [vmem:[#allocation2 + $0x330] sm:$0xff]  ;;  %v3397_v39 = vld [vmem:[#allocation2 + $0x587] sm:$0xff] }
 0x4f3   :  { %v4593_v63 = vpop.f32.mrf.mxu2  ;;  %9243 = vmatmul.msk.f32.gmra.mxu0 %vm827_vm2, %v11971_v2 }
 0x4f4   :  { %v4825_v46 = vadd.f32 %v4593_v63, %v4038_v12  ;;  %v5377_v45 = vpop.f32.mrf.mxu3  ;;  %v3809_v33 = vpop.f32.mrf.mxu1 }
 0x4f5   :  { %v12411_v26 = vadd.f32 %v5377_v45, %v4824_v30  ;;  %v4039_v30 = vadd.f32 %v3809_v33, %v10985_v18 }
 0x4f7   :  { %14525 = vst [vmem:[#allocation155_spill] sm:$0xff] %v12411_v26  ;;  %9370 = vmatmul.msk.f32.gmra.mxu1 %vm827_vm2, %v3364_v37  ;;  %v4152_v37 = vld [vmem:[#allocation2 + $0x348] sm:$0xff] }
 0x4f8   :  { %9466 = vmatmul.msk.f32.gmra.mxu2 %vm827_vm2, %v4151_v3  ;;  %v12422_v19 = vpop.f32.mrf.mxu0  ;;  %v4938_v3 = vld [vmem:[#allocation2 + $0x331] sm:$0xff] }
 0x4f9   :  { %9561 = vmatmul.msk.f32.gmra.mxu3 %vm827_vm2, %v4937_v6  ;;  %14526 = vst [vmem:[#allocation156_spill] sm:$0xff] %v12422_v19  ;;  %v3388_v26 = vld [vmem:[#allocation2 + $0x4ef] sm:$0xff]  ;;  %v3395_v19 = vld [vmem:[#allocation2 + $0x567] sm:$0xff] }
 0x4fb   :  { %v4596_v57 = vpop.f32.mrf.mxu2  ;;  %9244 = vmatmul.msk.f32.gmra.mxu0 %vm827_vm2, %v11990_v15  ;;  %v3366_v15 = vld [vmem:[#allocation2 + $0x34f] sm:$0xff] }
 0x4fc   :  { %v4826_v2 = vadd.f32 %v4596_v57, %v4039_v30  ;;  %v5380_v12 = vpop.f32.mrf.mxu3  ;;  %v3812_v45 = vpop.f32.mrf.mxu1 }
 0x4fd   :  { %v12424_v63 = vadd.f32 %v5380_v12, %v4825_v46  ;;  %v4040_v18 = vadd.f32 %v3812_v45, %v11000_v34 }
 0x4ff   :  { %14527 = vst [vmem:[#allocation157_spill] sm:$0xff] %v12424_v63  ;;  %9371 = vmatmul.msk.f32.gmra.mxu1 %vm827_vm2, %v3365_v23  ;;  %v4153_v23 = vld [vmem:[#allocation2 + $0x350] sm:$0xff]  ;;  %v3387_v63 = vld [vmem:[#allocation2 + $0x4e7] sm:$0xff] }
 0x500   :  { %9467 = vmatmul.msk.f32.gmra.mxu2 %vm827_vm2, %v4152_v37  ;;  %v12432_v33 = vpop.f32.mrf.mxu0  ;;  %v4939_v37 = vld [vmem:[#allocation2 + $0x349] sm:$0xff] }
 0x501   :  { %9562 = vmatmul.msk.f32.gmra.mxu3 %vm827_vm2, %v4938_v3 }
 0x503   :  { %v4599_v6 = vpop.f32.mrf.mxu2  ;;  %9245 = vmatmul.msk.f32.gmra.mxu0 %vm827_vm2, %v12006_v16  ;;  %v3367_v16 = vld [vmem:[#allocation2 + $0x367] sm:$0xff] }
 0x504   :  { %v4827_v46 = vadd.f32 %v4599_v6, %v4040_v18  ;;  %v5383_v30 = vpop.f32.mrf.mxu3  ;;  %v3815_v12 = vpop.f32.mrf.mxu1 }
 0x505   :  { %v12434_v57 = vadd.f32 %v5383_v30, %v4826_v2  ;;  %v4041_v34 = vadd.f32 %v3815_v12, %v11015_v47 }
 0x507   :  { %14528 = vst [vmem:[#allocation158_spill] sm:$0xff] %v12434_v57  ;;  %9372 = vmatmul.msk.f32.gmra.mxu1 %vm827_vm2, %v3366_v15  ;;  %v4154_v15 = vld [vmem:[#allocation2 + $0x368] sm:$0xff] }
 0x508   :  { %9468 = vmatmul.msk.f32.gmra.mxu2 %vm827_vm2, %v4153_v23  ;;  %v12442_v45 = vpop.f32.mrf.mxu0  ;;  %v4940_v23 = vld [vmem:[#allocation2 + $0x351] sm:$0xff] }
 0x509   :  { %9563 = vmatmul.msk.f32.gmra.mxu3 %vm827_vm2, %v4939_v37  ;;  %v3386_v57 = vld [vmem:[#allocation2 + $0x4cf] sm:$0xff] }
 0x50b   :  { %v4602_v3 = vpop.f32.mrf.mxu2  ;;  %9246 = vmatmul.msk.f32.gmra.mxu0 %vm827_vm2, %v12024_v20  ;;  %v3368_v20 = vld [vmem:[#allocation2 + $0x36f] sm:$0xff] }
 0x50c   :  { %v4828_v2 = vadd.f32 %v4602_v3, %v4041_v34  ;;  %v5386_v18 = vpop.f32.mrf.mxu3  ;;  %v3818_v30 = vpop.f32.mrf.mxu1 }
 0x50d   :  { %v12444_v6 = vadd.f32 %v5386_v18, %v4827_v46  ;;  %v4042_v47 = vadd.f32 %v3818_v30, %v11030_v61 }
 0x50f   :  { %14529 = vst [vmem:[#allocation159_spill] sm:$0xff] %v12444_v6  ;;  %9373 = vmatmul.msk.f32.gmra.mxu1 %vm827_vm2, %v3367_v16  ;;  %v4155_v16 = vld [vmem:[#allocation2 + $0x370] sm:$0xff]  ;;  %v3385_v6 = vld [vmem:[#allocation2 + $0x4c7] sm:$0xff] }
 0x510   :  { %9469 = vmatmul.msk.f32.gmra.mxu2 %vm827_vm2, %v4154_v15  ;;  %v12452_v12 = vpop.f32.mrf.mxu0  ;;  %v4941_v15 = vld [vmem:[#allocation2 + $0x369] sm:$0xff] }
 0x511   :  { %9564 = vmatmul.msk.f32.gmra.mxu3 %vm827_vm2, %v4940_v23 }
 0x513   :  { %v4605_v37 = vpop.f32.mrf.mxu2  ;;  %9247 = vmatmul.msk.f32.gmra.mxu0 %vm827_vm2, %v12044_v29  ;;  %v5778_v29 = vld [vmem:[%s14368_s3 + $0x68] sm:$0xff] }
 0x514   :  { %v4829_v46 = vadd.f32 %v4605_v37, %v4042_v47  ;;  %v5389_v34 = vpop.f32.mrf.mxu3  ;;  %v3821_v18 = vpop.f32.mrf.mxu1  ;;  %6081 = vmatpush.msra.mxu0 %v5778_v29 }
 0x515   :  { %v12454_v3 = vadd.f32 %v5389_v34, %v4828_v2  ;;  %v4043_v61 = vadd.f32 %v3821_v18, %v11045_v10  ;;  %v5777_v10 = vld [vmem:[%s14368_s3 + $0x60] sm:$0xff] }
 0x516   :  { %v3369_v18 = vld [vmem:[#allocation2 + $0x387] sm:$0xff]  ;;  %6082 = vmatpush.msra.mxu0 %v5777_v10 }
 0x517   :  { %14530 = vst [vmem:[#allocation160_spill] sm:$0xff] %v12454_v3  ;;  %9374 = vmatmul.msk.f32.gmra.mxu1 %vm827_vm2, %v3368_v20  ;;  %v4156_v20 = vld [vmem:[#allocation2 + $0x388] sm:$0xff] }
 0x518   :  { %9470 = vmatmul.msk.f32.gmra.mxu2 %vm827_vm2, %v4155_v16  ;;  %v12462_v30 = vpop.f32.mrf.mxu0  ;;  %v4943_v10 = vld [vmem:[#allocation2 + $0x389] sm:$0xff] }
 0x519   :  { %9565 = vmatmul.msk.f32.gmra.mxu3 %vm827_vm2, %v4941_v15  ;;  %v3384_v3 = vld [vmem:[#allocation2 + $0x4af] sm:$0xff] }
 0x51b   :  { %v4608_v23 = vpop.f32.mrf.mxu2  ;;  %9248 = vmatmul.msk.f32.gmra.mxu0 %vm827_vm2, %v12064_v22 }
 0x51c   :  { %v4830_v2 = vadd.f32 %v4608_v23, %v4043_v61  ;;  %v5392_v47 = vpop.f32.mrf.mxu3  ;;  %v3824_v34 = vpop.f32.mrf.mxu1 }
 0x51d   :  { %v12464_v37 = vadd.f32 %v5392_v47, %v4829_v46  ;;  %v4942_v46 = vld [vmem:[#allocation2 + $0x371] sm:$0xff]  ;;  %v4044_v22 = vadd.f32 %v3824_v34, %v11060_v25 }
 0x51f   :  { %14531 = vst [vmem:[#allocation161_spill] sm:$0xff] %v12464_v37  ;;  %9375 = vmatmul.msk.f32.gmra.mxu1 %vm827_vm2, %v3369_v18  ;;  %v3370_v18 = vld [vmem:[#allocation2 + $0x38f] sm:$0xff] }
 0x520   :  { %9471 = vmatmul.msk.f32.gmra.mxu2 %vm827_vm2, %v4156_v20  ;;  %v12478_v16 = vpop.f32.mrf.mxu0  ;;  %v4157_v37 = vld [vmem:[#allocation2 + $0x390] sm:$0xff] }
 0x521   :  { %9566 = vmatmul.msk.f32.gmra.mxu3 %vm827_vm2, %v4942_v46 }
 0x523   :  { %v4611_v15 = vpop.f32.mrf.mxu2  ;;  %9249 = vmatmul.msk.f32.gmra.mxu0 %vm827_vm2, %v12084_v38  ;;  %v3371_v38 = vld [vmem:[#allocation2 + $0x3a7] sm:$0xff] }
 0x524   :  { %v4831_v61 = vadd.f32 %v4611_v15, %v4044_v22  ;;  %v5395_v23 = vpop.f32.mrf.mxu3  ;;  %v3827_v29 = vpop.f32.mrf.mxu1 }
 0x525   :  { %v12480_v47 = vadd.f32 %v5395_v23, %v4830_v2  ;;  %v4045_v25 = vadd.f32 %v3827_v29, %v11075_v40  ;;  %v4158_v23 = vld [vmem:[#allocation2 + $0x3a8] sm:$0xff] }
 0x527   :  { %14532 = vst [vmem:[#allocation162_spill] sm:$0xff] %v12480_v47  ;;  %9376 = vmatmul.msk.f32.gmra.mxu1 %vm827_vm2, %v3370_v18  ;;  %v3383_v47 = vld [vmem:[#allocation2 + $0x4a7] sm:$0xff] }
 0x528   :  { %9472 = vmatmul.msk.f32.gmra.mxu2 %vm827_vm2, %v4157_v37  ;;  %v12488_v34 = vpop.f32.mrf.mxu0  ;;  %v4944_v37 = vld [vmem:[#allocation2 + $0x391] sm:$0xff] }
 0x529   :  { %9567 = vmatmul.msk.f32.gmra.mxu3 %vm827_vm2, %v4943_v10 }
 0x52b   :  { %v4614_v20 = vpop.f32.mrf.mxu2  ;;  %9250 = vmatmul.msk.f32.gmra.mxu0 %vm827_vm2, %v12104_v17  ;;  %v3372_v17 = vld [vmem:[#allocation2 + $0x3af] sm:$0xff] }
 0x52c   :  { %v4832_v2 = vadd.f32 %v4614_v20, %v4045_v25  ;;  %v5398_v46 = vpop.f32.mrf.mxu3  ;;  %v3830_v15 = vpop.f32.mrf.mxu1 }
 0x52d   :  { %v12490_v22 = vadd.f32 %v5398_v46, %v4831_v61  ;;  %v4046_v40 = vadd.f32 %v3830_v15, %v11090_v54  ;;  %v4159_v46 = vld [vmem:[#allocation2 + $0x3b0] sm:$0xff] }
 0x52f   :  { %14533 = vst [vmem:[#allocation163_spill] sm:$0xff] %v12490_v22  ;;  %9377 = vmatmul.msk.f32.gmra.mxu1 %vm827_vm2, %v3371_v38  ;;  %v4945_v38 = vld [vmem:[#allocation2 + $0x3a9] sm:$0xff] }
 0x530   :  { %9473 = vmatmul.msk.f32.gmra.mxu2 %vm827_vm2, %v4158_v23  ;;  %v12498_v29 = vpop.f32.mrf.mxu0  ;;  %v3382_v22 = vld [vmem:[#allocation2 + $0x44f] sm:$0xff] }
 0x531   :  { %9568 = vmatmul.msk.f32.gmra.mxu3 %vm827_vm2, %v4944_v37 }
 0x533   :  { %v4617_v18 = vpop.f32.mrf.mxu2  ;;  %9251 = vmatmul.msk.f32.gmra.mxu0 %vm827_vm2, %v12120_v0 }
 0x534   :  { %v4833_v61 = vadd.f32 %v4617_v18, %v4046_v40  ;;  %v5401_v10 = vpop.f32.mrf.mxu3  ;;  %v3833_v20 = vpop.f32.mrf.mxu1  ;;  %v5681_v40 = vld [vmem:[#allocation2 + $0x47] sm:$0xff] }
 0x535   :  { %v12500_v25 = vadd.f32 %v5401_v10, %v4832_v2  ;;  %v4047_v54 = vadd.f32 %v3833_v20, %v11105_v4  ;;  %v3373_v10 = vld [vmem:[#allocation2 + $0x3c7] sm:$0xff] }
 0x537   :  { %14534 = vst [vmem:[#allocation164_spill] sm:$0xff] %v12500_v25  ;;  %9378 = vmatmul.msk.f32.gmra.mxu1 %vm827_vm2, %v3372_v17  ;;  %v4160_v17 = vld [vmem:[#allocation2 + $0x3c8] sm:$0xff]  ;;  %v4954_v25 = vld [vmem:[#allocation2 + $0x431] sm:$0xff] }
 0x538   :  { %9474 = vmatmul.msk.f32.gmra.mxu2 %vm827_vm2, %v4159_v46  ;;  %v12508_v15 = vpop.f32.mrf.mxu0  ;;  %v4946_v46 = vld [vmem:[#allocation2 + $0x3b1] sm:$0xff] }
 0x539   :  { %9569 = vmatmul.msk.f32.gmra.mxu3 %vm827_vm2, %v4945_v38 }
 0x53b   :  { %v4620_v23 = vpop.f32.mrf.mxu2  ;;  %9613 = vmatmul.msk.f32.vlgmr.msra.gmra.mxu0 %vm827_vm2, %v5681_v40 }
 0x53c   :  { %v4834_v2 = vadd.f32 %v4620_v23, %v4047_v54  ;;  %v5404_v37 = vpop.f32.mrf.mxu3  ;;  %v3836_v0 = vpop.f32.mrf.mxu1  ;;  %v5682_v23 = vld [vmem:[#allocation2 + $0x4f] sm:$0xff] }
 0x53d   :  { %v12510_v18 = vadd.f32 %v5404_v37, %v4833_v61  ;;  %v4048_v4 = vadd.f32 %v3836_v0, %v11120_v21 }
 0x53f   :  { %14535 = vst [vmem:[#allocation165_spill] sm:$0xff] %v12510_v18  ;;  %9379 = vmatmul.msk.f32.gmra.mxu1 %vm827_vm2, %v3373_v10  ;;  %v3374_v18 = vld [vmem:[#allocation2 + $0x3cf] sm:$0xff] }
 0x540   :  { %9475 = vmatmul.msk.f32.gmra.mxu2 %vm827_vm2, %v4160_v17  ;;  %v12517_v20 = vpop.f32.mrf.mxu0  ;;  %v4161_v10 = vld [vmem:[#allocation2 + $0x3d0] sm:$0xff] }
 0x541   :  { %9570 = vmatmul.msk.f32.gmra.mxu3 %vm827_vm2, %v4946_v46  ;;  %v4947_v17 = vld [vmem:[#allocation2 + $0x3c9] sm:$0xff] }
 0x543   :  { %v4623_v38 = vpop.f32.mrf.mxu2  ;;  %9614 = vmatmul.msk.f32.gmra.mxu0 %vm827_vm2, %v5682_v23 }
 0x544   :  { %v4835_v54 = vadd.f32 %v4623_v38, %v4048_v4  ;;  %v5407_v61 = vpop.f32.mrf.mxu3  ;;  %v3839_v40 = vpop.f32.mrf.mxu1  ;;  %v5683_v38 = vld [vmem:[#allocation2 + $0x67] sm:$0xff] }
 0x545   :  { %v12519_v37 = vadd.f32 %v5407_v61, %v4834_v2  ;;  %v4049_v21 = vadd.f32 %v3839_v40, %v11141_v41 }
 0x547   :  { %14536 = vst [vmem:[#allocation166_spill] sm:$0xff] %v12519_v37  ;;  %9380 = vmatmul.msk.f32.gmra.mxu1 %vm827_vm2, %v3374_v18  ;;  %v3375_v37 = vld [vmem:[#allocation2 + $0x3e7] sm:$0xff] }
 0x548   :  { %9476 = vmatmul.msk.f32.gmra.mxu2 %vm827_vm2, %v4161_v10  ;;  %v12526_v0 = vpop.f32.mrf.mxu0  ;;  %v4162_v18 = vld [vmem:[#allocation2 + $0x3e8] sm:$0xff]  ;;  %v4948_v10 = vld [vmem:[#allocation2 + $0x3d1] sm:$0xff] }
 0x549   :  { %9571 = vmatmul.msk.f32.gmra.mxu3 %vm827_vm2, %v4947_v17 }
 0x54b   :  { %v4626_v46 = vpop.f32.mrf.mxu2  ;;  %9615 = vmatmul.msk.f32.gmra.mxu0 %vm827_vm2, %v5683_v38 }
 0x54c   :  { %v4836_v4 = vadd.f32 %v4626_v46, %v4049_v21  ;;  %v5410_v2 = vpop.f32.mrf.mxu3  ;;  %v3842_v23 = vpop.f32.mrf.mxu1  ;;  %v5684_v46 = vld [vmem:[#allocation2 + $0x6f] sm:$0xff] }
 0x54d   :  { %v12528_v61 = vadd.f32 %v5410_v2, %v4835_v54  ;;  %v4050_v41 = vadd.f32 %v3842_v23, %v11156_v56 }
 0x54f   :  { %14537 = vst [vmem:[#allocation167_spill] sm:$0xff] %v12528_v61  ;;  %9381 = vmatmul.msk.f32.gmra.mxu1 %vm827_vm2, %v3375_v37  ;;  %v3376_v61 = vld [vmem:[#allocation2 + $0x3ef] sm:$0xff] }
 0x550   :  { %9477 = vmatmul.msk.f32.gmra.mxu2 %vm827_vm2, %v4162_v18  ;;  %v12535_v40 = vpop.f32.mrf.mxu0  ;;  %v4163_v37 = vld [vmem:[#allocation2 + $0x3f0] sm:$0xff] }
 0x551   :  { %9572 = vmatmul.msk.f32.gmra.mxu3 %vm827_vm2, %v4948_v10  ;;  %v4949_v18 = vld [vmem:[#allocation2 + $0x3e9] sm:$0xff] }
 0x553   :  { %v4629_v17 = vpop.f32.mrf.mxu2  ;;  %9616 = vmatmul.msk.f32.gmra.mxu0 %vm827_vm2, %v5684_v46 }
 0x554   :  { %v4837_v21 = vadd.f32 %v4629_v17, %v4050_v41  ;;  %v5413_v54 = vpop.f32.mrf.mxu3  ;;  %v3845_v38 = vpop.f32.mrf.mxu1  ;;  %v5685_v17 = vld [vmem:[#allocation2 + $0x87] sm:$0xff] }
 0x555   :  { %v12537_v2 = vadd.f32 %v5413_v54, %v4836_v4  ;;  %v4051_v56 = vadd.f32 %v3845_v38, %v11171_v9 }
 0x557   :  { %14538 = vst [vmem:[#allocation168_spill] sm:$0xff] %v12537_v2  ;;  %9382 = vmatmul.msk.f32.gmra.mxu1 %vm827_vm2, %v3376_v61  ;;  %v3377_v2 = vld [vmem:[#allocation2 + $0x407] sm:$0xff] }
 0x558   :  { %9478 = vmatmul.msk.f32.gmra.mxu2 %vm827_vm2, %v4163_v37  ;;  %v12544_v23 = vpop.f32.mrf.mxu0  ;;  %v4164_v61 = vld [vmem:[#allocation2 + $0x408] sm:$0xff]  ;;  %v4950_v37 = vld [vmem:[#allocation2 + $0x3f1] sm:$0xff] }
 0x559   :  { %9573 = vmatmul.msk.f32.gmra.mxu3 %vm827_vm2, %v4949_v18 }
 0x55b   :  { %v4632_v10 = vpop.f32.mrf.mxu2  ;;  %9617 = vmatmul.msk.f32.gmra.mxu0 %vm827_vm2, %v5685_v17 }
 0x55c   :  { %v4838_v41 = vadd.f32 %v4632_v10, %v4051_v56  ;;  %v5416_v4 = vpop.f32.mrf.mxu3  ;;  %v3848_v46 = vpop.f32.mrf.mxu1  ;;  %v5686_v10 = vld [vmem:[#allocation2 + $0x8f] sm:$0xff] }
 0x55d   :  { %v12546_v54 = vadd.f32 %v5416_v4, %v4837_v21  ;;  %v4052_v9 = vadd.f32 %v3848_v46, %v11186_v28 }
 0x55f   :  { %14539 = vst [vmem:[#allocation169_spill] sm:$0xff] %v12546_v54  ;;  %9383 = vmatmul.msk.f32.gmra.mxu1 %vm827_vm2, %v3377_v2  ;;  %v3378_v54 = vld [vmem:[#allocation2 + $0x40f] sm:$0xff] }
 0x560   :  { %9479 = vmatmul.msk.f32.gmra.mxu2 %vm827_vm2, %v4164_v61  ;;  %v12553_v38 = vpop.f32.mrf.mxu0  ;;  %v4165_v2 = vld [vmem:[#allocation2 + $0x410] sm:$0xff] }
 0x561   :  { %9574 = vmatmul.msk.f32.gmra.mxu3 %vm827_vm2, %v4950_v37  ;;  %v4951_v61 = vld [vmem:[#allocation2 + $0x409] sm:$0xff] }
 0x563   :  { %v4635_v18 = vpop.f32.mrf.mxu2  ;;  %9618 = vmatmul.msk.f32.gmra.mxu0 %vm827_vm2, %v5686_v10 }
 0x564   :  { %v4839_v56 = vadd.f32 %v4635_v18, %v4052_v9  ;;  %v5419_v21 = vpop.f32.mrf.mxu3  ;;  %v3851_v17 = vpop.f32.mrf.mxu1  ;;  %v5687_v18 = vld [vmem:[#allocation2 + $0xa7] sm:$0xff] }
 0x565   :  { %v12555_v4 = vadd.f32 %v5419_v21, %v4838_v41  ;;  %v4053_v28 = vadd.f32 %v3851_v17, %v11201_v44 }
 0x567   :  { %14540 = vst [vmem:[#allocation170_spill] sm:$0xff] %v12555_v4  ;;  %9384 = vmatmul.msk.f32.gmra.mxu1 %vm827_vm2, %v3378_v54  ;;  %v3379_v4 = vld [vmem:[#allocation2 + $0x427] sm:$0xff] }
 0x568   :  { %9480 = vmatmul.msk.f32.gmra.mxu2 %vm827_vm2, %v4165_v2  ;;  %v12562_v46 = vpop.f32.mrf.mxu0  ;;  %v4166_v54 = vld [vmem:[#allocation2 + $0x428] sm:$0xff]  ;;  %v4952_v2 = vld [vmem:[#allocation2 + $0x411] sm:$0xff] }
 0x569   :  { %9575 = vmatmul.msk.f32.gmra.mxu3 %vm827_vm2, %v4951_v61 }
 0x56b   :  { %v4638_v37 = vpop.f32.mrf.mxu2  ;;  %9619 = vmatmul.msk.f32.gmra.mxu0 %vm827_vm2, %v5687_v18 }
 0x56c   :  { %v4840_v9 = vadd.f32 %v4638_v37, %v4053_v28  ;;  %v5422_v41 = vpop.f32.mrf.mxu3  ;;  %v3854_v10 = vpop.f32.mrf.mxu1  ;;  %v5688_v37 = vld [vmem:[#allocation2 + $0xaf] sm:$0xff] }
 0x56d   :  { %v12564_v21 = vadd.f32 %v5422_v41, %v4839_v56  ;;  %v4054_v44 = vadd.f32 %v3854_v10, %v11216_v62  ;;  %v8238_v62 = vld [vmem:[%s14369_s5] sm:$0xff] }
 0x56e   :  { %v14543_v10 = vld [vmem:[#allocation3_spill] sm:$0xff]  ;;  %8547 = vmatpush.msra.mxu3 %v8238_v62 }
 0x56f   :  { %14541 = vst [vmem:[#allocation171_spill] sm:$0xff] %v12564_v21  ;;  %9385 = vmatmul.msk.f32.gmra.mxu1 %vm827_vm2, %v3379_v4  ;;  %v3380_v21 = vld [vmem:[#allocation2 + $0x42f] sm:$0xff] }
 0x570   :  { %9481 = vmatmul.msk.f32.gmra.mxu2 %vm827_vm2, %v4166_v54  ;;  %v12571_v17 = vpop.f32.mrf.mxu0  ;;  %v4167_v4 = vld [vmem:[#allocation2 + $0x430] sm:$0xff] }
 0x571   :  { %9576 = vmatmul.msk.f32.gmra.mxu3 %vm827_vm2, %v4952_v2  ;;  %v4953_v54 = vld [vmem:[#allocation2 + $0x429] sm:$0xff] }
 0x573   :  { %v4641_v61 = vpop.f32.mrf.mxu2  ;;  %9620 = vmatmul.msk.f32.gmra.mxu0 %vm827_vm2, %v5688_v37  ;;  %v5689_v37 = vld [vmem:[#allocation2 + $0xc7] sm:$0xff] }
 0x574   :  { %v4841_v28 = vadd.f32 %v4641_v61, %v4054_v44  ;;  %v5425_v56 = vpop.f32.mrf.mxu3  ;;  %v3857_v18 = vpop.f32.mrf.mxu1 }
 0x575   :  { %v12573_v41 = vadd.f32 %v5425_v56, %v4840_v9  ;;  %v4055_v2 = vadd.f32 %v3857_v18, %v14543_v10  ;;  %v14545_v18 = vld [vmem:[#allocation4_spill] sm:$0xff] }
 0x577   :  { %14542 = vst [vmem:[#allocation172_spill] sm:$0xff] %v12573_v41  ;;  %9386 = vmatmul.msk.f32.gmra.mxu1 %vm827_vm2, %v3380_v21 }
 0x578   :  { %9482 = vmatmul.msk.f32.gmra.mxu2 %vm827_vm2, %v4167_v4  ;;  %v12583_v9 = vpop.f32.mrf.mxu0  ;;  %v3381_v4 = vld [vmem:[#allocation2 + $0x447] sm:$0xff] }
 0x579   :  { %9577 = vmatmul.msk.f32.gmra.mxu3 %vm827_vm2, %v4953_v54  ;;  %v4168_v54 = vld [vmem:[#allocation2 + $0x448] sm:$0xff] }
 0x57b   :  { %v4644_v44 = vpop.f32.mrf.mxu2  ;;  %9621 = vmatmul.msk.f32.gmra.mxu0 %vm827_vm2, %v5689_v37 }
 0x57c   :  { %v4842_v61 = vadd.f32 %v4644_v44, %v4055_v2  ;;  %v5428_v56 = vpop.f32.mrf.mxu3  ;;  %v3860_v21 = vpop.f32.mrf.mxu1 }
 0x57d   :  { %v12585_v41 = vadd.f32 %v5428_v56, %v4841_v28  ;;  %v4056_v62 = vadd.f32 %v3860_v21, %v14545_v18  ;;  %v5690_v56 = vld [vmem:[#allocation2 + $0xcf] sm:$0xff] }
 0x57e   :  { %v14547_v21 = vld [vmem:[#allocation5_spill] sm:$0xff] }
 0x57f   :  { %14544 = vst [vmem:[#allocation3_spill] sm:$0xff] %v12585_v41  ;;  %9387 = vmatmul.msk.f32.gmra.mxu1 %vm827_vm2, %v3381_v4  ;;  %v4169_v4 = vld [vmem:[#allocation2 + $0x450] sm:$0xff] }
 0x580   :  { %9483 = vmatmul.msk.f32.gmra.mxu2 %vm827_vm2, %v4168_v54  ;;  %v12592_v10 = vpop.f32.mrf.mxu0 }
 0x581   :  { %9578 = vmatmul.msk.f32.gmra.mxu3 %vm827_vm2, %v4954_v25  ;;  %v4955_v25 = vld [vmem:[#allocation2 + $0x449] sm:$0xff] }
 0x583   :  { %v4647_v2 = vpop.f32.mrf.mxu2  ;;  %9622 = vmatmul.msk.f32.gmra.mxu0 %vm827_vm2, %v5690_v56 }
 0x584   :  { %v4843_v44 = vadd.f32 %v4647_v2, %v4056_v62  ;;  %v5431_v28 = vpop.f32.mrf.mxu3  ;;  %v3863_v37 = vpop.f32.mrf.mxu1 }
 0x585   :  { %v12594_v41 = vadd.f32 %v5431_v28, %v4842_v61  ;;  %v4057_v54 = vadd.f32 %v3863_v37, %v14547_v21  ;;  %v5691_v28 = vld [vmem:[#allocation2 + $0xe7] sm:$0xff]  ;;  %v14550_v37 = vld [vmem:[#allocation6_spill] sm:$0xff] }
 0x587   :  { %14546 = vst [vmem:[#allocation4_spill] sm:$0xff] %v12594_v41  ;;  %9388 = vmatmul.msk.f32.gmra.mxu1 %vm827_vm2, %v3382_v22  ;;  %v4170_v22 = vld [vmem:[#allocation2 + $0x4a8] sm:$0xff] }
 0x588   :  { %9484 = vmatmul.msk.f32.gmra.mxu2 %vm827_vm2, %v4169_v4  ;;  %v12601_v18 = vpop.f32.mrf.mxu0  ;;  %v4956_v4 = vld [vmem:[#allocation2 + $0x451] sm:$0xff] }
 0x589   :  { %9579 = vmatmul.msk.f32.gmra.mxu3 %vm827_vm2, %v4955_v25  ;;  %14548 = vst [vmem:[#allocation5_spill] sm:$0xff] %v12601_v18  ;;  %v3404_v18 = vld [vmem:[#allocation2 + $0x5ef] sm:$0xff] }
 0x58b   :  { %v4650_v62 = vpop.f32.mrf.mxu2  ;;  %9623 = vmatmul.msk.f32.gmra.mxu0 %vm827_vm2, %v5691_v28 }
 0x58c   :  { %v4844_v2 = vadd.f32 %v4650_v62, %v4057_v54  ;;  %v5434_v61 = vpop.f32.mrf.mxu3  ;;  %v3866_v56 = vpop.f32.mrf.mxu1 }
 0x58d   :  { %v12603_v41 = vadd.f32 %v5434_v61, %v4843_v44  ;;  %v4058_v25 = vadd.f32 %v3866_v56, %v14550_v37  ;;  %v5692_v61 = vld [vmem:[#allocation2 + $0xef] sm:$0xff]  ;;  %v14553_v56 = vld [vmem:[#allocation7_spill] sm:$0xff] }
 0x58f   :  { %14549 = vst [vmem:[#allocation173_spill] sm:$0xff] %v12603_v41  ;;  %9389 = vmatmul.msk.f32.gmra.mxu1 %vm827_vm2, %v3383_v47  ;;  %v4171_v47 = vld [vmem:[#allocation2 + $0x4b0] sm:$0xff] }
 0x590   :  { %9485 = vmatmul.msk.f32.gmra.mxu2 %vm827_vm2, %v4170_v22  ;;  %v12610_v21 = vpop.f32.mrf.mxu0  ;;  %v4957_v22 = vld [vmem:[#allocation2 + $0x4a9] sm:$0xff] }
 0x591   :  { %9580 = vmatmul.msk.f32.gmra.mxu3 %vm827_vm2, %v4956_v4  ;;  %14551 = vst [vmem:[#allocation6_spill] sm:$0xff] %v12610_v21  ;;  %v3402_v21 = vld [vmem:[#allocation2 + $0x5cf] sm:$0xff] }
 0x593   :  { %v4653_v54 = vpop.f32.mrf.mxu2  ;;  %9624 = vmatmul.msk.f32.gmra.mxu0 %vm827_vm2, %v5692_v61 }
 0x594   :  { %v4845_v62 = vadd.f32 %v4653_v54, %v4058_v25  ;;  %v5437_v44 = vpop.f32.mrf.mxu3  ;;  %v3869_v28 = vpop.f32.mrf.mxu1 }
 0x595   :  { %v12612_v41 = vadd.f32 %v5437_v44, %v4844_v2  ;;  %v4059_v4 = vadd.f32 %v3869_v28, %v14553_v56  ;;  %v5693_v44 = vld [vmem:[#allocation2 + $0x107] sm:$0xff] }
 0x596   :  { %v14556_v28 = vld [vmem:[#allocation8_spill] sm:$0xff] }
 0x597   :  { %14552 = vst [vmem:[#allocation174_spill] sm:$0xff] %v12612_v41  ;;  %9390 = vmatmul.msk.f32.gmra.mxu1 %vm827_vm2, %v3384_v3  ;;  %v4172_v3 = vld [vmem:[#allocation2 + $0x4c8] sm:$0xff] }
 0x598   :  { %9486 = vmatmul.msk.f32.gmra.mxu2 %vm827_vm2, %v4171_v47  ;;  %v12619_v37 = vpop.f32.mrf.mxu0  ;;  %v4958_v47 = vld [vmem:[#allocation2 + $0x4b1] sm:$0xff] }
 0x599   :  { %9581 = vmatmul.msk.f32.gmra.mxu3 %vm827_vm2, %v4957_v22  ;;  %14554 = vst [vmem:[#allocation7_spill] sm:$0xff] %v12619_v37  ;;  %v3400_v37 = vld [vmem:[#allocation2 + $0x5af] sm:$0xff] }
 0x59b   :  { %v4656_v25 = vpop.f32.mrf.mxu2  ;;  %9625 = vmatmul.msk.f32.gmra.mxu0 %vm827_vm2, %v5693_v44 }
 0x59c   :  { %v4846_v54 = vadd.f32 %v4656_v25, %v4059_v4  ;;  %v5440_v2 = vpop.f32.mrf.mxu3  ;;  %v3872_v61 = vpop.f32.mrf.mxu1 }
 0x59d   :  { %v12621_v41 = vadd.f32 %v5440_v2, %v4845_v62  ;;  %v4060_v22 = vadd.f32 %v3872_v61, %v14556_v28  ;;  %v5694_v2 = vld [vmem:[#allocation2 + $0x10f] sm:$0xff] }
 0x59e   :  { %v14559_v61 = vld [vmem:[#allocation9_spill] sm:$0xff] }
 0x59f   :  { %14555 = vst [vmem:[#allocation175_spill] sm:$0xff] %v12621_v41  ;;  %9391 = vmatmul.msk.f32.gmra.mxu1 %vm827_vm2, %v3385_v6  ;;  %v4173_v6 = vld [vmem:[#allocation2 + $0x4d0] sm:$0xff] }
 0x5a0   :  { %9487 = vmatmul.msk.f32.gmra.mxu2 %vm827_vm2, %v4172_v3  ;;  %v12628_v56 = vpop.f32.mrf.mxu0  ;;  %v4959_v3 = vld [vmem:[#allocation2 + $0x4c9] sm:$0xff] }
 0x5a1   :  { %9582 = vmatmul.msk.f32.gmra.mxu3 %vm827_vm2, %v4958_v47  ;;  %14557 = vst [vmem:[#allocation8_spill] sm:$0xff] %v12628_v56  ;;  %v3398_v56 = vld [vmem:[#allocation2 + $0x58f] sm:$0xff] }
 0x5a3   :  { %v4659_v4 = vpop.f32.mrf.mxu2  ;;  %9626 = vmatmul.msk.f32.gmra.mxu0 %vm827_vm2, %v5694_v2 }
 0x5a4   :  { %v4847_v25 = vadd.f32 %v4659_v4, %v4060_v22  ;;  %v5443_v62 = vpop.f32.mrf.mxu3  ;;  %v3875_v44 = vpop.f32.mrf.mxu1 }
 0x5a5   :  { %v12630_v41 = vadd.f32 %v5443_v62, %v4846_v54  ;;  %v4061_v47 = vadd.f32 %v3875_v44, %v14559_v61  ;;  %v5695_v62 = vld [vmem:[#allocation2 + $0x127] sm:$0xff]  ;;  %v14562_v44 = vld [vmem:[#allocation10_spill] sm:$0xff] }
 0x5a7   :  { %14558 = vst [vmem:[#allocation176_spill] sm:$0xff] %v12630_v41  ;;  %9392 = vmatmul.msk.f32.gmra.mxu1 %vm827_vm2, %v3386_v57  ;;  %v4174_v57 = vld [vmem:[#allocation2 + $0x4e8] sm:$0xff] }
 0x5a8   :  { %9488 = vmatmul.msk.f32.gmra.mxu2 %vm827_vm2, %v4173_v6  ;;  %v12637_v28 = vpop.f32.mrf.mxu0  ;;  %v4960_v6 = vld [vmem:[#allocation2 + $0x4d1] sm:$0xff] }
 0x5a9   :  { %9583 = vmatmul.msk.f32.gmra.mxu3 %vm827_vm2, %v4959_v3  ;;  %14560 = vst [vmem:[#allocation9_spill] sm:$0xff] %v12637_v28  ;;  %v3396_v28 = vld [vmem:[#allocation2 + $0x56f] sm:$0xff] }
 0x5ab   :  { %v4662_v22 = vpop.f32.mrf.mxu2  ;;  %9627 = vmatmul.msk.f32.gmra.mxu0 %vm827_vm2, %v5695_v62 }
 0x5ac   :  { %v4848_v4 = vadd.f32 %v4662_v22, %v4061_v47  ;;  %v5446_v54 = vpop.f32.mrf.mxu3  ;;  %v3878_v2 = vpop.f32.mrf.mxu1 }
 0x5ad   :  { %v12639_v41 = vadd.f32 %v5446_v54, %v4847_v25  ;;  %v4062_v3 = vadd.f32 %v3878_v2, %v14562_v44  ;;  %v5696_v54 = vld [vmem:[#allocation2 + $0x12f] sm:$0xff]  ;;  %v14565_v2 = vld [vmem:[#allocation11_spill] sm:$0xff] }
 0x5af   :  { %14561 = vst [vmem:[#allocation177_spill] sm:$0xff] %v12639_v41  ;;  %9393 = vmatmul.msk.f32.gmra.mxu1 %vm827_vm2, %v3387_v63  ;;  %v4175_v63 = vld [vmem:[#allocation2 + $0x4f0] sm:$0xff] }
 0x5b0   :  { %9489 = vmatmul.msk.f32.gmra.mxu2 %vm827_vm2, %v4174_v57  ;;  %v12646_v61 = vpop.f32.mrf.mxu0  ;;  %v4961_v57 = vld [vmem:[#allocation2 + $0x4e9] sm:$0xff] }
 0x5b1   :  { %9584 = vmatmul.msk.f32.gmra.mxu3 %vm827_vm2, %v4960_v6  ;;  %14563 = vst [vmem:[#allocation10_spill] sm:$0xff] %v12646_v61  ;;  %v3394_v61 = vld [vmem:[#allocation2 + $0x54f] sm:$0xff] }
 0x5b3   :  { %v4665_v47 = vpop.f32.mrf.mxu2  ;;  %9628 = vmatmul.msk.f32.gmra.mxu0 %vm827_vm2, %v5696_v54 }
 0x5b4   :  { %v4849_v22 = vadd.f32 %v4665_v47, %v4062_v3  ;;  %v5449_v25 = vpop.f32.mrf.mxu3  ;;  %v3881_v62 = vpop.f32.mrf.mxu1 }
 0x5b5   :  { %v12648_v41 = vadd.f32 %v5449_v25, %v4848_v4  ;;  %v4063_v6 = vadd.f32 %v3881_v62, %v14565_v2  ;;  %v5697_v25 = vld [vmem:[#allocation2 + $0x147] sm:$0xff] }
 0x5b6   :  { %v14567_v62 = vld [vmem:[#allocation12_spill] sm:$0xff] }
 0x5b7   :  { %14564 = vst [vmem:[#allocation178_spill] sm:$0xff] %v12648_v41  ;;  %9394 = vmatmul.msk.f32.gmra.mxu1 %vm827_vm2, %v3388_v26  ;;  %v4176_v26 = vld [vmem:[#allocation2 + $0x508] sm:$0xff] }
 0x5b8   :  { %9490 = vmatmul.msk.f32.gmra.mxu2 %vm827_vm2, %v4175_v63  ;;  %v12655_v44 = vpop.f32.mrf.mxu0  ;;  %v4962_v63 = vld [vmem:[#allocation2 + $0x4f1] sm:$0xff] }
 0x5b9   :  { %9585 = vmatmul.msk.f32.gmra.mxu3 %vm827_vm2, %v4961_v57 }
 0x5bb   :  { %v4668_v3 = vpop.f32.mrf.mxu2  ;;  %9629 = vmatmul.msk.f32.gmra.mxu0 %vm827_vm2, %v5697_v25 }
 0x5bc   :  { %v4850_v47 = vadd.f32 %v4668_v3, %v4063_v6  ;;  %v5452_v4 = vpop.f32.mrf.mxu3  ;;  %v3884_v54 = vpop.f32.mrf.mxu1 }
 0x5bd   :  { %v12657_v41 = vadd.f32 %v5452_v4, %v4849_v22  ;;  %v4064_v57 = vadd.f32 %v3884_v54, %v14567_v62  ;;  %v5698_v4 = vld [vmem:[#allocation2 + $0x14f] sm:$0xff] }
 0x5be   :  { %v14569_v54 = vld [vmem:[#allocation13_spill] sm:$0xff] }
 0x5bf   :  { %14566 = vst [vmem:[#allocation11_spill] sm:$0xff] %v12657_v41  ;;  %9395 = vmatmul.msk.f32.gmra.mxu1 %vm827_vm2, %v3389_v60  ;;  %v4177_v60 = vld [vmem:[#allocation2 + $0x510] sm:$0xff] }
 0x5c0   :  { %9491 = vmatmul.msk.f32.gmra.mxu2 %vm827_vm2, %v4176_v26  ;;  %v12664_v2 = vpop.f32.mrf.mxu0  ;;  %v4963_v26 = vld [vmem:[#allocation2 + $0x509] sm:$0xff] }
 0x5c1   :  { %9586 = vmatmul.msk.f32.gmra.mxu3 %vm827_vm2, %v4962_v63 }
 0x5c3   :  { %v4671_v6 = vpop.f32.mrf.mxu2  ;;  %9630 = vmatmul.msk.f32.gmra.mxu0 %vm827_vm2, %v5698_v4 }
 0x5c4   :  { %v4851_v3 = vadd.f32 %v4671_v6, %v4064_v57  ;;  %v5455_v22 = vpop.f32.mrf.mxu3  ;;  %v3887_v25 = vpop.f32.mrf.mxu1 }
 0x5c5   :  { %v12666_v41 = vadd.f32 %v5455_v22, %v4850_v47  ;;  %v4065_v63 = vadd.f32 %v3887_v25, %v14569_v54  ;;  %v5699_v22 = vld [vmem:[#allocation2 + $0x167] sm:$0xff]  ;;  %v14571_v25 = vld [vmem:[#allocation14_spill] sm:$0xff] }
 0x5c7   :  { %14568 = vst [vmem:[#allocation12_spill] sm:$0xff] %v12666_v41  ;;  %9396 = vmatmul.msk.f32.gmra.mxu1 %vm827_vm2, %v3390_v5  ;;  %v4178_v5 = vld [vmem:[#allocation2 + $0x528] sm:$0xff] }
 0x5c8   :  { %9492 = vmatmul.msk.f32.gmra.mxu2 %vm827_vm2, %v4177_v60  ;;  %v12673_v62 = vpop.f32.mrf.mxu0  ;;  %v4964_v60 = vld [vmem:[#allocation2 + $0x511] sm:$0xff] }
 0x5c9   :  { %9587 = vmatmul.msk.f32.gmra.mxu3 %vm827_vm2, %v4963_v26 }
 0x5cb   :  { %v4674_v57 = vpop.f32.mrf.mxu2  ;;  %9631 = vmatmul.msk.f32.gmra.mxu0 %vm827_vm2, %v5699_v22 }
 0x5cc   :  { %v4852_v6 = vadd.f32 %v4674_v57, %v4065_v63  ;;  %v5458_v47 = vpop.f32.mrf.mxu3  ;;  %v3890_v4 = vpop.f32.mrf.mxu1 }
 0x5cd   :  { %v12675_v41 = vadd.f32 %v5458_v47, %v4851_v3  ;;  %v4066_v26 = vadd.f32 %v3890_v4, %v14571_v25  ;;  %v5700_v47 = vld [vmem:[#allocation2 + $0x16f] sm:$0xff]  ;;  %v14573_v4 = vld [vmem:[#allocation15_spill] sm:$0xff] }
 0x5cf   :  { %14570 = vst [vmem:[#allocation13_spill] sm:$0xff] %v12675_v41  ;;  %9397 = vmatmul.msk.f32.gmra.mxu1 %vm827_vm2, %v3391_v8  ;;  %v4179_v8 = vld [vmem:[#allocation2 + $0x530] sm:$0xff] }
 0x5d0   :  { %9493 = vmatmul.msk.f32.gmra.mxu2 %vm827_vm2, %v4178_v5  ;;  %v12682_v54 = vpop.f32.mrf.mxu0  ;;  %v4965_v5 = vld [vmem:[#allocation2 + $0x529] sm:$0xff] }
 0x5d1   :  { %9588 = vmatmul.msk.f32.gmra.mxu3 %vm827_vm2, %v4964_v60 }
 0x5d3   :  { %v4677_v63 = vpop.f32.mrf.mxu2  ;;  %9632 = vmatmul.msk.f32.gmra.mxu0 %vm827_vm2, %v5700_v47 }
 0x5d4   :  { %v4853_v57 = vadd.f32 %v4677_v63, %v4066_v26  ;;  %v5461_v3 = vpop.f32.mrf.mxu3  ;;  %v3893_v22 = vpop.f32.mrf.mxu1 }
 0x5d5   :  { %v12684_v41 = vadd.f32 %v5461_v3, %v4852_v6  ;;  %v4067_v60 = vadd.f32 %v3893_v22, %v14573_v4  ;;  %v5701_v3 = vld [vmem:[#allocation2 + $0x187] sm:$0xff] }
 0x5d6   :  { %v14575_v22 = vld [vmem:[#allocation16_spill] sm:$0xff] }
 0x5d7   :  { %14572 = vst [vmem:[#allocation14_spill] sm:$0xff] %v12684_v41  ;;  %9398 = vmatmul.msk.f32.gmra.mxu1 %vm827_vm2, %v3392_v7  ;;  %v4180_v7 = vld [vmem:[#allocation2 + $0x548] sm:$0xff] }
 0x5d8   :  { %9494 = vmatmul.msk.f32.gmra.mxu2 %vm827_vm2, %v4179_v8  ;;  %v12691_v25 = vpop.f32.mrf.mxu0  ;;  %v4966_v8 = vld [vmem:[#allocation2 + $0x531] sm:$0xff] }
 0x5d9   :  { %9589 = vmatmul.msk.f32.gmra.mxu3 %vm827_vm2, %v4965_v5 }
 0x5db   :  { %v4680_v26 = vpop.f32.mrf.mxu2  ;;  %9633 = vmatmul.msk.f32.gmra.mxu0 %vm827_vm2, %v5701_v3 }
 0x5dc   :  { %v4854_v63 = vadd.f32 %v4680_v26, %v4067_v60  ;;  %v5464_v6 = vpop.f32.mrf.mxu3  ;;  %v3896_v47 = vpop.f32.mrf.mxu1 }
 0x5dd   :  { %v12693_v41 = vadd.f32 %v5464_v6, %v4853_v57  ;;  %v4068_v5 = vadd.f32 %v3896_v47, %v14575_v22  ;;  %v5702_v6 = vld [vmem:[#allocation2 + $0x18f] sm:$0xff] }
 0x5de   :  { %v14577_v47 = vld [vmem:[#allocation17_spill] sm:$0xff] }
 0x5df   :  { %14574 = vst [vmem:[#allocation15_spill] sm:$0xff] %v12693_v41  ;;  %9399 = vmatmul.msk.f32.gmra.mxu1 %vm827_vm2, %v3393_v43  ;;  %v4181_v43 = vld [vmem:[#allocation2 + $0x550] sm:$0xff] }
 0x5e0   :  { %9495 = vmatmul.msk.f32.gmra.mxu2 %vm827_vm2, %v4180_v7  ;;  %v12700_v4 = vpop.f32.mrf.mxu0  ;;  %v4967_v7 = vld [vmem:[#allocation2 + $0x549] sm:$0xff] }
 0x5e1   :  { %9590 = vmatmul.msk.f32.gmra.mxu3 %vm827_vm2, %v4966_v8 }
 0x5e3   :  { %v4683_v60 = vpop.f32.mrf.mxu2  ;;  %9634 = vmatmul.msk.f32.gmra.mxu0 %vm827_vm2, %v5702_v6 }
 0x5e4   :  { %v4855_v26 = vadd.f32 %v4683_v60, %v4068_v5  ;;  %v5467_v57 = vpop.f32.mrf.mxu3  ;;  %v3899_v3 = vpop.f32.mrf.mxu1 }
 0x5e5   :  { %v12702_v41 = vadd.f32 %v5467_v57, %v4854_v63  ;;  %v4069_v8 = vadd.f32 %v3899_v3, %v14577_v47  ;;  %v5703_v57 = vld [vmem:[#allocation2 + $0x1a7] sm:$0xff]  ;;  %v14579_v3 = vld [vmem:[#allocation18_spill] sm:$0xff] }
 0x5e7   :  { %14576 = vst [vmem:[#allocation16_spill] sm:$0xff] %v12702_v41  ;;  %9400 = vmatmul.msk.f32.gmra.mxu1 %vm827_vm2, %v3394_v61  ;;  %v4182_v61 = vld [vmem:[#allocation2 + $0x568] sm:$0xff] }
 0x5e8   :  { %9496 = vmatmul.msk.f32.gmra.mxu2 %vm827_vm2, %v4181_v43  ;;  %v12709_v22 = vpop.f32.mrf.mxu0  ;;  %v4968_v43 = vld [vmem:[#allocation2 + $0x551] sm:$0xff] }
 0x5e9   :  { %9591 = vmatmul.msk.f32.gmra.mxu3 %vm827_vm2, %v4967_v7 }
 0x5eb   :  { %v4686_v5 = vpop.f32.mrf.mxu2  ;;  %9635 = vmatmul.msk.f32.gmra.mxu0 %vm827_vm2, %v5703_v57 }
 0x5ec   :  { %v4856_v60 = vadd.f32 %v4686_v5, %v4069_v8  ;;  %v5470_v63 = vpop.f32.mrf.mxu3  ;;  %v3902_v6 = vpop.f32.mrf.mxu1 }
 0x5ed   :  { %v12711_v41 = vadd.f32 %v5470_v63, %v4855_v26  ;;  %v4070_v7 = vadd.f32 %v3902_v6, %v14579_v3  ;;  %v5704_v63 = vld [vmem:[#allocation2 + $0x1af] sm:$0xff]  ;;  %v14581_v6 = vld [vmem:[#allocation19_spill] sm:$0xff] }
 0x5ef   :  { %14578 = vst [vmem:[#allocation17_spill] sm:$0xff] %v12711_v41  ;;  %9401 = vmatmul.msk.f32.gmra.mxu1 %vm827_vm2, %v3395_v19  ;;  %v4183_v19 = vld [vmem:[#allocation2 + $0x570] sm:$0xff] }
 0x5f0   :  { %9497 = vmatmul.msk.f32.gmra.mxu2 %vm827_vm2, %v4182_v61  ;;  %v12718_v47 = vpop.f32.mrf.mxu0  ;;  %v4969_v61 = vld [vmem:[#allocation2 + $0x569] sm:$0xff] }
 0x5f1   :  { %9592 = vmatmul.msk.f32.gmra.mxu3 %vm827_vm2, %v4968_v43 }
 0x5f3   :  { %v4689_v8 = vpop.f32.mrf.mxu2  ;;  %9636 = vmatmul.msk.f32.gmra.mxu0 %vm827_vm2, %v5704_v63 }
 0x5f4   :  { %v4857_v5 = vadd.f32 %v4689_v8, %v4070_v7  ;;  %v5473_v26 = vpop.f32.mrf.mxu3  ;;  %v3905_v57 = vpop.f32.mrf.mxu1 }
 0x5f5   :  { %v12720_v41 = vadd.f32 %v5473_v26, %v4856_v60  ;;  %v4071_v43 = vadd.f32 %v3905_v57, %v14581_v6  ;;  %v5705_v26 = vld [vmem:[#allocation2 + $0x1c7] sm:$0xff] }
 0x5f6   :  { %v14583_v57 = vld [vmem:[#allocation20_spill] sm:$0xff] }
 0x5f7   :  { %14580 = vst [vmem:[#allocation18_spill] sm:$0xff] %v12720_v41  ;;  %9402 = vmatmul.msk.f32.gmra.mxu1 %vm827_vm2, %v3396_v28  ;;  %v4184_v28 = vld [vmem:[#allocation2 + $0x588] sm:$0xff] }
 0x5f8   :  { %9498 = vmatmul.msk.f32.gmra.mxu2 %vm827_vm2, %v4183_v19  ;;  %v12727_v3 = vpop.f32.mrf.mxu0  ;;  %v4970_v19 = vld [vmem:[#allocation2 + $0x571] sm:$0xff] }
 0x5f9   :  { %9593 = vmatmul.msk.f32.gmra.mxu3 %vm827_vm2, %v4969_v61 }
 0x5fb   :  { %v4692_v7 = vpop.f32.mrf.mxu2  ;;  %9637 = vmatmul.msk.f32.gmra.mxu0 %vm827_vm2, %v5705_v26 }
 0x5fc   :  { %v4858_v8 = vadd.f32 %v4692_v7, %v4071_v43  ;;  %v5476_v60 = vpop.f32.mrf.mxu3  ;;  %v3908_v63 = vpop.f32.mrf.mxu1 }
 0x5fd   :  { %v12729_v41 = vadd.f32 %v5476_v60, %v4857_v5  ;;  %v4072_v61 = vadd.f32 %v3908_v63, %v14583_v57  ;;  %v5706_v60 = vld [vmem:[#allocation2 + $0x1cf] sm:$0xff] }
 0x5fe   :  { %v14585_v63 = vld [vmem:[#allocation21_spill] sm:$0xff] }
 0x5ff   :  { %14582 = vst [vmem:[#allocation19_spill] sm:$0xff] %v12729_v41  ;;  %9403 = vmatmul.msk.f32.gmra.mxu1 %vm827_vm2, %v3397_v39  ;;  %v4185_v39 = vld [vmem:[#allocation2 + $0x590] sm:$0xff] }
 0x600   :  { %9499 = vmatmul.msk.f32.gmra.mxu2 %vm827_vm2, %v4184_v28  ;;  %v12736_v6 = vpop.f32.mrf.mxu0  ;;  %v4971_v28 = vld [vmem:[#allocation2 + $0x589] sm:$0xff] }
 0x601   :  { %9594 = vmatmul.msk.f32.gmra.mxu3 %vm827_vm2, %v4970_v19 }
 0x603   :  { %v4695_v43 = vpop.f32.mrf.mxu2  ;;  %9638 = vmatmul.msk.f32.gmra.mxu0 %vm827_vm2, %v5706_v60 }
 0x604   :  { %v4859_v7 = vadd.f32 %v4695_v43, %v4072_v61  ;;  %v5479_v5 = vpop.f32.mrf.mxu3  ;;  %v3911_v26 = vpop.f32.mrf.mxu1 }
 0x605   :  { %v12738_v41 = vadd.f32 %v5479_v5, %v4858_v8  ;;  %v4073_v19 = vadd.f32 %v3911_v26, %v14585_v63  ;;  %v5707_v5 = vld [vmem:[#allocation2 + $0x1e7] sm:$0xff]  ;;  %v14587_v26 = vld [vmem:[#allocation22_spill] sm:$0xff] }
 0x607   :  { %14584 = vst [vmem:[#allocation20_spill] sm:$0xff] %v12738_v41  ;;  %9404 = vmatmul.msk.f32.gmra.mxu1 %vm827_vm2, %v3398_v56  ;;  %v4186_v56 = vld [vmem:[#allocation2 + $0x5a8] sm:$0xff] }
 0x608   :  { %9500 = vmatmul.msk.f32.gmra.mxu2 %vm827_vm2, %v4185_v39  ;;  %v12745_v57 = vpop.f32.mrf.mxu0  ;;  %v4972_v39 = vld [vmem:[#allocation2 + $0x591] sm:$0xff] }
 0x609   :  { %9595 = vmatmul.msk.f32.gmra.mxu3 %vm827_vm2, %v4971_v28 }
 0x60b   :  { %v4698_v61 = vpop.f32.mrf.mxu2  ;;  %9639 = vmatmul.msk.f32.gmra.mxu0 %vm827_vm2, %v5707_v5 }
 0x60c   :  { %v4860_v43 = vadd.f32 %v4698_v61, %v4073_v19  ;;  %v5482_v8 = vpop.f32.mrf.mxu3  ;;  %v3914_v60 = vpop.f32.mrf.mxu1 }
 0x60d   :  { %v12747_v41 = vadd.f32 %v5482_v8, %v4859_v7  ;;  %v4074_v28 = vadd.f32 %v3914_v60, %v14587_v26  ;;  %v5708_v8 = vld [vmem:[#allocation2 + $0x1ef] sm:$0xff]  ;;  %v14589_v60 = vld [vmem:[#allocation23_spill] sm:$0xff] }
 0x60f   :  { %14586 = vst [vmem:[#allocation21_spill] sm:$0xff] %v12747_v41  ;;  %9405 = vmatmul.msk.f32.gmra.mxu1 %vm827_vm2, %v3399_v13  ;;  %v4187_v13 = vld [vmem:[#allocation2 + $0x5b0] sm:$0xff] }
 0x610   :  { %9501 = vmatmul.msk.f32.gmra.mxu2 %vm827_vm2, %v4186_v56  ;;  %v12754_v63 = vpop.f32.mrf.mxu0  ;;  %v4973_v56 = vld [vmem:[#allocation2 + $0x5a9] sm:$0xff] }
 0x611   :  { %9596 = vmatmul.msk.f32.gmra.mxu3 %vm827_vm2, %v4972_v39 }
 0x613   :  { %v4701_v19 = vpop.f32.mrf.mxu2  ;;  %9640 = vmatmul.msk.f32.gmra.mxu0 %vm827_vm2, %v5708_v8 }
 0x614   :  { %v4861_v61 = vadd.f32 %v4701_v19, %v4074_v28  ;;  %v5485_v7 = vpop.f32.mrf.mxu3  ;;  %v3917_v5 = vpop.f32.mrf.mxu1 }
 0x615   :  { %v12756_v41 = vadd.f32 %v5485_v7, %v4860_v43  ;;  %v4075_v39 = vadd.f32 %v3917_v5, %v14589_v60  ;;  %v5709_v7 = vld [vmem:[#allocation2 + $0x207] sm:$0xff] }
 0x616   :  { %v14591_v5 = vld [vmem:[#allocation24_spill] sm:$0xff] }
 0x617   :  { %14588 = vst [vmem:[#allocation22_spill] sm:$0xff] %v12756_v41  ;;  %9406 = vmatmul.msk.f32.gmra.mxu1 %vm827_vm2, %v3400_v37  ;;  %v4188_v37 = vld [vmem:[#allocation2 + $0x5c8] sm:$0xff] }
 0x618   :  { %9502 = vmatmul.msk.f32.gmra.mxu2 %vm827_vm2, %v4187_v13  ;;  %v12763_v26 = vpop.f32.mrf.mxu0  ;;  %v4974_v13 = vld [vmem:[#allocation2 + $0x5b1] sm:$0xff] }
 0x619   :  { %9597 = vmatmul.msk.f32.gmra.mxu3 %vm827_vm2, %v4973_v56 }
 0x61b   :  { %v4704_v28 = vpop.f32.mrf.mxu2  ;;  %9641 = vmatmul.msk.f32.gmra.mxu0 %vm827_vm2, %v5709_v7 }
 0x61c   :  { %v4862_v19 = vadd.f32 %v4704_v28, %v4075_v39  ;;  %v5488_v43 = vpop.f32.mrf.mxu3  ;;  %v3920_v8 = vpop.f32.mrf.mxu1 }
 0x61d   :  { %v12765_v41 = vadd.f32 %v5488_v43, %v4861_v61  ;;  %v4076_v56 = vadd.f32 %v3920_v8, %v14591_v5  ;;  %v5710_v43 = vld [vmem:[#allocation2 + $0x20f] sm:$0xff] }
 0x61e   :  { %v14593_v8 = vld [vmem:[#allocation25_spill] sm:$0xff] }
 0x61f   :  { %14590 = vst [vmem:[#allocation23_spill] sm:$0xff] %v12765_v41  ;;  %9407 = vmatmul.msk.f32.gmra.mxu1 %vm827_vm2, %v3401_v32  ;;  %v4189_v32 = vld [vmem:[#allocation2 + $0x5d0] sm:$0xff] }
 0x620   :  { %9503 = vmatmul.msk.f32.gmra.mxu2 %vm827_vm2, %v4188_v37  ;;  %v12772_v60 = vpop.f32.mrf.mxu0  ;;  %v4975_v37 = vld [vmem:[#allocation2 + $0x5c9] sm:$0xff] }
 0x621   :  { %9598 = vmatmul.msk.f32.gmra.mxu3 %vm827_vm2, %v4974_v13 }
 0x623   :  { %v4707_v39 = vpop.f32.mrf.mxu2  ;;  %9642 = vmatmul.msk.f32.gmra.mxu0 %vm827_vm2, %v5710_v43 }
 0x624   :  { %v4863_v28 = vadd.f32 %v4707_v39, %v4076_v56  ;;  %v5491_v61 = vpop.f32.mrf.mxu3  ;;  %v3923_v7 = vpop.f32.mrf.mxu1  ;;  %v5711_v56 = vld [vmem:[#allocation2 + $0x227] sm:$0xff] }
 0x625   :  { %v12774_v41 = vadd.f32 %v5491_v61, %v4862_v19  ;;  %v4077_v13 = vadd.f32 %v3923_v7, %v14593_v8  ;;  %v14595_v7 = vld [vmem:[#allocation26_spill] sm:$0xff] }
 0x627   :  { %14592 = vst [vmem:[#allocation24_spill] sm:$0xff] %v12774_v41  ;;  %9408 = vmatmul.msk.f32.gmra.mxu1 %vm827_vm2, %v3402_v21  ;;  %v4190_v21 = vld [vmem:[#allocation2 + $0x5e8] sm:$0xff] }
 0x628   :  { %9504 = vmatmul.msk.f32.gmra.mxu2 %vm827_vm2, %v4189_v32  ;;  %v12781_v5 = vpop.f32.mrf.mxu0  ;;  %v4976_v32 = vld [vmem:[#allocation2 + $0x5d1] sm:$0xff] }
 0x629   :  { %9599 = vmatmul.msk.f32.gmra.mxu3 %vm827_vm2, %v4975_v37 }
 0x62b   :  { %v4710_v39 = vpop.f32.mrf.mxu2  ;;  %9643 = vmatmul.msk.f32.gmra.mxu0 %vm827_vm2, %v5711_v56 }
 0x62c   :  { %v4864_v19 = vadd.f32 %v4710_v39, %v4077_v13  ;;  %v5494_v61 = vpop.f32.mrf.mxu3  ;;  %v3926_v43 = vpop.f32.mrf.mxu1  ;;  %v5712_v13 = vld [vmem:[#allocation2 + $0x22f] sm:$0xff] }
 0x62d   :  { %v12783_v41 = vadd.f32 %v5494_v61, %v4863_v28  ;;  %v4078_v37 = vadd.f32 %v3926_v43, %v14595_v7  ;;  %v14598_v43 = vld [vmem:[#allocation27_spill] sm:$0xff] }
 0x62f   :  { %14594 = vst [vmem:[#allocation25_spill] sm:$0xff] %v12783_v41  ;;  %9409 = vmatmul.msk.f32.gmra.mxu1 %vm827_vm2, %v3403_v52  ;;  %v4191_v52 = vld [vmem:[#allocation2 + $0x5f0] sm:$0xff] }
 0x630   :  { %9505 = vmatmul.msk.f32.gmra.mxu2 %vm827_vm2, %v4190_v21  ;;  %v12790_v8 = vpop.f32.mrf.mxu0  ;;  %v4977_v21 = vld [vmem:[#allocation2 + $0x5e9] sm:$0xff] }
 0x631   :  { %9600 = vmatmul.msk.f32.gmra.mxu3 %vm827_vm2, %v4976_v32  ;;  %14596 = vst [vmem:[#allocation26_spill] sm:$0xff] %v12790_v8  ;;  %v3405_v8 = vld [vmem:[#allocation2 + $0x607] sm:$0xff] }
 0x633   :  { %v4713_v39 = vpop.f32.mrf.mxu2  ;;  %9644 = vmatmul.msk.f32.gmra.mxu0 %vm827_vm2, %v5712_v13 }
 0x634   :  { %v4865_v28 = vadd.f32 %v4713_v39, %v4078_v37  ;;  %v5497_v61 = vpop.f32.mrf.mxu3  ;;  %v3929_v56 = vpop.f32.mrf.mxu1 }
 0x635   :  { %v12792_v41 = vadd.f32 %v5497_v61, %v4864_v19  ;;  %v4079_v32 = vadd.f32 %v3929_v56, %v14598_v43  ;;  %v5713_v61 = vld [vmem:[#allocation2 + $0x287] sm:$0xff] }
 0x636   :  { %v14601_v56 = vld [vmem:[#allocation28_spill] sm:$0xff] }
 0x637   :  { %14597 = vst [vmem:[#allocation179_spill] sm:$0xff] %v12792_v41  ;;  %9410 = vmatmul.msk.f32.gmra.mxu1 %vm827_vm2, %v3404_v18  ;;  %v4192_v18 = vld [vmem:[#allocation2 + $0x608] sm:$0xff] }
 0x638   :  { %9506 = vmatmul.msk.f32.gmra.mxu2 %vm827_vm2, %v4191_v52  ;;  %v12799_v7 = vpop.f32.mrf.mxu0  ;;  %v4978_v52 = vld [vmem:[#allocation2 + $0x5f1] sm:$0xff] }
 0x639   :  { %9601 = vmatmul.msk.f32.gmra.mxu3 %vm827_vm2, %v4977_v21  ;;  %14599 = vst [vmem:[#allocation27_spill] sm:$0xff] %v12799_v7  ;;  %v3406_v7 = vld [vmem:[#allocation2 + $0x60f] sm:$0xff] }
 0x63b   :  { %v4716_v37 = vpop.f32.mrf.mxu2  ;;  %9645 = vmatmul.msk.f32.gmra.mxu0 %vm827_vm2, %v5713_v61 }
 0x63c   :  { %v4866_v39 = vadd.f32 %v4716_v37, %v4079_v32  ;;  %v5500_v19 = vpop.f32.mrf.mxu3  ;;  %v3932_v13 = vpop.f32.mrf.mxu1 }
 0x63d   :  { %v12801_v41 = vadd.f32 %v5500_v19, %v4865_v28  ;;  %v4080_v21 = vadd.f32 %v3932_v13, %v14601_v56  ;;  %v5714_v19 = vld [vmem:[#allocation2 + $0x28f] sm:$0xff] }
 0x63e   :  { %v14604_v13 = vld [vmem:[#allocation29_spill] sm:$0xff] }
 0x63f   :  { %14600 = vst [vmem:[#allocation180_spill] sm:$0xff] %v12801_v41  ;;  %9411 = vmatmul.msk.f32.gmra.mxu1 %vm827_vm2, %v3405_v8  ;;  %v4193_v8 = vld [vmem:[#allocation2 + $0x610] sm:$0xff] }
 0x640   :  { %9507 = vmatmul.msk.f32.gmra.mxu2 %vm827_vm2, %v4192_v18  ;;  %v12808_v43 = vpop.f32.mrf.mxu0  ;;  %v4979_v18 = vld [vmem:[#allocation2 + $0x609] sm:$0xff] }
 0x641   :  { %9602 = vmatmul.msk.f32.gmra.mxu3 %vm827_vm2, %v4978_v52  ;;  %14602 = vst [vmem:[#allocation28_spill] sm:$0xff] %v12808_v43  ;;  %v3407_v43 = vld [vmem:[#allocation2 + $0x627] sm:$0xff] }
 0x643   :  { %v4719_v32 = vpop.f32.mrf.mxu2  ;;  %9646 = vmatmul.msk.f32.gmra.mxu0 %vm827_vm2, %v5714_v19 }
 0x644   :  { %v4867_v37 = vadd.f32 %v4719_v32, %v4080_v21  ;;  %v5503_v28 = vpop.f32.mrf.mxu3  ;;  %v3935_v61 = vpop.f32.mrf.mxu1 }
 0x645   :  { %v12810_v41 = vadd.f32 %v5503_v28, %v4866_v39  ;;  %v4081_v52 = vadd.f32 %v3935_v61, %v14604_v13  ;;  %v5715_v28 = vld [vmem:[#allocation2 + $0x2a7] sm:$0xff]  ;;  %v14607_v61 = vld [vmem:[#allocation30_spill] sm:$0xff] }
 0x647   :  { %14603 = vst [vmem:[#allocation181_spill] sm:$0xff] %v12810_v41  ;;  %9412 = vmatmul.msk.f32.gmra.mxu1 %vm827_vm2, %v3406_v7  ;;  %v4194_v7 = vld [vmem:[#allocation2 + $0x628] sm:$0xff] }
 0x648   :  { %9508 = vmatmul.msk.f32.gmra.mxu2 %vm827_vm2, %v4193_v8  ;;  %v12817_v56 = vpop.f32.mrf.mxu0  ;;  %v4980_v8 = vld [vmem:[#allocation2 + $0x611] sm:$0xff] }
 0x649   :  { %9603 = vmatmul.msk.f32.gmra.mxu3 %vm827_vm2, %v4979_v18  ;;  %14605 = vst [vmem:[#allocation29_spill] sm:$0xff] %v12817_v56  ;;  %v4195_v56 = vld [vmem:[#allocation2 + $0x630] sm:$0xff] }
 0x64b   :  { %v4722_v21 = vpop.f32.mrf.mxu2  ;;  %9647 = vmatmul.msk.f32.gmra.mxu0 %vm827_vm2, %v5715_v28 }
 0x64c   :  { %v4868_v32 = vadd.f32 %v4722_v21, %v4081_v52  ;;  %v5506_v39 = vpop.f32.mrf.mxu3  ;;  %v3938_v19 = vpop.f32.mrf.mxu1 }
 0x64d   :  { %v12819_v41 = vadd.f32 %v5506_v39, %v4867_v37  ;;  %v4082_v18 = vadd.f32 %v3938_v19, %v14607_v61  ;;  %v5716_v39 = vld [vmem:[#allocation2 + $0x2af] sm:$0xff]  ;;  %v14610_v19 = vld [vmem:[#allocation31_spill] sm:$0xff] }
 0x64f   :  { %14606 = vst [vmem:[#allocation182_spill] sm:$0xff] %v12819_v41  ;;  %9413 = vmatmul.msk.f32.gmra.mxu1 %vm827_vm2, %v3407_v43  ;;  %v3408_v43 = vld [vmem:[#allocation2 + $0x62f] sm:$0xff] }
 0x650   :  { %9509 = vmatmul.msk.f32.gmra.mxu2 %vm827_vm2, %v4194_v7  ;;  %v12826_v13 = vpop.f32.mrf.mxu0  ;;  %v4981_v7 = vld [vmem:[#allocation2 + $0x629] sm:$0xff] }
 0x651   :  { %9604 = vmatmul.msk.f32.gmra.mxu3 %vm827_vm2, %v4980_v8 }
 0x653   :  { %v4725_v52 = vpop.f32.mrf.mxu2  ;;  %9648 = vmatmul.msk.f32.gmra.mxu0 %vm827_vm2, %v5716_v39  ;;  %v3409_v39 = vld [vmem:[#allocation2 + $0x647] sm:$0xff] }
 0x654   :  { %v12828_v21 = vadd.f32 %v4725_v52, %v4082_v18  ;;  %v5509_v37 = vpop.f32.mrf.mxu3  ;;  %v3941_v28 = vpop.f32.mrf.mxu1 }
 0x655   :  { %v12830_v41 = vadd.f32 %v5509_v37, %v4868_v32  ;;  %v4083_v8 = vadd.f32 %v3941_v28, %v14610_v19  ;;  %v5717_v32 = vld [vmem:[#allocation2 + $0x2c7] sm:$0xff] }
 0x656   :  { %14608 = vst [vmem:[#allocation30_spill] sm:$0xff] %v12828_v21  ;;  %v4196_v21 = vld [vmem:[#allocation2 + $0x648] sm:$0xff] }
 0x657   :  { %14609 = vst [vmem:[#allocation183_spill] sm:$0xff] %v12830_v41  ;;  %9414 = vmatmul.msk.f32.gmra.mxu1 %vm827_vm2, %v3408_v43  ;;  %v14613_v43 = vld [vmem:[#allocation32_spill] sm:$0xff]  ;;  %v4197_v41 = vld [vmem:[#allocation2 + $0x650] sm:$0xff] }
 0x658   :  { %9510 = vmatmul.msk.f32.gmra.mxu2 %vm827_vm2, %v4195_v56  ;;  %v12837_v61 = vpop.f32.mrf.mxu0  ;;  %v4982_v56 = vld [vmem:[#allocation2 + $0x631] sm:$0xff] }
 0x659   :  { %9605 = vmatmul.msk.f32.gmra.mxu3 %vm827_vm2, %v4981_v7  ;;  %14611 = vst [vmem:[#allocation31_spill] sm:$0xff] %v12837_v61  ;;  %v4988_v61 = vld [vmem:[#allocation2 + $0x691] sm:$0xff] }
 0x65b   :  { %v4728_v18 = vpop.f32.mrf.mxu2  ;;  %9649 = vmatmul.msk.f32.gmra.mxu0 %vm827_vm2, %v5717_v32  ;;  %v3410_v32 = vld [vmem:[#allocation2 + $0x64f] sm:$0xff] }
 0x65c   :  { %v12839_v52 = vadd.f32 %v4728_v18, %v4083_v8  ;;  %v3944_v37 = vpop.f32.mrf.mxu1  ;;  %v5718_v18 = vld [vmem:[#allocation2 + $0x2cf] sm:$0xff] }
 0x65d   :  { %v4084_v28 = vadd.f32 %v3944_v37, %v14613_v43 }
 0x65e   :  { %14612 = vst [vmem:[#allocation184_spill] sm:$0xff] %v12839_v52 }
 0x65f   :  { %9415 = vmatmul.msk.f32.gmra.mxu1 %vm827_vm2, %v3409_v39  ;;  %v14616_v39 = vld [vmem:[#allocation33_spill] sm:$0xff] }
 0x660   :  { %9511 = vmatmul.msk.f32.gmra.mxu2 %vm827_vm2, %v4196_v21  ;;  %v12846_v7 = vpop.f32.mrf.mxu0  ;;  %v4983_v21 = vld [vmem:[#allocation2 + $0x649] sm:$0xff] }
 0x661   :  { %9606 = vmatmul.msk.f32.gmra.mxu3 %vm827_vm2, %v4982_v56  ;;  %14614 = vst [vmem:[#allocation32_spill] sm:$0xff] %v12846_v7  ;;  %v4198_v7 = vld [vmem:[#allocation2 + $0x668] sm:$0xff] }
 0x663   :  { %v4731_v19 = vpop.f32.mrf.mxu2  ;;  %9650 = vmatmul.msk.f32.gmra.mxu0 %vm827_vm2, %v5718_v18  ;;  %v3411_v18 = vld [vmem:[#allocation2 + $0x667] sm:$0xff] }
 0x664   :  { %v12848_v8 = vadd.f32 %v4731_v19, %v4084_v28  ;;  %v3947_v52 = vpop.f32.mrf.mxu1  ;;  %v5719_v19 = vld [vmem:[#allocation2 + $0x2e7] sm:$0xff] }
 0x665   :  { %v4085_v37 = vadd.f32 %v3947_v52, %v14616_v39 }
 0x666   :  { %14615 = vst [vmem:[#allocation185_spill] sm:$0xff] %v12848_v8 }
 0x667   :  { %9416 = vmatmul.msk.f32.gmra.mxu1 %vm827_vm2, %v3410_v32  ;;  %v14619_v32 = vld [vmem:[#allocation34_spill] sm:$0xff] }
 0x668   :  { %9512 = vmatmul.msk.f32.gmra.mxu2 %vm827_vm2, %v4197_v41  ;;  %v12855_v56 = vpop.f32.mrf.mxu0  ;;  %v4984_v41 = vld [vmem:[#allocation2 + $0x651] sm:$0xff] }
 0x669   :  { %9607 = vmatmul.msk.f32.gmra.mxu3 %vm827_vm2, %v4983_v21  ;;  %14617 = vst [vmem:[#allocation33_spill] sm:$0xff] %v12855_v56  ;;  %v4199_v56 = vld [vmem:[#allocation2 + $0x670] sm:$0xff] }
 0x66b   :  { %v4734_v43 = vpop.f32.mrf.mxu2  ;;  %9651 = vmatmul.msk.f32.gmra.mxu0 %vm827_vm2, %v5719_v19  ;;  %v3412_v19 = vld [vmem:[#allocation2 + $0x66f] sm:$0xff] }
 0x66c   :  { %v12857_v28 = vadd.f32 %v4734_v43, %v4085_v37  ;;  %v3950_v8 = vpop.f32.mrf.mxu1  ;;  %v5720_v43 = vld [vmem:[#allocation2 + $0x2ef] sm:$0xff] }
 0x66d   :  { %v4086_v52 = vadd.f32 %v3950_v8, %v14619_v32 }
 0x66e   :  { %14618 = vst [vmem:[#allocation186_spill] sm:$0xff] %v12857_v28 }
 0x66f   :  { %9417 = vmatmul.msk.f32.gmra.mxu1 %vm827_vm2, %v3411_v18  ;;  %v14622_v18 = vld [vmem:[#allocation35_spill] sm:$0xff] }
 0x670   :  { %9513 = vmatmul.msk.f32.gmra.mxu2 %vm827_vm2, %v4198_v7  ;;  %v12864_v21 = vpop.f32.mrf.mxu0  ;;  %v4985_v7 = vld [vmem:[#allocation2 + $0x669] sm:$0xff] }
 0x671   :  { %9608 = vmatmul.msk.f32.gmra.mxu3 %vm827_vm2, %v4984_v41  ;;  %14620 = vst [vmem:[#allocation34_spill] sm:$0xff] %v12864_v21  ;;  %v4200_v21 = vld [vmem:[#allocation2 + $0x688] sm:$0xff] }
 0x673   :  { %v4737_v39 = vpop.f32.mrf.mxu2  ;;  %9652 = vmatmul.msk.f32.gmra.mxu0 %vm827_vm2, %v5720_v43  ;;  %v3413_v43 = vld [vmem:[#allocation2 + $0x687] sm:$0xff] }
 0x674   :  { %v12866_v37 = vadd.f32 %v4737_v39, %v4086_v52  ;;  %v3953_v28 = vpop.f32.mrf.mxu1  ;;  %v5721_v39 = vld [vmem:[#allocation2 + $0x307] sm:$0xff] }
 0x675   :  { %v4087_v8 = vadd.f32 %v3953_v28, %v14622_v18 }
 0x676   :  { %14621 = vst [vmem:[#allocation187_spill] sm:$0xff] %v12866_v37 }
 0x677   :  { %9418 = vmatmul.msk.f32.gmra.mxu1 %vm827_vm2, %v3412_v19  ;;  %v14625_v19 = vld [vmem:[#allocation36_spill] sm:$0xff] }
 0x678   :  { %9514 = vmatmul.msk.f32.gmra.mxu2 %vm827_vm2, %v4199_v56  ;;  %v12873_v41 = vpop.f32.mrf.mxu0  ;;  %v4986_v56 = vld [vmem:[#allocation2 + $0x671] sm:$0xff] }
 0x679   :  { %9609 = vmatmul.msk.f32.gmra.mxu3 %vm827_vm2, %v4985_v7  ;;  %14623 = vst [vmem:[#allocation35_spill] sm:$0xff] %v12873_v41  ;;  %v4201_v41 = vld [vmem:[#allocation2 + $0x690] sm:$0xff] }
 0x67b   :  { %v4740_v32 = vpop.f32.mrf.mxu2  ;;  %9653 = vmatmul.msk.f32.gmra.mxu0 %vm827_vm2, %v5721_v39  ;;  %v3414_v39 = vld [vmem:[#allocation2 + $0x68f] sm:$0xff] }
 0x67c   :  { %v12875_v52 = vadd.f32 %v4740_v32, %v4087_v8  ;;  %v3956_v37 = vpop.f32.mrf.mxu1  ;;  %v5722_v32 = vld [vmem:[#allocation2 + $0x30f] sm:$0xff] }
 0x67d   :  { %v4088_v28 = vadd.f32 %v3956_v37, %v14625_v19 }
 0x67e   :  { %14624 = vst [vmem:[#allocation188_spill] sm:$0xff] %v12875_v52 }
 0x67f   :  { %9419 = vmatmul.msk.f32.gmra.mxu1 %vm827_vm2, %v3413_v43  ;;  %v14628_v43 = vld [vmem:[#allocation38_spill] sm:$0xff] }
 0x680   :  { %9515 = vmatmul.msk.f32.gmra.mxu2 %vm827_vm2, %v4200_v21  ;;  %v12882_v7 = vpop.f32.mrf.mxu0  ;;  %v4987_v21 = vld [vmem:[#allocation2 + $0x689] sm:$0xff] }
 0x681   :  { %9610 = vmatmul.msk.f32.gmra.mxu3 %vm827_vm2, %v4986_v56  ;;  %14626 = vst [vmem:[#allocation36_spill] sm:$0xff] %v12882_v7  ;;  %v7255_v7 = vld [vmem:[#allocation2 + $0x49] sm:$0xff] }
 0x683   :  { %v4743_v18 = vpop.f32.mrf.mxu2  ;;  %9654 = vmatmul.msk.f32.gmra.mxu0 %vm827_vm2, %v5722_v32  ;;  %v6468_v32 = vld [vmem:[#allocation2 + $0x48] sm:$0xff] }
 0x684   :  { %v12884_v8 = vadd.f32 %v4743_v18, %v4088_v28  ;;  %v3959_v52 = vpop.f32.mrf.mxu1  ;;  %v5723_v18 = vld [vmem:[#allocation2 + $0x327] sm:$0xff] }
 0x685   :  { %v4089_v37 = vadd.f32 %v3959_v52, %v14628_v43 }
 0x686   :  { %14627 = vst [vmem:[#allocation189_spill] sm:$0xff] %v12884_v8 }
 0x687   :  { %9420 = vmatmul.msk.f32.gmra.mxu1 %vm827_vm2, %v3414_v39 }
 0x688   :  { %9516 = vmatmul.msk.f32.gmra.mxu2 %vm827_vm2, %v4201_v41  ;;  %v12891_v56 = vpop.f32.mrf.mxu0  ;;  %v14630_v41 = vld [vmem:[#allocation40_spill] sm:$0xff] }
 0x689   :  { %9611 = vmatmul.msk.f32.gmra.mxu3 %vm827_vm2, %v4987_v21 }
 0x68b   :  { %v4746_v19 = vpop.f32.mrf.mxu2  ;;  %9655 = vmatmul.msk.f32.gmra.mxu0 %vm827_vm2, %v5723_v18  ;;  %v6469_v18 = vld [vmem:[#allocation2 + $0x50] sm:$0xff] }
 0x68c   :  { %v12893_v28 = vadd.f32 %v4746_v19, %v4089_v37  ;;  %v3962_v8 = vpop.f32.mrf.mxu1  ;;  %v5724_v37 = vld [vmem:[#allocation2 + $0x32f] sm:$0xff] }
 0x68d   :  { %v4090_v52 = vadd.f32 %v3962_v8, %v14630_v41 }
 0x68e   :  { %14629 = vst [vmem:[#allocation38_spill] sm:$0xff] %v12893_v28  ;;  %v7256_v28 = vld [vmem:[#allocation2 + $0x51] sm:$0xff] }
 0x68f   :  { %9709 = vmatmul.msk.f32.vlgmr.msra.gmra.mxu1 %vm827_vm2, %v6468_v32 }
 0x690   :  { %9805 = vmatmul.msk.f32.vlgmr.msra.gmra.mxu2 %vm827_vm2, %v7255_v7  ;;  %v12900_v39 = vpop.f32.mrf.mxu0  ;;  %v14633_v7 = vld [vmem:[#allocation42_spill] sm:$0xff] }
 0x691   :  { %9612 = vmatmul.msk.f32.gmra.mxu3 %vm827_vm2, %v4988_v61  ;;  %14631 = vst [vmem:[#allocation40_spill] sm:$0xff] %v12900_v39  ;;  %v5725_v39 = vld [vmem:[#allocation2 + $0x347] sm:$0xff] }
 0x693   :  { %v4749_v21 = vpop.f32.mrf.mxu2  ;;  %9656 = vmatmul.msk.f32.gmra.mxu0 %vm827_vm2, %v5724_v37  ;;  %v14636_v37 = vld [vmem:[#allocation44_spill] sm:$0xff] }
 0x694   :  { %v12902_v43 = vadd.f32 %v4749_v21, %v4090_v52  ;;  %v3965_v19 = vpop.f32.mrf.mxu1  ;;  %v6470_v21 = vld [vmem:[#allocation2 + $0x68] sm:$0xff] }
 0x695   :  { %v4091_v32 = vadd.f32 %v3965_v19, %v14633_v7 }
 0x696   :  { %14632 = vst [vmem:[#allocation190_spill] sm:$0xff] %v12902_v43  ;;  %v7257_v43 = vld [vmem:[#allocation2 + $0x69] sm:$0xff] }
 0x697   :  { %9710 = vmatmul.msk.f32.gmra.mxu1 %vm827_vm2, %v6469_v18 }
 0x698   :  { %9806 = vmatmul.msk.f32.gmra.mxu2 %vm827_vm2, %v7256_v28  ;;  %v12908_v61 = vpop.f32.mrf.mxu0 }
 0x699   :  { %14634 = vst [vmem:[#allocation42_spill] sm:$0xff] %v12908_v61  ;;  %v5726_v61 = vld [vmem:[#allocation2 + $0x34f] sm:$0xff] }
 0x69b   :  { %v4752_v8 = vpop.f32.mrf.mxu2  ;;  %9657 = vmatmul.msk.f32.gmra.mxu0 %vm827_vm2, %v5725_v39  ;;  %v14639_v39 = vld [vmem:[#allocation46_spill] sm:$0xff] }
 0x69c   :  { %v12910_v41 = vadd.f32 %v4752_v8, %v4091_v32  ;;  %v3968_v52 = vpop.f32.mrf.mxu1  ;;  %v6471_v8 = vld [vmem:[#allocation2 + $0x70] sm:$0xff] }
 0x69d   :  { %v4092_v18 = vadd.f32 %v3968_v52, %v14636_v37 }
 0x69e   :  { %14635 = vst [vmem:[#allocation191_spill] sm:$0xff] %v12910_v41  ;;  %v7258_v41 = vld [vmem:[#allocation2 + $0x71] sm:$0xff] }
 0x69f   :  { %9711 = vmatmul.msk.f32.gmra.mxu1 %vm827_vm2, %v6470_v21 }
 0x6a0   :  { %9807 = vmatmul.msk.f32.gmra.mxu2 %vm827_vm2, %v7257_v43  ;;  %v12916_v28 = vpop.f32.mrf.mxu0 }
 0x6a1   :  { %14637 = vst [vmem:[#allocation44_spill] sm:$0xff] %v12916_v28  ;;  %v5727_v28 = vld [vmem:[#allocation2 + $0x367] sm:$0xff] }
 0x6a3   :  { %v4755_v19 = vpop.f32.mrf.mxu2  ;;  %9658 = vmatmul.msk.f32.gmra.mxu0 %vm827_vm2, %v5726_v61  ;;  %v6472_v61 = vld [vmem:[#allocation2 + $0x88] sm:$0xff] }
 0x6a4   :  { %v12918_v7 = vadd.f32 %v4755_v19, %v4092_v18  ;;  %v3971_v32 = vpop.f32.mrf.mxu1  ;;  %v12929_v19 = vpop.f32.mrf.mxu3 }
 0x6a5   :  { %v4093_v21 = vadd.f32 %v3971_v32, %v14639_v39  ;;  %14642 = vst [vmem:[#allocation194_spill] sm:$0xff] %v12929_v19 }
 0x6a6   :  { %14638 = vst [vmem:[#allocation192_spill] sm:$0xff] %v12918_v7  ;;  %v7259_v7 = vld [vmem:[#allocation2 + $0x89] sm:$0xff] }
 0x6a7   :  { %9712 = vmatmul.msk.f32.gmra.mxu1 %vm827_vm2, %v6471_v8 }
 0x6a8   :  { %9808 = vmatmul.msk.f32.gmra.mxu2 %vm827_vm2, %v7258_v41  ;;  %v12924_v43 = vpop.f32.mrf.mxu0  ;;  %v14643_v41 = vld [vmem:[#allocation48_spill] sm:$0xff] }
 0x6a9   :  { %14640 = vst [vmem:[#allocation46_spill] sm:$0xff] %v12924_v43 }
 0x6ab   :  { %v4758_v52 = vpop.f32.mrf.mxu2  ;;  %9659 = vmatmul.msk.f32.gmra.mxu0 %vm827_vm2, %v5727_v28  ;;  %v6473_v28 = vld [vmem:[#allocation2 + $0x90] sm:$0xff] }
 0x6ac   :  { %v12926_v37 = vadd.f32 %v4758_v52, %v4093_v21  ;;  %v3974_v18 = vpop.f32.mrf.mxu1  ;;  %v5728_v21 = vld [vmem:[#allocation2 + $0x36f] sm:$0xff] }
 0x6ad   :  { %v4094_v8 = vadd.f32 %v3974_v18, %v14643_v41 }
 0x6ae   :  { %14641 = vst [vmem:[#allocation193_spill] sm:$0xff] %v12926_v37  ;;  %v7260_v37 = vld [vmem:[#allocation2 + $0x91] sm:$0xff] }
 0x6af   :  { %9713 = vmatmul.msk.f32.gmra.mxu1 %vm827_vm2, %v6472_v61  ;;  %v12941_v61 = vpop.f32.mrf.mxu3 }
 0x6b0   :  { %9809 = vmatmul.msk.f32.gmra.mxu2 %vm827_vm2, %v7259_v7  ;;  %v12934_v32 = vpop.f32.mrf.mxu0  ;;  %14646 = vst [vmem:[#allocation196_spill] sm:$0xff] %v12941_v61  ;;  %v14647_v7 = vld [vmem:[#allocation50_spill] sm:$0xff] }
 0x6b1   :  { %14644 = vst [vmem:[#allocation48_spill] sm:$0xff] %v12934_v32 }
 0x6b3   :  { %v4761_v39 = vpop.f32.mrf.mxu2  ;;  %9660 = vmatmul.msk.f32.gmra.mxu0 %vm827_vm2, %v5728_v21  ;;  %v6474_v21 = vld [vmem:[#allocation2 + $0xa8] sm:$0xff] }
 0x6b4   :  { %v12936_v43 = vadd.f32 %v4761_v39, %v4094_v8  ;;  %v3977_v52 = vpop.f32.mrf.mxu1  ;;  %v5729_v8 = vld [vmem:[#allocation2 + $0x387] sm:$0xff] }
 0x6b5   :  { %v4095_v19 = vadd.f32 %v3977_v52, %v14647_v7 }
 0x6b6   :  { %14645 = vst [vmem:[#allocation195_spill] sm:$0xff] %v12936_v43  ;;  %v7261_v43 = vld [vmem:[#allocation2 + $0xa9] sm:$0xff] }
 0x6b7   :  { %9714 = vmatmul.msk.f32.gmra.mxu1 %vm827_vm2, %v6473_v28  ;;  %v12954_v52 = vpop.f32.mrf.mxu3 }
 0x6b8   :  { %9810 = vmatmul.msk.f32.gmra.mxu2 %vm827_vm2, %v7260_v37  ;;  %v12944_v18 = vpop.f32.mrf.mxu0  ;;  %v14650_v37 = vld [vmem:[#allocation52_spill] sm:$0xff]  ;;  %14652 = vst [vmem:[#allocation198_spill] sm:$0xff] %v12954_v52 }
 0x6b9   :  { %14648 = vst [vmem:[#allocation50_spill] sm:$0xff] %v12944_v18  ;;  %v5731_v52 = vld [vmem:[#allocation2 + $0x3a7] sm:$0xff] }
 0x6bb   :  { %v4764_v41 = vpop.f32.mrf.mxu2  ;;  %9661 = vmatmul.msk.f32.gmra.mxu0 %vm827_vm2, %v5729_v8  ;;  %v6475_v8 = vld [vmem:[#allocation2 + $0xb0] sm:$0xff] }
 0x6bc   :  { %v12946_v32 = vadd.f32 %v4764_v41, %v4095_v19  ;;  %v3980_v39 = vpop.f32.mrf.mxu1  ;;  %v5730_v19 = vld [vmem:[#allocation2 + $0x38f] sm:$0xff] }
 0x6bd   :  { %v4096_v28 = vadd.f32 %v3980_v39, %v14650_v37 }
 0x6be   :  { %14649 = vst [vmem:[#allocation197_spill] sm:$0xff] %v12946_v32  ;;  %v7262_v32 = vld [vmem:[#allocation2 + $0xb1] sm:$0xff] }
 0x6bf   :  { %9715 = vmatmul.msk.f32.gmra.mxu1 %vm827_vm2, %v6474_v21 }
 0x6c0   :  { %9811 = vmatmul.msk.f32.gmra.mxu2 %vm827_vm2, %v7261_v43  ;;  %v12952_v61 = vpop.f32.mrf.mxu0  ;;  %v14654_v43 = vld [vmem:[#allocation54_spill] sm:$0xff] }
 0x6c1   :  { %14651 = vst [vmem:[#allocation52_spill] sm:$0xff] %v12952_v61 }
 0x6c3   :  { %v4767_v7 = vpop.f32.mrf.mxu2  ;;  %9662 = vmatmul.msk.f32.gmra.mxu0 %vm827_vm2, %v5730_v19  ;;  %v6476_v19 = vld [vmem:[#allocation2 + $0xc8] sm:$0xff] }
 0x6c4   :  { %v12956_v18 = vadd.f32 %v4767_v7, %v4096_v28  ;;  %v3983_v41 = vpop.f32.mrf.mxu1  ;;  %v12966_v28 = vpop.f32.mrf.mxu3 }
 0x6c5   :  { %v4097_v21 = vadd.f32 %v3983_v41, %v14654_v43  ;;  %14657 = vst [vmem:[#allocation201_spill] sm:$0xff] %v12966_v28  ;;  %v7264_v28 = vld [vmem:[#allocation2 + $0xd1] sm:$0xff] }
 0x6c6   :  { %14653 = vst [vmem:[#allocation199_spill] sm:$0xff] %v12956_v18  ;;  %v7263_v18 = vld [vmem:[#allocation2 + $0xc9] sm:$0xff] }
 0x6c7   :  { %9716 = vmatmul.msk.f32.gmra.mxu1 %vm827_vm2, %v6475_v8 }
 0x6c8   :  { %9812 = vmatmul.msk.f32.gmra.mxu2 %vm827_vm2, %v7262_v32  ;;  %v12962_v39 = vpop.f32.mrf.mxu0  ;;  %v14658_v32 = vld [vmem:[#allocation56_spill] sm:$0xff] }
 0x6c9   :  { %14655 = vst [vmem:[#allocation54_spill] sm:$0xff] %v12962_v39 }
 0x6cb   :  { %v4770_v37 = vpop.f32.mrf.mxu2  ;;  %9663 = vmatmul.msk.f32.gmra.mxu0 %vm827_vm2, %v5731_v52  ;;  %v6477_v52 = vld [vmem:[#allocation2 + $0xd0] sm:$0xff] }
 0x6cc   :  { %v12964_v61 = vadd.f32 %v4770_v37, %v4097_v21  ;;  %v3986_v7 = vpop.f32.mrf.mxu1  ;;  %v5732_v21 = vld [vmem:[#allocation2 + $0x3af] sm:$0xff] }
 0x6cd   :  { %v4098_v8 = vadd.f32 %v3986_v7, %v14658_v32 }
 0x6ce   :  { %14656 = vst [vmem:[#allocation200_spill] sm:$0xff] %v12964_v61  ;;  %v12977_v61 = vpop.f32.mrf.mxu3 }
 0x6cf   :  { %9717 = vmatmul.msk.f32.gmra.mxu1 %vm827_vm2, %v6476_v19  ;;  %14661 = vst [vmem:[#allocation203_spill] sm:$0xff] %v12977_v61 }
 0x6d0   :  { %9813 = vmatmul.msk.f32.gmra.mxu2 %vm827_vm2, %v7263_v18  ;;  %v12972_v41 = vpop.f32.mrf.mxu0  ;;  %v14662_v18 = vld [vmem:[#allocation58_spill] sm:$0xff] }
 0x6d1   :  { %14659 = vst [vmem:[#allocation56_spill] sm:$0xff] %v12972_v41 }
 0x6d3   :  { %v4773_v43 = vpop.f32.mrf.mxu2  ;;  %9664 = vmatmul.msk.f32.gmra.mxu0 %vm827_vm2, %v5732_v21  ;;  %v6478_v21 = vld [vmem:[#allocation2 + $0xe8] sm:$0xff] }
 0x6d4   :  { %v12974_v39 = vadd.f32 %v4773_v43, %v4098_v8  ;;  %v3989_v37 = vpop.f32.mrf.mxu1  ;;  %v5733_v8 = vld [vmem:[#allocation2 + $0x3c7] sm:$0xff] }
 0x6d5   :  { %v4099_v19 = vadd.f32 %v3989_v37, %v14662_v18 }
 0x6d6   :  { %14660 = vst [vmem:[#allocation202_spill] sm:$0xff] %v12974_v39  ;;  %v7265_v39 = vld [vmem:[#allocation2 + $0xe9] sm:$0xff] }
 0x6d7   :  { %9718 = vmatmul.msk.f32.gmra.mxu1 %vm827_vm2, %v6477_v52  ;;  %v12989_v52 = vpop.f32.mrf.mxu3 }
 0x6d8   :  { %9814 = vmatmul.msk.f32.gmra.mxu2 %vm827_vm2, %v7264_v28  ;;  %v12982_v7 = vpop.f32.mrf.mxu0  ;;  %14665 = vst [vmem:[#allocation205_spill] sm:$0xff] %v12989_v52  ;;  %v14666_v28 = vld [vmem:[#allocation60_spill] sm:$0xff] }
 0x6d9   :  { %14663 = vst [vmem:[#allocation58_spill] sm:$0xff] %v12982_v7 }
 0x6db   :  { %v4776_v32 = vpop.f32.mrf.mxu2  ;;  %9665 = vmatmul.msk.f32.gmra.mxu0 %vm827_vm2, %v5733_v8  ;;  %v6479_v8 = vld [vmem:[#allocation2 + $0xf0] sm:$0xff] }
 0x6dc   :  { %v12984_v41 = vadd.f32 %v4776_v32, %v4099_v19  ;;  %v3992_v43 = vpop.f32.mrf.mxu1  ;;  %v5734_v19 = vld [vmem:[#allocation2 + $0x3cf] sm:$0xff] }
 0x6dd   :  { %v4100_v61 = vadd.f32 %v3992_v43, %v14666_v28 }
 0x6de   :  { %14664 = vst [vmem:[#allocation204_spill] sm:$0xff] %v12984_v41  ;;  %v7266_v41 = vld [vmem:[#allocation2 + $0xf1] sm:$0xff] }
 0x6df   :  { %9719 = vmatmul.msk.f32.gmra.mxu1 %vm827_vm2, %v6478_v21  ;;  %v13002_v43 = vpop.f32.mrf.mxu3 }
 0x6e0   :  { %9815 = vmatmul.msk.f32.gmra.mxu2 %vm827_vm2, %v7265_v39  ;;  %v12992_v37 = vpop.f32.mrf.mxu0  ;;  %v14669_v39 = vld [vmem:[#allocation62_spill] sm:$0xff]  ;;  %14671 = vst [vmem:[#allocation207_spill] sm:$0xff] %v13002_v43  ;;  %v5736_v43 = vld [vmem:[#allocation2 + $0x3ef] sm:$0xff] }
 0x6e1   :  { %14667 = vst [vmem:[#allocation60_spill] sm:$0xff] %v12992_v37 }
 0x6e3   :  { %v4779_v18 = vpop.f32.mrf.mxu2  ;;  %9666 = vmatmul.msk.f32.gmra.mxu0 %vm827_vm2, %v5734_v19  ;;  %v6480_v19 = vld [vmem:[#allocation2 + $0x108] sm:$0xff] }
 0x6e4   :  { %v12994_v7 = vadd.f32 %v4779_v18, %v4100_v61  ;;  %v3995_v32 = vpop.f32.mrf.mxu1  ;;  %v5735_v61 = vld [vmem:[#allocation2 + $0x3e7] sm:$0xff] }
 0x6e5   :  { %v4101_v21 = vadd.f32 %v3995_v32, %v14669_v39 }
 0x6e6   :  { %14668 = vst [vmem:[#allocation206_spill] sm:$0xff] %v12994_v7  ;;  %v7267_v7 = vld [vmem:[#allocation2 + $0x109] sm:$0xff] }
 0x6e7   :  { %9720 = vmatmul.msk.f32.gmra.mxu1 %vm827_vm2, %v6479_v8 }
 0x6e8   :  { %9816 = vmatmul.msk.f32.gmra.mxu2 %vm827_vm2, %v7266_v41  ;;  %v13000_v52 = vpop.f32.mrf.mxu0 }
 0x6e9   :  { %14670 = vst [vmem:[#allocation62_spill] sm:$0xff] %v13000_v52  ;;  %v14680_v52 = vld [vmem:[#allocation37_spill] sm:$0xff] }
 0x6eb   :  { %v4782_v28 = vpop.f32.mrf.mxu2  ;;  %9667 = vmatmul.msk.f32.gmra.mxu0 %vm827_vm2, %v5735_v61  ;;  %v6481_v61 = vld [vmem:[#allocation2 + $0x110] sm:$0xff] }
 0x6ec   :  { %v13004_v37 = vadd.f32 %v4782_v28, %v4101_v21  ;;  %v3998_v18 = vpop.f32.mrf.mxu1  ;;  %v13014_v21 = vpop.f32.mrf.mxu3 }
 0x6ed   :  { %v4102_v41 = vadd.f32 %v3998_v18, %v11980_v48  ;;  %14675 = vst [vmem:[#allocation211_spill] sm:$0xff] %v13014_v21 }
 0x6ee   :  { %14672 = vst [vmem:[#allocation208_spill] sm:$0xff] %v13004_v37  ;;  %v7268_v37 = vld [vmem:[#allocation2 + $0x111] sm:$0xff] }
 0x6ef   :  { %9721 = vmatmul.msk.f32.gmra.mxu1 %vm827_vm2, %v6480_v19 }
 0x6f0   :  { %9817 = vmatmul.msk.f32.gmra.mxu2 %vm827_vm2, %v7267_v7  ;;  %v13012_v39 = vpop.f32.mrf.mxu0  ;;  %v14676_v7 = vld [vmem:[#allocation65_spill] sm:$0xff] }
 0x6f1   :  { %14674 = vst [vmem:[#allocation210_spill] sm:$0xff] %v13012_v39  ;;  %v7269_v39 = vld [vmem:[#allocation2 + $0x129] sm:$0xff] }
 0x6f3   :  { %v4785_v32 = vpop.f32.mrf.mxu2  ;;  %9668 = vmatmul.msk.f32.gmra.mxu0 %vm827_vm2, %v5736_v43  ;;  %v6482_v43 = vld [vmem:[#allocation2 + $0x128] sm:$0xff] }
 0x6f4   :  { %v13010_v8 = vadd.f32 %v4785_v32, %v4102_v41  ;;  %v4001_v28 = vpop.f32.mrf.mxu1  ;;  %v5737_v41 = vld [vmem:[#allocation2 + $0x407] sm:$0xff]  ;;  %v13025_v21 = vpop.f32.mrf.mxu3 }
 0x6f5   :  { %v4103_v19 = vadd.f32 %v4001_v28, %v14676_v7  ;;  %14679 = vst [vmem:[#allocation213_spill] sm:$0xff] %v13025_v21  ;;  %v6483_v21 = vld [vmem:[#allocation2 + $0x130] sm:$0xff] }
 0x6f6   :  { %14673 = vst [vmem:[#allocation209_spill] sm:$0xff] %v13010_v8 }
 0x6f7   :  { %9722 = vmatmul.msk.f32.gmra.mxu1 %vm827_vm2, %v6481_v61  ;;  %v2245_v61 = vadd.f32 %v12150_v53, %v14680_v52  ;;  %v14682_v53 = vld [vmem:[#allocation39_spill] sm:$0xff] }
 0x6f8   :  { %9818 = vmatmul.msk.f32.gmra.mxu2 %vm827_vm2, %v7268_v37  ;;  %v13023_v8 = vpop.f32.mrf.mxu0  ;;  %v2248_v52 = vadd.f32 %v12163_v11, %v14682_v53  ;;  %v14687_v11 = vld [vmem:[#allocation70_spill] sm:$0xff] }
 0x6f9   :  { %14678 = vst [vmem:[#allocation212_spill] sm:$0xff] %v13023_v8  ;;  %v3223_v37 = vadd.f32 %v12432_v33, %v2245_v61  ;;  %v7270_v8 = vld [vmem:[#allocation2 + $0x131] sm:$0xff] }
 0x6fa   :  { %v3224_v33 = vadd.f32 %v12442_v45, %v2248_v52  ;;  %v14686_v61 = vld [vmem:[#allocation69_spill] sm:$0xff]  ;;  %v14690_v52 = vld [vmem:[#allocation72_spill] sm:$0xff] }
 0x6fb   :  { %v4788_v48 = vpop.f32.mrf.mxu2  ;;  %9669 = vmatmul.msk.f32.gmra.mxu0 %vm827_vm2, %v5737_v41 }
 0x6fc   :  { %v13020_v18 = vadd.f32 %v4788_v48, %v4103_v19  ;;  %v4004_v32 = vpop.f32.mrf.mxu1  ;;  %v5738_v48 = vld [vmem:[#allocation2 + $0x40f] sm:$0xff]  ;;  %v4011_v53 = vadd.f32 %v14687_v11, %v3224_v33 }
 0x6fd   :  { %v4104_v28 = vadd.f32 %v4004_v32, %v12012_v58  ;;  %v13043_v58 = vpop.f32.mrf.mxu3 }
 0x6fe   :  { %14677 = vst [vmem:[#allocation65_spill] sm:$0xff] %v13020_v18  ;;  %v4010_v18 = vadd.f32 %v12014_v55, %v3223_v37 }
 0x6ff   :  { %9723 = vmatmul.msk.f32.gmra.mxu1 %vm827_vm2, %v6482_v43  ;;  %14684 = vst [vmem:[#allocation214_spill] sm:$0xff] %v13043_v58  ;;  %v14689_v58 = vld [vmem:[#allocation41_spill] sm:$0xff] }
 0x700   :  { %9819 = vmatmul.msk.f32.gmra.mxu2 %vm827_vm2, %v7269_v39  ;;  %v13039_v43 = vpop.f32.mrf.mxu0  ;;  %v14685_v39 = vld [vmem:[#allocation68_spill] sm:$0xff]  ;;  %v2251_v45 = vadd.f32 %v12176_v50, %v14689_v58 }
 0x701   :  { %14683 = vst [vmem:[#allocation39_spill] sm:$0xff] %v13039_v43  ;;  %v4797_v32 = vadd.f32 %v14685_v39, %v4010_v18  ;;  %v7271_v43 = vld [vmem:[#allocation2 + $0x149] sm:$0xff]  ;;  %v4798_v39 = vadd.f32 %v14690_v52, %v4011_v53  ;;  %v7272_v53 = vld [vmem:[#allocation2 + $0x151] sm:$0xff] }
 0x703   :  { %v4791_v7 = vpop.f32.mrf.mxu2  ;;  %9670 = vmatmul.msk.f32.gmra.mxu0 %vm827_vm2, %v5738_v48 }
 0x704   :  { %v13033_v19 = vadd.f32 %v4791_v7, %v4104_v28  ;;  %v4007_v41 = vpop.f32.mrf.mxu1  ;;  %v5739_v7 = vld [vmem:[#allocation2 + $0x427] sm:$0xff] }
 0x705   :  { %v4105_v28 = vadd.f32 %v4007_v41, %v14686_v61  ;;  %v3225_v41 = vadd.f32 %v12452_v12, %v2251_v45 }
 0x706   :  { %14681 = vst [vmem:[#allocation37_spill] sm:$0xff] %v13033_v19 }
 0x707   :  { %9724 = vmatmul.msk.f32.gmra.mxu1 %vm827_vm2, %v6483_v21  ;;  %v14688_v21 = vld [vmem:[#allocation73_spill] sm:$0xff] }
 0x708   :  { %9820 = vmatmul.msk.f32.gmra.mxu2 %vm827_vm2, %v7270_v8  ;;  %v5584_v19 = vadd.f32 %v14688_v21, %v4797_v32  ;;  %v6484_v8 = vld [vmem:[#allocation2 + $0x148] sm:$0xff]  ;;  %v13060_v61 = vpop.f32.mrf.mxu0  ;;  %v13065_v32 = vld [vmem:[%s14370_s4] ss:$0 sm:$0xff] }
 0x709   :  { %v14693_v21 = vld [vmem:[#allocation43_spill] sm:$0xff] }
 0x70a   :  { %v6372_v18 = vadd.f32 %v12655_v44, %v5584_v19  ;;  %v5740_v19 = vld [vmem:[#allocation2 + $0x42f] sm:$0xff] }
 0x70b   :  { %v4794_v55 = vpop.f32.mrf.mxu2  ;;  %9671 = vmatmul.msk.f32.gmra.mxu0 %vm827_vm2, %v5739_v7 }
 0x70c   :  { %v13048_v37 = vadd.f32 %v4794_v55, %v4105_v28  ;;  %v6871_v48 = vpop.f32.mrf.mxu1  ;;  %v13067_v28 = vpop.f32.mrf.mxu3  ;;  %v14692_v55 = vld [vmem:[#allocation77_spill] sm:$0xff] }
 0x70d   :  { %v7159_v33 = vadd.f32 %v6871_v48, %v6372_v18  ;;  %v5585_v7 = vadd.f32 %v14692_v55, %v4798_v39  ;;  %v6485_v48 = vld [vmem:[#allocation2 + $0x150] sm:$0xff]  ;;  %v14695_v55 = vld [vmem:[#allocation78_spill] sm:$0xff] }
 0x70f   :  { %9725 = vmatmul.msk.f32.gmra.mxu1 %vm827_vm2, %v6484_v8  ;;  %v2254_v8 = vadd.f32 %v12189_v1, %v14693_v21  ;;  %v6373_v45 = vadd.f32 %v12664_v2, %v5585_v7 }
 0x710   :  { %9821 = vmatmul.msk.f32.gmra.mxu2 %vm827_vm2, %v7271_v43  ;;  %v14691_v43 = vld [vmem:[#allocation74_spill] sm:$0xff] }
 0x711   :  { %v4012_v12 = vadd.f32 %v14691_v43, %v3225_v41  ;;  %v3226_v52 = vadd.f32 %v12462_v30, %v2254_v8  ;;  %v5741_v43 = vld [vmem:[#allocation2 + $0x447] sm:$0xff] }
 0x713   :  { %v7658_v50 = vpop.f32.mrf.mxu2  ;;  %9672 = vmatmul.msk.f32.gmra.mxu0 %vm827_vm2, %v5740_v19  ;;  %v4013_v7 = vadd.f32 %v14695_v55, %v3226_v52  ;;  %v14700_v55 = vld [vmem:[#allocation85_spill] sm:$0xff] }
 0x714   :  { %v7946_v44 = vadd.f32 %v7658_v50, %v7159_v33  ;;  %v6874_v58 = vpop.f32.mrf.mxu1  ;;  %v14694_v33 = vld [vmem:[#allocation76_spill] sm:$0xff]  ;;  %v13083_v1 = vpop.f32.mrf.mxu3 }
 0x715   :  { %v4799_v41 = vadd.f32 %v14694_v33, %v4012_v12  ;;  %v7160_v50 = vadd.f32 %v6874_v58, %v6373_v45  ;;  %v6486_v12 = vld [vmem:[#allocation2 + $0x168] sm:$0xff] }
 0x716   :  { %v8046_v11 = vadd.f32 %v13065_v32, %v7946_v44  ;;  %v13081_v44 = vpop.f32.mrf.mxu0  ;;  %v7273_v58 = vld [vmem:[#allocation2 + $0x169] sm:$0xff] }
 0x717   :  { %9726 = vmatmul.msk.f32.gmra.mxu1 %vm827_vm2, %v6485_v48  ;;  %v14698_v33 = vld [vmem:[#allocation80_spill] sm:$0xff] }
 0x718   :  { %v8142_v18 = vmax.f32 %v8046_v11, 0.0  ;;  %9822 = vmatmul.msk.f32.gmra.mxu2 %vm827_vm2, %v7272_v53  ;;  %v14696_v11 = vld [vmem:[#allocation81_spill] sm:$0xff]  ;;  %v4800_v52 = vadd.f32 %v14698_v33, %v4013_v7 }
 0x719   :  { %v5586_v48 = vadd.f32 %v14696_v11, %v4799_v41  ;;  %v14697_v53 = vld [vmem:[#allocation45_spill] sm:$0xff] }
 0x71a   :  { %9901 = vmatmul.msk.f32.vlgmr.msra.gmra.mxu3 %vm827_vm2, %v8142_v18  ;;  %v2257_v21 = vadd.f32 %v12202_v24, %v14697_v53  ;;  %v14699_v24 = vld [vmem:[#allocation82_spill] sm:$0xff]  ;;  %v5587_v11 = vadd.f32 %v14700_v55, %v4800_v52  ;;  %v6487_v7 = vld [vmem:[#allocation2 + $0x170] sm:$0xff]  ;;  %v5743_v52 = vld [vmem:[#allocation2 + $0x467] sm:$0xff] }
 0x71b   :  { %v7661_v39 = vpop.f32.mrf.mxu2  ;;  %9673 = vmatmul.msk.f32.gmra.mxu0 %vm827_vm2, %v5741_v43  ;;  %v6374_v8 = vadd.f32 %v12673_v62, %v5586_v48 }
 0x71c   :  { %v7947_v19 = vadd.f32 %v7661_v39, %v7160_v50  ;;  %v6877_v2 = vpop.f32.mrf.mxu1  ;;  %v3227_v18 = vadd.f32 %v12478_v16, %v2257_v21  ;;  %v13103_v16 = vpop.f32.mrf.mxu3  ;;  %v6375_v53 = vadd.f32 %v12682_v54, %v5587_v11  ;;  %v6488_v11 = vld [vmem:[#allocation2 + $0x188] sm:$0xff] }
 0x71d   :  { %v7161_v50 = vadd.f32 %v6877_v2, %v6374_v8  ;;  %v7274_v2 = vld [vmem:[#allocation2 + $0x171] sm:$0xff] }
 0x71e   :  { %v8047_v30 = vadd.f32 %v13065_v32, %v7947_v19  ;;  %v5742_v19 = vld [vmem:[#allocation2 + $0x44f] sm:$0xff]  ;;  %v4014_v62 = vadd.f32 %v14699_v24, %v3227_v18  ;;  %v13100_v48 = vpop.f32.mrf.mxu0 }
 0x71f   :  { %9727 = vmatmul.msk.f32.gmra.mxu1 %vm827_vm2, %v6486_v12  ;;  %v14701_v12 = vld [vmem:[#allocation47_spill] sm:$0xff] }
 0x720   :  { %v8143_v45 = vmax.f32 %v8047_v30, 0.0  ;;  %9823 = vmatmul.msk.f32.gmra.mxu2 %vm827_vm2, %v7273_v58  ;;  %v2260_v58 = vadd.f32 %v12215_v42, %v14701_v12  ;;  %v14703_v42 = vld [vmem:[#allocation86_spill] sm:$0xff] }
 0x722   :  { %9902 = vmatmul.msk.f32.gmra.mxu3 %vm827_vm2, %v8143_v45  ;;  %v3228_v8 = vadd.f32 %v12488_v34, %v2260_v58  ;;  %v14702_v45 = vld [vmem:[#allocation84_spill] sm:$0xff]  ;;  %v14705_v34 = vld [vmem:[#allocation49_spill] sm:$0xff] }
 0x723   :  { %v7664_v41 = vpop.f32.mrf.mxu2  ;;  %9674 = vmatmul.msk.f32.gmra.mxu0 %vm827_vm2, %v5742_v19  ;;  %v4801_v18 = vadd.f32 %v14702_v45, %v4014_v62  ;;  %v14704_v19 = vld [vmem:[#allocation89_spill] sm:$0xff]  ;;  %v2263_v62 = vadd.f32 %v12228_v14, %v14705_v34  ;;  %v14711_v34 = vld [vmem:[#allocation92_spill] sm:$0xff] }
 0x724   :  { %v7948_v39 = vadd.f32 %v7664_v41, %v7161_v50  ;;  %v6880_v43 = vpop.f32.mrf.mxu1  ;;  %v4015_v54 = vadd.f32 %v14703_v42, %v3228_v8  ;;  %v13124_v12 = vpop.f32.mrf.mxu3  ;;  %v5744_v45 = vld [vmem:[#allocation2 + $0x46f] sm:$0xff] }
 0x725   :  { %v7162_v33 = vadd.f32 %v6880_v43, %v6375_v53  ;;  %v5588_v24 = vadd.f32 %v14704_v19, %v4801_v18  ;;  %v3229_v58 = vadd.f32 %v12498_v29, %v2263_v62  ;;  %v14706_v53 = vld [vmem:[#allocation88_spill] sm:$0xff]  ;;  %v6489_v19 = vld [vmem:[#allocation2 + $0x190] sm:$0xff]  ;;  %v14709_v29 = vld [vmem:[#allocation51_spill] sm:$0xff] }
 0x726   :  { %v8048_v30 = vadd.f32 %v13065_v32, %v7948_v39 }
 0x727   :  { %9728 = vmatmul.msk.f32.gmra.mxu1 %vm827_vm2, %v6487_v7  ;;  %v6376_v43 = vadd.f32 %v12691_v25, %v5588_v24  ;;  %v13120_v7 = vpop.f32.mrf.mxu0  ;;  %v7276_v24 = vld [vmem:[#allocation2 + $0x191] sm:$0xff] }
 0x728   :  { %v8144_v21 = vmax.f32 %v8048_v30, 0.0  ;;  %9824 = vmatmul.msk.f32.gmra.mxu2 %vm827_vm2, %v7274_v2  ;;  %v7275_v30 = vld [vmem:[#allocation2 + $0x189] sm:$0xff] }
 0x72a   :  { %9903 = vmatmul.msk.f32.gmra.mxu3 %vm827_vm2, %v8144_v21  ;;  %v4802_v21 = vadd.f32 %v14706_v53, %v4015_v54 }
 0x72b   :  { %v7667_v50 = vpop.f32.mrf.mxu2  ;;  %9675 = vmatmul.msk.f32.gmra.mxu0 %vm827_vm2, %v5743_v52 }
 0x72c   :  { %v7949_v41 = vadd.f32 %v7667_v50, %v7162_v33  ;;  %v6883_v39 = vpop.f32.mrf.mxu1  ;;  %v14707_v33 = vld [vmem:[#allocation90_spill] sm:$0xff]  ;;  %v14708_v50 = vld [vmem:[#allocation93_spill] sm:$0xff] }
 0x72d   :  { %v7163_v8 = vadd.f32 %v6883_v39, %v6376_v43  ;;  %v4016_v52 = vadd.f32 %v14707_v33, %v3229_v58  ;;  %v13143_v58 = vpop.f32.mrf.mxu3 }
 0x72e   :  { %v8049_v55 = vadd.f32 %v13065_v32, %v7949_v41  ;;  %v5589_v41 = vadd.f32 %v14708_v50, %v4802_v21  ;;  %v7277_v50 = vld [vmem:[#allocation2 + $0x1a9] sm:$0xff] }
 0x72f   :  { %9729 = vmatmul.msk.f32.gmra.mxu1 %vm827_vm2, %v6488_v11  ;;  %v4803_v62 = vadd.f32 %v14711_v34, %v4016_v52  ;;  %v13140_v43 = vpop.f32.mrf.mxu0  ;;  %v6490_v52 = vld [vmem:[#allocation2 + $0x1a8] sm:$0xff] }
 0x730   :  { %v8145_v2 = vmax.f32 %v8049_v55, 0.0  ;;  %9825 = vmatmul.msk.f32.gmra.mxu2 %vm827_vm2, %v7275_v30  ;;  %v14710_v55 = vld [vmem:[#allocation116_spill] sm:$0xff]  ;;  %v6377_v39 = vadd.f32 %v12700_v4, %v5589_v41  ;;  %v14714_v41 = vld [vmem:[#allocation53_spill] sm:$0xff] }
 0x731   :  { %v2266_v54 = vadd.f32 %v14710_v55, %v14709_v29  ;;  %v14715_v29 = vld [vmem:[#allocation95_spill] sm:$0xff]  ;;  %v5746_v34 = vld [vmem:[#allocation2 + $0x4cf] sm:$0xff] }
 0x732   :  { %9904 = vmatmul.msk.f32.gmra.mxu3 %vm827_vm2, %v8145_v2 }
 0x733   :  { %v7670_v14 = vpop.f32.mrf.mxu2  ;;  %9676 = vmatmul.msk.f32.gmra.mxu0 %vm827_vm2, %v5744_v45  ;;  %v3230_v30 = vadd.f32 %v12508_v15, %v2266_v54  ;;  %v14712_v45 = vld [vmem:[#allocation94_spill] sm:$0xff] }
 0x734   :  { %v7950_v18 = vadd.f32 %v7670_v14, %v7163_v8  ;;  %v6886_v25 = vpop.f32.mrf.mxu1  ;;  %v5745_v8 = vld [vmem:[#allocation2 + $0x4c7] sm:$0xff] }
 0x735   :  { %v7164_v2 = vadd.f32 %v6886_v25, %v6377_v39  ;;  %v4017_v14 = vadd.f32 %v14712_v45, %v3230_v30  ;;  %v2269_v25 = vadd.f32 %v12253_v35, %v14714_v41  ;;  %v13159_v35 = vpop.f32.mrf.mxu3  ;;  %v14718_v45 = vld [vmem:[#allocation55_spill] sm:$0xff] }
 0x736   :  { %v8050_v42 = vadd.f32 %v13065_v32, %v7950_v18  ;;  %v14713_v18 = vld [vmem:[#allocation96_spill] sm:$0xff] }
 0x737   :  { %9730 = vmatmul.msk.f32.gmra.mxu1 %vm827_vm2, %v6489_v19  ;;  %v5590_v33 = vadd.f32 %v14713_v18, %v4803_v62  ;;  %v4804_v55 = vadd.f32 %v14715_v29, %v4017_v14  ;;  %v14716_v62 = vld [vmem:[#allocation97_spill] sm:$0xff]  ;;  %v2272_v14 = vadd.f32 %v12265_v31, %v14718_v45  ;;  %v14720_v31 = vld [vmem:[#allocation100_spill] sm:$0xff]  ;;  %v14721_v29 = vld [vmem:[#allocation102_spill] sm:$0xff] }
 0x738   :  { %v8146_v11 = vmax.f32 %v8050_v42, 0.0  ;;  %9826 = vmatmul.msk.f32.gmra.mxu2 %vm827_vm2, %v7276_v24  ;;  %v3231_v24 = vadd.f32 %v12517_v20, %v2269_v25 }
 0x739   :  { %v6378_v42 = vadd.f32 %v12709_v22, %v5590_v33 }
 0x73a   :  { %9905 = vmatmul.msk.f32.gmra.mxu3 %vm827_vm2, %v8146_v11  ;;  %v13157_v11 = vpop.f32.mrf.mxu0 }
 0x73b   :  { %v7673_v53 = vpop.f32.mrf.mxu2  ;;  %9677 = vmatmul.msk.f32.gmra.mxu0 %vm827_vm2, %v5745_v8  ;;  %v6491_v8 = vld [vmem:[#allocation2 + $0x1b0] sm:$0xff] }
 0x73c   :  { %v7951_v21 = vadd.f32 %v7673_v53, %v7164_v2  ;;  %v6889_v4 = vpop.f32.mrf.mxu1  ;;  %v4018_v2 = vadd.f32 %v14716_v62, %v3231_v24  ;;  %v14717_v53 = vld [vmem:[#allocation99_spill] sm:$0xff] }
 0x73d   :  { %v7165_v54 = vadd.f32 %v6889_v4, %v6378_v42  ;;  %v7278_v4 = vld [vmem:[#allocation2 + $0x1b1] sm:$0xff] }
 0x73e   :  { %v8051_v15 = vadd.f32 %v13065_v32, %v7951_v21  ;;  %v5591_v21 = vadd.f32 %v14717_v53, %v4804_v55 }
 0x73f   :  { %9731 = vmatmul.msk.f32.gmra.mxu1 %vm827_vm2, %v6490_v52  ;;  %v14719_v52 = vld [vmem:[#allocation98_spill] sm:$0xff] }
 0x740   :  { %v8147_v19 = vmax.f32 %v8051_v15, 0.0  ;;  %9827 = vmatmul.msk.f32.gmra.mxu2 %vm827_vm2, %v7277_v50  ;;  %v6379_v18 = vadd.f32 %v12718_v47, %v5591_v21  ;;  %v3232_v15 = vadd.f32 %v12526_v0, %v2272_v14  ;;  %v4805_v50 = vadd.f32 %v14719_v52, %v4018_v2  ;;  %v13179_v0 = vpop.f32.mrf.mxu3 }
 0x742   :  { %9906 = vmatmul.msk.f32.gmra.mxu3 %vm827_vm2, %v8147_v19  ;;  %v5747_v19 = vld [vmem:[#allocation2 + $0x4e7] sm:$0xff]  ;;  %v4019_v47 = vadd.f32 %v14720_v31, %v3232_v15  ;;  %v5592_v55 = vadd.f32 %v14721_v29, %v4805_v50  ;;  %v14725_v15 = vld [vmem:[#allocation105_spill] sm:$0xff] }
 0x743   :  { %v7676_v39 = vpop.f32.mrf.mxu2  ;;  %9678 = vmatmul.msk.f32.gmra.mxu0 %vm827_vm2, %v5746_v34  ;;  %v7279_v34 = vld [vmem:[#allocation2 + $0x1c9] sm:$0xff] }
 0x744   :  { %v7952_v30 = vadd.f32 %v7676_v39, %v7165_v54  ;;  %v6892_v22 = vpop.f32.mrf.mxu1  ;;  %v13176_v54 = vpop.f32.mrf.mxu0  ;;  %v6380_v2 = vadd.f32 %v12727_v3, %v5592_v55  ;;  %v14727_v55 = vld [vmem:[#allocation104_spill] sm:$0xff] }
 0x745   :  { %v7166_v41 = vadd.f32 %v6892_v22, %v6379_v18  ;;  %v14722_v22 = vld [vmem:[#allocation57_spill] sm:$0xff] }
 0x746   :  { %v8052_v20 = vadd.f32 %v13065_v32, %v7952_v30  ;;  %v6492_v30 = vld [vmem:[#allocation2 + $0x1c8] sm:$0xff]  ;;  %v2275_v62 = vadd.f32 %v12278_v51, %v14722_v22  ;;  %v14724_v51 = vld [vmem:[#allocation103_spill] sm:$0xff] }
 0x747   :  { %9732 = vmatmul.msk.f32.gmra.mxu1 %vm827_vm2, %v6491_v8  ;;  %v5748_v18 = vld [vmem:[#allocation2 + $0x4ef] sm:$0xff]  ;;  %v5749_v22 = vld [vmem:[#allocation2 + $0x507] sm:$0xff] }
 0x748   :  { %v8148_v33 = vmax.f32 %v8052_v20, 0.0  ;;  %9828 = vmatmul.msk.f32.gmra.mxu2 %vm827_vm2, %v7278_v4  ;;  %v3233_v21 = vadd.f32 %v12535_v40, %v2275_v62  ;;  %v14723_v20 = vld [vmem:[#allocation101_spill] sm:$0xff]  ;;  %v14726_v40 = vld [vmem:[#allocation59_spill] sm:$0xff]  ;;  %v14728_v62 = vld [vmem:[#allocation106_spill] sm:$0xff] }
 0x749   :  { %v4806_v8 = vadd.f32 %v14723_v20, %v4019_v47  ;;  %v13200_v47 = vpop.f32.mrf.mxu3 }
 0x74a   :  { %9907 = vmatmul.msk.f32.gmra.mxu3 %vm827_vm2, %v8148_v33  ;;  %v4020_v3 = vadd.f32 %v14724_v51, %v3233_v21  ;;  %v14731_v51 = vld [vmem:[#allocation107_spill] sm:$0xff] }
 0x74b   :  { %v7679_v25 = vpop.f32.mrf.mxu2  ;;  %9679 = vmatmul.msk.f32.gmra.mxu0 %vm827_vm2, %v5747_v19  ;;  %v5593_v52 = vadd.f32 %v14725_v15, %v4806_v8  ;;  %v6494_v8 = vld [vmem:[#allocation2 + $0x1e8] sm:$0xff] }
 0x74c   :  { %v7953_v42 = vadd.f32 %v7679_v25, %v7166_v41  ;;  %v6895_v24 = vpop.f32.mrf.mxu1  ;;  %v6493_v41 = vld [vmem:[#allocation2 + $0x1d0] sm:$0xff] }
 0x74d   :  { %v7167_v4 = vadd.f32 %v6895_v24, %v6380_v2  ;;  %v7280_v25 = vld [vmem:[#allocation2 + $0x1d1] sm:$0xff]  ;;  %v6381_v19 = vadd.f32 %v12736_v6, %v5593_v52  ;;  %v13196_v24 = vpop.f32.mrf.mxu0 }
 0x74e   :  { %v8053_v39 = vadd.f32 %v13065_v32, %v7953_v42  ;;  %v2278_v42 = vadd.f32 %v12291_v59, %v14726_v40  ;;  %v14732_v40 = vld [vmem:[#allocation109_spill] sm:$0xff] }
 0x74f   :  { %9733 = vmatmul.msk.f32.gmra.mxu1 %vm827_vm2, %v6492_v30 }
 0x750   :  { %v8149_v53 = vmax.f32 %v8053_v39, 0.0  ;;  %9829 = vmatmul.msk.f32.gmra.mxu2 %vm827_vm2, %v7279_v34  ;;  %v3234_v29 = vadd.f32 %v12544_v23, %v2278_v42  ;;  %v4807_v39 = vadd.f32 %v14727_v55, %v4020_v3  ;;  %v14730_v23 = vld [vmem:[#allocation61_spill] sm:$0xff] }
 0x751   :  { %v7282_v55 = vld [vmem:[#allocation2 + $0x1f1] sm:$0xff] }
 0x752   :  { %9908 = vmatmul.msk.f32.gmra.mxu3 %vm827_vm2, %v8149_v53  ;;  %v4021_v2 = vadd.f32 %v14728_v62, %v3234_v29  ;;  %v14729_v53 = vld [vmem:[#allocation108_spill] sm:$0xff]  ;;  %v6495_v29 = vld [vmem:[#allocation2 + $0x1f0] sm:$0xff]  ;;  %v14736_v62 = vld [vmem:[#allocation110_spill] sm:$0xff] }
 0x753   :  { %v7682_v45 = vpop.f32.mrf.mxu2  ;;  %9680 = vmatmul.msk.f32.gmra.mxu0 %vm827_vm2, %v5748_v18  ;;  %v5594_v21 = vadd.f32 %v14729_v53, %v4807_v39  ;;  %v14734_v39 = vld [vmem:[#allocation63_spill] sm:$0xff] }
 0x754   :  { %v7954_v14 = vadd.f32 %v7682_v45, %v7167_v4  ;;  %v6898_v33 = vpop.f32.mrf.mxu1  ;;  %v7281_v4 = vld [vmem:[#allocation2 + $0x1e9] sm:$0xff]  ;;  %v2281_v45 = vadd.f32 %v12304_v27, %v14730_v23  ;;  %v4808_v3 = vadd.f32 %v14731_v51, %v4021_v2 }
 0x755   :  { %v7168_v30 = vadd.f32 %v6898_v33, %v6381_v19  ;;  %v13216_v15 = vpop.f32.mrf.mxu0  ;;  %v14733_v19 = vld [vmem:[#allocation111_spill] sm:$0xff]  ;;  %v6496_v51 = vld [vmem:[#allocation2 + $0x208] sm:$0xff] }
 0x756   :  { %v8054_v50 = vadd.f32 %v13065_v32, %v7954_v14  ;;  %v6382_v14 = vadd.f32 %v12745_v57, %v5594_v21  ;;  %v3235_v33 = vadd.f32 %v12553_v38, %v2281_v45  ;;  %v14737_v45 = vld [vmem:[#allocation112_spill] sm:$0xff] }
 0x757   :  { %9734 = vmatmul.msk.f32.gmra.mxu1 %vm827_vm2, %v6493_v41 }
 0x758   :  { %v8150_v31 = vmax.f32 %v8054_v50, 0.0  ;;  %9830 = vmatmul.msk.f32.gmra.mxu2 %vm827_vm2, %v7280_v25  ;;  %v13219_v50 = vpop.f32.mrf.mxu3  ;;  %v5750_v25 = vld [vmem:[#allocation2 + $0x50f] sm:$0xff]  ;;  %v4022_v42 = vadd.f32 %v14732_v40, %v3235_v33 }
 0x75a   :  { %9909 = vmatmul.msk.f32.gmra.mxu3 %vm827_vm2, %v8150_v31  ;;  %v5595_v31 = vadd.f32 %v14733_v19, %v4808_v3  ;;  %v4809_v2 = vadd.f32 %v14736_v62, %v4022_v42  ;;  %v7283_v3 = vld [vmem:[#allocation2 + $0x209] sm:$0xff] }
 0x75b   :  { %v7685_v34 = vpop.f32.mrf.mxu2  ;;  %9681 = vmatmul.msk.f32.gmra.mxu0 %vm827_vm2, %v5749_v22  ;;  %v14741_v42 = vld [vmem:[#allocation113_spill] sm:$0xff] }
 0x75c   :  { %v7955_v59 = vadd.f32 %v7685_v34, %v7168_v30  ;;  %v6901_v6 = vpop.f32.mrf.mxu1  ;;  %v14735_v30 = vld [vmem:[#allocation135_spill] sm:$0xff]  ;;  %v6497_v62 = vld [vmem:[#allocation2 + $0x210] sm:$0xff] }
 0x75d   :  { %v7169_v52 = vadd.f32 %v6901_v6, %v6382_v14  ;;  %v2284_v34 = vadd.f32 %v14735_v30, %v14734_v39  ;;  %v14742_v30 = vld [vmem:[#allocation115_spill] sm:$0xff] }
 0x75e   :  { %v8055_v20 = vadd.f32 %v13065_v32, %v7955_v59  ;;  %v6383_v59 = vadd.f32 %v12754_v63, %v5595_v31 }
 0x75f   :  { %9735 = vmatmul.msk.f32.gmra.mxu1 %vm827_vm2, %v6494_v8  ;;  %v3236_v6 = vadd.f32 %v12562_v46, %v2284_v34  ;;  %v14743_v34 = vld [vmem:[#allocation118_spill] sm:$0xff] }
 0x760   :  { %v8151_v18 = vmax.f32 %v8055_v20, 0.0  ;;  %9831 = vmatmul.msk.f32.gmra.mxu2 %vm827_vm2, %v7281_v4  ;;  %v13233_v20 = vpop.f32.mrf.mxu0  ;;  %v5751_v4 = vld [vmem:[#allocation2 + $0x527] sm:$0xff]  ;;  %v13235_v23 = vpop.f32.mrf.mxu3 }
 0x761   :  { %v4023_v14 = vadd.f32 %v14737_v45, %v3236_v6 }
 0x762   :  { %9910 = vmatmul.msk.f32.gmra.mxu3 %vm827_vm2, %v8151_v18  ;;  %v14738_v18 = vld [vmem:[#allocation114_spill] sm:$0xff] }
 0x763   :  { %v7688_v41 = vpop.f32.mrf.mxu2  ;;  %9682 = vmatmul.msk.f32.gmra.mxu0 %vm827_vm2, %v5750_v25  ;;  %v5596_v33 = vadd.f32 %v14738_v18, %v4809_v2  ;;  %v4810_v19 = vadd.f32 %v14741_v42, %v4023_v14  ;;  %v7284_v2 = vld [vmem:[#allocation2 + $0x211] sm:$0xff] }
 0x764   :  { %v7956_v27 = vadd.f32 %v7688_v41, %v7169_v52  ;;  %v6904_v57 = vpop.f32.mrf.mxu1  ;;  %v14739_v52 = vld [vmem:[#allocation64_spill] sm:$0xff]  ;;  %v14740_v41 = vld [vmem:[#allocation139_spill] sm:$0xff]  ;;  %v14746_v14 = vld [vmem:[#allocation117_spill] sm:$0xff] }
 0x765   :  { %v7170_v53 = vadd.f32 %v6904_v57, %v6383_v59  ;;  %v6384_v25 = vadd.f32 %v12763_v26, %v5596_v33  ;;  %v5597_v59 = vadd.f32 %v14743_v34, %v4810_v19 }
 0x766   :  { %v8056_v38 = vadd.f32 %v13065_v32, %v7956_v27  ;;  %v2287_v27 = vadd.f32 %v14740_v41, %v14739_v52  ;;  %v6498_v41 = vld [vmem:[#allocation2 + $0x228] sm:$0xff] }
 0x767   :  { %9736 = vmatmul.msk.f32.gmra.mxu1 %vm827_vm2, %v6495_v29 }
 0x768   :  { %v8152_v22 = vmax.f32 %v8056_v38, 0.0  ;;  %9832 = vmatmul.msk.f32.gmra.mxu2 %vm827_vm2, %v7282_v55  ;;  %v3237_v40 = vadd.f32 %v12571_v17, %v2287_v27  ;;  %v5752_v55 = vld [vmem:[#allocation2 + $0x52f] sm:$0xff]  ;;  %v13255_v17 = vpop.f32.mrf.mxu3  ;;  %v14747_v27 = vld [vmem:[#allocation119_spill] sm:$0xff] }
 0x76a   :  { %9911 = vmatmul.msk.f32.gmra.mxu3 %vm827_vm2, %v8152_v22  ;;  %v4024_v26 = vadd.f32 %v14742_v30, %v3237_v40  ;;  %v13252_v22 = vpop.f32.mrf.mxu0  ;;  %v14750_v30 = vld [vmem:[#allocation120_spill] sm:$0xff] }
 0x76b   :  { %v7691_v21 = vpop.f32.mrf.mxu2  ;;  %9683 = vmatmul.msk.f32.gmra.mxu0 %vm827_vm2, %v5751_v4  ;;  %v6385_v4 = vadd.f32 %v12772_v60, %v5597_v59  ;;  %v7285_v60 = vld [vmem:[#allocation2 + $0x229] sm:$0xff] }
 0x76c   :  { %v7957_v8 = vadd.f32 %v7691_v21, %v7170_v53  ;;  %v6907_v63 = vpop.f32.mrf.mxu1  ;;  %v14744_v53 = vld [vmem:[#allocation66_spill] sm:$0xff]  ;;  %v14745_v21 = vld [vmem:[#allocation143_spill] sm:$0xff]  ;;  %v4811_v18 = vadd.f32 %v14746_v14, %v4024_v26 }
 0x76d   :  { %v7171_v31 = vadd.f32 %v6907_v63, %v6384_v25  ;;  %v14754_v14 = vld [vmem:[#allocation26_spill] sm:$0xff] }
 0x76e   :  { %v8057_v46 = vadd.f32 %v13065_v32, %v7957_v8  ;;  %v2290_v8 = vadd.f32 %v14745_v21, %v14744_v53  ;;  %v14751_v53 = vld [vmem:[#allocation122_spill] sm:$0xff] }
 0x76f   :  { %9737 = vmatmul.msk.f32.gmra.mxu1 %vm827_vm2, %v6496_v51 }
 0x770   :  { %v8153_v57 = vmax.f32 %v8057_v46, 0.0  ;;  %9833 = vmatmul.msk.f32.gmra.mxu2 %vm827_vm2, %v7283_v3  ;;  %v3238_v45 = vadd.f32 %v12583_v9, %v2290_v8  ;;  %v5753_v3 = vld [vmem:[#allocation2 + $0x547] sm:$0xff] }
 0x771   :  { %v14749_v9 = vld [vmem:[#allocation67_spill] sm:$0xff]  ;;  %v14752_v8 = vld [vmem:[#allocation124_spill] sm:$0xff] }
 0x772   :  { %9912 = vmatmul.msk.f32.gmra.mxu3 %vm827_vm2, %v8153_v57  ;;  %v4025_v25 = vadd.f32 %v14747_v27, %v3238_v45  ;;  %v14748_v57 = vld [vmem:[#allocation121_spill] sm:$0xff]  ;;  %v2293_v19 = vadd.f32 %v12356_v36, %v14749_v9 }
 0x773   :  { %v7694_v38 = vpop.f32.mrf.mxu2  ;;  %9684 = vmatmul.msk.f32.gmra.mxu0 %vm827_vm2, %v5752_v55  ;;  %v5598_v40 = vadd.f32 %v14748_v57, %v4811_v18  ;;  %v13276_v55 = vpop.f32.mrf.mxu3  ;;  %v5755_v57 = vld [vmem:[#allocation2 + $0x567] sm:$0xff] }
 0x774   :  { %v7958_v29 = vadd.f32 %v7694_v38, %v7171_v31  ;;  %v6910_v39 = vpop.f32.mrf.mxu1  ;;  %v13272_v38 = vpop.f32.mrf.mxu0  ;;  %v4812_v26 = vadd.f32 %v14750_v30, %v4025_v25  ;;  %v7287_v30 = vld [vmem:[#allocation2 + $0x289] sm:$0xff] }
 0x775   :  { %v7172_v33 = vadd.f32 %v6910_v39, %v6385_v4  ;;  %v6386_v31 = vadd.f32 %v12781_v5, %v5598_v40  ;;  %v3239_v39 = vadd.f32 %v12592_v10, %v2293_v19  ;;  %v14753_v10 = vld [vmem:[#allocation71_spill] sm:$0xff] }
 0x776   :  { %v8058_v6 = vadd.f32 %v13065_v32, %v7958_v29  ;;  %v5599_v4 = vadd.f32 %v14752_v8, %v4812_v26  ;;  %v2296_v45 = vadd.f32 %v12366_v49, %v14753_v10  ;;  %v14758_v19 = vld [vmem:[#allocation127_spill] sm:$0xff] }
 0x777   :  { %9738 = vmatmul.msk.f32.gmra.mxu1 %vm827_vm2, %v6497_v62  ;;  %v6499_v62 = vld [vmem:[#allocation2 + $0x230] sm:$0xff]  ;;  %v4026_v21 = vadd.f32 %v14751_v53, %v3239_v39  ;;  %v6500_v39 = vld [vmem:[#allocation2 + $0x288] sm:$0xff]  ;;  %v14759_v26 = vld [vmem:[#allocation75_spill] sm:$0xff] }
 0x778   :  { %v8154_v63 = vmax.f32 %v8058_v6, 0.0  ;;  %9834 = vmatmul.msk.f32.gmra.mxu2 %vm827_vm2, %v7284_v2  ;;  %v5754_v6 = vld [vmem:[#allocation2 + $0x54f] sm:$0xff]  ;;  %v6387_v18 = vadd.f32 %v14754_v14, %v5599_v4  ;;  %v14763_v53 = vld [vmem:[#allocation126_spill] sm:$0xff] }
 0x779   :  { %v7286_v2 = vld [vmem:[#allocation2 + $0x231] sm:$0xff] }
 0x77a   :  { %9913 = vmatmul.msk.f32.gmra.mxu3 %vm827_vm2, %v8154_v63 }
 0x77b   :  { %v7697_v46 = vpop.f32.mrf.mxu2  ;;  %9685 = vmatmul.msk.f32.gmra.mxu0 %vm827_vm2, %v5753_v3  ;;  %v14756_v3 = vld [vmem:[#allocation123_spill] sm:$0xff]  ;;  %v13295_v27 = vpop.f32.mrf.mxu3 }
 0x77c   :  { %v7959_v51 = vadd.f32 %v7697_v46, %v7172_v33  ;;  %v6913_v52 = vpop.f32.mrf.mxu1  ;;  %v14755_v46 = vld [vmem:[#allocation5_spill] sm:$0xff] }
 0x77d   :  { %v7173_v34 = vadd.f32 %v6913_v52, %v6386_v31  ;;  %v4813_v52 = vadd.f32 %v14756_v3, %v4026_v21 }
 0x77e   :  { %v8059_v42 = vadd.f32 %v13065_v32, %v7959_v51  ;;  %v3240_v51 = vadd.f32 %v14755_v46, %v2296_v45  ;;  %v5756_v45 = vld [vmem:[#allocation2 + $0x56f] sm:$0xff] }
 0x77f   :  { %9739 = vmatmul.msk.f32.gmra.mxu1 %vm827_vm2, %v6498_v41  ;;  %v13292_v41 = vpop.f32.mrf.mxu0  ;;  %v5600_v31 = vadd.f32 %v14758_v19, %v4813_v52 }
 0x780   :  { %v8155_v29 = vmax.f32 %v8059_v42, 0.0  ;;  %9835 = vmatmul.msk.f32.gmra.mxu2 %vm827_vm2, %v7285_v60  ;;  %v14757_v42 = vld [vmem:[#allocation125_spill] sm:$0xff] }
 0x781   :  { %v4027_v9 = vadd.f32 %v14757_v42, %v3240_v51  ;;  %v14766_v51 = vld [vmem:[#allocation130_spill] sm:$0xff]  ;;  %v14769_v42 = vld [vmem:[#allocation28_spill] sm:$0xff] }
 0x782   :  { %9914 = vmatmul.msk.f32.gmra.mxu3 %vm827_vm2, %v8155_v29 }
 0x783   :  { %v7700_v59 = vpop.f32.mrf.mxu2  ;;  %9686 = vmatmul.msk.f32.gmra.mxu0 %vm827_vm2, %v5754_v6  ;;  %v4814_v21 = vadd.f32 %v14763_v53, %v4027_v9  ;;  %v13311_v14 = vpop.f32.mrf.mxu3 }
 0x784   :  { %v7960_v36 = vadd.f32 %v7700_v59, %v7173_v34  ;;  %v6916_v5 = vpop.f32.mrf.mxu1  ;;  %v14760_v34 = vld [vmem:[#allocation148_spill] sm:$0xff]  ;;  %14764 = vst [vmem:[#allocation68_spill] sm:$0xff] %v13311_v14 }
 0x785   :  { %v7174_v60 = vadd.f32 %v6916_v5, %v6387_v18  ;;  %v2299_v59 = vadd.f32 %v14760_v34, %v14759_v26  ;;  %v5601_v3 = vadd.f32 %v14766_v51, %v4814_v21  ;;  %v13328_v34 = vld [vmem:[%s14371_s6] ss:$0 sm:$0xff]  ;;  %v14773_v21 = vld [vmem:[#allocation133_spill] sm:$0xff]  ;;  %v14775_v51 = vld [vmem:[#allocation152_spill] sm:$0xff] }
 0x786   :  { %v8060_v63 = vadd.f32 %v13065_v32, %v7960_v36  ;;  %v14761_v36 = vld [vmem:[#allocation27_spill] sm:$0xff] }
 0x787   :  { %9740 = vmatmul.msk.f32.gmra.mxu1 %vm827_vm2, %v6499_v62  ;;  %v6388_v6 = vadd.f32 %v14761_v36, %v5600_v31  ;;  %v14762_v62 = vld [vmem:[#allocation6_spill] sm:$0xff]  ;;  %v6389_v9 = vadd.f32 %v14769_v42, %v5601_v3  ;;  %v14770_v31 = vld [vmem:[#allocation7_spill] sm:$0xff] }
 0x788   :  { %v8156_v33 = vmax.f32 %v8060_v63, 0.0  ;;  %9836 = vmatmul.msk.f32.gmra.mxu2 %vm827_vm2, %v7286_v2  ;;  %v3241_v2 = vadd.f32 %v14762_v62, %v2299_v59  ;;  %v13309_v63 = vpop.f32.mrf.mxu0 }
 0x78a   :  { %9915 = vmatmul.msk.f32.gmra.mxu3 %vm827_vm2, %v8156_v33  ;;  %v14765_v33 = vld [vmem:[#allocation128_spill] sm:$0xff] }
 0x78b   :  { %v7703_v25 = vpop.f32.mrf.mxu2  ;;  %9687 = vmatmul.msk.f32.gmra.mxu0 %vm827_vm2, %v5755_v57  ;;  %v4028_v46 = vadd.f32 %v14765_v33, %v3241_v2  ;;  %v14768_v57 = vld [vmem:[#allocation150_spill] sm:$0xff]  ;;  %v14772_v2 = vld [vmem:[#allocation131_spill] sm:$0xff]  ;;  %v7289_v33 = vld [vmem:[#allocation2 + $0x2a9] sm:$0xff] }
 0x78c   :  { %v7961_v49 = vadd.f32 %v7703_v25, %v7174_v60  ;;  %v6919_v40 = vpop.f32.mrf.mxu1  ;;  %v6501_v60 = vld [vmem:[#allocation2 + $0x290] sm:$0xff] }
 0x78d   :  { %v7175_v8 = vadd.f32 %v6919_v40, %v6388_v6  ;;  %v7288_v25 = vld [vmem:[#allocation2 + $0x291] sm:$0xff]  ;;  %v5757_v6 = vld [vmem:[#allocation2 + $0x587] sm:$0xff] }
 0x78e   :  { %v8061_v29 = vadd.f32 %v13065_v32, %v7961_v49  ;;  %v14767_v49 = vld [vmem:[#allocation79_spill] sm:$0xff] }
 0x78f   :  { %9741 = vmatmul.msk.f32.gmra.mxu1 %vm827_vm2, %v6500_v39  ;;  %v2302_v40 = vadd.f32 %v14768_v57, %v14767_v49  ;;  %v14771_v39 = vld [vmem:[#allocation129_spill] sm:$0xff]  ;;  %v14777_v49 = vld [vmem:[#allocation8_spill] sm:$0xff] }
 0x790   :  { %v8157_v5 = vmax.f32 %v8061_v29, 0.0  ;;  %9837 = vmatmul.msk.f32.gmra.mxu2 %vm827_vm2, %v7287_v30  ;;  %v4815_v30 = vadd.f32 %v14771_v39, %v4028_v46  ;;  %v14774_v46 = vld [vmem:[#allocation83_spill] sm:$0xff] }
 0x791   :  { %v3242_v29 = vadd.f32 %v14770_v31, %v2302_v40  ;;  %v2305_v3 = vadd.f32 %v14775_v51, %v14774_v46  ;;  %v14778_v40 = vld [vmem:[#allocation132_spill] sm:$0xff]  ;;  %v14783_v46 = vld [vmem:[#allocation9_spill] sm:$0xff] }
 0x792   :  { %9916 = vmatmul.msk.f32.gmra.mxu3 %vm827_vm2, %v8157_v5 }
 0x793   :  { %v7706_v4 = vpop.f32.mrf.mxu2  ;;  %9688 = vmatmul.msk.f32.gmra.mxu0 %vm827_vm2, %v5756_v45  ;;  %v4029_v53 = vadd.f32 %v14772_v2, %v3242_v29  ;;  %v3243_v57 = vadd.f32 %v14777_v49, %v2305_v3  ;;  %v5758_v29 = vld [vmem:[#allocation2 + $0x58f] sm:$0xff]  ;;  %v5759_v49 = vld [vmem:[#allocation2 + $0x5a7] sm:$0xff] }
 0x794   :  { %v7962_v10 = vadd.f32 %v7706_v4, %v7175_v8  ;;  %v6922_v18 = vpop.f32.mrf.mxu1  ;;  %v5602_v8 = vadd.f32 %v14773_v21, %v4815_v30  ;;  %v13333_v4 = vpop.f32.mrf.mxu0  ;;  %v6503_v21 = vld [vmem:[#allocation2 + $0x2b0] sm:$0xff]  ;;  %v14784_v3 = vld [vmem:[#allocation136_spill] sm:$0xff] }
 0x795   :  { %v7176_v26 = vadd.f32 %v6922_v18, %v6389_v9  ;;  %v6502_v18 = vld [vmem:[#allocation2 + $0x2a8] sm:$0xff]  ;;  %v4816_v42 = vadd.f32 %v14778_v40, %v4029_v53  ;;  %v7290_v53 = vld [vmem:[#allocation2 + $0x2b1] sm:$0xff] }
 0x796   :  { %v8062_v52 = vadd.f32 %v13065_v32, %v7962_v10 }
 0x797   :  { %9742 = vmatmul.msk.f32.gmra.mxu1 %vm827_vm2, %v6501_v60 }
 0x798   :  { %v8158_v19 = vmax.f32 %v8062_v52, 0.0  ;;  %9838 = vmatmul.msk.f32.gmra.mxu2 %vm827_vm2, %v7288_v25  ;;  %v14776_v52 = vld [vmem:[#allocation29_spill] sm:$0xff] }
 0x799   :  { %v6390_v60 = vadd.f32 %v14776_v52, %v5602_v8  ;;  %v14782_v8 = vld [vmem:[#allocation154_spill] sm:$0xff] }
 0x79a   :  { %9917 = vmatmul.msk.f32.gmra.mxu3 %vm827_vm2, %v8158_v19 }
 0x79b   :  { %v7709_v59 = vpop.f32.mrf.mxu2  ;;  %9689 = vmatmul.msk.f32.gmra.mxu0 %vm827_vm2, %v5757_v6 }
 0x79c   :  { %v7963_v36 = vadd.f32 %v7709_v59, %v7176_v26  ;;  %v6925_v5 = vpop.f32.mrf.mxu1  ;;  %v14779_v26 = vld [vmem:[#allocation134_spill] sm:$0xff] }
 0x79d   :  { %v8549_v62 = vpop.f32.mrf.mxu3  ;;  %v7177_v9 = vadd.f32 %v6925_v5, %v6390_v60  ;;  %v4030_v59 = vadd.f32 %v14779_v26, %v3243_v57  ;;  %v14781_v5 = vld [vmem:[#allocation87_spill] sm:$0xff]  ;;  %v6504_v26 = vld [vmem:[#allocation2 + $0x2c8] sm:$0xff] }
 0x79e   :  { %v8063_v10 = vadd.f32 %v13065_v32, %v7963_v36  ;;  %v8550_v45 = vadd.f32 %v13328_v34, %v8549_v62  ;;  %v14780_v36 = vld [vmem:[#allocation137_spill] sm:$0xff] }
 0x79f   :  { %9743 = vmatmul.msk.f32.gmra.mxu1 %vm827_vm2, %v6502_v18  ;;  %v5603_v6 = vadd.f32 %v14780_v36, %v4816_v42  ;;  %v13357_v18 = vpop.f32.mrf.mxu0  ;;  %v4817_v52 = vadd.f32 %v14784_v3, %v4030_v59  ;;  %v14785_v42 = vld [vmem:[#allocation138_spill] sm:$0xff]  ;;  %v7291_v59 = vld [vmem:[#allocation2 + $0x2c9] sm:$0xff] }
 0x7a0   :  { %v8159_v25 = vmax.f32 %v8063_v10, 0.0  ;;  %8837 = vst.msk [vmem:[%s14372_s8] sm:$0xff] %vm827_vm2, %v8550_v45  ;;  %9839 = vmatmul.msk.f32.gmra.mxu2 %vm827_vm2, %v7289_v33  ;;  %v2308_v10 = vadd.f32 %v14782_v8, %v14781_v5  ;;  %v14788_v36 = vld [vmem:[#allocation156_spill] sm:$0xff] }
 0x7a1   :  { %v6391_v45 = vadd.f32 %v12826_v13, %v5603_v6  ;;  %v14791_v8 = vld [vmem:[#allocation140_spill] sm:$0xff] }
 0x7a2   :  { %9918 = vmatmul.msk.f32.gmra.mxu3 %vm827_vm2, %v8159_v25  ;;  %v3244_v51 = vadd.f32 %v14783_v46, %v2308_v10  ;;  %v5760_v3 = vld [vmem:[#allocation2 + $0x5af] sm:$0xff] }
 0x7a3   :  { %v7712_v19 = vpop.f32.mrf.mxu2  ;;  %9690 = vmatmul.msk.f32.gmra.mxu0 %vm827_vm2, %v5758_v29 }
 0x7a4   :  { %v7964_v31 = vadd.f32 %v7712_v19, %v7177_v9  ;;  %v6928_v39 = vpop.f32.mrf.mxu1  ;;  %v4031_v9 = vadd.f32 %v14785_v42, %v3244_v51  ;;  %v14786_v19 = vld [vmem:[#allocation141_spill] sm:$0xff] }
 0x7a5   :  { %v8552_v30 = vpop.f32.mrf.mxu3  ;;  %v7178_v60 = vadd.f32 %v6928_v39, %v6391_v45  ;;  %v14787_v39 = vld [vmem:[#allocation91_spill] sm:$0xff] }
 0x7a6   :  { %v8064_v62 = vadd.f32 %v13065_v32, %v7964_v31  ;;  %v8553_v2 = vadd.f32 %v13328_v34, %v8552_v30  ;;  %v5604_v31 = vadd.f32 %v14786_v19, %v4817_v52  ;;  %v2311_v6 = vadd.f32 %v14788_v36, %v14787_v39  ;;  %v6505_v19 = vld [vmem:[#allocation2 + $0x2d0] sm:$0xff] }
 0x7a7   :  { %9744 = vmatmul.msk.f32.gmra.mxu1 %vm827_vm2, %v6503_v21  ;;  %v4818_v10 = vadd.f32 %v14791_v8, %v4031_v9  ;;  %v13384_v45 = vpop.f32.mrf.mxu0 }
 0x7a8   :  { %v8160_v33 = vmax.f32 %v8064_v62, 0.0  ;;  %8838 = vst.msk [vmem:[%s14372_s8 + $0x8] sm:$0xff] %vm827_vm2, %v8553_v2  ;;  %9840 = vmatmul.msk.f32.gmra.mxu2 %vm827_vm2, %v7290_v53  ;;  %v14789_v62 = vld [vmem:[#allocation31_spill] sm:$0xff]  ;;  %v14790_v53 = vld [vmem:[#allocation10_spill] sm:$0xff] }
 0x7a9   :  { %v6392_v2 = vadd.f32 %v14789_v62, %v5604_v31  ;;  %v3245_v5 = vadd.f32 %v14790_v53, %v2311_v6  ;;  %v7292_v31 = vld [vmem:[#allocation2 + $0x2d1] sm:$0xff] }
 0x7aa   :  { %9919 = vmatmul.msk.f32.gmra.mxu3 %vm827_vm2, %v8160_v33 }
 0x7ab   :  { %v7715_v13 = vpop.f32.mrf.mxu2  ;;  %9691 = vmatmul.msk.f32.gmra.mxu0 %vm827_vm2, %v5759_v49  ;;  %v14793_v49 = vld [vmem:[#allocation145_spill] sm:$0xff] }
 0x7ac   :  { %v7965_v25 = vadd.f32 %v7715_v13, %v7178_v60  ;;  %v6931_v57 = vpop.f32.mrf.mxu1  ;;  %v14792_v13 = vld [vmem:[#allocation142_spill] sm:$0xff] }
 0x7ad   :  { %v8555_v40 = vpop.f32.mrf.mxu3  ;;  %v7179_v33 = vadd.f32 %v6931_v57, %v6392_v2  ;;  %v14794_v57 = vld [vmem:[#allocation32_spill] sm:$0xff] }
 0x7ae   :  { %v8065_v29 = vadd.f32 %v13065_v32, %v7965_v25  ;;  %v8556_v30 = vadd.f32 %v13328_v34, %v8555_v40  ;;  %v4032_v25 = vadd.f32 %v14792_v13, %v3245_v5  ;;  %v5605_v40 = vadd.f32 %v14793_v49, %v4818_v10  ;;  %v5761_v2 = vld [vmem:[#allocation2 + $0x5c7] sm:$0xff]  ;;  %v14796_v5 = vld [vmem:[#allocation146_spill] sm:$0xff] }
 0x7af   :  { %9745 = vmatmul.msk.f32.gmra.mxu1 %vm827_vm2, %v6504_v26  ;;  %v14795_v26 = vld [vmem:[#allocation144_spill] sm:$0xff]  ;;  %v13401_v6 = vpop.f32.mrf.mxu0 }
 0x7b0   :  { %v8161_v21 = vmax.f32 %v8065_v29, 0.0  ;;  %8839 = vst.msk [vmem:[%s14372_s8 + $0x10] sm:$0xff] %vm827_vm2, %v8556_v30  ;;  %9841 = vmatmul.msk.f32.gmra.mxu2 %vm827_vm2, %v7291_v59  ;;  %v6393_v29 = vadd.f32 %v14794_v57, %v5605_v40  ;;  %v4819_v59 = vadd.f32 %v14795_v26, %v4032_v25  ;;  %v5762_v40 = vld [vmem:[#allocation2 + $0x5cf] sm:$0xff]  ;;  %v14798_v26 = vld [vmem:[#allocation147_spill] sm:$0xff] }
 0x7b2   :  { %9920 = vmatmul.msk.f32.gmra.mxu3 %vm827_vm2, %v8161_v21  ;;  %v5606_v8 = vadd.f32 %v14796_v5, %v4819_v59  ;;  %v14799_v59 = vld [vmem:[#allocation34_spill] sm:$0xff] }
 0x7b3   :  { %v7718_v46 = vpop.f32.mrf.mxu2  ;;  %9692 = vmatmul.msk.f32.gmra.mxu0 %vm827_vm2, %v5760_v3  ;;  %v14797_v3 = vld [vmem:[#allocation33_spill] sm:$0xff] }
 0x7b4   :  { %v7966_v51 = vadd.f32 %v7718_v46, %v7179_v33  ;;  %v6934_v52 = vpop.f32.mrf.mxu1  ;;  %v6506_v46 = vld [vmem:[#allocation2 + $0x2e8] sm:$0xff] }
 0x7b5   :  { %v8558_v60 = vpop.f32.mrf.mxu3  ;;  %v7180_v39 = vadd.f32 %v6934_v52, %v6393_v29  ;;  %v6394_v52 = vadd.f32 %v14797_v3, %v5606_v8  ;;  %v6507_v29 = vld [vmem:[#allocation2 + $0x2f0] sm:$0xff] }
 0x7b6   :  { %v8066_v42 = vadd.f32 %v13065_v32, %v7966_v51  ;;  %v8559_v9 = vadd.f32 %v13328_v34, %v8558_v60  ;;  %v7293_v51 = vld [vmem:[#allocation2 + $0x2e9] sm:$0xff] }
 0x7b7   :  { %9746 = vmatmul.msk.f32.gmra.mxu1 %vm827_vm2, %v6505_v19  ;;  %v13416_v19 = vpop.f32.mrf.mxu0  ;;  %v14800_v3 = vld [vmem:[#allocation149_spill] sm:$0xff] }
 0x7b8   :  { %v8162_v30 = vmax.f32 %v8066_v42, 0.0  ;;  %8840 = vst.msk [vmem:[%s14372_s8 + $0x18] sm:$0xff] %vm827_vm2, %v8559_v9  ;;  %9842 = vmatmul.msk.f32.gmra.mxu2 %vm827_vm2, %v7292_v31 }
 0x7ba   :  { %9921 = vmatmul.msk.f32.gmra.mxu3 %vm827_vm2, %v8162_v30  ;;  %v7294_v30 = vld [vmem:[#allocation2 + $0x2f1] sm:$0xff] }
 0x7bb   :  { %v7721_v36 = vpop.f32.mrf.mxu2  ;;  %9693 = vmatmul.msk.f32.gmra.mxu0 %vm827_vm2, %v5761_v2 }
 0x7bc   :  { %v7967_v62 = vadd.f32 %v7721_v36, %v7180_v39  ;;  %v6937_v21 = vpop.f32.mrf.mxu1  ;;  %v6395_v39 = vadd.f32 %v14799_v59, %v14798_v26  ;;  %v6509_v26 = vld [vmem:[#allocation2 + $0x310] sm:$0xff] }
 0x7bd   :  { %v8561_v53 = vpop.f32.mrf.mxu3  ;;  %v7181_v13 = vadd.f32 %v6937_v21, %v6394_v52  ;;  %v14801_v52 = vld [vmem:[#allocation35_spill] sm:$0xff]  ;;  %v7296_v59 = vld [vmem:[#allocation2 + $0x311] sm:$0xff] }
 0x7be   :  { %v8067_v10 = vadd.f32 %v13065_v32, %v7967_v62  ;;  %v8562_v33 = vadd.f32 %v13328_v34, %v8561_v53  ;;  %v5763_v53 = vld [vmem:[#allocation2 + $0x5e7] sm:$0xff] }
 0x7bf   :  { %9747 = vmatmul.msk.f32.gmra.mxu1 %vm827_vm2, %v6506_v46  ;;  %v6508_v46 = vld [vmem:[#allocation2 + $0x308] sm:$0xff] }
 0x7c0   :  { %v8163_v60 = vmax.f32 %v8067_v10, 0.0  ;;  %8841 = vst.msk [vmem:[%s14372_s8 + $0x20] sm:$0xff] %vm827_vm2, %v8562_v33  ;;  %9843 = vmatmul.msk.f32.gmra.mxu2 %vm827_vm2, %v7293_v51  ;;  %v7295_v51 = vld [vmem:[#allocation2 + $0x309] sm:$0xff] }
 0x7c2   :  { %9922 = vmatmul.msk.f32.gmra.mxu3 %vm827_vm2, %v8163_v60  ;;  %v6396_v60 = vadd.f32 %v14801_v52, %v14800_v3  ;;  %v6510_v52 = vld [vmem:[#allocation2 + $0x328] sm:$0xff] }
 0x7c3   :  { %v7724_v25 = vpop.f32.mrf.mxu2  ;;  %9694 = vmatmul.msk.f32.gmra.mxu0 %vm827_vm2, %v5762_v40 }
 0x7c4   :  { %v7968_v49 = vadd.f32 %v7724_v25, %v7181_v13  ;;  %v6940_v42 = vpop.f32.mrf.mxu1  ;;  %v13434_v13 = vpop.f32.mrf.mxu0 }
 0x7c5   :  { %v8564_v9 = vpop.f32.mrf.mxu3  ;;  %v7182_v62 = vadd.f32 %v6940_v42, %v6395_v39  ;;  %v14802_v39 = vld [vmem:[#allocation151_spill] sm:$0xff] }
 0x7c6   :  { %v8068_v31 = vadd.f32 %v13065_v32, %v7968_v49  ;;  %v8565_v57 = vadd.f32 %v13328_v34, %v8564_v9  ;;  %v5764_v9 = vld [vmem:[#allocation2 + $0x5ef] sm:$0xff] }
 0x7c7   :  { %9748 = vmatmul.msk.f32.gmra.mxu1 %vm827_vm2, %v6507_v29 }
 0x7c8   :  { %v8164_v36 = vmax.f32 %v8068_v31, 0.0  ;;  %8842 = vst.msk [vmem:[%s14372_s8 + $0x28] sm:$0xff] %vm827_vm2, %v8565_v57  ;;  %9844 = vmatmul.msk.f32.gmra.mxu2 %vm827_vm2, %v7294_v30 }
 0x7ca   :  { %9923 = vmatmul.msk.f32.gmra.mxu3 %vm827_vm2, %v8164_v36  ;;  %v14803_v36 = vld [vmem:[#allocation36_spill] sm:$0xff] }
 0x7cb   :  { %v7727_v2 = vpop.f32.mrf.mxu2  ;;  %9695 = vmatmul.msk.f32.gmra.mxu0 %vm827_vm2, %v5763_v53 }
 0x7cc   :  { %v7969_v21 = vadd.f32 %v7727_v2, %v7182_v62  ;;  %v6943_v5 = vpop.f32.mrf.mxu1  ;;  %v6397_v62 = vadd.f32 %v14803_v36, %v14802_v39  ;;  %v6511_v39 = vld [vmem:[#allocation2 + $0x330] sm:$0xff] }
 0x7cd   :  { %v8567_v8 = vpop.f32.mrf.mxu3  ;;  %v7183_v49 = vadd.f32 %v6943_v5, %v6396_v60  ;;  %v7297_v60 = vld [vmem:[#allocation2 + $0x329] sm:$0xff]  ;;  %v7298_v36 = vld [vmem:[#allocation2 + $0x331] sm:$0xff] }
 0x7ce   :  { %v8069_v10 = vadd.f32 %v13065_v32, %v7969_v21  ;;  %v8568_v33 = vadd.f32 %v13328_v34, %v8567_v8  ;;  %v13454_v21 = vpop.f32.mrf.mxu0  ;;  %v5765_v8 = vld [vmem:[#allocation2 + $0x607] sm:$0xff] }
 0x7cf   :  { %9749 = vmatmul.msk.f32.gmra.mxu1 %vm827_vm2, %v6508_v46  ;;  %v13461_v46 = vld [vmem:[%s14370_s4] ss:$0 sm:$0xff] }
 0x7d0   :  { %v8165_v25 = vmax.f32 %v8069_v10, 0.0  ;;  %8843 = vst.msk [vmem:[%s14372_s8 + $0x30] sm:$0xff] %vm827_vm2, %v8568_v33  ;;  %9845 = vmatmul.msk.f32.gmra.mxu2 %vm827_vm2, %v7295_v51 }
 0x7d2   :  { %9924 = vmatmul.msk.f32.gmra.mxu3 %vm827_vm2, %v8165_v25  ;;  %v14804_v25 = vld [vmem:[#allocation153_spill] sm:$0xff] }
 0x7d3   :  { %v7730_v40 = vpop.f32.mrf.mxu2  ;;  %9696 = vmatmul.msk.f32.gmra.mxu0 %vm827_vm2, %v5764_v9 }
 0x7d4   :  { %v7970_v42 = vadd.f32 %v7730_v40, %v7183_v49  ;;  %v6946_v31 = vpop.f32.mrf.mxu1  ;;  %v6398_v49 = vadd.f32 %v12891_v56, %v14804_v25 }
 0x7d5   :  { %v8570_v57 = vpop.f32.mrf.mxu3 }
 0x7d6   :  { %v8070_v29 = vadd.f32 %v13065_v32, %v7970_v42  ;;  %v8571_v30 = vadd.f32 %v13328_v34, %v8570_v57  ;;  %v7184_v32 = vadd.f32 %v6946_v31, %v6397_v62  ;;  %v13474_v31 = vpop.f32.mrf.mxu0  ;;  %v14805_v62 = vld [vmem:[#allocation155_spill] sm:$0xff] }
 0x7d7   :  { %9750 = vmatmul.msk.f32.gmra.mxu1 %vm827_vm2, %v6509_v26 }
 0x7d8   :  { %v8166_v2 = vmax.f32 %v8070_v29, 0.0  ;;  %8844 = vst.msk [vmem:[%s14372_s8 + $0x38] sm:$0xff] %vm827_vm2, %v8571_v30  ;;  %9846 = vmatmul.msk.f32.gmra.mxu2 %vm827_vm2, %v7296_v59  ;;  %v5766_v29 = vld [vmem:[#allocation2 + $0x60f] sm:$0xff] }
 0x7da   :  { %9925 = vmatmul.msk.f32.gmra.mxu3 %vm827_vm2, %v8166_v2  ;;  %v14806_v2 = vld [vmem:[#allocation40_spill] sm:$0xff] }
 0x7db   :  { %v7733_v53 = vpop.f32.mrf.mxu2  ;;  %9697 = vmatmul.msk.f32.gmra.mxu0 %vm827_vm2, %v5765_v8 }
 0x7dc   :  { %v7971_v5 = vadd.f32 %v7733_v53, %v7184_v32  ;;  %v6949_v10 = vpop.f32.mrf.mxu1  ;;  %v6399_v32 = vadd.f32 %v14806_v2, %v14805_v62 }
 0x7dd   :  { %v8573_v33 = vpop.f32.mrf.mxu3  ;;  %v7185_v42 = vadd.f32 %v6949_v10, %v6398_v49  ;;  %v6512_v49 = vld [vmem:[#allocation2 + $0x348] sm:$0xff] }
 0x7de   :  { %v8071_v51 = vadd.f32 %v13461_v46, %v7971_v5  ;;  %v8574_v3 = vadd.f32 %v13328_v34, %v8573_v33  ;;  %v5767_v33 = vld [vmem:[#allocation2 + $0x627] sm:$0xff] }
 0x7df   :  { %9751 = vmatmul.msk.f32.gmra.mxu1 %vm827_vm2, %v6510_v52  ;;  %v13489_v52 = vpop.f32.mrf.mxu0 }
 0x7e0   :  { %v8167_v40 = vmax.f32 %v8071_v51, 0.0  ;;  %8845 = vst.msk [vmem:[%s14372_s8 + $0x40] sm:$0xff] %vm827_vm2, %v8574_v3  ;;  %9847 = vmatmul.msk.f32.gmra.mxu2 %vm827_vm2, %v7297_v60 }
 0x7e2   :  { %9926 = vmatmul.msk.f32.gmra.mxu3 %vm827_vm2, %v8167_v40  ;;  %v7299_v40 = vld [vmem:[#allocation2 + $0x349] sm:$0xff] }
 0x7e3   :  { %v7736_v9 = vpop.f32.mrf.mxu2  ;;  %9698 = vmatmul.msk.f32.gmra.mxu0 %vm827_vm2, %v5766_v29 }
 0x7e4   :  { %v7972_v57 = vadd.f32 %v7736_v9, %v7185_v42  ;;  %v6952_v30 = vpop.f32.mrf.mxu1  ;;  %v14807_v42 = vld [vmem:[#allocation157_spill] sm:$0xff]  ;;  %v14808_v9 = vld [vmem:[#allocation42_spill] sm:$0xff] }
 0x7e5   :  { %v8576_v56 = vpop.f32.mrf.mxu3  ;;  %v7186_v5 = vadd.f32 %v6952_v30, %v6399_v32  ;;  %v6513_v32 = vld [vmem:[#allocation2 + $0x350] sm:$0xff] }
 0x7e6   :  { %v8072_v26 = vadd.f32 %v13461_v46, %v7972_v57  ;;  %v8577_v59 = vadd.f32 %v13328_v34, %v8576_v56  ;;  %v6400_v57 = vadd.f32 %v14808_v9, %v14807_v42 }
 0x7e7   :  { %9752 = vmatmul.msk.f32.gmra.mxu1 %vm827_vm2, %v6511_v39 }
 0x7e8   :  { %v8168_v53 = vmax.f32 %v8072_v26, 0.0  ;;  %8846 = vst.msk [vmem:[%s14372_s8 + $0x48] sm:$0xff] %vm827_vm2, %v8577_v59  ;;  %9848 = vmatmul.msk.f32.gmra.mxu2 %vm827_vm2, %v7298_v36  ;;  %v5768_v59 = vld [vmem:[#allocation2 + $0x62f] sm:$0xff] }
 0x7ea   :  { %9927 = vmatmul.msk.f32.gmra.mxu3 %vm827_vm2, %v8168_v53  ;;  %v7300_v53 = vld [vmem:[#allocation2 + $0x351] sm:$0xff] }
 0x7eb   :  { %v7739_v8 = vpop.f32.mrf.mxu2  ;;  %9699 = vmatmul.msk.f32.gmra.mxu0 %vm827_vm2, %v5767_v33  ;;  %v13507_v33 = vpop.f32.mrf.mxu0 }
 0x7ec   :  { %v7973_v10 = vadd.f32 %v7739_v8, %v7186_v5  ;;  %v6955_v51 = vpop.f32.mrf.mxu1  ;;  %v14809_v5 = vld [vmem:[#allocation158_spill] sm:$0xff]  ;;  %v14810_v8 = vld [vmem:[#allocation44_spill] sm:$0xff] }
 0x7ed   :  { %v8579_v3 = vpop.f32.mrf.mxu3  ;;  %v7187_v30 = vadd.f32 %v6955_v51, %v6400_v57 }
 0x7ee   :  { %v8073_v60 = vadd.f32 %v13461_v46, %v7973_v10  ;;  %v8580_v25 = vadd.f32 %v13328_v34, %v8579_v3  ;;  %v6401_v10 = vadd.f32 %v14810_v8, %v14809_v5 }
 0x7ef   :  { %9753 = vmatmul.msk.f32.gmra.mxu1 %vm827_vm2, %v6512_v49  ;;  %v5769_v49 = vld [vmem:[#allocation2 + $0x647] sm:$0xff] }
 0x7f0   :  { %v8169_v29 = vmax.f32 %v8073_v60, 0.0  ;;  %8847 = vst.msk [vmem:[%s14372_s8 + $0x50] sm:$0xff] %vm827_vm2, %v8580_v25  ;;  %9849 = vmatmul.msk.f32.gmra.mxu2 %vm827_vm2, %v7299_v40 }
 0x7f2   :  { %9928 = vmatmul.msk.f32.gmra.mxu3 %vm827_vm2, %v8169_v29  ;;  %v6514_v29 = vld [vmem:[#allocation2 + $0x368] sm:$0xff] }
 0x7f3   :  { %v7742_v56 = vpop.f32.mrf.mxu2  ;;  %9700 = vmatmul.msk.f32.gmra.mxu0 %vm827_vm2, %v5768_v59 }
 0x7f4   :  { %v7974_v26 = vadd.f32 %v7742_v56, %v7187_v30  ;;  %v6958_v39 = vpop.f32.mrf.mxu1  ;;  %v7301_v30 = vld [vmem:[#allocation2 + $0x369] sm:$0xff]  ;;  %v14811_v56 = vld [vmem:[#allocation159_spill] sm:$0xff] }
 0x7f5   :  { %v8582_v36 = vpop.f32.mrf.mxu3  ;;  %v7188_v3 = vadd.f32 %v6958_v39, %v6401_v10  ;;  %v13527_v39 = vpop.f32.mrf.mxu0 }
 0x7f6   :  { %v8074_v62 = vadd.f32 %v13461_v46, %v7974_v26  ;;  %v8583_v2 = vadd.f32 %v13328_v34, %v8582_v36  ;;  %v14812_v26 = vld [vmem:[#allocation46_spill] sm:$0xff] }
 0x7f7   :  { %9754 = vmatmul.msk.f32.gmra.mxu1 %vm827_vm2, %v6513_v32  ;;  %v6402_v59 = vadd.f32 %v14812_v26, %v14811_v56  ;;  %v5771_v56 = vld [vmem:[#allocation2 + $0x667] sm:$0xff] }
 0x7f8   :  { %v8170_v51 = vmax.f32 %v8074_v62, 0.0  ;;  %8848 = vst.msk [vmem:[%s14372_s8 + $0x58] sm:$0xff] %vm827_vm2, %v8583_v2  ;;  %9850 = vmatmul.msk.f32.gmra.mxu2 %vm827_vm2, %v7300_v53  ;;  %v5770_v53 = vld [vmem:[#allocation2 + $0x64f] sm:$0xff] }
 0x7fa   :  { %9929 = vmatmul.msk.f32.gmra.mxu3 %vm827_vm2, %v8170_v51 }
 0x7fb   :  { %v7745_v60 = vpop.f32.mrf.mxu2  ;;  %9701 = vmatmul.msk.f32.gmra.mxu0 %vm827_vm2, %v5769_v49  ;;  %v14814_v49 = vld [vmem:[#allocation48_spill] sm:$0xff] }
 0x7fc   :  { %v7975_v25 = vadd.f32 %v7745_v60, %v7188_v3  ;;  %v6961_v40 = vpop.f32.mrf.mxu1  ;;  %v6515_v3 = vld [vmem:[#allocation2 + $0x370] sm:$0xff] }
 0x7fd   :  { %v8585_v42 = vpop.f32.mrf.mxu3  ;;  %v7189_v62 = vadd.f32 %v6961_v40, %v6402_v59  ;;  %v7302_v60 = vld [vmem:[#allocation2 + $0x371] sm:$0xff] }
 0x7fe   :  { %v8075_v9 = vadd.f32 %v13461_v46, %v7975_v25  ;;  %v8586_v57 = vadd.f32 %v13328_v34, %v8585_v42  ;;  %v14813_v25 = vld [vmem:[#allocation160_spill] sm:$0xff] }
 0x7ff   :  { %9755 = vmatmul.msk.f32.gmra.mxu1 %vm827_vm2, %v6514_v29  ;;  %v6403_v42 = vadd.f32 %v14814_v49, %v14813_v25  ;;  %v13542_v29 = vpop.f32.mrf.mxu0  ;;  %v5772_v25 = vld [vmem:[#allocation2 + $0x66f] sm:$0xff] }
 0x800   :  { %v8171_v36 = vmax.f32 %v8075_v9, 0.0  ;;  %8849 = vst.msk [vmem:[%s14372_s8 + $0x60] sm:$0xff] %vm827_vm2, %v8586_v57  ;;  %9851 = vmatmul.msk.f32.gmra.mxu2 %vm827_vm2, %v7301_v30 }
 0x802   :  { %9930 = vmatmul.msk.f32.gmra.mxu3 %vm827_vm2, %v8171_v36 }
 0x803   :  { %v7748_v2 = vpop.f32.mrf.mxu2  ;;  %9702 = vmatmul.msk.f32.gmra.mxu0 %vm827_vm2, %v5770_v53  ;;  %v14815_v53 = vld [vmem:[#allocation161_spill] sm:$0xff] }
 0x804   :  { %v7976_v32 = vadd.f32 %v7748_v2, %v7189_v62  ;;  %v6964_v5 = vpop.f32.mrf.mxu1  ;;  %v6516_v2 = vld [vmem:[#allocation2 + $0x388] sm:$0xff] }
 0x805   :  { %v8588_v8 = vpop.f32.mrf.mxu3  ;;  %v7190_v40 = vadd.f32 %v6964_v5, %v6403_v42 }
 0x806   :  { %v8076_v10 = vadd.f32 %v13461_v46, %v7976_v32  ;;  %v8589_v51 = vadd.f32 %v13328_v34, %v8588_v8  ;;  %v7303_v32 = vld [vmem:[#allocation2 + $0x389] sm:$0xff]  ;;  %v14816_v8 = vld [vmem:[#allocation50_spill] sm:$0xff] }
 0x807   :  { %9756 = vmatmul.msk.f32.gmra.mxu1 %vm827_vm2, %v6515_v3  ;;  %v6404_v5 = vadd.f32 %v14816_v8, %v14815_v53  ;;  %v5773_v8 = vld [vmem:[#allocation2 + $0x687] sm:$0xff] }
 0x808   :  { %v8172_v9 = vmax.f32 %v8076_v10, 0.0  ;;  %8850 = vst.msk [vmem:[%s14372_s8 + $0x68] sm:$0xff] %vm827_vm2, %v8589_v51  ;;  %9852 = vmatmul.msk.f32.gmra.mxu2 %vm827_vm2, %v7302_v60 }
 0x80a   :  { %9931 = vmatmul.msk.f32.gmra.mxu3 %vm827_vm2, %v8172_v9  ;;  %v13557_v9 = vpop.f32.mrf.mxu0 }
 0x80b   :  { %v7751_v57 = vpop.f32.mrf.mxu2  ;;  %9703 = vmatmul.msk.f32.gmra.mxu0 %vm827_vm2, %v5771_v56  ;;  %v7304_v56 = vld [vmem:[#allocation2 + $0x391] sm:$0xff] }
 0x80c   :  { %v7977_v30 = vadd.f32 %v7751_v57, %v7190_v40  ;;  %v6967_v26 = vpop.f32.mrf.mxu1 }
 0x80d   :  { %v8591_v59 = vpop.f32.mrf.mxu3  ;;  %v7191_v51 = vadd.f32 %v6967_v26, %v6404_v5 }
 0x80e   :  { %v8077_v36 = vadd.f32 %v13461_v46, %v7977_v30  ;;  %v8592_v62 = vadd.f32 %v13328_v34, %v8591_v59  ;;  %v6517_v30 = vld [vmem:[#allocation2 + $0x390] sm:$0xff]  ;;  %v14817_v59 = vld [vmem:[#allocation162_spill] sm:$0xff] }
 0x80f   :  { %9757 = vmatmul.msk.f32.gmra.mxu1 %vm827_vm2, %v6516_v2 }
 0x810   :  { %v8173_v10 = vmax.f32 %v8077_v36, 0.0  ;;  %8851 = vst.msk [vmem:[%s14372_s8 + $0x70] sm:$0xff] %vm827_vm2, %v8592_v62  ;;  %9853 = vmatmul.msk.f32.gmra.mxu2 %vm827_vm2, %v7303_v32  ;;  %v14818_v36 = vld [vmem:[#allocation52_spill] sm:$0xff] }
 0x811   :  { %v6405_v26 = vadd.f32 %v14818_v36, %v14817_v59 }
 0x812   :  { %9932 = vmatmul.msk.f32.gmra.mxu3 %vm827_vm2, %v8173_v10 }
 0x813   :  { %v7754_v3 = vpop.f32.mrf.mxu2  ;;  %9704 = vmatmul.msk.f32.gmra.mxu0 %vm827_vm2, %v5772_v25  ;;  %v7305_v25 = vld [vmem:[#allocation2 + $0x3a9] sm:$0xff] }
 0x814   :  { %v7978_v60 = vadd.f32 %v7754_v3, %v7191_v51  ;;  %v6970_v49 = vpop.f32.mrf.mxu1 }
 0x815   :  { %v8594_v42 = vpop.f32.mrf.mxu3  ;;  %v7192_v2 = vadd.f32 %v6970_v49, %v6405_v26  ;;  %v5774_v26 = vld [vmem:[#allocation2 + $0x68f] sm:$0xff] }
 0x816   :  { %v8078_v40 = vadd.f32 %v13461_v46, %v7978_v60  ;;  %v8595_v57 = vadd.f32 %v13328_v34, %v8594_v42  ;;  %v6518_v60 = vld [vmem:[#allocation2 + $0x3a8] sm:$0xff]  ;;  %v14819_v42 = vld [vmem:[#allocation163_spill] sm:$0xff] }
 0x817   :  { %9758 = vmatmul.msk.f32.gmra.mxu1 %vm827_vm2, %v6517_v30  ;;  %v13575_v30 = vpop.f32.mrf.mxu0 }
 0x818   :  { %v8174_v62 = vmax.f32 %v8078_v40, 0.0  ;;  %8852 = vst.msk [vmem:[%s14372_s8 + $0x78] sm:$0xff] %vm827_vm2, %v8595_v57  ;;  %9854 = vmatmul.msk.f32.gmra.mxu2 %vm827_vm2, %v7304_v56  ;;  %v14820_v40 = vld [vmem:[#allocation54_spill] sm:$0xff] }
 0x819   :  { %v6406_v57 = vadd.f32 %v14820_v40, %v14819_v42  ;;  %v5775_v40 = vld [vmem:[#allocation2 + $0x6a7] sm:$0xff] }
 0x81a   :  { %9933 = vmatmul.msk.f32.gmra.mxu3 %vm827_vm2, %v8174_v62 }
 0x81b   :  { %v7757_v32 = vpop.f32.mrf.mxu2  ;;  %9705 = vmatmul.msk.f32.gmra.mxu0 %vm827_vm2, %v5773_v8  ;;  %v6519_v8 = vld [vmem:[#allocation2 + $0x3b0] sm:$0xff] }
 0x81c   :  { %v7979_v53 = vadd.f32 %v7757_v32, %v7192_v2  ;;  %v6973_v5 = vpop.f32.mrf.mxu1 }
 0x81d   :  { %v8597_v10 = vpop.f32.mrf.mxu3  ;;  %v7193_v56 = vadd.f32 %v6973_v5, %v6406_v57 }
 0x81e   :  { %v8079_v51 = vadd.f32 %v13461_v46, %v7979_v53  ;;  %v8598_v3 = vadd.f32 %v13328_v34, %v8597_v10  ;;  %v7306_v10 = vld [vmem:[#allocation2 + $0x3b1] sm:$0xff] }
 0x81f   :  { %9759 = vmatmul.msk.f32.gmra.mxu1 %vm827_vm2, %v6518_v60  ;;  %v13595_v5 = vpop.f32.mrf.mxu0 }
 0x820   :  { %v8175_v49 = vmax.f32 %v8079_v51, 0.0  ;;  %8853 = vst.msk [vmem:[%s14372_s8 + $0x80] sm:$0xff] %vm827_vm2, %v8598_v3  ;;  %9855 = vmatmul.msk.f32.gmra.mxu2 %vm827_vm2, %v7305_v25  ;;  %v14821_v51 = vld [vmem:[#allocation164_spill] sm:$0xff] }
 0x821   :  { %v14822_v3 = vld [vmem:[#allocation56_spill] sm:$0xff] }
 0x822   :  { %9934 = vmatmul.msk.f32.gmra.mxu3 %vm827_vm2, %v8175_v49  ;;  %v6407_v60 = vadd.f32 %v14822_v3, %v14821_v51  ;;  %v5776_v3 = vld [vmem:[#allocation2 + $0x6af] sm:$0xff] }
 0x823   :  { %v7760_v59 = vpop.f32.mrf.mxu2  ;;  %9706 = vmatmul.msk.f32.gmra.mxu0 %vm827_vm2, %v5774_v26 }
 0x824   :  { %v7980_v36 = vadd.f32 %v7760_v59, %v7193_v56  ;;  %v6976_v62 = vpop.f32.mrf.mxu1 }
 0x825   :  { %v8600_v2 = vpop.f32.mrf.mxu3  ;;  %v7194_v42 = vadd.f32 %v6976_v62, %v6407_v60 }
 0x826   :  { %v8080_v32 = vadd.f32 %v13461_v46, %v7980_v36  ;;  %v8601_v53 = vadd.f32 %v13328_v34, %v8600_v2  ;;  %v6520_v2 = vld [vmem:[#allocation2 + $0x3c8] sm:$0xff] }
 0x827   :  { %9760 = vmatmul.msk.f32.gmra.mxu1 %vm827_vm2, %v6519_v8  ;;  %v14824_v8 = vld [vmem:[#allocation58_spill] sm:$0xff] }
 0x828   :  { %v8176_v25 = vmax.f32 %v8080_v32, 0.0  ;;  %8854 = vst.msk [vmem:[%s14372_s8 + $0x88] sm:$0xff] %vm827_vm2, %v8601_v53  ;;  %9856 = vmatmul.msk.f32.gmra.mxu2 %vm827_vm2, %v7306_v10  ;;  %v7307_v32 = vld [vmem:[#allocation2 + $0x3c9] sm:$0xff] }
 0x829   :  { %v14823_v53 = vld [vmem:[#allocation165_spill] sm:$0xff] }
 0x82a   :  { %9935 = vmatmul.msk.f32.gmra.mxu3 %vm827_vm2, %v8176_v25  ;;  %v6408_v10 = vadd.f32 %v14824_v8, %v14823_v53  ;;  %v13610_v25 = vpop.f32.mrf.mxu0 }
 0x82b   :  { %v7763_v57 = vpop.f32.mrf.mxu2  ;;  %9707 = vmatmul.msk.f32.gmra.mxu0 %vm827_vm2, %v5775_v40 }
 0x82c   :  { %v7981_v49 = vadd.f32 %v7763_v57, %v7194_v42  ;;  %v6979_v56 = vpop.f32.mrf.mxu1 }
 0x82d   :  { %v8603_v59 = vpop.f32.mrf.mxu3  ;;  %v7195_v62 = vadd.f32 %v6979_v56, %v6408_v10 }
 0x82e   :  { %v8081_v36 = vadd.f32 %v13461_v46, %v7981_v49  ;;  %v8604_v26 = vadd.f32 %v13328_v34, %v8603_v59 }
 0x82f   :  { %9761 = vmatmul.msk.f32.gmra.mxu1 %vm827_vm2, %v6520_v2  ;;  %v14825_v2 = vld [vmem:[#allocation166_spill] sm:$0xff] }
 0x830   :  { %v8177_v51 = vmax.f32 %v8081_v36, 0.0  ;;  %8855 = vst.msk [vmem:[%s14372_s8 + $0x90] sm:$0xff] %vm827_vm2, %v8604_v26  ;;  %9857 = vmatmul.msk.f32.gmra.mxu2 %vm827_vm2, %v7307_v32  ;;  %v6521_v36 = vld [vmem:[#allocation2 + $0x3d0] sm:$0xff]  ;;  %v14826_v32 = vld [vmem:[#allocation60_spill] sm:$0xff] }
 0x831   :  { %v7308_v26 = vld [vmem:[#allocation2 + $0x3d1] sm:$0xff]  ;;  %v6409_v56 = vadd.f32 %v14826_v32, %v14825_v2  ;;  %v14827_v2 = vld [vmem:[#allocation167_spill] sm:$0xff] }
 0x832   :  { %9936 = vmatmul.msk.f32.gmra.mxu3 %vm827_vm2, %v8177_v51  ;;  %v14828_v32 = vld [vmem:[#allocation62_spill] sm:$0xff] }
 0x833   :  { %v7766_v60 = vpop.f32.mrf.mxu2  ;;  %9708 = vmatmul.msk.f32.gmra.mxu0 %vm827_vm2, %v5776_v3 }
 0x834   :  { %v7982_v42 = vadd.f32 %v7766_v60, %v7195_v62  ;;  %v6982_v40 = vpop.f32.mrf.mxu1 }
 0x835   :  { %v8606_v57 = vpop.f32.mrf.mxu3  ;;  %v7196_v8 = vadd.f32 %v6982_v40, %v6409_v56 }
 0x836   :  { %v8082_v49 = vadd.f32 %v13461_v46, %v7982_v42  ;;  %v8607_v59 = vadd.f32 %v13328_v34, %v8606_v57  ;;  %v6522_v57 = vld [vmem:[#allocation2 + $0x3e8] sm:$0xff] }
 0x837   :  { %9762 = vmatmul.msk.f32.gmra.mxu1 %vm827_vm2, %v6521_v36 }
 0x838   :  { %v8178_v53 = vmax.f32 %v8082_v49, 0.0  ;;  %8856 = vst.msk [vmem:[%s14372_s8 + $0x98] sm:$0xff] %vm827_vm2, %v8607_v59  ;;  %9858 = vmatmul.msk.f32.gmra.mxu2 %vm827_vm2, %v7308_v26  ;;  %v7309_v49 = vld [vmem:[#allocation2 + $0x3e9] sm:$0xff]  ;;  %v6410_v59 = vadd.f32 %v14828_v32, %v14827_v2  ;;  %v14830_v2 = vld [vmem:[#allocation210_spill] sm:$0xff] }
 0x83a   :  { %9937 = vmatmul.msk.f32.gmra.mxu3 %vm827_vm2, %v8178_v53 }
 0x83b   :  { %v7769_v10 = vpop.f32.mrf.mxu2 }
 0x83c   :  { %v7983_v51 = vadd.f32 %v7769_v10, %v7196_v8  ;;  %v6985_v62 = vpop.f32.mrf.mxu1 }
 0x83d   :  { %v8609_v3 = vpop.f32.mrf.mxu3  ;;  %v7197_v40 = vadd.f32 %v6985_v62, %v6410_v59 }
 0x83e   :  { %v8083_v60 = vadd.f32 %v13461_v46, %v7983_v51  ;;  %v8610_v42 = vadd.f32 %v13328_v34, %v8609_v3  ;;  %v6523_v51 = vld [vmem:[#allocation2 + $0x3f0] sm:$0xff] }
 0x83f   :  { %9763 = vmatmul.msk.f32.gmra.mxu1 %vm827_vm2, %v6522_v57  ;;  %v7310_v3 = vld [vmem:[#allocation2 + $0x3f1] sm:$0xff] }
 0x840   :  { %v8179_v14 = vmax.f32 %v8083_v60, 0.0  ;;  %8857 = vst.msk [vmem:[%s14372_s8 + $0xa0] sm:$0xff] %vm827_vm2, %v8610_v42  ;;  %9859 = vmatmul.msk.f32.gmra.mxu2 %vm827_vm2, %v7309_v49  ;;  %v14829_v60 = vld [vmem:[#allocation168_spill] sm:$0xff] }
 0x841   :  { %v6411_v42 = vadd.f32 %v14830_v2, %v14829_v60  ;;  %v14832_v60 = vld [vmem:[#allocation212_spill] sm:$0xff] }
 0x842   :  { %9938 = vmatmul.msk.f32.gmra.mxu3 %vm827_vm2, %v8179_v14 }
 0x843   :  { %v7772_v36 = vpop.f32.mrf.mxu2 }
 0x844   :  { %v7984_v26 = vadd.f32 %v7772_v36, %v7197_v40  ;;  %v6988_v56 = vpop.f32.mrf.mxu1 }
 0x845   :  { %v8612_v53 = vpop.f32.mrf.mxu3  ;;  %v7198_v14 = vadd.f32 %v6988_v56, %v6411_v42 }
 0x846   :  { %v8084_v8 = vadd.f32 %v13461_v46, %v7984_v26  ;;  %v8613_v10 = vadd.f32 %v13328_v34, %v8612_v53  ;;  %v6524_v26 = vld [vmem:[#allocation2 + $0x408] sm:$0xff] }
 0x847   :  { %9764 = vmatmul.msk.f32.gmra.mxu1 %vm827_vm2, %v6523_v51  ;;  %v7311_v53 = vld [vmem:[#allocation2 + $0x409] sm:$0xff] }
 0x848   :  { %v8180_v32 = vmax.f32 %v8084_v8, 0.0  ;;  %8858 = vst.msk [vmem:[%s14372_s8 + $0xa8] sm:$0xff] %vm827_vm2, %v8613_v10  ;;  %9860 = vmatmul.msk.f32.gmra.mxu2 %vm827_vm2, %v7310_v3  ;;  %v14831_v8 = vld [vmem:[#allocation169_spill] sm:$0xff] }
 0x849   :  { %v6412_v10 = vadd.f32 %v14832_v60, %v14831_v8  ;;  %v14834_v8 = vld [vmem:[#allocation39_spill] sm:$0xff] }
 0x84a   :  { %9939 = vmatmul.msk.f32.gmra.mxu3 %vm827_vm2, %v8180_v32 }
 0x84b   :  { %v7775_v62 = vpop.f32.mrf.mxu2 }
 0x84c   :  { %v7985_v57 = vadd.f32 %v7775_v62, %v7198_v14  ;;  %v6991_v49 = vpop.f32.mrf.mxu1 }
 0x84d   :  { %v8615_v59 = vpop.f32.mrf.mxu3  ;;  %v7199_v56 = vadd.f32 %v6991_v49, %v6412_v10 }
 0x84e   :  { %v8085_v40 = vadd.f32 %v13461_v46, %v7985_v57  ;;  %v8616_v36 = vadd.f32 %v13328_v34, %v8615_v59  ;;  %v6525_v57 = vld [vmem:[#allocation2 + $0x410] sm:$0xff] }
 0x84f   :  { %9765 = vmatmul.msk.f32.gmra.mxu1 %vm827_vm2, %v6524_v26  ;;  %v7312_v59 = vld [vmem:[#allocation2 + $0x411] sm:$0xff] }
 0x850   :  { %v8181_v2 = vmax.f32 %v8085_v40, 0.0  ;;  %8859 = vst.msk [vmem:[%s14372_s8 + $0xb0] sm:$0xff] %vm827_vm2, %v8616_v36  ;;  %9861 = vmatmul.msk.f32.gmra.mxu2 %vm827_vm2, %v7311_v53  ;;  %v14833_v40 = vld [vmem:[#allocation170_spill] sm:$0xff] }
 0x851   :  { %v6413_v36 = vadd.f32 %v14834_v8, %v14833_v40 }
 0x852   :  { %9940 = vmatmul.msk.f32.gmra.mxu3 %vm827_vm2, %v8181_v2 }
 0x853   :  { %v7778_v51 = vpop.f32.mrf.mxu2 }
 0x854   :  { %v7986_v3 = vadd.f32 %v7778_v51, %v7199_v56  ;;  %v6994_v42 = vpop.f32.mrf.mxu1 }
 0x855   :  { %v8618_v32 = vpop.f32.mrf.mxu3  ;;  %v7200_v49 = vadd.f32 %v6994_v42, %v6413_v36 }
 0x856   :  { %v8086_v14 = vadd.f32 %v13461_v46, %v7986_v3  ;;  %v8619_v62 = vadd.f32 %v13328_v34, %v8618_v32  ;;  %v6526_v3 = vld [vmem:[#allocation2 + $0x428] sm:$0xff] }
 0x857   :  { %9766 = vmatmul.msk.f32.gmra.mxu1 %vm827_vm2, %v6525_v57  ;;  %v7313_v32 = vld [vmem:[#allocation2 + $0x429] sm:$0xff] }
 0x858   :  { %v8182_v60 = vmax.f32 %v8086_v14, 0.0  ;;  %8860 = vst.msk [vmem:[%s14372_s8 + $0xb8] sm:$0xff] %vm827_vm2, %v8619_v62  ;;  %9862 = vmatmul.msk.f32.gmra.mxu2 %vm827_vm2, %v7312_v59  ;;  %v14835_v14 = vld [vmem:[#allocation171_spill] sm:$0xff] }
 0x859   :  { %v6414_v62 = vadd.f32 %v13060_v61, %v14835_v14 }
 0x85a   :  { %9941 = vmatmul.msk.f32.gmra.mxu3 %vm827_vm2, %v8182_v60 }
 0x85b   :  { %v7781_v26 = vpop.f32.mrf.mxu2 }
 0x85c   :  { %v7987_v53 = vadd.f32 %v7781_v26, %v7200_v49  ;;  %v6997_v10 = vpop.f32.mrf.mxu1  ;;  %v6527_v49 = vld [vmem:[#allocation2 + $0x430] sm:$0xff] }
 0x85d   :  { %v8621_v2 = vpop.f32.mrf.mxu3  ;;  %v7201_v42 = vadd.f32 %v6997_v10, %v6414_v62  ;;  %v7314_v26 = vld [vmem:[#allocation2 + $0x431] sm:$0xff] }
 0x85e   :  { %v8087_v56 = vadd.f32 %v13461_v46, %v7987_v53  ;;  %v8622_v51 = vadd.f32 %v13328_v34, %v8621_v2  ;;  %v14836_v53 = vld [vmem:[#allocation172_spill] sm:$0xff] }
 0x85f   :  { %9767 = vmatmul.msk.f32.gmra.mxu1 %vm827_vm2, %v6526_v3  ;;  %v6415_v2 = vadd.f32 %v13081_v44, %v14836_v53 }
 0x860   :  { %v8183_v40 = vmax.f32 %v8087_v56, 0.0  ;;  %8861 = vst.msk [vmem:[%s14372_s8 + $0xc0] sm:$0xff] %vm827_vm2, %v8622_v51  ;;  %9863 = vmatmul.msk.f32.gmra.mxu2 %vm827_vm2, %v7313_v32 }
 0x862   :  { %9942 = vmatmul.msk.f32.gmra.mxu3 %vm827_vm2, %v8183_v40  ;;  %v6528_v40 = vld [vmem:[#allocation2 + $0x448] sm:$0xff] }
 0x863   :  { %v7784_v57 = vpop.f32.mrf.mxu2 }
 0x864   :  { %v7988_v59 = vadd.f32 %v7784_v57, %v7201_v42  ;;  %v7000_v8 = vpop.f32.mrf.mxu1  ;;  %v7315_v42 = vld [vmem:[#allocation2 + $0x449] sm:$0xff]  ;;  %v14837_v57 = vld [vmem:[#allocation3_spill] sm:$0xff] }
 0x865   :  { %v8624_v36 = vpop.f32.mrf.mxu3  ;;  %v7202_v10 = vadd.f32 %v7000_v8, %v6415_v2  ;;  %v6529_v2 = vld [vmem:[#allocation2 + $0x450] sm:$0xff] }
 0x866   :  { %v8088_v60 = vadd.f32 %v13461_v46, %v7988_v59  ;;  %v8625_v61 = vadd.f32 %v13328_v34, %v8624_v36  ;;  %v6416_v59 = vadd.f32 %v13100_v48, %v14837_v57  ;;  %v7317_v57 = vld [vmem:[#allocation2 + $0x469] sm:$0xff] }
 0x867   :  { %9768 = vmatmul.msk.f32.gmra.mxu1 %vm827_vm2, %v6527_v49 }
 0x868   :  { %v8184_v56 = vmax.f32 %v8088_v60, 0.0  ;;  %8862 = vst.msk [vmem:[%s14372_s8 + $0xc8] sm:$0xff] %vm827_vm2, %v8625_v61  ;;  %9864 = vmatmul.msk.f32.gmra.mxu2 %vm827_vm2, %v7314_v26 }
 0x86a   :  { %9943 = vmatmul.msk.f32.gmra.mxu3 %vm827_vm2, %v8184_v56  ;;  %v7316_v56 = vld [vmem:[#allocation2 + $0x451] sm:$0xff] }
 0x86b   :  { %v7787_v51 = vpop.f32.mrf.mxu2 }
 0x86c   :  { %v7989_v3 = vadd.f32 %v7787_v51, %v7202_v10  ;;  %v7003_v32 = vpop.f32.mrf.mxu1  ;;  %v14838_v10 = vld [vmem:[#allocation4_spill] sm:$0xff] }
 0x86d   :  { %v8627_v14 = vpop.f32.mrf.mxu3  ;;  %v7203_v8 = vadd.f32 %v7003_v32, %v6416_v59  ;;  %v6417_v51 = vadd.f32 %v13120_v7, %v14838_v10 }
 0x86e   :  { %v8089_v62 = vadd.f32 %v13461_v46, %v7989_v3  ;;  %v8628_v44 = vadd.f32 %v13328_v34, %v8627_v14 }
 0x86f   :  { %9769 = vmatmul.msk.f32.gmra.mxu1 %vm827_vm2, %v6528_v40 }
 0x870   :  { %v8185_v36 = vmax.f32 %v8089_v62, 0.0  ;;  %8863 = vst.msk [vmem:[%s14372_s8 + $0xd0] sm:$0xff] %vm827_vm2, %v8628_v44  ;;  %9865 = vmatmul.msk.f32.gmra.mxu2 %vm827_vm2, %v7315_v42  ;;  %v6530_v42 = vld [vmem:[#allocation2 + $0x468] sm:$0xff] }
 0x872   :  { %9944 = vmatmul.msk.f32.gmra.mxu3 %vm827_vm2, %v8185_v36  ;;  %v14839_v36 = vld [vmem:[#allocation173_spill] sm:$0xff] }
 0x873   :  { %v7790_v60 = vpop.f32.mrf.mxu2 }
 0x874   :  { %v7990_v61 = vadd.f32 %v7790_v60, %v7203_v8  ;;  %v7006_v49 = vpop.f32.mrf.mxu1  ;;  %v6418_v8 = vadd.f32 %v13140_v43, %v14839_v36  ;;  %v14841_v36 = vld [vmem:[#allocation175_spill] sm:$0xff] }
 0x875   :  { %v8630_v26 = vpop.f32.mrf.mxu3  ;;  %v7204_v32 = vadd.f32 %v7006_v49, %v6417_v51  ;;  %v14840_v51 = vld [vmem:[#allocation174_spill] sm:$0xff] }
 0x876   :  { %v8090_v53 = vadd.f32 %v13461_v46, %v7990_v61  ;;  %v8631_v48 = vadd.f32 %v13328_v34, %v8630_v26 }
 0x877   :  { %9770 = vmatmul.msk.f32.gmra.mxu1 %vm827_vm2, %v6529_v2  ;;  %v7318_v2 = vld [vmem:[#allocation2 + $0x471] sm:$0xff] }
 0x878   :  { %v8186_v3 = vmax.f32 %v8090_v53, 0.0  ;;  %8864 = vst.msk [vmem:[%s14372_s8 + $0xd8] sm:$0xff] %vm827_vm2, %v8631_v48  ;;  %9866 = vmatmul.msk.f32.gmra.mxu2 %vm827_vm2, %v7316_v56  ;;  %v6531_v48 = vld [vmem:[#allocation2 + $0x470] sm:$0xff]  ;;  %v13727_v56 = vld [vmem:[%s14371_s6] ss:$0 sm:$0xff] }
 0x87a   :  { %9945 = vmatmul.msk.f32.gmra.mxu3 %vm827_vm2, %v8186_v3  ;;  %v6419_v3 = vadd.f32 %v13157_v11, %v14840_v51 }
 0x87b   :  { %v7793_v14 = vpop.f32.mrf.mxu2 }
 0x87c   :  { %v7991_v62 = vadd.f32 %v7793_v14, %v7204_v32  ;;  %v7009_v44 = vpop.f32.mrf.mxu1 }
 0x87d   :  { %v8633_v40 = vpop.f32.mrf.mxu3  ;;  %v7205_v61 = vadd.f32 %v7009_v44, %v6418_v8  ;;  %v6420_v8 = vadd.f32 %v13176_v54, %v14841_v36 }
 0x87e   :  { %v8091_v7 = vadd.f32 %v13461_v46, %v7991_v62  ;;  %v8634_v59 = vadd.f32 %v13328_v34, %v8633_v40 }
 0x87f   :  { %9771 = vmatmul.msk.f32.gmra.mxu1 %vm827_vm2, %v6530_v42 }
 0x880   :  { %v8187_v60 = vmax.f32 %v8091_v7, 0.0  ;;  %8865 = vst.msk [vmem:[%s14372_s8 + $0xe0] sm:$0xff] %vm827_vm2, %v8634_v59  ;;  %9867 = vmatmul.msk.f32.gmra.mxu2 %vm827_vm2, %v7317_v57  ;;  %v6532_v7 = vld [vmem:[#allocation2 + $0x4c8] sm:$0xff] }
 0x881   :  { %v7319_v59 = vld [vmem:[#allocation2 + $0x4c9] sm:$0xff] }
 0x882   :  { %9946 = vmatmul.msk.f32.gmra.mxu3 %vm827_vm2, %v8187_v60 }
 0x883   :  { %v7796_v49 = vpop.f32.mrf.mxu2 }
 0x884   :  { %v7992_v26 = vadd.f32 %v7796_v49, %v7205_v61  ;;  %v7012_v53 = vpop.f32.mrf.mxu1 }
 0x885   :  { %v8636_v34 = vpop.f32.mrf.mxu3  ;;  %v7206_v14 = vadd.f32 %v7012_v53, %v6419_v3 }
 0x886   :  { %v8092_v43 = vadd.f32 %v13461_v46, %v7992_v26  ;;  %v8637_v10 = vadd.f32 %v13727_v56, %v8636_v34 }
 0x887   :  { %9772 = vmatmul.msk.f32.gmra.mxu1 %vm827_vm2, %v6531_v48 }
 0x888   :  { %v8188_v32 = vmax.f32 %v8092_v43, 0.0  ;;  %8866 = vst.msk [vmem:[%s14372_s8 + $0xe8] sm:$0xff] %vm827_vm2, %v8637_v10  ;;  %9868 = vmatmul.msk.f32.gmra.mxu2 %vm827_vm2, %v7318_v2  ;;  %v6533_v2 = vld [vmem:[#allocation2 + $0x4d0] sm:$0xff]  ;;  %v14842_v10 = vld [vmem:[#allocation176_spill] sm:$0xff] }
 0x889   :  { %v7320_v43 = vld [vmem:[#allocation2 + $0x4d1] sm:$0xff]  ;;  %v6421_v51 = vadd.f32 %v13196_v24, %v14842_v10 }
 0x88a   :  { %9947 = vmatmul.msk.f32.gmra.mxu3 %vm827_vm2, %v8188_v32 }
 0x88b   :  { %v7799_v62 = vpop.f32.mrf.mxu2 }
 0x88c   :  { %v7993_v44 = vadd.f32 %v7799_v62, %v7206_v14  ;;  %v7015_v40 = vpop.f32.mrf.mxu1 }
 0x88d   :  { %v8639_v42 = vpop.f32.mrf.mxu3  ;;  %v7207_v61 = vadd.f32 %v7015_v40, %v6420_v8 }
 0x88e   :  { %v8093_v57 = vadd.f32 %v13461_v46, %v7993_v44  ;;  %v8640_v11 = vadd.f32 %v13727_v56, %v8639_v42 }
 0x88f   :  { %9773 = vmatmul.msk.f32.gmra.mxu1 %vm827_vm2, %v6532_v7  ;;  %v14843_v7 = vld [vmem:[#allocation177_spill] sm:$0xff] }
 0x890   :  { %v8189_v60 = vmax.f32 %v8093_v57, 0.0  ;;  %8867 = vst.msk [vmem:[%s14372_s8 + $0xf0] sm:$0xff] %vm827_vm2, %v8640_v11  ;;  %9869 = vmatmul.msk.f32.gmra.mxu2 %vm827_vm2, %v7319_v59  ;;  %v6534_v57 = vld [vmem:[#allocation2 + $0x4e8] sm:$0xff]  ;;  %v6422_v59 = vadd.f32 %v13216_v15, %v14843_v7 }
 0x891   :  { %v7321_v11 = vld [vmem:[#allocation2 + $0x4e9] sm:$0xff] }
 0x892   :  { %9948 = vmatmul.msk.f32.gmra.mxu3 %vm827_vm2, %v8189_v60 }
 0x893   :  { %v7802_v49 = vpop.f32.mrf.mxu2 }
 0x894   :  { %v7994_v26 = vadd.f32 %v7802_v49, %v7207_v61  ;;  %v7018_v53 = vpop.f32.mrf.mxu1 }
 0x895   :  { %v8642_v34 = vpop.f32.mrf.mxu3  ;;  %v7208_v32 = vadd.f32 %v7018_v53, %v6421_v51 }
 0x896   :  { %v8094_v48 = vadd.f32 %v13461_v46, %v7994_v26  ;;  %v8643_v54 = vadd.f32 %v13727_v56, %v8642_v34  ;;  %v6535_v34 = vld [vmem:[#allocation2 + $0x4f0] sm:$0xff] }
 0x897   :  { %9774 = vmatmul.msk.f32.gmra.mxu1 %vm827_vm2, %v6533_v2 }
 0x898   :  { %v8190_v3 = vmax.f32 %v8094_v48, 0.0  ;;  %8868 = vst.msk [vmem:[%s14372_s8 + $0xf8] sm:$0xff] %vm827_vm2, %v8643_v54  ;;  %9870 = vmatmul.msk.f32.gmra.mxu2 %vm827_vm2, %v7320_v43  ;;  %v7322_v48 = vld [vmem:[#allocation2 + $0x4f1] sm:$0xff] }
 0x899   :  { %v14844_v54 = vld [vmem:[#allocation178_spill] sm:$0xff] }
 0x89a   :  { %9949 = vmatmul.msk.f32.gmra.mxu3 %vm827_vm2, %v8190_v3  ;;  %v6423_v2 = vadd.f32 %v13233_v20, %v14844_v54 }
 0x89b   :  { %v7805_v14 = vpop.f32.mrf.mxu2 }
 0x89c   :  { %v7995_v62 = vadd.f32 %v7805_v14, %v7208_v32  ;;  %v7021_v44 = vpop.f32.mrf.mxu1 }
 0x89d   :  { %v8645_v40 = vpop.f32.mrf.mxu3  ;;  %v7209_v8 = vadd.f32 %v7021_v44, %v6422_v59  ;;  %v6536_v44 = vld [vmem:[#allocation2 + $0x508] sm:$0xff] }
 0x89e   :  { %v8095_v42 = vadd.f32 %v13461_v46, %v7995_v62  ;;  %v8646_v24 = vadd.f32 %v13727_v56, %v8645_v40  ;;  %v7323_v40 = vld [vmem:[#allocation2 + $0x509] sm:$0xff] }
 0x89f   :  { %9775 = vmatmul.msk.f32.gmra.mxu1 %vm827_vm2, %v6534_v57 }
 0x8a0   :  { %v8191_v36 = vmax.f32 %v8095_v42, 0.0  ;;  %8869 = vst.msk [vmem:[%s14372_s8 + $0x100] sm:$0xff] %vm827_vm2, %v8646_v24  ;;  %9871 = vmatmul.msk.f32.gmra.mxu2 %vm827_vm2, %v7321_v11  ;;  %v14845_v42 = vld [vmem:[#allocation11_spill] sm:$0xff] }
 0x8a1   :  { %v6424_v24 = vadd.f32 %v13252_v22, %v14845_v42 }
 0x8a2   :  { %9950 = vmatmul.msk.f32.gmra.mxu3 %vm827_vm2, %v8191_v36 }
 0x8a3   :  { %v7808_v60 = vpop.f32.mrf.mxu2 }
 0x8a4   :  { %v7996_v61 = vadd.f32 %v7808_v60, %v7209_v8  ;;  %v7024_v49 = vpop.f32.mrf.mxu1 }
 0x8a5   :  { %v8648_v26 = vpop.f32.mrf.mxu3  ;;  %v7210_v10 = vadd.f32 %v7024_v49, %v6423_v2  ;;  %v7324_v49 = vld [vmem:[#allocation2 + $0x511] sm:$0xff] }
 0x8a6   :  { %v8096_v53 = vadd.f32 %v13461_v46, %v7996_v61  ;;  %v8649_v15 = vadd.f32 %v13727_v56, %v8648_v26  ;;  %v6537_v61 = vld [vmem:[#allocation2 + $0x510] sm:$0xff]  ;;  %v14846_v26 = vld [vmem:[#allocation12_spill] sm:$0xff] }
 0x8a7   :  { %9776 = vmatmul.msk.f32.gmra.mxu1 %vm827_vm2, %v6535_v34 }
 0x8a8   :  { %v8192_v43 = vmax.f32 %v8096_v53, 0.0  ;;  %8870 = vst.msk [vmem:[%s14372_s8 + $0x108] sm:$0xff] %vm827_vm2, %v8649_v15  ;;  %9872 = vmatmul.msk.f32.gmra.mxu2 %vm827_vm2, %v7322_v48  ;;  %v6425_v53 = vadd.f32 %v13272_v38, %v14846_v26 }
 0x8aa   :  { %9951 = vmatmul.msk.f32.gmra.mxu3 %vm827_vm2, %v8192_v43 }
 0x8ab   :  { %v7811_v51 = vpop.f32.mrf.mxu2 }
 0x8ac   :  { %v7997_v3 = vadd.f32 %v7811_v51, %v7210_v10  ;;  %v7027_v32 = vpop.f32.mrf.mxu1  ;;  %v6538_v51 = vld [vmem:[#allocation2 + $0x528] sm:$0xff] }
 0x8ad   :  { %v8651_v14 = vpop.f32.mrf.mxu3  ;;  %v7211_v11 = vadd.f32 %v7027_v32, %v6424_v24  ;;  %v14847_v32 = vld [vmem:[#allocation13_spill] sm:$0xff] }
 0x8ae   :  { %v8097_v62 = vadd.f32 %v13461_v46, %v7997_v3  ;;  %v8652_v20 = vadd.f32 %v13727_v56, %v8651_v14  ;;  %v7325_v3 = vld [vmem:[#allocation2 + $0x529] sm:$0xff]  ;;  %v6426_v14 = vadd.f32 %v13292_v41, %v14847_v32 }
 0x8af   :  { %9777 = vmatmul.msk.f32.gmra.mxu1 %vm827_vm2, %v6536_v44 }
 0x8b0   :  { %v8193_v57 = vmax.f32 %v8097_v62, 0.0  ;;  %8871 = vst.msk [vmem:[%s14372_s8 + $0x110] sm:$0xff] %vm827_vm2, %v8652_v20  ;;  %9873 = vmatmul.msk.f32.gmra.mxu2 %vm827_vm2, %v7323_v40 }
 0x8b2   :  { %9952 = vmatmul.msk.f32.gmra.mxu3 %vm827_vm2, %v8193_v57 }
 0x8b3   :  { %v7814_v7 = vpop.f32.mrf.mxu2 }
 0x8b4   :  { %v7998_v59 = vadd.f32 %v7814_v7, %v7211_v11  ;;  %v7030_v36 = vpop.f32.mrf.mxu1  ;;  %v6539_v11 = vld [vmem:[#allocation2 + $0x530] sm:$0xff] }
 0x8b5   :  { %v8654_v8 = vpop.f32.mrf.mxu3  ;;  %v7212_v34 = vadd.f32 %v7030_v36, %v6425_v53  ;;  %v7326_v7 = vld [vmem:[#allocation2 + $0x531] sm:$0xff] }
 0x8b6   :  { %v8098_v60 = vadd.f32 %v13461_v46, %v7998_v59  ;;  %v8655_v22 = vadd.f32 %v13727_v56, %v8654_v8  ;;  %v14848_v59 = vld [vmem:[#allocation14_spill] sm:$0xff] }
 0x8b7   :  { %9778 = vmatmul.msk.f32.gmra.mxu1 %vm827_vm2, %v6537_v61  ;;  %v6427_v36 = vadd.f32 %v13309_v63, %v14848_v59  ;;  %v6542_v59 = vld [vmem:[#allocation2 + $0x568] sm:$0xff] }
 0x8b8   :  { %v8194_v15 = vmax.f32 %v8098_v60, 0.0  ;;  %8872 = vst.msk [vmem:[%s14372_s8 + $0x118] sm:$0xff] %vm827_vm2, %v8655_v22  ;;  %9874 = vmatmul.msk.f32.gmra.mxu2 %vm827_vm2, %v7324_v49 }
 0x8ba   :  { %9953 = vmatmul.msk.f32.gmra.mxu3 %vm827_vm2, %v8194_v15  ;;  %v6540_v15 = vld [vmem:[#allocation2 + $0x548] sm:$0xff] }
 0x8bb   :  { %v7817_v48 = vpop.f32.mrf.mxu2 }
 0x8bc   :  { %v7999_v54 = vadd.f32 %v7817_v48, %v7212_v34  ;;  %v7033_v2 = vpop.f32.mrf.mxu1  ;;  %v7327_v34 = vld [vmem:[#allocation2 + $0x549] sm:$0xff]  ;;  %v14849_v48 = vld [vmem:[#allocation15_spill] sm:$0xff] }
 0x8bd   :  { %v8657_v43 = vpop.f32.mrf.mxu3  ;;  %v7213_v20 = vadd.f32 %v7033_v2, %v6426_v14  ;;  %v6541_v14 = vld [vmem:[#allocation2 + $0x550] sm:$0xff] }
 0x8be   :  { %v8099_v10 = vadd.f32 %v13461_v46, %v7999_v54  ;;  %v8658_v38 = vadd.f32 %v13727_v56, %v8657_v43  ;;  %v6428_v54 = vadd.f32 %v13333_v4, %v14849_v48  ;;  %v7330_v48 = vld [vmem:[#allocation2 + $0x571] sm:$0xff] }
 0x8bf   :  { %9779 = vmatmul.msk.f32.gmra.mxu1 %vm827_vm2, %v6538_v51 }
 0x8c0   :  { %v8195_v62 = vmax.f32 %v8099_v10, 0.0  ;;  %8873 = vst.msk [vmem:[%s14372_s8 + $0x120] sm:$0xff] %vm827_vm2, %v8658_v38  ;;  %9875 = vmatmul.msk.f32.gmra.mxu2 %vm827_vm2, %v7325_v3 }
 0x8c2   :  { %9954 = vmatmul.msk.f32.gmra.mxu3 %vm827_vm2, %v8195_v62  ;;  %v7328_v62 = vld [vmem:[#allocation2 + $0x551] sm:$0xff] }
 0x8c3   :  { %v7820_v44 = vpop.f32.mrf.mxu2 }
 0x8c4   :  { %v8000_v40 = vadd.f32 %v7820_v44, %v7213_v20  ;;  %v7036_v42 = vpop.f32.mrf.mxu1  ;;  %v14850_v20 = vld [vmem:[#allocation16_spill] sm:$0xff] }
 0x8c5   :  { %v8660_v24 = vpop.f32.mrf.mxu3  ;;  %v7214_v60 = vadd.f32 %v7036_v42, %v6427_v36  ;;  %v6429_v44 = vadd.f32 %v13357_v18, %v14850_v20  ;;  %v7329_v36 = vld [vmem:[#allocation2 + $0x569] sm:$0xff]  ;;  %v14853_v20 = vld [vmem:[#allocation19_spill] sm:$0xff] }
 0x8c6   :  { %v8100_v57 = vadd.f32 %v13461_v46, %v8000_v40  ;;  %v8661_v41 = vadd.f32 %v13727_v56, %v8660_v24 }
 0x8c7   :  { %9780 = vmatmul.msk.f32.gmra.mxu1 %vm827_vm2, %v6539_v11 }
 0x8c8   :  { %v8196_v8 = vmax.f32 %v8100_v57, 0.0  ;;  %8874 = vst.msk [vmem:[%s14372_s8 + $0x128] sm:$0xff] %vm827_vm2, %v8661_v41  ;;  %9876 = vmatmul.msk.f32.gmra.mxu2 %vm827_vm2, %v7326_v7 }
 0x8ca   :  { %9955 = vmatmul.msk.f32.gmra.mxu3 %vm827_vm2, %v8196_v8  ;;  %v14851_v8 = vld [vmem:[#allocation17_spill] sm:$0xff] }
 0x8cb   :  { %v7823_v22 = vpop.f32.mrf.mxu2 }
 0x8cc   :  { %v8001_v61 = vadd.f32 %v7823_v22, %v7214_v60  ;;  %v7039_v49 = vpop.f32.mrf.mxu1  ;;  %v6430_v60 = vadd.f32 %v13384_v45, %v14851_v8  ;;  %v13863_v45 = vld [vmem:[%s14370_s4] ss:$0 sm:$0xff] }
 0x8cd   :  { %v8663_v26 = vpop.f32.mrf.mxu3  ;;  %v7215_v43 = vadd.f32 %v7039_v49, %v6428_v54  ;;  %v14852_v54 = vld [vmem:[#allocation18_spill] sm:$0xff] }
 0x8ce   :  { %v8101_v53 = vadd.f32 %v13461_v46, %v8001_v61  ;;  %v8664_v63 = vadd.f32 %v13727_v56, %v8663_v26 }
 0x8cf   :  { %9781 = vmatmul.msk.f32.gmra.mxu1 %vm827_vm2, %v6540_v15 }
 0x8d0   :  { %v8197_v2 = vmax.f32 %v8101_v53, 0.0  ;;  %8875 = vst.msk [vmem:[%s14372_s8 + $0x130] sm:$0xff] %vm827_vm2, %v8664_v63  ;;  %9877 = vmatmul.msk.f32.gmra.mxu2 %vm827_vm2, %v7327_v34  ;;  %v6543_v34 = vld [vmem:[#allocation2 + $0x570] sm:$0xff] }
 0x8d2   :  { %9956 = vmatmul.msk.f32.gmra.mxu3 %vm827_vm2, %v8197_v2  ;;  %v6431_v2 = vadd.f32 %v13401_v6, %v14852_v54 }
 0x8d3   :  { %v7826_v10 = vpop.f32.mrf.mxu2 }
 0x8d4   :  { %v8002_v38 = vadd.f32 %v7826_v10, %v7215_v43  ;;  %v7042_v51 = vpop.f32.mrf.mxu1 }
 0x8d5   :  { %v8666_v3 = vpop.f32.mrf.mxu3  ;;  %v7216_v42 = vadd.f32 %v7042_v51, %v6429_v44  ;;  %v6432_v44 = vadd.f32 %v13416_v19, %v14853_v20 }
 0x8d6   :  { %v8102_v32 = vadd.f32 %v13461_v46, %v8002_v38  ;;  %v8667_v4 = vadd.f32 %v13727_v56, %v8666_v3 }
 0x8d7   :  { %9782 = vmatmul.msk.f32.gmra.mxu1 %vm827_vm2, %v6541_v14  ;;  %v6544_v14 = vld [vmem:[#allocation2 + $0x588] sm:$0xff] }
 0x8d8   :  { %v8198_v40 = vmax.f32 %v8102_v32, 0.0  ;;  %8876 = vst.msk [vmem:[%s14372_s8 + $0x138] sm:$0xff] %vm827_vm2, %v8667_v4  ;;  %9878 = vmatmul.msk.f32.gmra.mxu2 %vm827_vm2, %v7328_v62  ;;  %v7331_v62 = vld [vmem:[#allocation2 + $0x589] sm:$0xff] }
 0x8da   :  { %9957 = vmatmul.msk.f32.gmra.mxu3 %vm827_vm2, %v8198_v40 }
 0x8db   :  { %v7829_v24 = vpop.f32.mrf.mxu2 }
 0x8dc   :  { %v8003_v57 = vadd.f32 %v7829_v24, %v7216_v42  ;;  %v7045_v41 = vpop.f32.mrf.mxu1 }
 0x8dd   :  { %v8669_v11 = vpop.f32.mrf.mxu3  ;;  %v7217_v61 = vadd.f32 %v7045_v41, %v6430_v60 }
 0x8de   :  { %v8103_v7 = vadd.f32 %v13461_v46, %v8003_v57  ;;  %v8670_v18 = vadd.f32 %v13727_v56, %v8669_v11 }
 0x8df   :  { %9783 = vmatmul.msk.f32.gmra.mxu1 %vm827_vm2, %v6542_v59  ;;  %v7332_v59 = vld [vmem:[#allocation2 + $0x591] sm:$0xff] }
 0x8e0   :  { %v8199_v22 = vmax.f32 %v8103_v7, 0.0  ;;  %8877 = vst.msk [vmem:[%s14372_s8 + $0x140] sm:$0xff] %vm827_vm2, %v8670_v18  ;;  %9879 = vmatmul.msk.f32.gmra.mxu2 %vm827_vm2, %v7329_v36  ;;  %v6545_v18 = vld [vmem:[#allocation2 + $0x590] sm:$0xff]  ;;  %v14854_v36 = vld [vmem:[#allocation20_spill] sm:$0xff] }
 0x8e1   :  { %v6433_v8 = vadd.f32 %v13434_v13, %v14854_v36 }
 0x8e2   :  { %9958 = vmatmul.msk.f32.gmra.mxu3 %vm827_vm2, %v8199_v22 }
 0x8e3   :  { %v7832_v46 = vpop.f32.mrf.mxu2 }
 0x8e4   :  { %v8004_v49 = vadd.f32 %v7832_v46, %v7217_v61  ;;  %v7048_v26 = vpop.f32.mrf.mxu1 }
 0x8e5   :  { %v8672_v53 = vpop.f32.mrf.mxu3  ;;  %v7218_v10 = vadd.f32 %v7048_v26, %v6431_v2 }
 0x8e6   :  { %v8104_v63 = vadd.f32 %v13863_v45, %v8004_v49  ;;  %v8673_v15 = vadd.f32 %v13727_v56, %v8672_v53 }
 0x8e7   :  { %9784 = vmatmul.msk.f32.gmra.mxu1 %vm827_vm2, %v6543_v34  ;;  %v14855_v34 = vld [vmem:[#allocation21_spill] sm:$0xff] }
 0x8e8   :  { %v8200_v43 = vmax.f32 %v8104_v63, 0.0  ;;  %8878 = vst.msk [vmem:[%s14372_s8 + $0x148] sm:$0xff] %vm827_vm2, %v8673_v15  ;;  %9880 = vmatmul.msk.f32.gmra.mxu2 %vm827_vm2, %v7330_v48  ;;  %v6546_v63 = vld [vmem:[#allocation2 + $0x5a8] sm:$0xff]  ;;  %v6434_v48 = vadd.f32 %v13454_v21, %v14855_v34 }
 0x8e9   :  { %v7333_v15 = vld [vmem:[#allocation2 + $0x5a9] sm:$0xff] }
 0x8ea   :  { %9959 = vmatmul.msk.f32.gmra.mxu3 %vm827_vm2, %v8200_v43 }
 0x8eb   :  { %v7835_v38 = vpop.f32.mrf.mxu2 }
 0x8ec   :  { %v8005_v51 = vadd.f32 %v7835_v38, %v7218_v10  ;;  %v7051_v3 = vpop.f32.mrf.mxu1 }
 0x8ed   :  { %v8675_v32 = vpop.f32.mrf.mxu3  ;;  %v7219_v42 = vadd.f32 %v7051_v3, %v6432_v44 }
 0x8ee   :  { %v8105_v4 = vadd.f32 %v13863_v45, %v8005_v51  ;;  %v8676_v6 = vadd.f32 %v13727_v56, %v8675_v32  ;;  %v6547_v32 = vld [vmem:[#allocation2 + $0x5b0] sm:$0xff] }
 0x8ef   :  { %9785 = vmatmul.msk.f32.gmra.mxu1 %vm827_vm2, %v6544_v14 }
 0x8f0   :  { %v8201_v40 = vmax.f32 %v8105_v4, 0.0  ;;  %8879 = vst.msk [vmem:[%s14372_s8 + $0x150] sm:$0xff] %vm827_vm2, %v8676_v6  ;;  %9881 = vmatmul.msk.f32.gmra.mxu2 %vm827_vm2, %v7331_v62  ;;  %v7334_v4 = vld [vmem:[#allocation2 + $0x5b1] sm:$0xff] }
 0x8f1   :  { %v14856_v6 = vld [vmem:[#allocation22_spill] sm:$0xff] }
 0x8f2   :  { %9960 = vmatmul.msk.f32.gmra.mxu3 %vm827_vm2, %v8201_v40  ;;  %v6435_v14 = vadd.f32 %v13474_v31, %v14856_v6 }
 0x8f3   :  { %v7838_v24 = vpop.f32.mrf.mxu2 }
 0x8f4   :  { %v8006_v57 = vadd.f32 %v7838_v24, %v7219_v42  ;;  %v7054_v41 = vpop.f32.mrf.mxu1 }
 0x8f5   :  { %v8678_v11 = vpop.f32.mrf.mxu3  ;;  %v7220_v22 = vadd.f32 %v7054_v41, %v6433_v8  ;;  %v6548_v41 = vld [vmem:[#allocation2 + $0x5c8] sm:$0xff] }
 0x8f6   :  { %v8106_v7 = vadd.f32 %v13863_v45, %v8006_v57  ;;  %v8679_v19 = vadd.f32 %v13727_v56, %v8678_v11  ;;  %v7335_v11 = vld [vmem:[#allocation2 + $0x5c9] sm:$0xff] }
 0x8f7   :  { %9786 = vmatmul.msk.f32.gmra.mxu1 %vm827_vm2, %v6545_v18 }
 0x8f8   :  { %v8202_v60 = vmax.f32 %v8106_v7, 0.0  ;;  %8880 = vst.msk [vmem:[%s14372_s8 + $0x158] sm:$0xff] %vm827_vm2, %v8679_v19  ;;  %9882 = vmatmul.msk.f32.gmra.mxu2 %vm827_vm2, %v7332_v59  ;;  %v14857_v7 = vld [vmem:[#allocation23_spill] sm:$0xff] }
 0x8f9   :  { %v6436_v19 = vadd.f32 %v13489_v52, %v14857_v7 }
 0x8fa   :  { %9961 = vmatmul.msk.f32.gmra.mxu3 %vm827_vm2, %v8202_v60 }
 0x8fb   :  { %v7841_v61 = vpop.f32.mrf.mxu2 }
 0x8fc   :  { %v8007_v46 = vadd.f32 %v7841_v61, %v7220_v22  ;;  %v7057_v49 = vpop.f32.mrf.mxu1 }
 0x8fd   :  { %v8681_v26 = vpop.f32.mrf.mxu3  ;;  %v7221_v2 = vadd.f32 %v7057_v49, %v6434_v48  ;;  %v7336_v49 = vld [vmem:[#allocation2 + $0x5d1] sm:$0xff] }
 0x8fe   :  { %v8107_v53 = vadd.f32 %v13863_v45, %v8007_v46  ;;  %v8682_v13 = vadd.f32 %v13727_v56, %v8681_v26  ;;  %v6549_v46 = vld [vmem:[#allocation2 + $0x5d0] sm:$0xff]  ;;  %v14858_v26 = vld [vmem:[#allocation24_spill] sm:$0xff] }
 0x8ff   :  { %9787 = vmatmul.msk.f32.gmra.mxu1 %vm827_vm2, %v6546_v63 }
 0x900   :  { %v8203_v54 = vmax.f32 %v8107_v53, 0.0  ;;  %8881 = vst.msk [vmem:[%s14372_s8 + $0x160] sm:$0xff] %vm827_vm2, %v8682_v13  ;;  %9883 = vmatmul.msk.f32.gmra.mxu2 %vm827_vm2, %v7333_v15  ;;  %v6437_v53 = vadd.f32 %v13507_v33, %v14858_v26 }
 0x902   :  { %9962 = vmatmul.msk.f32.gmra.mxu3 %vm827_vm2, %v8203_v54 }
 0x903   :  { %v7844_v43 = vpop.f32.mrf.mxu2 }
 0x904   :  { %v8008_v10 = vadd.f32 %v7844_v43, %v7221_v2  ;;  %v7060_v38 = vpop.f32.mrf.mxu1  ;;  %v13942_v2 = vpop.f32.mrf.mxu0 }
 0x905   :  { %v8684_v51 = vpop.f32.mrf.mxu3  ;;  %v7222_v20 = vadd.f32 %v7060_v38, %v6435_v14  ;;  %v7337_v38 = vld [vmem:[#allocation2 + $0x5e9] sm:$0xff] }
 0x906   :  { %v8108_v3 = vadd.f32 %v13863_v45, %v8008_v10  ;;  %v8685_v21 = vadd.f32 %v13727_v56, %v8684_v51  ;;  %v6550_v10 = vld [vmem:[#allocation2 + $0x5e8] sm:$0xff]  ;;  %v14859_v51 = vld [vmem:[#allocation25_spill] sm:$0xff] }
 0x907   :  { %9788 = vmatmul.msk.f32.gmra.mxu1 %vm827_vm2, %v6547_v32 }
 0x908   :  { %v8204_v62 = vmax.f32 %v8108_v3, 0.0  ;;  %8882 = vst.msk [vmem:[%s14372_s8 + $0x168] sm:$0xff] %vm827_vm2, %v8685_v21  ;;  %9884 = vmatmul.msk.f32.gmra.mxu2 %vm827_vm2, %v7334_v4  ;;  %v6438_v3 = vadd.f32 %v13527_v39, %v14859_v51 }
 0x90a   :  { %9963 = vmatmul.msk.f32.gmra.mxu3 %vm827_vm2, %v8204_v62 }
 0x90b   :  { %v7847_v44 = vpop.f32.mrf.mxu2 }
 0x90c   :  { %v8009_v40 = vadd.f32 %v7847_v44, %v7222_v20  ;;  %v7063_v42 = vpop.f32.mrf.mxu1  ;;  %v6551_v44 = vld [vmem:[#allocation2 + $0x5f0] sm:$0xff] }
 0x90d   :  { %v8687_v24 = vpop.f32.mrf.mxu3  ;;  %v7223_v59 = vadd.f32 %v7063_v42, %v6436_v19  ;;  %v14860_v42 = vld [vmem:[#allocation179_spill] sm:$0xff] }
 0x90e   :  { %v8109_v57 = vadd.f32 %v13863_v45, %v8009_v40  ;;  %v8688_v31 = vadd.f32 %v13727_v56, %v8687_v24  ;;  %v7338_v40 = vld [vmem:[#allocation2 + $0x5f1] sm:$0xff]  ;;  %v6439_v24 = vadd.f32 %v13542_v29, %v14860_v42 }
 0x90f   :  { %9789 = vmatmul.msk.f32.gmra.mxu1 %vm827_vm2, %v6548_v41 }
 0x910   :  { %v8205_v18 = vmax.f32 %v8109_v57, 0.0  ;;  %8883 = vst.msk [vmem:[%s14372_s8 + $0x170] sm:$0xff] %vm827_vm2, %v8688_v31  ;;  %9885 = vmatmul.msk.f32.gmra.mxu2 %vm827_vm2, %v7335_v11  ;;  %v13959_v57 = vpop.f32.mrf.mxu0 }
 0x912   :  { %9964 = vmatmul.msk.f32.gmra.mxu3 %vm827_vm2, %v8205_v18 }
 0x913   :  { %v7850_v36 = vpop.f32.mrf.mxu2 }
 0x914   :  { %v8010_v8 = vadd.f32 %v7850_v36, %v7223_v59  ;;  %v7066_v60 = vpop.f32.mrf.mxu1  ;;  %v6552_v36 = vld [vmem:[#allocation2 + $0x608] sm:$0xff] }
 0x915   :  { %v8690_v22 = vpop.f32.mrf.mxu3  ;;  %v7224_v63 = vadd.f32 %v7066_v60, %v6437_v53  ;;  %v14861_v60 = vld [vmem:[#allocation180_spill] sm:$0xff] }
 0x916   :  { %v8110_v61 = vadd.f32 %v13863_v45, %v8010_v8  ;;  %v8691_v52 = vadd.f32 %v13727_v56, %v8690_v22  ;;  %v7339_v8 = vld [vmem:[#allocation2 + $0x609] sm:$0xff]  ;;  %v6440_v22 = vadd.f32 %v13557_v9, %v14861_v60 }
 0x917   :  { %9790 = vmatmul.msk.f32.gmra.mxu1 %vm827_vm2, %v6549_v46 }
 0x918   :  { %v8206_v13 = vmax.f32 %v8110_v61, 0.0  ;;  %8884 = vst.msk [vmem:[%s14372_s8 + $0x178] sm:$0xff] %vm827_vm2, %v8691_v52  ;;  %9886 = vmatmul.msk.f32.gmra.mxu2 %vm827_vm2, %v7336_v49  ;;  %v13978_v52 = vpop.f32.mrf.mxu0 }
 0x91a   :  { %9965 = vmatmul.msk.f32.gmra.mxu3 %vm827_vm2, %v8206_v13 }
 0x91b   :  { %v7853_v15 = vpop.f32.mrf.mxu2 }
 0x91c   :  { %v8011_v34 = vadd.f32 %v7853_v15, %v7224_v63  ;;  %v7069_v48 = vpop.f32.mrf.mxu1  ;;  %v6553_v15 = vld [vmem:[#allocation2 + $0x610] sm:$0xff] }
 0x91d   :  { %v8693_v54 = vpop.f32.mrf.mxu3  ;;  %v7225_v32 = vadd.f32 %v7069_v48, %v6438_v3  ;;  %v14862_v48 = vld [vmem:[#allocation181_spill] sm:$0xff] }
 0x91e   :  { %v8111_v33 = vadd.f32 %v13863_v45, %v8011_v34  ;;  %v8694_v43 = vadd.f32 %v13727_v56, %v8693_v54  ;;  %v7340_v34 = vld [vmem:[#allocation2 + $0x611] sm:$0xff]  ;;  %v6441_v54 = vadd.f32 %v13575_v30, %v14862_v48 }
 0x91f   :  { %9791 = vmatmul.msk.f32.gmra.mxu1 %vm827_vm2, %v6550_v10 }
 0x920   :  { %v8207_v21 = vmax.f32 %v8111_v33, 0.0  ;;  %8885 = vst.msk [vmem:[%s14372_s8 + $0x180] sm:$0xff] %vm827_vm2, %v8694_v43  ;;  %9887 = vmatmul.msk.f32.gmra.mxu2 %vm827_vm2, %v7337_v38  ;;  %v13992_v38 = vpop.f32.mrf.mxu0 }
 0x922   :  { %9966 = vmatmul.msk.f32.gmra.mxu3 %vm827_vm2, %v8207_v21 }
 0x923   :  { %v7856_v4 = vpop.f32.mrf.mxu2 }
 0x924   :  { %v8012_v6 = vadd.f32 %v7856_v4, %v7225_v32  ;;  %v7072_v14 = vpop.f32.mrf.mxu1  ;;  %v6554_v4 = vld [vmem:[#allocation2 + $0x628] sm:$0xff] }
 0x925   :  { %v8696_v62 = vpop.f32.mrf.mxu3  ;;  %v7226_v41 = vadd.f32 %v7072_v14, %v6439_v24  ;;  %v14863_v14 = vld [vmem:[#allocation182_spill] sm:$0xff] }
 0x926   :  { %v8112_v20 = vadd.f32 %v13863_v45, %v8012_v6  ;;  %v8697_v39 = vadd.f32 %v13727_v56, %v8696_v62  ;;  %v7341_v6 = vld [vmem:[#allocation2 + $0x629] sm:$0xff]  ;;  %v6442_v62 = vadd.f32 %v13595_v5, %v14863_v14 }
 0x927   :  { %9792 = vmatmul.msk.f32.gmra.mxu1 %vm827_vm2, %v6551_v44 }
 0x928   :  { %v8208_v31 = vmax.f32 %v8112_v20, 0.0  ;;  %8886 = vst.msk [vmem:[%s14372_s8 + $0x188] sm:$0xff] %vm827_vm2, %v8697_v39  ;;  %9888 = vmatmul.msk.f32.gmra.mxu2 %vm827_vm2, %v7338_v40 }
 0x92a   :  { %9967 = vmatmul.msk.f32.gmra.mxu3 %vm827_vm2, %v8208_v31  ;;  %v14005_v31 = vpop.f32.mrf.mxu0 }
 0x92b   :  { %v7859_v11 = vpop.f32.mrf.mxu2 }
 0x92c   :  { %v8013_v7 = vadd.f32 %v7859_v11, %v7226_v41  ;;  %v7075_v19 = vpop.f32.mrf.mxu1  ;;  %v6555_v11 = vld [vmem:[#allocation2 + $0x630] sm:$0xff] }
 0x92d   :  { %v8699_v18 = vpop.f32.mrf.mxu3  ;;  %v7227_v46 = vadd.f32 %v7075_v19, %v6440_v22  ;;  %v14864_v19 = vld [vmem:[#allocation183_spill] sm:$0xff] }
 0x92e   :  { %v8113_v29 = vadd.f32 %v13863_v45, %v8013_v7  ;;  %v8700_v59 = vadd.f32 %v13727_v56, %v8699_v18  ;;  %v7342_v7 = vld [vmem:[#allocation2 + $0x631] sm:$0xff]  ;;  %v6443_v18 = vadd.f32 %v13610_v25, %v14864_v19 }
 0x92f   :  { %9793 = vmatmul.msk.f32.gmra.mxu1 %vm827_vm2, %v6552_v36 }
 0x930   :  { %v8209_v61 = vmax.f32 %v8113_v29, 0.0  ;;  %8887 = vst.msk [vmem:[%s14372_s8 + $0x190] sm:$0xff] %vm827_vm2, %v8700_v59  ;;  %9889 = vmatmul.msk.f32.gmra.mxu2 %vm827_vm2, %v7339_v8 }
 0x932   :  { %9968 = vmatmul.msk.f32.gmra.mxu3 %vm827_vm2, %v8209_v61  ;;  %v14865_v61 = vld [vmem:[#allocation30_spill] sm:$0xff] }
 0x933   :  { %v7862_v49 = vpop.f32.mrf.mxu2 }
 0x934   :  { %v8014_v26 = vadd.f32 %v7862_v49, %v7227_v46  ;;  %v7078_v53 = vpop.f32.mrf.mxu1  ;;  %v14866_v46 = vld [vmem:[#allocation194_spill] sm:$0xff] }
 0x935   :  { %v8702_v13 = vpop.f32.mrf.mxu3  ;;  %v7228_v43 = vadd.f32 %v7078_v53, %v6441_v54  ;;  %v5656_v25 = vadd.f32 %v14866_v46, %v14865_v61  ;;  %v6556_v53 = vld [vmem:[#allocation2 + $0x648] sm:$0xff]  ;;  %v14872_v61 = vld [vmem:[#allocation201_spill] sm:$0xff] }
 0x936   :  { %v8114_v9 = vadd.f32 %v13863_v45, %v8014_v26  ;;  %v8703_v63 = vadd.f32 %v13727_v56, %v8702_v13  ;;  %v7343_v13 = vld [vmem:[#allocation2 + $0x649] sm:$0xff] }
 0x937   :  { %9794 = vmatmul.msk.f32.gmra.mxu1 %vm827_vm2, %v6553_v15 }
 0x938   :  { %v8210_v33 = vmax.f32 %v8114_v9, 0.0  ;;  %8888 = vst.msk [vmem:[%s14372_s8 + $0x198] sm:$0xff] %vm827_vm2, %v8703_v63  ;;  %9890 = vmatmul.msk.f32.gmra.mxu2 %vm827_vm2, %v7340_v34  ;;  %v6444_v9 = vadd.f32 %v13942_v2, %v5656_v25  ;;  %v14023_v63 = vpop.f32.mrf.mxu0  ;;  %v14867_v2 = vld [vmem:[#allocation184_spill] sm:$0xff] }
 0x93a   :  { %9969 = vmatmul.msk.f32.gmra.mxu3 %vm827_vm2, %v8210_v33 }
 0x93b   :  { %v7865_v10 = vpop.f32.mrf.mxu2 }
 0x93c   :  { %v8015_v51 = vadd.f32 %v7865_v10, %v7228_v43  ;;  %v7081_v3 = vpop.f32.mrf.mxu1  ;;  %v14868_v10 = vld [vmem:[#allocation196_spill] sm:$0xff] }
 0x93d   :  { %v8705_v21 = vpop.f32.mrf.mxu3  ;;  %v7229_v39 = vadd.f32 %v7081_v3, %v6442_v62 }
 0x93e   :  { %v8115_v30 = vadd.f32 %v13863_v45, %v8015_v51  ;;  %v8706_v32 = vadd.f32 %v13727_v56, %v8705_v21  ;;  %v5657_v51 = vadd.f32 %v14868_v10, %v14867_v2  ;;  %v14874_v2 = vld [vmem:[#allocation203_spill] sm:$0xff] }
 0x93f   :  { %9795 = vmatmul.msk.f32.gmra.mxu1 %vm827_vm2, %v6554_v4 }
 0x940   :  { %v8211_v20 = vmax.f32 %v8115_v30, 0.0  ;;  %8889 = vst.msk [vmem:[%s14372_s8 + $0x1a0] sm:$0xff] %vm827_vm2, %v8706_v32  ;;  %9891 = vmatmul.msk.f32.gmra.mxu2 %vm827_vm2, %v7341_v6  ;;  %v6557_v30 = vld [vmem:[#allocation2 + $0x650] sm:$0xff]  ;;  %v6445_v4 = vadd.f32 %v13959_v57, %v5657_v51  ;;  %v14043_v14 = vpop.f32.mrf.mxu0 }
 0x941   :  { %v7344_v32 = vld [vmem:[#allocation2 + $0x651] sm:$0xff] }
 0x942   :  { %9970 = vmatmul.msk.f32.gmra.mxu3 %vm827_vm2, %v8211_v20  ;;  %v14869_v57 = vld [vmem:[#allocation185_spill] sm:$0xff] }
 0x943   :  { %v7868_v44 = vpop.f32.mrf.mxu2 }
 0x944   :  { %v8016_v40 = vadd.f32 %v7868_v44, %v7229_v39  ;;  %v7084_v42 = vpop.f32.mrf.mxu1 }
 0x945   :  { %v8708_v24 = vpop.f32.mrf.mxu3  ;;  %v7230_v59 = vadd.f32 %v7084_v42, %v6443_v18  ;;  %v14870_v42 = vld [vmem:[#allocation198_spill] sm:$0xff] }
 0x946   :  { %v8116_v5 = vadd.f32 %v13863_v45, %v8016_v40  ;;  %v8709_v41 = vadd.f32 %v13727_v56, %v8708_v24  ;;  %v5658_v24 = vadd.f32 %v14870_v42, %v14869_v57  ;;  %v14876_v57 = vld [vmem:[#allocation205_spill] sm:$0xff] }
 0x947   :  { %9796 = vmatmul.msk.f32.gmra.mxu1 %vm827_vm2, %v6555_v11  ;;  %v6558_v11 = vld [vmem:[#allocation2 + $0x668] sm:$0xff] }
 0x948   :  { %v8212_v29 = vmax.f32 %v8116_v5, 0.0  ;;  %8890 = vst.msk [vmem:[%s14372_s8 + $0x1a8] sm:$0xff] %vm827_vm2, %v8709_v41  ;;  %9892 = vmatmul.msk.f32.gmra.mxu2 %vm827_vm2, %v7342_v7  ;;  %v7345_v7 = vld [vmem:[#allocation2 + $0x669] sm:$0xff]  ;;  %v6446_v19 = vadd.f32 %v13978_v52, %v5658_v24  ;;  %v14871_v52 = vld [vmem:[#allocation186_spill] sm:$0xff] }
 0x949   :  { %v5659_v46 = vadd.f32 %v14872_v61, %v14871_v52  ;;  %v14877_v52 = vld [vmem:[#allocation189_spill] sm:$0xff]  ;;  %v14878_v61 = vld [vmem:[#allocation207_spill] sm:$0xff] }
 0x94a   :  { %9971 = vmatmul.msk.f32.gmra.mxu3 %vm827_vm2, %v8212_v29 }
 0x94b   :  { %v7871_v36 = vpop.f32.mrf.mxu2 }
 0x94c   :  { %v8017_v8 = vadd.f32 %v7871_v36, %v7230_v59  ;;  %v7087_v60 = vpop.f32.mrf.mxu1  ;;  %v14058_v36 = vpop.f32.mrf.mxu0 }
 0x94d   :  { %v8711_v22 = vpop.f32.mrf.mxu3  ;;  %v7231_v34 = vadd.f32 %v7087_v60, %v6444_v9 }
 0x94e   :  { %v8117_v49 = vadd.f32 %v13863_v45, %v8017_v8  ;;  %v8712_v26 = vadd.f32 %v13727_v56, %v8711_v22 }
 0x94f   :  { %9797 = vmatmul.msk.f32.gmra.mxu1 %vm827_vm2, %v6556_v53  ;;  %v7346_v53 = vld [vmem:[#allocation2 + $0x671] sm:$0xff] }
 0x950   :  { %v8213_v15 = vmax.f32 %v8117_v49, 0.0  ;;  %8891 = vst.msk [vmem:[%s14372_s8 + $0x1b0] sm:$0xff] %vm827_vm2, %v8712_v26  ;;  %9893 = vmatmul.msk.f32.gmra.mxu2 %vm827_vm2, %v7343_v13  ;;  %v6559_v26 = vld [vmem:[#allocation2 + $0x670] sm:$0xff]  ;;  %v6447_v13 = vadd.f32 %v13992_v38, %v5659_v46  ;;  %v5662_v46 = vadd.f32 %v14878_v61, %v14877_v52 }
 0x952   :  { %9972 = vmatmul.msk.f32.gmra.mxu3 %vm827_vm2, %v8213_v15 }
 0x953   :  { %v7874_v48 = vpop.f32.mrf.mxu2 }
 0x954   :  { %v8018_v54 = vadd.f32 %v7874_v48, %v7231_v34  ;;  %v7090_v33 = vpop.f32.mrf.mxu1  ;;  %v14074_v10 = vpop.f32.mrf.mxu0 }
 0x955   :  { %v8714_v43 = vpop.f32.mrf.mxu3  ;;  %v7232_v62 = vadd.f32 %v7090_v33, %v6445_v4 }
 0x956   :  { %v8118_v3 = vadd.f32 %v13863_v45, %v8018_v54  ;;  %v8715_v21 = vadd.f32 %v13727_v56, %v8714_v43  ;;  %v14873_v43 = vld [vmem:[#allocation187_spill] sm:$0xff] }
 0x957   :  { %9798 = vmatmul.msk.f32.gmra.mxu1 %vm827_vm2, %v6557_v30  ;;  %v5660_v38 = vadd.f32 %v14874_v2, %v14873_v43  ;;  %v7347_v30 = vld [vmem:[#allocation2 + $0x689] sm:$0xff]  ;;  %v14879_v43 = vld [vmem:[#allocation38_spill] sm:$0xff]  ;;  %v14880_v2 = vld [vmem:[#allocation211_spill] sm:$0xff] }
 0x958   :  { %v8214_v6 = vmax.f32 %v8118_v3, 0.0  ;;  %8892 = vst.msk [vmem:[%s14372_s8 + $0x1b8] sm:$0xff] %vm827_vm2, %v8715_v21  ;;  %9894 = vmatmul.msk.f32.gmra.mxu2 %vm827_vm2, %v7344_v32  ;;  %v6560_v21 = vld [vmem:[#allocation2 + $0x688] sm:$0xff] }
 0x959   :  { %v6448_v32 = vadd.f32 %v14005_v31, %v5660_v38  ;;  %v5663_v38 = vadd.f32 %v14880_v2, %v14879_v43 }
 0x95a   :  { %9973 = vmatmul.msk.f32.gmra.mxu3 %vm827_vm2, %v8214_v6 }
 0x95b   :  { %v7877_v20 = vpop.f32.mrf.mxu2 }
 0x95c   :  { %v8019_v39 = vadd.f32 %v7877_v20, %v7232_v62  ;;  %v7093_v44 = vpop.f32.mrf.mxu1 }
 0x95d   :  { %v8717_v40 = vpop.f32.mrf.mxu3  ;;  %v7233_v29 = vadd.f32 %v7093_v44, %v6446_v19 }
 0x95e   :  { %v8119_v5 = vadd.f32 %v13863_v45, %v8019_v39  ;;  %v8718_v41 = vadd.f32 %v13727_v56, %v8717_v40  ;;  %v14875_v40 = vld [vmem:[#allocation188_spill] sm:$0xff] }
 0x95f   :  { %9799 = vmatmul.msk.f32.gmra.mxu1 %vm827_vm2, %v6558_v11  ;;  %v5661_v31 = vadd.f32 %v14876_v57, %v14875_v40  ;;  %v14128_v57 = vld [vmem:[%s14371_s6] ss:$0 sm:$0xff] }
 0x960   :  { %v8215_v18 = vmax.f32 %v8119_v5, 0.0  ;;  %8893 = vst.msk [vmem:[%s14372_s8 + $0x1c0] sm:$0xff] %vm827_vm2, %v8718_v41  ;;  %9895 = vmatmul.msk.f32.gmra.mxu2 %vm827_vm2, %v7345_v7  ;;  %v6561_v5 = vld [vmem:[#allocation2 + $0x690] sm:$0xff]  ;;  %v6327_v7 = vpop.f32.mrf.mxu0 }
 0x961   :  { %v7348_v41 = vld [vmem:[#allocation2 + $0x691] sm:$0xff]  ;;  %v6449_v11 = vadd.f32 %v14023_v63, %v5661_v31  ;;  %v7349_v63 = vld [vmem:[#allocation2 + $0x6a9] sm:$0xff] }
 0x962   :  { %9974 = vmatmul.msk.f32.gmra.mxu3 %vm827_vm2, %v8215_v18 }
 0x963   :  { %v7880_v59 = vpop.f32.mrf.mxu2 }
 0x964   :  { %v8020_v8 = vadd.f32 %v7880_v59, %v7233_v29  ;;  %v7096_v60 = vpop.f32.mrf.mxu1 }
 0x965   :  { %v8720_v22 = vpop.f32.mrf.mxu3  ;;  %v7234_v15 = vadd.f32 %v7096_v60, %v6447_v13 }
 0x966   :  { %v8120_v25 = vadd.f32 %v13863_v45, %v8020_v8  ;;  %v8721_v49 = vadd.f32 %v13727_v56, %v8720_v22  ;;  %v6562_v22 = vld [vmem:[#allocation2 + $0x6a8] sm:$0xff] }
 0x967   :  { %9800 = vmatmul.msk.f32.gmra.mxu1 %vm827_vm2, %v6559_v26  ;;  %v6450_v26 = vadd.f32 %v14043_v14, %v5662_v46  ;;  %v7350_v14 = vld [vmem:[#allocation2 + $0x6b1] sm:$0xff] }
 0x968   :  { %v8216_v9 = vmax.f32 %v8120_v25, 0.0  ;;  %8894 = vst.msk [vmem:[%s14372_s8 + $0x1c8] sm:$0xff] %vm827_vm2, %v8721_v49  ;;  %9896 = vmatmul.msk.f32.gmra.mxu2 %vm827_vm2, %v7346_v53  ;;  %v6330_v13 = vpop.f32.mrf.mxu0 }
 0x96a   :  { %9975 = vmatmul.msk.f32.gmra.mxu3 %vm827_vm2, %v8216_v9 }
 0x96b   :  { %v7883_v34 = vpop.f32.mrf.mxu2 }
 0x96c   :  { %v8021_v48 = vadd.f32 %v7883_v34, %v7234_v15  ;;  %v7099_v54 = vpop.f32.mrf.mxu1 }
 0x96d   :  { %v8723_v33 = vpop.f32.mrf.mxu3  ;;  %v7235_v6 = vadd.f32 %v7099_v54, %v6448_v32 }
 0x96e   :  { %v8121_v51 = vadd.f32 %v13863_v45, %v8021_v48  ;;  %v8724_v3 = vadd.f32 %v13727_v56, %v8723_v33  ;;  %v6563_v33 = vld [vmem:[#allocation2 + $0x6b0] sm:$0xff] }
 0x96f   :  { %9801 = vmatmul.msk.f32.gmra.mxu1 %vm827_vm2, %v6560_v21  ;;  %v6451_v21 = vadd.f32 %v14058_v36, %v5663_v38  ;;  %v14882_v36 = vld [vmem:[#allocation213_spill] sm:$0xff] }
 0x970   :  { %v8217_v4 = vmax.f32 %v8121_v51, 0.0  ;;  %8895 = vst.msk [vmem:[%s14372_s8 + $0x1d0] sm:$0xff] %vm827_vm2, %v8724_v3  ;;  %9897 = vmatmul.msk.f32.gmra.mxu2 %vm827_vm2, %v7347_v30 }
 0x972   :  { %9976 = vmatmul.msk.f32.gmra.mxu3 %vm827_vm2, %v8217_v4 }
 0x973   :  { %v7886_v62 = vpop.f32.mrf.mxu2 }
 0x974   :  { %v8022_v20 = vadd.f32 %v7886_v62, %v7235_v6  ;;  %v7102_v39 = vpop.f32.mrf.mxu1  ;;  %v6333_v6 = vpop.f32.mrf.mxu0 }
 0x975   :  { %v8726_v44 = vpop.f32.mrf.mxu3  ;;  %v7236_v18 = vadd.f32 %v7102_v39, %v6449_v11  ;;  %v14881_v39 = vld [vmem:[#allocation190_spill] sm:$0xff] }
 0x976   :  { %v8122_v42 = vadd.f32 %v13863_v45, %v8022_v20  ;;  %v8727_v24 = vadd.f32 %v13727_v56, %v8726_v44  ;;  %v5664_v44 = vadd.f32 %v14882_v36, %v14881_v39 }
 0x977   :  { %9802 = vmatmul.msk.f32.gmra.mxu1 %vm827_vm2, %v6561_v5 }
 0x978   :  { %v8218_v19 = vmax.f32 %v8122_v42, 0.0  ;;  %8896 = vst.msk [vmem:[%s14372_s8 + $0x1d8] sm:$0xff] %vm827_vm2, %v8727_v24  ;;  %9898 = vmatmul.msk.f32.gmra.mxu2 %vm827_vm2, %v7348_v41  ;;  %v6452_v42 = vadd.f32 %v14074_v10, %v5664_v44 }
 0x97a   :  { %9977 = vmatmul.msk.f32.gmra.mxu3 %vm827_vm2, %v8218_v19 }
 0x97b   :  { %v7889_v29 = vpop.f32.mrf.mxu2 }
 0x97c   :  { %v8023_v59 = vadd.f32 %v7889_v29, %v7236_v18  ;;  %v7105_v8 = vpop.f32.mrf.mxu1  ;;  %v14883_v29 = vld [vmem:[#allocation191_spill] sm:$0xff] }
 0x97d   :  { %v8729_v60 = vpop.f32.mrf.mxu3  ;;  %v7237_v9 = vadd.f32 %v7105_v8, %v6450_v26 }
 0x97e   :  { %v8123_v25 = vadd.f32 %v13863_v45, %v8023_v59  ;;  %v8730_v49 = vadd.f32 %v13727_v56, %v8729_v60  ;;  %v14884_v59 = vld [vmem:[#allocation214_spill] sm:$0xff]  ;;  %v6336_v60 = vpop.f32.mrf.mxu0 }
 0x97f   :  { %9803 = vmatmul.msk.f32.gmra.mxu1 %vm827_vm2, %v6562_v22  ;;  %v5665_v8 = vadd.f32 %v14884_v59, %v14883_v29 }
 0x980   :  { %v8219_v53 = vmax.f32 %v8123_v25, 0.0  ;;  %8897 = vst.msk [vmem:[%s14372_s8 + $0x1e0] sm:$0xff] %vm827_vm2, %v8730_v49  ;;  %9899 = vmatmul.msk.f32.gmra.mxu2 %vm827_vm2, %v7349_v63 }
 0x981   :  { %v6453_v63 = vadd.f32 %v6327_v7, %v5665_v8 }
 0x982   :  { %9978 = vmatmul.msk.f32.gmra.mxu3 %vm827_vm2, %v8219_v53  ;;  %v14885_v53 = vld [vmem:[#allocation192_spill] sm:$0xff] }
 0x983   :  { %v7892_v15 = vpop.f32.mrf.mxu2 }
 0x984   :  { %v8024_v34 = vadd.f32 %v7892_v15, %v7237_v9  ;;  %v7108_v48 = vpop.f32.mrf.mxu1  ;;  %v5666_v9 = vadd.f32 %v13067_v28, %v14885_v53  ;;  %v14886_v28 = vld [vmem:[#allocation193_spill] sm:$0xff] }
 0x985   :  { %v8732_v54 = vpop.f32.mrf.mxu3  ;;  %v7238_v32 = vadd.f32 %v7108_v48, %v6451_v21 }
 0x986   :  { %v8124_v51 = vadd.f32 %v13863_v45, %v8024_v34  ;;  %v8733_v3 = vadd.f32 %v13727_v56, %v8732_v54  ;;  %v6454_v34 = vadd.f32 %v6330_v13, %v5666_v9  ;;  %v6339_v48 = vpop.f32.mrf.mxu0 }
 0x987   :  { %9804 = vmatmul.msk.f32.gmra.mxu1 %vm827_vm2, %v6563_v33 }
 0x988   :  { %v8220_v30 = vmax.f32 %v8124_v51, 0.0  ;;  %8898 = vst.msk [vmem:[%s14372_s8 + $0x1e8] sm:$0xff] %vm827_vm2, %v8733_v3  ;;  %9900 = vmatmul.msk.f32.gmra.mxu2 %vm827_vm2, %v7350_v14  ;;  %v5667_v51 = vadd.f32 %v13083_v1, %v14886_v28  ;;  %v14887_v1 = vld [vmem:[#allocation195_spill] sm:$0xff] }
 0x989   :  { %v5668_v36 = vadd.f32 %v13103_v16, %v14887_v1  ;;  %v14888_v16 = vld [vmem:[#allocation197_spill] sm:$0xff] }
 0x98a   :  { %9979 = vmatmul.msk.f32.gmra.mxu3 %vm827_vm2, %v8220_v30  ;;  %v6455_v21 = vadd.f32 %v6333_v6, %v5667_v51 }
 0x98b   :  { %v7895_v4 = vpop.f32.mrf.mxu2 }
 0x98c   :  { %v8025_v62 = vadd.f32 %v7895_v4, %v7238_v32  ;;  %v7111_v20 = vpop.f32.mrf.mxu1 }
 0x98d   :  { %v8735_v56 = vpop.f32.mrf.mxu3  ;;  %v7239_v5 = vadd.f32 %v7111_v20, %v6452_v42 }
 0x98e   :  { %v8125_v40 = vadd.f32 %v13863_v45, %v8025_v62  ;;  %v8736_v31 = vadd.f32 %v14128_v57, %v8735_v56  ;;  %v6342_v32 = vpop.f32.mrf.mxu0 }
 0x990   :  { %v8221_v24 = vmax.f32 %v8125_v40, 0.0  ;;  %8899 = vst.msk [vmem:[%s14372_s8 + $0x1f0] sm:$0xff] %vm827_vm2, %v8736_v31  ;;  %v6456_v40 = vadd.f32 %v6336_v60, %v5668_v36 }
 0x992   :  { %9980 = vmatmul.msk.f32.gmra.mxu3 %vm827_vm2, %v8221_v24 }
 0x993   :  { %v7898_v41 = vpop.f32.mrf.mxu2 }
 0x994   :  { %v8026_v11 = vadd.f32 %v7898_v41, %v7239_v5  ;;  %v7114_v19 = vpop.f32.mrf.mxu1 }
 0x995   :  { %v8738_v18 = vpop.f32.mrf.mxu3  ;;  %v7240_v61 = vadd.f32 %v7114_v19, %v6453_v63 }
 0x996   :  { %v8126_v22 = vadd.f32 %v13863_v45, %v8026_v11  ;;  %v8739_v10 = vadd.f32 %v14128_v57, %v8738_v18  ;;  %v6345_v5 = vpop.f32.mrf.mxu0  ;;  %v5669_v18 = vadd.f32 %v13124_v12, %v14888_v16 }
 0x998   :  { %v8222_v52 = vmax.f32 %v8126_v22, 0.0  ;;  %8900 = vst.msk [vmem:[%s14372_s8 + $0x1f8] sm:$0xff] %vm827_vm2, %v8739_v10  ;;  %v6457_v8 = vadd.f32 %v6339_v48, %v5669_v18 }
 0x99a   :  { %9981 = vmatmul.msk.f32.gmra.mxu3 %vm827_vm2, %v8222_v52 }
 0x99b   :  { %v7901_v46 = vpop.f32.mrf.mxu2 }
 0x99c   :  { %v8027_v25 = vadd.f32 %v7901_v46, %v7240_v61  ;;  %v7117_v49 = vpop.f32.mrf.mxu1  ;;  %v14889_v46 = vld [vmem:[#allocation199_spill] sm:$0xff] }
 0x99d   :  { %v8741_v26 = vpop.f32.mrf.mxu3  ;;  %v7241_v33 = vadd.f32 %v7117_v49, %v6454_v34  ;;  %v5670_v12 = vadd.f32 %v13143_v58, %v14889_v46  ;;  %v14890_v58 = vld [vmem:[#allocation200_spill] sm:$0xff] }
 0x99e   :  { %v8127_v15 = vadd.f32 %v13863_v45, %v8027_v25  ;;  %v8742_v7 = vadd.f32 %v14128_v57, %v8741_v26  ;;  %v6348_v25 = vpop.f32.mrf.mxu0 }
 0x99f   :  { %v6458_v53 = vadd.f32 %v6342_v32, %v5670_v12 }
 0x9a0   :  { %v8223_v54 = vmax.f32 %v8127_v15, 0.0  ;;  %8901 = vst.msk [vmem:[%s14372_s8 + $0x200] sm:$0xff] %vm827_vm2, %v8742_v7 }
 0x9a2   :  { %9982 = vmatmul.msk.f32.gmra.mxu3 %vm827_vm2, %v8223_v54 }
 0x9a3   :  { %v7904_v14 = vpop.f32.mrf.mxu2 }
 0x9a4   :  { %v8028_v43 = vadd.f32 %v7904_v14, %v7241_v33  ;;  %v7120_v2 = vpop.f32.mrf.mxu1  ;;  %v5671_v33 = vadd.f32 %v13159_v35, %v14890_v58  ;;  %v14891_v35 = vld [vmem:[#allocation202_spill] sm:$0xff] }
 0x9a5   :  { %v8744_v38 = vpop.f32.mrf.mxu3  ;;  %v7242_v4 = vadd.f32 %v7120_v2, %v6455_v21  ;;  %v5672_v32 = vadd.f32 %v13179_v0, %v14891_v35  ;;  %v14892_v0 = vld [vmem:[#allocation204_spill] sm:$0xff] }
 0x9a6   :  { %v8128_v3 = vadd.f32 %v13863_v45, %v8028_v43  ;;  %v8745_v13 = vadd.f32 %v14128_v57, %v8744_v38  ;;  %v6459_v2 = vadd.f32 %v6345_v5, %v5671_v33  ;;  %v6351_v38 = vpop.f32.mrf.mxu0 }
 0x9a8   :  { %v8224_v30 = vmax.f32 %v8128_v3, 0.0  ;;  %8902 = vst.msk [vmem:[%s14372_s8 + $0x208] sm:$0xff] %vm827_vm2, %v8745_v13 }
 0x9aa   :  { %9983 = vmatmul.msk.f32.gmra.mxu3 %vm827_vm2, %v8224_v30 }
 0x9ab   :  { %v7907_v62 = vpop.f32.mrf.mxu2 }
 0x9ac   :  { %v8029_v20 = vadd.f32 %v7907_v62, %v7242_v4  ;;  %v7123_v56 = vpop.f32.mrf.mxu1 }
 0x9ad   :  { %v8747_v39 = vpop.f32.mrf.mxu3  ;;  %v7243_v42 = vadd.f32 %v7123_v56, %v6456_v40 }
 0x9ae   :  { %v8129_v44 = vadd.f32 %v13863_v45, %v8029_v20  ;;  %v8748_v6 = vadd.f32 %v14128_v57, %v8747_v39  ;;  %v6460_v20 = vadd.f32 %v6348_v25, %v5672_v32  ;;  %v6354_v39 = vpop.f32.mrf.mxu0 }
 0x9b0   :  { %v8225_v31 = vmax.f32 %v8129_v44, 0.0  ;;  %8903 = vst.msk [vmem:[%s14372_s8 + $0x210] sm:$0xff] %vm827_vm2, %v8748_v6 }
 0x9b2   :  { %9984 = vmatmul.msk.f32.gmra.mxu3 %vm827_vm2, %v8225_v31  ;;  %v5673_v31 = vadd.f32 %v13200_v47, %v14892_v0  ;;  %v14893_v47 = vld [vmem:[#allocation206_spill] sm:$0xff]  ;;  %v10015_v0 = vld [vmem:[%s14370_s4] ss:$0 sm:$0xff] }
 0x9b3   :  { %v7910_v24 = vpop.f32.mrf.mxu2 }
 0x9b4   :  { %v8030_v41 = vadd.f32 %v7910_v24, %v7243_v42  ;;  %v7126_v11 = vpop.f32.mrf.mxu1  ;;  %v6461_v5 = vadd.f32 %v6351_v38, %v5673_v31 }
 0x9b5   :  { %v8750_v19 = vpop.f32.mrf.mxu3  ;;  %v7244_v22 = vadd.f32 %v7126_v11, %v6457_v8  ;;  %v5674_v8 = vadd.f32 %v13219_v50, %v14893_v47 }
 0x9b6   :  { %v8130_v29 = vadd.f32 %v13863_v45, %v8030_v41  ;;  %v8751_v59 = vadd.f32 %v14128_v57, %v8750_v19  ;;  %v6357_v16 = vpop.f32.mrf.mxu0 }
 0x9b8   :  { %v8226_v60 = vmax.f32 %v8130_v29, 0.0  ;;  %8904 = vst.msk [vmem:[%s14372_s8 + $0x218] sm:$0xff] %vm827_vm2, %v8751_v59 }
 0x9ba   :  { %9985 = vmatmul.msk.f32.gmra.mxu3 %vm827_vm2, %v8226_v60 }
 0x9bb   :  { %v7913_v10 = vpop.f32.mrf.mxu2 }
 0x9bc   :  { %v8031_v63 = vadd.f32 %v7913_v10, %v7244_v22  ;;  %v7129_v52 = vpop.f32.mrf.mxu1  ;;  %v6462_v10 = vadd.f32 %v6354_v39, %v5674_v8 }
 0x9bd   :  { %v8753_v61 = vpop.f32.mrf.mxu3  ;;  %v7245_v15 = vadd.f32 %v7129_v52, %v6458_v53 }
 0x9be   :  { %v8131_v49 = vadd.f32 %v13863_v45, %v8031_v63  ;;  %v8754_v26 = vadd.f32 %v14128_v57, %v8753_v61 }
 0x9c0   :  { %v8227_v9 = vmax.f32 %v8131_v49, 0.0  ;;  %8905 = vst.msk [vmem:[%s14372_s8 + $0x220] sm:$0xff] %vm827_vm2, %v8754_v26  ;;  %v14894_v49 = vld [vmem:[#allocation208_spill] sm:$0xff] }
 0x9c1   :  { %v5675_v50 = vadd.f32 %v13235_v23, %v14894_v49  ;;  %v14895_v23 = vld [vmem:[#allocation209_spill] sm:$0xff] }
 0x9c2   :  { %9986 = vmatmul.msk.f32.gmra.mxu3 %vm827_vm2, %v8227_v9  ;;  %v6360_v9 = vpop.f32.mrf.mxu0 }
 0x9c3   :  { %v7916_v7 = vpop.f32.mrf.mxu2 }
 0x9c4   :  { %v8032_v34 = vadd.f32 %v7916_v7, %v7245_v15  ;;  %v7132_v48 = vpop.f32.mrf.mxu1  ;;  %v6463_v15 = vadd.f32 %v6357_v16, %v5675_v50 }
 0x9c5   :  { %v8756_v54 = vpop.f32.mrf.mxu3  ;;  %v7246_v51 = vadd.f32 %v7132_v48, %v6459_v2 }
 0x9c6   :  { %v8132_v14 = vadd.f32 %v13863_v45, %v8032_v34  ;;  %v8757_v43 = vadd.f32 %v14128_v57, %v8756_v54 }
 0x9c8   :  { %v8228_v28 = vmax.f32 %v8132_v14, 0.0  ;;  %8906 = vst.msk [vmem:[%s14372_s8 + $0x228] sm:$0xff] %vm827_vm2, %v8757_v43  ;;  %v5676_v14 = vadd.f32 %v13255_v17, %v14895_v23  ;;  %v14896_v17 = vld [vmem:[#allocation65_spill] sm:$0xff] }
 0x9c9   :  { %v5677_v32 = vadd.f32 %v13276_v55, %v14896_v17  ;;  %v14897_v55 = vld [vmem:[#allocation37_spill] sm:$0xff] }
 0x9ca   :  { %9987 = vmatmul.msk.f32.gmra.mxu3 %vm827_vm2, %v8228_v28  ;;  %v6464_v38 = vadd.f32 %v6360_v9, %v5676_v14 }
 0x9cb   :  { %v7919_v3 = vpop.f32.mrf.mxu2 }
 0x9cc   :  { %v8033_v13 = vadd.f32 %v7919_v3, %v7246_v51  ;;  %v7135_v21 = vpop.f32.mrf.mxu1  ;;  %v6363_v51 = vpop.f32.mrf.mxu0 }
 0x9cd   :  { %v8759_v30 = vpop.f32.mrf.mxu3  ;;  %v7247_v1 = vadd.f32 %v7135_v21, %v6460_v20  ;;  %v6465_v20 = vadd.f32 %v6363_v51, %v5677_v32 }
 0x9ce   :  { %v8133_v4 = vadd.f32 %v13863_v45, %v8033_v13  ;;  %v8760_v62 = vadd.f32 %v14128_v57, %v8759_v30 }
 0x9d0   :  { %v8229_v56 = vmax.f32 %v8133_v4, 0.0  ;;  %8907 = vst.msk [vmem:[%s14372_s8 + $0x230] sm:$0xff] %vm827_vm2, %v8760_v62 }
 0x9d2   :  { %9988 = vmatmul.msk.f32.gmra.mxu3 %vm827_vm2, %v8229_v56 }
 0x9d3   :  { %v7922_v36 = vpop.f32.mrf.mxu2 }
 0x9d4   :  { %v8034_v44 = vadd.f32 %v7922_v36, %v7247_v1  ;;  %v7138_v6 = vpop.f32.mrf.mxu1  ;;  %v6366_v1 = vpop.f32.mrf.mxu0 }
 0x9d5   :  { %v8762_v40 = vpop.f32.mrf.mxu3  ;;  %v7248_v11 = vadd.f32 %v7138_v6, %v6461_v5 }
 0x9d6   :  { %v8134_v42 = vadd.f32 %v13863_v45, %v8034_v44  ;;  %v8763_v24 = vadd.f32 %v14128_v57, %v8762_v40 }
 0x9d8   :  { %v8230_v41 = vmax.f32 %v8134_v42, 0.0  ;;  %8908 = vst.msk [vmem:[%s14372_s8 + $0x238] sm:$0xff] %vm827_vm2, %v8763_v24 }
 0x9da   :  { %9989 = vmatmul.msk.f32.gmra.mxu3 %vm827_vm2, %v8230_v41 }
 0x9db   :  { %v7925_v19 = vpop.f32.mrf.mxu2 }
 0x9dc   :  { %v8035_v18 = vadd.f32 %v7925_v19, %v7248_v11  ;;  %v7141_v29 = vpop.f32.mrf.mxu1 }
 0x9dd   :  { %v8765_v59 = vpop.f32.mrf.mxu3  ;;  %v7249_v52 = vadd.f32 %v7141_v29, %v6462_v10 }
 0x9de   :  { %v8135_v60 = vadd.f32 %v13863_v45, %v8035_v18  ;;  %v8766_v22 = vadd.f32 %v14128_v57, %v8765_v59  ;;  %v14898_v18 = vld [vmem:[#allocation68_spill] sm:$0xff] }
 0x9df   :  { %v5679_v29 = vadd.f32 %v14898_v18, %v13048_v37 }
 0x9e0   :  { %v8231_v63 = vmax.f32 %v8135_v60, 0.0  ;;  %8909 = vst.msk [vmem:[%s14372_s8 + $0x240] sm:$0xff] %vm827_vm2, %v8766_v22 }
 0x9e2   :  { %9990 = vmatmul.msk.f32.gmra.mxu3 %vm827_vm2, %v8231_v63 }
 0x9e3   :  { %v7928_v61 = vpop.f32.mrf.mxu2 }
 0x9e4   :  { %v8036_v46 = vadd.f32 %v7928_v61, %v7249_v52  ;;  %v7144_v12 = vpop.f32.mrf.mxu1 }
 0x9e5   :  { %v8768_v25 = vpop.f32.mrf.mxu3  ;;  %v7250_v34 = vadd.f32 %v7144_v12, %v6463_v15 }
 0x9e6   :  { %v8136_v26 = vadd.f32 %v13863_v45, %v8036_v46  ;;  %v8769_v53 = vadd.f32 %v14128_v57, %v8768_v25 }
 0x9e8   :  { %v8232_v7 = vmax.f32 %v8136_v26, 0.0  ;;  %8910 = vst.msk [vmem:[%s14372_s8 + $0x248] sm:$0xff] %vm827_vm2, %v8769_v53 }
 0x9ea   :  { %9991 = vmatmul.msk.f32.gmra.mxu3 %vm827_vm2, %v8232_v7 }
 0x9eb   :  { %v7931_v48 = vpop.f32.mrf.mxu2 }
 0x9ec   :  { %v8037_v54 = vadd.f32 %v7931_v48, %v7250_v34  ;;  %v7147_v58 = vpop.f32.mrf.mxu1 }
 0x9ed   :  { %v8771_v33 = vpop.f32.mrf.mxu3  ;;  %v7251_v3 = vadd.f32 %v7147_v58, %v6464_v38 }
 0x9ee   :  { %v8137_v43 = vadd.f32 %v13863_v45, %v8037_v54  ;;  %v8772_v2 = vadd.f32 %v14128_v57, %v8771_v33 }
 0x9f0   :  { %v8233_v28 = vmax.f32 %v8137_v43, 0.0  ;;  %8911 = vst.msk [vmem:[%s14372_s8 + $0x250] sm:$0xff] %vm827_vm2, %v8772_v2 }
 0x9f2   :  { %9992 = vmatmul.msk.f32.gmra.mxu3 %vm827_vm2, %v8233_v28 }
 0x9f3   :  { %v7934_v13 = vpop.f32.mrf.mxu2 }
 0x9f4   :  { %v8038_v21 = vadd.f32 %v7934_v13, %v7251_v3  ;;  %v7150_v30 = vpop.f32.mrf.mxu1 }
 0x9f5   :  { %v8774_v35 = vpop.f32.mrf.mxu3  ;;  %v7252_v39 = vadd.f32 %v7150_v30, %v6465_v20 }
 0x9f6   :  { %v8138_v4 = vadd.f32 %v13863_v45, %v8038_v21  ;;  %v8775_v62 = vadd.f32 %v14128_v57, %v8774_v35  ;;  %v5678_v45 = vadd.f32 %v13295_v27, %v14897_v55  ;;  %v6369_v27 = vpop.f32.mrf.mxu0 }
 0x9f7   :  { %v6467_v60 = vadd.f32 %v6369_v27, %v5679_v29 }
 0x9f8   :  { %v8234_v56 = vmax.f32 %v8138_v4, 0.0  ;;  %8912 = vst.msk [vmem:[%s14372_s8 + $0x258] sm:$0xff] %vm827_vm2, %v8775_v62  ;;  %v6466_v24 = vadd.f32 %v6366_v1, %v5678_v45 }
 0x9fa   :  { %9993 = vmatmul.msk.f32.gmra.mxu3 %vm827_vm2, %v8234_v56 }
 0x9fb   :  { %v7937_v36 = vpop.f32.mrf.mxu2 }
 0x9fc   :  { %v8039_v44 = vadd.f32 %v7937_v36, %v7252_v39  ;;  %v7153_v6 = vpop.f32.mrf.mxu1 }
 0x9fd   :  { %v8777_v40 = vpop.f32.mrf.mxu3  ;;  %v7253_v41 = vadd.f32 %v7153_v6, %v6466_v24 }
 0x9fe   :  { %v8139_v31 = vadd.f32 %v10015_v0, %v8039_v44  ;;  %v8778_v42 = vadd.f32 %v14128_v57, %v8777_v40 }
 0xa00   :  { %v8235_v5 = vmax.f32 %v8139_v31, 0.0  ;;  %8913 = vst.msk [vmem:[%s14372_s8 + $0x260] sm:$0xff] %vm827_vm2, %v8778_v42 }
 0xa02   :  { %9994 = vmatmul.msk.f32.gmra.mxu3 %vm827_vm2, %v8235_v5 }
 0xa03   :  { %v7940_v11 = vpop.f32.mrf.mxu2 }
 0xa04   :  { %v8040_v19 = vadd.f32 %v7940_v11, %v7253_v41  ;;  %v7156_v8 = vpop.f32.mrf.mxu1 }
 0xa05   :  { %v8780_v16 = vpop.f32.mrf.mxu3  ;;  %v7254_v10 = vadd.f32 %v7156_v8, %v6467_v60 }
 0xa06   :  { %v8140_v59 = vadd.f32 %v10015_v0, %v8040_v19  ;;  %v8781_v47 = vadd.f32 %v14128_v57, %v8780_v16 }
 0xa08   :  { %v8236_v22 = vmax.f32 %v8140_v59, 0.0  ;;  %8914 = vst.msk [vmem:[%s14372_s8 + $0x268] sm:$0xff] %vm827_vm2, %v8781_v47 }
 0xa0a   :  { %9995 = vmatmul.msk.f32.gmra.mxu3 %vm827_vm2, %v8236_v22 }
 0xa0b   :  { %v7943_v63 = vpop.f32.mrf.mxu2 }
 0xa0c   :  { %v8041_v52 = vadd.f32 %v7943_v63, %v7254_v10 }
 0xa0d   :  { %v8783_v61 = vpop.f32.mrf.mxu3 }
 0xa0e   :  { %v8141_v46 = vadd.f32 %v10015_v0, %v8041_v52  ;;  %v8784_v37 = vadd.f32 %v14128_v57, %v8783_v61 }
 0xa10   :  { %v8237_v12 = vmax.f32 %v8141_v46, 0.0  ;;  %8915 = vst.msk [vmem:[%s14372_s8 + $0x270] sm:$0xff] %vm827_vm2, %v8784_v37 }
 0xa12   :  { %9996 = vmatmul.msk.f32.gmra.mxu3 %vm827_vm2, %v8237_v12 }
 0xa15   :  { %v8786_v25 = vpop.f32.mrf.mxu3 }
 0xa16   :  { %v8787_v49 = vadd.f32 %v14128_v57, %v8786_v25 }
 0xa18   :  { %8916 = vst.msk [vmem:[%s14372_s8 + $0x278] sm:$0xff] %vm827_vm2, %v8787_v49 }
 0xa1d   :  { %v8789_v50 = vpop.f32.mrf.mxu3 }
 0xa1e   :  { %v8790_v26 = vadd.f32 %v14128_v57, %v8789_v50 }
 0xa20   :  { %8917 = vst.msk [vmem:[%s14372_s8 + $0x280] sm:$0xff] %vm827_vm2, %v8790_v26 }
 0xa25   :  { %v8792_v53 = vpop.f32.mrf.mxu3 }
 0xa26   :  { %v8793_v9 = vadd.f32 %v14128_v57, %v8792_v53 }
 0xa28   :  { %8918 = vst.msk [vmem:[%s14372_s8 + $0x288] sm:$0xff] %vm827_vm2, %v8793_v9 }
 0xa2d   :  { %v8795_v15 = vpop.f32.mrf.mxu3 }
 0xa2e   :  { %v8796_v7 = vadd.f32 %v14128_v57, %v8795_v15 }
 0xa30   :  { %8919 = vst.msk [vmem:[%s14372_s8 + $0x290] sm:$0xff] %vm827_vm2, %v8796_v7 }
 0xa35   :  { %v8798_v34 = vpop.f32.mrf.mxu3 }
 0xa36   :  { %v8799_v48 = vadd.f32 %v14128_v57, %v8798_v34 }
 0xa38   :  { %8920 = vst.msk [vmem:[%s14372_s8 + $0x298] sm:$0xff] %vm827_vm2, %v8799_v48 }
 0xa3d   :  { %v8801_v54 = vpop.f32.mrf.mxu3 }
 0xa3e   :  { %v8802_v58 = vadd.f32 %v14128_v57, %v8801_v54 }
 0xa40   :  { %8921 = vst.msk [vmem:[%s14372_s8 + $0x2a0] sm:$0xff] %vm827_vm2, %v8802_v58 }
 0xa45   :  { %v8804_v33 = vpop.f32.mrf.mxu3 }
 0xa46   :  { %v8805_v23 = vadd.f32 %v14128_v57, %v8804_v33 }
 0xa48   :  { %8922 = vst.msk [vmem:[%s14372_s8 + $0x2a8] sm:$0xff] %vm827_vm2, %v8805_v23 }
 0xa4d   :  { %v8807_v14 = vpop.f32.mrf.mxu3 }
 0xa4e   :  { %v8808_v43 = vadd.f32 %v14128_v57, %v8807_v14 }
 0xa50   :  { %8923 = vst.msk [vmem:[%s14372_s8 + $0x2b0] sm:$0xff] %vm827_vm2, %v8808_v43 }
 0xa55   :  { %v8810_v2 = vpop.f32.mrf.mxu3 }
 0xa56   :  { %v8811_v38 = vadd.f32 %v14128_v57, %v8810_v2 }
 0xa58   :  { %8924 = vst.msk [vmem:[%s14372_s8 + $0x2b8] sm:$0xff] %vm827_vm2, %v8811_v38 }
 0xa5d   :  { %v8813_v28 = vpop.f32.mrf.mxu3 }
 0xa5e   :  { %v8814_v51 = vadd.f32 %v14128_v57, %v8813_v28 }
 0xa60   :  { %8925 = vst.msk [vmem:[%s14372_s8 + $0x2c0] sm:$0xff] %vm827_vm2, %v8814_v51 }
 0xa65   :  { %v8816_v3 = vpop.f32.mrf.mxu3 }
 0xa66   :  { %v8817_v13 = vadd.f32 %v14128_v57, %v8816_v3 }
 0xa68   :  { %8926 = vst.msk [vmem:[%s14372_s8 + $0x2c8] sm:$0xff] %vm827_vm2, %v8817_v13 }
 0xa6d   :  { %v8819_v21 = vpop.f32.mrf.mxu3 }
 0xa6e   :  { %v8820_v30 = vadd.f32 %v14128_v57, %v8819_v21 }
 0xa70   :  { %8927 = vst.msk [vmem:[%s14372_s8 + $0x2d0] sm:$0xff] %vm827_vm2, %v8820_v30 }
 0xa75   :  { %v8822_v35 = vpop.f32.mrf.mxu3 }
 0xa76   :  { %v8823_v17 = vadd.f32 %v14128_v57, %v8822_v35 }
 0xa78   :  { %8928 = vst.msk [vmem:[%s14372_s8 + $0x2d8] sm:$0xff] %vm827_vm2, %v8823_v17 }
 0xa7d   :  { %v8825_v32 = vpop.f32.mrf.mxu3 }
 0xa7e   :  { %v8826_v4 = vadd.f32 %v14128_v57, %v8825_v32 }
 0xa80   :  { %8929 = vst.msk [vmem:[%s14372_s8 + $0x2e0] sm:$0xff] %vm827_vm2, %v8826_v4 }
 0xa85   :  { %v8828_v62 = vpop.f32.mrf.mxu3 }
 0xa86   :  { %v8829_v20 = vadd.f32 %v14128_v57, %v8828_v62 }
 0xa88   :  { %8930 = vst.msk [vmem:[%s14372_s8 + $0x2e8] sm:$0xff] %vm827_vm2, %v8829_v20 }
 0xa8d   :  { %v8831_v56 = vpop.f32.mrf.mxu3 }
 0xa8e   :  { %v8832_v39 = vadd.f32 %v14128_v57, %v8831_v56 }
 0xa90   :  { %8931 = vst.msk [vmem:[%s14372_s8 + $0x2f0] sm:$0xff] %vm827_vm2, %v8832_v39 }
 0xa95   :  { %v8834_v1 = vpop.f32.mrf.mxu3 }
 0xa96   :  { %v8835_v36 = vadd.f32 %v14128_v57, %v8834_v1 }
 0xa98   :  { %8932 = vst.msk [vmem:[%s14372_s8 + $0x2f8] sm:$0xff] %vm827_vm2, %v8835_v36 }

</bundles_post_ra>
